<compile_context>
chip_gen: v7x
topology: tpu7x:2x2x1
jax: 0.10.0
libtpu: 0.0.40
codegen_flags: <defaults>
</compile_context>

<pallas_src>
import functools
import jax
import jax.numpy as jnp
from jax.experimental import pallas as pl
from jax.experimental.pallas import tpu as pltpu

_MXU_PRECISION = jax.lax.Precision.DEFAULT   # HIGHEST for closer torch-f32 parity


def _ceil8(n):
    return ((n + 7) // 8) * 8


# ------------------------------ in-kernel math --------------------------------

def _layernorm(v, g, b, eps=1e-5):
    mu = jnp.mean(v, axis=-1, keepdims=True)
    d = v - mu
    var = jnp.mean(d * d, axis=-1, keepdims=True)
    return d * jax.lax.rsqrt(var + eps) * g + b


def _gelu(v):
    # TODO(synk): nn.GELU() is the exact erf form; the tanh approximation used
    # here (one EUP tanh, short VALU chain) deviates from it by up to ~1e-3.
    c = 0.7978845608028654  # sqrt(2/pi)
    return 0.5 * v * (1.0 + jnp.tanh(c * (v + 0.044715 * v * v * v)))


# --------------------------------- kernel -------------------------------------

def vit_kernel(x_ref, qkv_w_ref, out_w_ref, ff1_w_ref, ff2_w_ref,
               mix_ref, small_ref, o_ref):
    """Full ViT forward (CAF mode, mask=None) on a (BT, *) batch-folded slab."""
    patch_dim = x_ref.shape[1]
    depth, dim, mlp = ff1_w_ref.shape
    heads = qkv_w_ref.shape[0] // (3 * depth)
    num_classes = o_ref.shape[1]
    n_skip = (mix_ref.shape[0] - 1) // 2
    bt = mix_ref.shape[1]                           # b_tile * ntok
    pad_bt = _ceil8(bt)
    prec = _MXU_PRECISION

    small = small_ref[...]                          # (rows, W) packed constants
    o_emb = pad_bt
    o_vec = o_emb + _ceil8(patch_dim)
    o_head = o_vec + 8 * depth
    o_skipb = o_head + _ceil8(num_classes + 3)

    pos_eff = small[0:bt, :dim]                     # cls/pos/emb-bias folded, tiled
    emb_w = small[o_emb:o_emb + patch_dim, :dim]    # (patch_dim, dim)
    attn_bias = mix_ref[0]                          # (bt, bt) block-diag 0 / -1e30

    # patch_to_embedding (cls rows zero-padded host-side) + cls / pos / emb bias.
    xt = jnp.dot(x_ref[...], emb_w, precision=prec,
                 preferred_element_type=jnp.float32) + pos_eff      # (bt, dim)

    last = []
    for l in range(depth):
        last.append(xt)
        vec = small[o_vec + 8 * l:o_vec + 8 * (l + 1), :]
        ln1_g, ln1_b = vec[0:1, :dim], vec[1:2, :dim]
        out_b = vec[2:3, :dim]
        ln2_g, ln2_b = vec[3:4, :dim], vec[4:5, :dim]
        ff2_b = vec[5:6, :dim]
        ff1_b = vec[6:7, :mlp]

        # --- CAF skipcat: Conv2d(ntok, ntok, (1,2)) as block-diag token mixing.
        if l > 1:
            s = l - 2
            sb = small[o_skipb + s * pad_bt:o_skipb + s * pad_bt + bt, :dim]
            xt = (jnp.dot(mix_ref[1 + s], xt, precision=prec,
                          preferred_element_type=jnp.float32)
                  + jnp.dot(mix_ref[1 + n_skip + s], last[l - 2], precision=prec,
                            preferred_element_type=jnp.float32)
                  + sb)

        # --- Residual(PreNorm(Attention)), per-head weights (no lane slicing).
        xn = _layernorm(xt, ln1_g, ln1_b)
        att = None
        for h in range(heads):
            q = jnp.dot(xn, qkv_w_ref[(3 * l + 0) * heads + h], precision=prec,
                        preferred_element_type=jnp.float32)          # scale folded
            k = jnp.dot(xn, qkv_w_ref[(3 * l + 1) * heads + h], precision=prec,
                        preferred_element_type=jnp.float32)
            v = jnp.dot(xn, qkv_w_ref[(3 * l + 2) * heads + h], precision=prec,
                        preferred_element_type=jnp.float32)
            dots = jax.lax.dot_general(q, k, (((1,), (1,)), ((), ())),
                                       precision=prec,
                                       preferred_element_type=jnp.float32)
            dots = dots + attn_bias
            dots = dots - jnp.max(dots, axis=-1, keepdims=True)
            e = jnp.exp(dots)
            inv = pl.reciprocal(jnp.sum(e, axis=-1, keepdims=True), approx=True)
            ho = jnp.dot(e, v, precision=prec,
                         preferred_element_type=jnp.float32) * inv   # (bt, dh)
            contrib = jnp.dot(ho, out_w_ref[l * heads + h], precision=prec,
                              preferred_element_type=jnp.float32)    # (bt, dim)
            att = contrib if att is None else att + contrib
        xt = xt + att + out_b

        # --- Residual(PreNorm(FeedForward)).
        xn2 = _layernorm(xt, ln2_g, ln2_b)
        h1 = _gelu(jnp.dot(xn2, ff1_w_ref[l], precision=prec,
                           preferred_element_type=jnp.float32) + ff1_b)
        xt = xt + jnp.dot(h1, ff2_w_ref[l], precision=prec,
                          preferred_element_type=jnp.float32) + ff2_b

    # --- mlp_head (computed for every token row; host keeps the cls rows).
    head_w = small[o_head:o_head + num_classes, :dim]                # (ncls, dim)
    head_g = small[o_head + num_classes:o_head + num_classes + 1, :dim]
    head_beta = small[o_head + num_classes + 1:o_head + num_classes + 2, :dim]
    head_bias = small[o_head + num_classes + 2:o_head + num_classes + 3,
                      :num_classes]
    cls_n = _layernorm(xt, head_g, head_beta)
    o_ref[...] = jax.lax.dot_general(
        cls_n, head_w, (((1,), (1,)), ((), ())), precision=prec,
        preferred_element_type=jnp.float32) + head_bias


# --------------------------------- wrapper -------------------------------------

def vit_forward(x, packed, *, num_classes):
    """x: (batch, num_patches, patch_dim) -> logits (batch, num_classes)."""
    batch, n_patch, patch_dim = x.shape
    ntok = n_patch + 1
    bt = batch * ntok
    assert packed['mix'].shape[1] == bt, "packed params built for a different batch"

    # Zero leading cls row per element (removes the in-kernel concatenate).
    x_pad = jnp.concatenate(
        [jnp.zeros((batch, 1, patch_dim), jnp.float32), x.astype(jnp.float32)],
        axis=1)
    x_flat = x_pad.reshape(bt, patch_dim)

    def whole(a):
        nd = a.ndim
        return pl.BlockSpec(a.shape, lambda i, nd=nd: (0,) * nd)

    args = (x_flat, packed['qkv_w'], packed['out_w'], packed['ff1_w'],
            packed['ff2_w'], packed['mix'], packed['small'])
    in_specs = [pl.BlockSpec((bt, patch_dim), lambda i: (i, 0))]
    in_specs += [whole(a) for a in args[1:]]

    logits_all = pl.pallas_call(
        vit_kernel,
        out_shape=jax.ShapeDtypeStruct((bt, num_classes), jnp.float32),
        grid=(1,),                      # whole batch folded into one grid step
        in_specs=in_specs,
        out_specs=pl.BlockSpec((bt, num_classes), lambda i: (i, 0)),
        compiler_params=pltpu.CompilerParams(dimension_semantics=("parallel",)),
    )(*args)
    return logits_all.reshape(batch, ntok, num_classes)[:, 0, :]


# ----------------------------- parameters --------------------------------------

def init_params(key, *, patch_dim, num_patches, num_classes, dim, depth,
                heads, dim_head, mlp_dim):
    inner = heads * dim_head
    ntok = num_patches + 1
    ks = iter(jax.random.split(key, 128))

    def nrm(shape, scale=0.1):
        return (scale * jax.random.normal(next(ks), shape)).astype(jnp.float32)

    p = dict(
        pos_embedding=nrm((1, ntok, dim), 0.2),
        cls_token=nrm((1, 1, dim), 0.2),
        emb_w=nrm((dim, patch_dim)),            # Linear(patch_dim, dim).weight
        emb_b=nrm((dim,), 0.05),
        head_ln_g=1.0 + nrm((dim,)),
        head_ln_b=nrm((dim,)),
        head_w=nrm((num_classes, dim)),
        head_b=nrm((num_classes,), 0.05),
        layers=[],
        skipcat=[],
    )
    for _ in range(depth):
        p['layers'].append(dict(
            ln1_g=1.0 + nrm((dim,)), ln1_b=nrm((dim,)),
            qkv_w=nrm((3 * inner, dim)),        # Linear(dim, 3*inner, bias=False)
            out_w=nrm((dim, inner)), out_b=nrm((dim,), 0.05),
            ln2_g=1.0 + nrm((dim,)), ln2_b=nrm((dim,)),
            ff1_w=nrm((mlp_dim, dim)), ff1_b=nrm((mlp_dim,), 0.05),
            ff2_w=nrm((dim, mlp_dim)), ff2_b=nrm((dim,), 0.05),
        ))
    for _ in range(depth - 2):
        p['skipcat'].append(dict(
            w=nrm((ntok, ntok, 1, 2)),          # Conv2d(ntok, ntok, (1,2))
            b=nrm((ntok,), 0.05),
        ))
    return p


def pack_params(p, *, heads, dim_head, b_tile):
    """One-off host-side packing into the kernel layout: per-head pre-transposed
    weights (attention scale folded into Wq), block-diagonal skip / attention-
    mask matrices for a b_tile-element token slab, and one merged `small` array
    holding every tiny vector / bias / the embedding matrix / classifier."""
    L = p['layers']
    depth = len(L)
    ntok, dim = p['pos_embedding'].shape[1], p['pos_embedding'].shape[2]
    patch_dim = p['emb_w'].shape[1]
    mlp = L[0]['ff1_w'].shape[0]
    num_classes = p['head_w'].shape[0]
    inner = heads * dim_head
    scale = float(dim_head) ** -0.5
    bt = b_tile * ntok
    pad_bt = _ceil8(bt)
    W = max(dim, mlp, num_classes)

    def rows(a, nrows):
        a = jnp.asarray(a, jnp.float32)
        out = jnp.zeros((nrows, W), jnp.float32)
        return out.at[:a.shape[0], :a.shape[1]].set(a)

    # -- `small`: pos_eff | emb_w | per-layer vecs | head | skip biases --------
    pos_eff = p['pos_embedding'][0]
    pos_eff = pos_eff.at[0].add(p['cls_token'][0, 0])       # cls token folded
    pos_eff = pos_eff.at[1:].add(p['emb_b'])                 # embedding bias folded
    sections = [rows(jnp.tile(pos_eff, (b_tile, 1)), pad_bt),
                rows(jnp.transpose(p['emb_w']), _ceil8(patch_dim))]
    for l in L:
        v = jnp.zeros((8, W), jnp.float32)
        v = v.at[0, :dim].set(l['ln1_g']).at[1, :dim].set(l['ln1_b'])
        v = v.at[2, :dim].set(l['out_b'])
        v = v.at[3, :dim].set(l['ln2_g']).at[4, :dim].set(l['ln2_b'])
        v = v.at[5, :dim].set(l['ff2_b']).at[6, :mlp].set(l['ff1_b'])
        sections.append(v)
    hd = jnp.zeros((_ceil8(num_classes + 3), W), jnp.float32)
    hd = hd.at[0:num_classes, :dim].set(p['head_w'])         # Linear weight as-is
    hd = hd.at[num_classes + 0, :dim].set(p['head_ln_g'])
    hd = hd.at[num_classes + 1, :dim].set(p['head_ln_b'])
    hd = hd.at[num_classes + 2, :num_classes].set(p['head_b'])
    sections.append(hd)
    for s in p['skipcat']:
        sb = jnp.broadcast_to(s['b'][:, None], (ntok, dim))  # pre-broadcast bias
        sections.append(rows(jnp.tile(sb, (b_tile, 1)), pad_bt))
    small = jnp.concatenate(sections, axis=0)

    # -- big stacked per-layer / per-head weights (pre-transposed) -------------
    qkv_list, out_list = [], []
    for l in L:
        wq = jnp.transpose(l['qkv_w'])                        # (dim, 3*inner)
        for c in range(3):                                    # q, k, v
            for h in range(heads):
                blk = wq[:, c * inner + h * dim_head:c * inner + (h + 1) * dim_head]
                qkv_list.append(blk * scale if c == 0 else blk)
        wo = jnp.transpose(l['out_w'])                        # (inner, dim)
        for h in range(heads):
            out_list.append(wo[h * dim_head:(h + 1) * dim_head, :])
    qkv_w = jnp.stack(qkv_list)                               # (depth*3*heads, dim, dh)
    out_w = jnp.stack(out_list)                               # (depth*heads, dh, dim)
    ff1_w = jnp.stack([jnp.transpose(l['ff1_w']) for l in L]) # (depth, dim, mlp)
    ff2_w = jnp.stack([jnp.transpose(l['ff2_w']) for l in L]) # (depth, mlp, dim)

    # -- block-diagonal (bt, bt) mixing matrices: attn mask + skipcat conv -----
    eye = jnp.eye(b_tile, dtype=jnp.float32)
    blk = jnp.kron(eye, jnp.ones((ntok, ntok), jnp.float32))
    mats = [jnp.where(blk > 0, 0.0, -1e30)]                   # additive attn bias
    mats += [jnp.kron(eye, s['w'][:, :, 0, 0]) for s in p['skipcat']]
    mats += [jnp.kron(eye, s['w'][:, :, 0, 1]) for s in p['skipcat']]
    mix = jnp.stack(mats).astype(jnp.float32)                 # (1+2*(depth-2), bt, bt)

    return dict(qkv_w=qkv_w.astype(jnp.float32), out_w=out_w.astype(jnp.float32),
                ff1_w=ff1_w.astype(jnp.float32), ff2_w=ff2_w.astype(jnp.float32),
                mix=mix, small=small.astype(jnp.float32))


# ----------------------------------- main ---------------------------------------

if __name__ == "__main__":
    key = jax.random.PRNGKey(0)
    k_x, k_p = jax.random.split(key)

    # ViT(n_gcn=16, num_patches=8, num_classes=5, dim=32, depth=4, heads=4,
    #     mlp_dim=32, dim_head=16, dropout=0.0, emb_dropout=0.0, mode='CAF')
    batch = 2
    n_gcn = 16          # patch_dim
    num_patches = 8
    num_classes = 5
    dim = 32
    depth = 4
    heads = 4
    dim_head = 16
    mlp_dim = 32

    x = jax.random.normal(k_x, (batch, num_patches, n_gcn), dtype=jnp.float32)
    params = init_params(k_p, patch_dim=n_gcn, num_patches=num_patches,
                         num_classes=num_classes, dim=dim, depth=depth,
                         heads=heads, dim_head=dim_head, mlp_dim=mlp_dim)
    packed = pack_params(params, heads=heads, dim_head=dim_head, b_tile=batch)

    fwd = jax.jit(functools.partial(vit_forward, num_classes=num_classes))
    out = jax.block_until_ready(fwd(x, packed))

    assert out.shape == (batch, num_classes), out.shape
    assert bool(jnp.all(jnp.isfinite(out)))
    print("KERNEL_OK")
</pallas_src>

<mosaic_0001>
module attributes {stable_mosaic.version = 11 : i64} {
  func.func @vit_kernel(%arg0: i32, %arg1: memref<18x16xf32, #tpu.memory_space<vmem>>, %arg2: memref<48x32x16xf32, #tpu.memory_space<vmem>>, %arg3: memref<16x16x32xf32, #tpu.memory_space<vmem>>, %arg4: memref<4x32x32xf32, #tpu.memory_space<vmem>>, %arg5: memref<4x32x32xf32, #tpu.memory_space<vmem>>, %arg6: memref<5x18x18xf32, #tpu.memory_space<vmem>>, %arg7: memref<128x32xf32, #tpu.memory_space<vmem>>, %arg8: memref<18x5xf32, #tpu.memory_space<vmem>>) attributes {dimension_semantics = [#tpu.dimension_semantics<parallel>], iteration_bounds = array<i64: 1>, scalar_prefetch = 0 : i64, scratch_operands = 0 : i64, tpu.core_type = #tpu.core_type<tc>, window_params = [{transform_indices = @transform_0, window_bounds = array<i64: 18, 16>}, {pipeline_mode = #tpu.pipeline_mode<synchronous>, transform_indices = @transform_1, window_bounds = array<i64: 48, 32, 16>}, {pipeline_mode = #tpu.pipeline_mode<synchronous>, transform_indices = @transform_2, window_bounds = array<i64: 16, 16, 32>}, {pipeline_mode = #tpu.pipeline_mode<synchronous>, transform_indices = @transform_3, window_bounds = array<i64: 4, 32, 32>}, {pipeline_mode = #tpu.pipeline_mode<synchronous>, transform_indices = @transform_4, window_bounds = array<i64: 4, 32, 32>}, {pipeline_mode = #tpu.pipeline_mode<synchronous>, transform_indices = @transform_5, window_bounds = array<i64: 5, 18, 18>}, {pipeline_mode = #tpu.pipeline_mode<synchronous>, transform_indices = @transform_6, window_bounds = array<i64: 128, 32>}, {transform_indices = @transform_7, window_bounds = array<i64: 18, 5>}]} {
    %c0 = arith.constant 0 : index
    %c0_0 = arith.constant 0 : index
    %0 = vector.load %arg7[%c0, %c0_0] : memref<128x32xf32, #tpu.memory_space<vmem>>, vector<128x32xf32>
    %1 = vector.extract_strided_slice %0 {offsets = [0, 0], sizes = [18, 32], strides = [1, 1]} : vector<128x32xf32> to vector<18x32xf32>
    %2 = vector.extract_strided_slice %0 {offsets = [24, 0], sizes = [16, 32], strides = [1, 1]} : vector<128x32xf32> to vector<16x32xf32>
    %c0_1 = arith.constant 0 : index
    %c0_2 = arith.constant 0 : index
    %c0_3 = arith.constant 0 : index
    %3 = vector.load %arg6[%c0_1, %c0_2, %c0_3] : memref<5x18x18xf32, #tpu.memory_space<vmem>>, vector<1x18x18xf32>
    %4 = vector.shape_cast %3 : vector<1x18x18xf32> to vector<18x18xf32>
    %c0_4 = arith.constant 0 : index
    %c0_5 = arith.constant 0 : index
    %5 = vector.load %arg1[%c0_4, %c0_5] : memref<18x16xf32, #tpu.memory_space<vmem>>, vector<18x16xf32>
    %cst = arith.constant dense<0.000000e+00> : vector<18x32xf32>
    %6 = tpu.matmul %5, %2, %cst {dimension_numbers = #tpu.dot_dimension_numbers<[1], [0], [0], [1], [0, 0, 1, 1], [], []>} : vector<18x16xf32>, vector<16x32xf32>, vector<18x32xf32> -> vector<18x32xf32>
    %7 = arith.addf %6, %1 : vector<18x32xf32>
    %8 = vector.extract_strided_slice %0 {offsets = [40, 0], sizes = [8, 32], strides = [1, 1]} : vector<128x32xf32> to vector<8x32xf32>
    %9 = vector.extract_strided_slice %8 {offsets = [0, 0], sizes = [1, 32], strides = [1, 1]} : vector<8x32xf32> to vector<1x32xf32>
    %10 = vector.extract_strided_slice %8 {offsets = [1, 0], sizes = [1, 32], strides = [1, 1]} : vector<8x32xf32> to vector<1x32xf32>
    %11 = vector.extract_strided_slice %8 {offsets = [2, 0], sizes = [1, 32], strides = [1, 1]} : vector<8x32xf32> to vector<1x32xf32>
    %12 = vector.extract_strided_slice %8 {offsets = [3, 0], sizes = [1, 32], strides = [1, 1]} : vector<8x32xf32> to vector<1x32xf32>
    %13 = vector.extract_strided_slice %8 {offsets = [4, 0], sizes = [1, 32], strides = [1, 1]} : vector<8x32xf32> to vector<1x32xf32>
    %14 = vector.extract_strided_slice %8 {offsets = [5, 0], sizes = [1, 32], strides = [1, 1]} : vector<8x32xf32> to vector<1x32xf32>
    %15 = vector.extract_strided_slice %8 {offsets = [6, 0], sizes = [1, 32], strides = [1, 1]} : vector<8x32xf32> to vector<1x32xf32>
    %cst_6 = arith.constant dense<0.000000e+00> : vector<18xf32>
    %16 = vector.multi_reduction <add>, %7, %cst_6 [1] : vector<18x32xf32> to vector<18xf32>
    %17 = vector.shape_cast %16 : vector<18xf32> to vector<18x1xf32>
    %cst_7 = arith.constant 3.200000e+01 : f32
    %18 = vector.broadcast %cst_7 : f32 to vector<18x1xf32>
    %19 = arith.divf %17, %18 : vector<18x1xf32>
    %20 = vector.broadcast %19 : vector<18x1xf32> to vector<18x32xf32>
    %21 = arith.subf %7, %20 : vector<18x32xf32>
    %22 = arith.mulf %21, %21 : vector<18x32xf32>
    %cst_8 = arith.constant dense<0.000000e+00> : vector<18xf32>
    %23 = vector.multi_reduction <add>, %22, %cst_8 [1] : vector<18x32xf32> to vector<18xf32>
    %24 = vector.shape_cast %23 : vector<18xf32> to vector<18x1xf32>
    %cst_9 = arith.constant 3.200000e+01 : f32
    %25 = vector.broadcast %cst_9 : f32 to vector<18x1xf32>
    %26 = arith.divf %24, %25 : vector<18x1xf32>
    %cst_10 = arith.constant 9.99999974E-6 : f32
    %27 = vector.broadcast %cst_10 : f32 to vector<18x1xf32>
    %28 = arith.addf %26, %27 : vector<18x1xf32>
    %29 = math.rsqrt %28 : vector<18x1xf32>
    %30 = vector.broadcast %29 : vector<18x1xf32> to vector<18x32xf32>
    %31 = arith.mulf %21, %30 : vector<18x32xf32>
    %32 = vector.broadcast %9 : vector<1x32xf32> to vector<18x32xf32>
    %33 = arith.mulf %31, %32 : vector<18x32xf32>
    %34 = vector.broadcast %10 : vector<1x32xf32> to vector<18x32xf32>
    %35 = arith.addf %33, %34 : vector<18x32xf32>
    %c0_11 = arith.constant 0 : index
    %c0_12 = arith.constant 0 : index
    %c0_13 = arith.constant 0 : index
    %36 = vector.load %arg2[%c0_11, %c0_12, %c0_13] : memref<48x32x16xf32, #tpu.memory_space<vmem>>, vector<1x32x16xf32>
    %37 = vector.shape_cast %36 : vector<1x32x16xf32> to vector<32x16xf32>
    %cst_14 = arith.constant dense<0.000000e+00> : vector<18x16xf32>
    %38 = tpu.matmul %35, %37, %cst_14 {dimension_numbers = #tpu.dot_dimension_numbers<[1], [0], [0], [1], [0, 0, 1, 1], [], []>} : vector<18x32xf32>, vector<32x16xf32>, vector<18x16xf32> -> vector<18x16xf32>
    %c4 = arith.constant 4 : index
    %c0_15 = arith.constant 0 : index
    %c0_16 = arith.constant 0 : index
    %39 = vector.load %arg2[%c4, %c0_15, %c0_16] : memref<48x32x16xf32, #tpu.memory_space<vmem>>, vector<1x32x16xf32>
    %40 = vector.shape_cast %39 : vector<1x32x16xf32> to vector<32x16xf32>
    %cst_17 = arith.constant dense<0.000000e+00> : vector<18x16xf32>
    %41 = tpu.matmul %35, %40, %cst_17 {dimension_numbers = #tpu.dot_dimension_numbers<[1], [0], [0], [1], [0, 0, 1, 1], [], []>} : vector<18x32xf32>, vector<32x16xf32>, vector<18x16xf32> -> vector<18x16xf32>
    %c8 = arith.constant 8 : index
    %c0_18 = arith.constant 0 : index
    %c0_19 = arith.constant 0 : index
    %42 = vector.load %arg2[%c8, %c0_18, %c0_19] : memref<48x32x16xf32, #tpu.memory_space<vmem>>, vector<1x32x16xf32>
    %43 = vector.shape_cast %42 : vector<1x32x16xf32> to vector<32x16xf32>
    %cst_20 = arith.constant dense<0.000000e+00> : vector<18x16xf32>
    %44 = tpu.matmul %35, %43, %cst_20 {dimension_numbers = #tpu.dot_dimension_numbers<[1], [0], [0], [1], [0, 0, 1, 1], [], []>} : vector<18x32xf32>, vector<32x16xf32>, vector<18x16xf32> -> vector<18x16xf32>
    %cst_21 = arith.constant dense<0.000000e+00> : vector<18x18xf32>
    %45 = tpu.matmul %38, %41, %cst_21 {dimension_numbers = #tpu.dot_dimension_numbers<[1], [1], [0], [0], [0, 0, 1, 0], [], []>} : vector<18x16xf32>, vector<18x16xf32>, vector<18x18xf32> -> vector<18x18xf32>
    %46 = arith.addf %45, %4 : vector<18x18xf32>
    %cst_22 = arith.constant dense<0xFF800000> : vector<18xf32>
    %47 = vector.multi_reduction <maximumf>, %46, %cst_22 [1] : vector<18x18xf32> to vector<18xf32>
    %48 = vector.shape_cast %47 : vector<18xf32> to vector<18x1xf32>
    %49 = vector.broadcast %48 : vector<18x1xf32> to vector<18x18xf32>
    %50 = arith.subf %46, %49 : vector<18x18xf32>
    %51 = math.exp %50 : vector<18x18xf32>
    %cst_23 = arith.constant dense<0.000000e+00> : vector<18xf32>
    %52 = vector.multi_reduction <add>, %51, %cst_23 [1] : vector<18x18xf32> to vector<18xf32>
    %53 = vector.shape_cast %52 : vector<18xf32> to vector<18x1xf32>
    %54 = tpu.reciprocal %53 {approx = true} : vector<18x1xf32> -> vector<18x1xf32>
    %cst_24 = arith.constant dense<0.000000e+00> : vector<18x16xf32>
    %55 = tpu.matmul %51, %44, %cst_24 {dimension_numbers = #tpu.dot_dimension_numbers<[1], [0], [0], [1], [0, 0, 1, 1], [], []>} : vector<18x18xf32>, vector<18x16xf32>, vector<18x16xf32> -> vector<18x16xf32>
    %56 = vector.broadcast %54 : vector<18x1xf32> to vector<18x16xf32>
    %57 = arith.mulf %55, %56 : vector<18x16xf32>
    %c0_25 = arith.constant 0 : index
    %c0_26 = arith.constant 0 : index
    %c0_27 = arith.constant 0 : index
    %58 = vector.load %arg3[%c0_25, %c0_26, %c0_27] : memref<16x16x32xf32, #tpu.memory_space<vmem>>, vector<1x16x32xf32>
    %59 = vector.shape_cast %58 : vector<1x16x32xf32> to vector<16x32xf32>
    %cst_28 = arith.constant dense<0.000000e+00> : vector<18x32xf32>
    %60 = tpu.matmul %57, %59, %cst_28 {dimension_numbers = #tpu.dot_dimension_numbers<[1], [0], [0], [1], [0, 0, 1, 1], [], []>} : vector<18x16xf32>, vector<16x32xf32>, vector<18x32xf32> -> vector<18x32xf32>
    %c1 = arith.constant 1 : index
    %c0_29 = arith.constant 0 : index
    %c0_30 = arith.constant 0 : index
    %61 = vector.load %arg2[%c1, %c0_29, %c0_30] : memref<48x32x16xf32, #tpu.memory_space<vmem>>, vector<1x32x16xf32>
    %62 = vector.shape_cast %61 : vector<1x32x16xf32> to vector<32x16xf32>
    %cst_31 = arith.constant dense<0.000000e+00> : vector<18x16xf32>
    %63 = tpu.matmul %35, %62, %cst_31 {dimension_numbers = #tpu.dot_dimension_numbers<[1], [0], [0], [1], [0, 0, 1, 1], [], []>} : vector<18x32xf32>, vector<32x16xf32>, vector<18x16xf32> -> vector<18x16xf32>
    %c5 = arith.constant 5 : index
    %c0_32 = arith.constant 0 : index
    %c0_33 = arith.constant 0 : index
    %64 = vector.load %arg2[%c5, %c0_32, %c0_33] : memref<48x32x16xf32, #tpu.memory_space<vmem>>, vector<1x32x16xf32>
    %65 = vector.shape_cast %64 : vector<1x32x16xf32> to vector<32x16xf32>
    %cst_34 = arith.constant dense<0.000000e+00> : vector<18x16xf32>
    %66 = tpu.matmul %35, %65, %cst_34 {dimension_numbers = #tpu.dot_dimension_numbers<[1], [0], [0], [1], [0, 0, 1, 1], [], []>} : vector<18x32xf32>, vector<32x16xf32>, vector<18x16xf32> -> vector<18x16xf32>
    %c9 = arith.constant 9 : index
    %c0_35 = arith.constant 0 : index
    %c0_36 = arith.constant 0 : index
    %67 = vector.load %arg2[%c9, %c0_35, %c0_36] : memref<48x32x16xf32, #tpu.memory_space<vmem>>, vector<1x32x16xf32>
    %68 = vector.shape_cast %67 : vector<1x32x16xf32> to vector<32x16xf32>
    %cst_37 = arith.constant dense<0.000000e+00> : vector<18x16xf32>
    %69 = tpu.matmul %35, %68, %cst_37 {dimension_numbers = #tpu.dot_dimension_numbers<[1], [0], [0], [1], [0, 0, 1, 1], [], []>} : vector<18x32xf32>, vector<32x16xf32>, vector<18x16xf32> -> vector<18x16xf32>
    %cst_38 = arith.constant dense<0.000000e+00> : vector<18x18xf32>
    %70 = tpu.matmul %63, %66, %cst_38 {dimension_numbers = #tpu.dot_dimension_numbers<[1], [1], [0], [0], [0, 0, 1, 0], [], []>} : vector<18x16xf32>, vector<18x16xf32>, vector<18x18xf32> -> vector<18x18xf32>
    %71 = arith.addf %70, %4 : vector<18x18xf32>
    %cst_39 = arith.constant dense<0xFF800000> : vector<18xf32>
    %72 = vector.multi_reduction <maximumf>, %71, %cst_39 [1] : vector<18x18xf32> to vector<18xf32>
    %73 = vector.shape_cast %72 : vector<18xf32> to vector<18x1xf32>
    %74 = vector.broadcast %73 : vector<18x1xf32> to vector<18x18xf32>
    %75 = arith.subf %71, %74 : vector<18x18xf32>
    %76 = math.exp %75 : vector<18x18xf32>
    %cst_40 = arith.constant dense<0.000000e+00> : vector<18xf32>
    %77 = vector.multi_reduction <add>, %76, %cst_40 [1] : vector<18x18xf32> to vector<18xf32>
    %78 = vector.shape_cast %77 : vector<18xf32> to vector<18x1xf32>
    %79 = tpu.reciprocal %78 {approx = true} : vector<18x1xf32> -> vector<18x1xf32>
    %cst_41 = arith.constant dense<0.000000e+00> : vector<18x16xf32>
    %80 = tpu.matmul %76, %69, %cst_41 {dimension_numbers = #tpu.dot_dimension_numbers<[1], [0], [0], [1], [0, 0, 1, 1], [], []>} : vector<18x18xf32>, vector<18x16xf32>, vector<18x16xf32> -> vector<18x16xf32>
    %81 = vector.broadcast %79 : vector<18x1xf32> to vector<18x16xf32>
    %82 = arith.mulf %80, %81 : vector<18x16xf32>
    %c1_42 = arith.constant 1 : index
    %c0_43 = arith.constant 0 : index
    %c0_44 = arith.constant 0 : index
    %83 = vector.load %arg3[%c1_42, %c0_43, %c0_44] : memref<16x16x32xf32, #tpu.memory_space<vmem>>, vector<1x16x32xf32>
    %84 = vector.shape_cast %83 : vector<1x16x32xf32> to vector<16x32xf32>
    %cst_45 = arith.constant dense<0.000000e+00> : vector<18x32xf32>
    %85 = tpu.matmul %82, %84, %cst_45 {dimension_numbers = #tpu.dot_dimension_numbers<[1], [0], [0], [1], [0, 0, 1, 1], [], []>} : vector<18x16xf32>, vector<16x32xf32>, vector<18x32xf32> -> vector<18x32xf32>
    %86 = arith.addf %60, %85 : vector<18x32xf32>
    %c2 = arith.constant 2 : index
    %c0_46 = arith.constant 0 : index
    %c0_47 = arith.constant 0 : index
    %87 = vector.load %arg2[%c2, %c0_46, %c0_47] : memref<48x32x16xf32, #tpu.memory_space<vmem>>, vector<1x32x16xf32>
    %88 = vector.shape_cast %87 : vector<1x32x16xf32> to vector<32x16xf32>
    %cst_48 = arith.constant dense<0.000000e+00> : vector<18x16xf32>
    %89 = tpu.matmul %35, %88, %cst_48 {dimension_numbers = #tpu.dot_dimension_numbers<[1], [0], [0], [1], [0, 0, 1, 1], [], []>} : vector<18x32xf32>, vector<32x16xf32>, vector<18x16xf32> -> vector<18x16xf32>
    %c6 = arith.constant 6 : index
    %c0_49 = arith.constant 0 : index
    %c0_50 = arith.constant 0 : index
    %90 = vector.load %arg2[%c6, %c0_49, %c0_50] : memref<48x32x16xf32, #tpu.memory_space<vmem>>, vector<1x32x16xf32>
    %91 = vector.shape_cast %90 : vector<1x32x16xf32> to vector<32x16xf32>
    %cst_51 = arith.constant dense<0.000000e+00> : vector<18x16xf32>
    %92 = tpu.matmul %35, %91, %cst_51 {dimension_numbers = #tpu.dot_dimension_numbers<[1], [0], [0], [1], [0, 0, 1, 1], [], []>} : vector<18x32xf32>, vector<32x16xf32>, vector<18x16xf32> -> vector<18x16xf32>
    %c10 = arith.constant 10 : index
    %c0_52 = arith.constant 0 : index
    %c0_53 = arith.constant 0 : index
    %93 = vector.load %arg2[%c10, %c0_52, %c0_53] : memref<48x32x16xf32, #tpu.memory_space<vmem>>, vector<1x32x16xf32>
    %94 = vector.shape_cast %93 : vector<1x32x16xf32> to vector<32x16xf32>
    %cst_54 = arith.constant dense<0.000000e+00> : vector<18x16xf32>
    %95 = tpu.matmul %35, %94, %cst_54 {dimension_numbers = #tpu.dot_dimension_numbers<[1], [0], [0], [1], [0, 0, 1, 1], [], []>} : vector<18x32xf32>, vector<32x16xf32>, vector<18x16xf32> -> vector<18x16xf32>
    %cst_55 = arith.constant dense<0.000000e+00> : vector<18x18xf32>
    %96 = tpu.matmul %89, %92, %cst_55 {dimension_numbers = #tpu.dot_dimension_numbers<[1], [1], [0], [0], [0, 0, 1, 0], [], []>} : vector<18x16xf32>, vector<18x16xf32>, vector<18x18xf32> -> vector<18x18xf32>
    %97 = arith.addf %96, %4 : vector<18x18xf32>
    %cst_56 = arith.constant dense<0xFF800000> : vector<18xf32>
    %98 = vector.multi_reduction <maximumf>, %97, %cst_56 [1] : vector<18x18xf32> to vector<18xf32>
    %99 = vector.shape_cast %98 : vector<18xf32> to vector<18x1xf32>
    %100 = vector.broadcast %99 : vector<18x1xf32> to vector<18x18xf32>
    %101 = arith.subf %97, %100 : vector<18x18xf32>
    %102 = math.exp %101 : vector<18x18xf32>
    %cst_57 = arith.constant dense<0.000000e+00> : vector<18xf32>
    %103 = vector.multi_reduction <add>, %102, %cst_57 [1] : vector<18x18xf32> to vector<18xf32>
    %104 = vector.shape_cast %103 : vector<18xf32> to vector<18x1xf32>
    %105 = tpu.reciprocal %104 {approx = true} : vector<18x1xf32> -> vector<18x1xf32>
    %cst_58 = arith.constant dense<0.000000e+00> : vector<18x16xf32>
    %106 = tpu.matmul %102, %95, %cst_58 {dimension_numbers = #tpu.dot_dimension_numbers<[1], [0], [0], [1], [0, 0, 1, 1], [], []>} : vector<18x18xf32>, vector<18x16xf32>, vector<18x16xf32> -> vector<18x16xf32>
    %107 = vector.broadcast %105 : vector<18x1xf32> to vector<18x16xf32>
    %108 = arith.mulf %106, %107 : vector<18x16xf32>
    %c2_59 = arith.constant 2 : index
    %c0_60 = arith.constant 0 : index
    %c0_61 = arith.constant 0 : index
    %109 = vector.load %arg3[%c2_59, %c0_60, %c0_61] : memref<16x16x32xf32, #tpu.memory_space<vmem>>, vector<1x16x32xf32>
    %110 = vector.shape_cast %109 : vector<1x16x32xf32> to vector<16x32xf32>
    %cst_62 = arith.constant dense<0.000000e+00> : vector<18x32xf32>
    %111 = tpu.matmul %108, %110, %cst_62 {dimension_numbers = #tpu.dot_dimension_numbers<[1], [0], [0], [1], [0, 0, 1, 1], [], []>} : vector<18x16xf32>, vector<16x32xf32>, vector<18x32xf32> -> vector<18x32xf32>
    %112 = arith.addf %86, %111 : vector<18x32xf32>
    %c3 = arith.constant 3 : index
    %c0_63 = arith.constant 0 : index
    %c0_64 = arith.constant 0 : index
    %113 = vector.load %arg2[%c3, %c0_63, %c0_64] : memref<48x32x16xf32, #tpu.memory_space<vmem>>, vector<1x32x16xf32>
    %114 = vector.shape_cast %113 : vector<1x32x16xf32> to vector<32x16xf32>
    %cst_65 = arith.constant dense<0.000000e+00> : vector<18x16xf32>
    %115 = tpu.matmul %35, %114, %cst_65 {dimension_numbers = #tpu.dot_dimension_numbers<[1], [0], [0], [1], [0, 0, 1, 1], [], []>} : vector<18x32xf32>, vector<32x16xf32>, vector<18x16xf32> -> vector<18x16xf32>
    %c7 = arith.constant 7 : index
    %c0_66 = arith.constant 0 : index
    %c0_67 = arith.constant 0 : index
    %116 = vector.load %arg2[%c7, %c0_66, %c0_67] : memref<48x32x16xf32, #tpu.memory_space<vmem>>, vector<1x32x16xf32>
    %117 = vector.shape_cast %116 : vector<1x32x16xf32> to vector<32x16xf32>
    %cst_68 = arith.constant dense<0.000000e+00> : vector<18x16xf32>
    %118 = tpu.matmul %35, %117, %cst_68 {dimension_numbers = #tpu.dot_dimension_numbers<[1], [0], [0], [1], [0, 0, 1, 1], [], []>} : vector<18x32xf32>, vector<32x16xf32>, vector<18x16xf32> -> vector<18x16xf32>
    %c11 = arith.constant 11 : index
    %c0_69 = arith.constant 0 : index
    %c0_70 = arith.constant 0 : index
    %119 = vector.load %arg2[%c11, %c0_69, %c0_70] : memref<48x32x16xf32, #tpu.memory_space<vmem>>, vector<1x32x16xf32>
    %120 = vector.shape_cast %119 : vector<1x32x16xf32> to vector<32x16xf32>
    %cst_71 = arith.constant dense<0.000000e+00> : vector<18x16xf32>
    %121 = tpu.matmul %35, %120, %cst_71 {dimension_numbers = #tpu.dot_dimension_numbers<[1], [0], [0], [1], [0, 0, 1, 1], [], []>} : vector<18x32xf32>, vector<32x16xf32>, vector<18x16xf32> -> vector<18x16xf32>
    %cst_72 = arith.constant dense<0.000000e+00> : vector<18x18xf32>
    %122 = tpu.matmul %115, %118, %cst_72 {dimension_numbers = #tpu.dot_dimension_numbers<[1], [1], [0], [0], [0, 0, 1, 0], [], []>} : vector<18x16xf32>, vector<18x16xf32>, vector<18x18xf32> -> vector<18x18xf32>
    %123 = arith.addf %122, %4 : vector<18x18xf32>
    %cst_73 = arith.constant dense<0xFF800000> : vector<18xf32>
    %124 = vector.multi_reduction <maximumf>, %123, %cst_73 [1] : vector<18x18xf32> to vector<18xf32>
    %125 = vector.shape_cast %124 : vector<18xf32> to vector<18x1xf32>
    %126 = vector.broadcast %125 : vector<18x1xf32> to vector<18x18xf32>
    %127 = arith.subf %123, %126 : vector<18x18xf32>
    %128 = math.exp %127 : vector<18x18xf32>
    %cst_74 = arith.constant dense<0.000000e+00> : vector<18xf32>
    %129 = vector.multi_reduction <add>, %128, %cst_74 [1] : vector<18x18xf32> to vector<18xf32>
    %130 = vector.shape_cast %129 : vector<18xf32> to vector<18x1xf32>
    %131 = tpu.reciprocal %130 {approx = true} : vector<18x1xf32> -> vector<18x1xf32>
    %cst_75 = arith.constant dense<0.000000e+00> : vector<18x16xf32>
    %132 = tpu.matmul %128, %121, %cst_75 {dimension_numbers = #tpu.dot_dimension_numbers<[1], [0], [0], [1], [0, 0, 1, 1], [], []>} : vector<18x18xf32>, vector<18x16xf32>, vector<18x16xf32> -> vector<18x16xf32>
    %133 = vector.broadcast %131 : vector<18x1xf32> to vector<18x16xf32>
    %134 = arith.mulf %132, %133 : vector<18x16xf32>
    %c3_76 = arith.constant 3 : index
    %c0_77 = arith.constant 0 : index
    %c0_78 = arith.constant 0 : index
    %135 = vector.load %arg3[%c3_76, %c0_77, %c0_78] : memref<16x16x32xf32, #tpu.memory_space<vmem>>, vector<1x16x32xf32>
    %136 = vector.shape_cast %135 : vector<1x16x32xf32> to vector<16x32xf32>
    %cst_79 = arith.constant dense<0.000000e+00> : vector<18x32xf32>
    %137 = tpu.matmul %134, %136, %cst_79 {dimension_numbers = #tpu.dot_dimension_numbers<[1], [0], [0], [1], [0, 0, 1, 1], [], []>} : vector<18x16xf32>, vector<16x32xf32>, vector<18x32xf32> -> vector<18x32xf32>
    %138 = arith.addf %112, %137 : vector<18x32xf32>
    %139 = arith.addf %7, %138 : vector<18x32xf32>
    %140 = vector.broadcast %11 : vector<1x32xf32> to vector<18x32xf32>
    %141 = arith.addf %139, %140 : vector<18x32xf32>
    %cst_80 = arith.constant dense<0.000000e+00> : vector<18xf32>
    %142 = vector.multi_reduction <add>, %141, %cst_80 [1] : vector<18x32xf32> to vector<18xf32>
    %143 = vector.shape_cast %142 : vector<18xf32> to vector<18x1xf32>
    %cst_81 = arith.constant 3.200000e+01 : f32
    %144 = vector.broadcast %cst_81 : f32 to vector<18x1xf32>
    %145 = arith.divf %143, %144 : vector<18x1xf32>
    %146 = vector.broadcast %145 : vector<18x1xf32> to vector<18x32xf32>
    %147 = arith.subf %141, %146 : vector<18x32xf32>
    %148 = arith.mulf %147, %147 : vector<18x32xf32>
    %cst_82 = arith.constant dense<0.000000e+00> : vector<18xf32>
    %149 = vector.multi_reduction <add>, %148, %cst_82 [1] : vector<18x32xf32> to vector<18xf32>
    %150 = vector.shape_cast %149 : vector<18xf32> to vector<18x1xf32>
    %cst_83 = arith.constant 3.200000e+01 : f32
    %151 = vector.broadcast %cst_83 : f32 to vector<18x1xf32>
    %152 = arith.divf %150, %151 : vector<18x1xf32>
    %cst_84 = arith.constant 9.99999974E-6 : f32
    %153 = vector.broadcast %cst_84 : f32 to vector<18x1xf32>
    %154 = arith.addf %152, %153 : vector<18x1xf32>
    %155 = math.rsqrt %154 : vector<18x1xf32>
    %156 = vector.broadcast %155 : vector<18x1xf32> to vector<18x32xf32>
    %157 = arith.mulf %147, %156 : vector<18x32xf32>
    %158 = vector.broadcast %12 : vector<1x32xf32> to vector<18x32xf32>
    %159 = arith.mulf %157, %158 : vector<18x32xf32>
    %160 = vector.broadcast %13 : vector<1x32xf32> to vector<18x32xf32>
    %161 = arith.addf %159, %160 : vector<18x32xf32>
    %c0_85 = arith.constant 0 : index
    %c0_86 = arith.constant 0 : index
    %c0_87 = arith.constant 0 : index
    %162 = vector.load %arg4[%c0_85, %c0_86, %c0_87] : memref<4x32x32xf32, #tpu.memory_space<vmem>>, vector<1x32x32xf32>
    %163 = vector.shape_cast %162 : vector<1x32x32xf32> to vector<32x32xf32>
    %cst_88 = arith.constant dense<0.000000e+00> : vector<18x32xf32>
    %164 = tpu.matmul %161, %163, %cst_88 {dimension_numbers = #tpu.dot_dimension_numbers<[1], [0], [0], [1], [0, 0, 1, 1], [], []>} : vector<18x32xf32>, vector<32x32xf32>, vector<18x32xf32> -> vector<18x32xf32>
    %165 = vector.broadcast %15 : vector<1x32xf32> to vector<18x32xf32>
    %166 = arith.addf %164, %165 : vector<18x32xf32>
    %cst_89 = arith.constant 5.000000e-01 : f32
    %167 = vector.broadcast %cst_89 : f32 to vector<18x32xf32>
    %168 = arith.mulf %167, %166 : vector<18x32xf32>
    %cst_90 = arith.constant 4.471500e-02 : f32
    %169 = vector.broadcast %cst_90 : f32 to vector<18x32xf32>
    %170 = arith.mulf %169, %166 : vector<18x32xf32>
    %171 = arith.mulf %170, %166 : vector<18x32xf32>
    %172 = arith.mulf %171, %166 : vector<18x32xf32>
    %173 = arith.addf %166, %172 : vector<18x32xf32>
    %cst_91 = arith.constant 0.797884583 : f32
    %174 = vector.broadcast %cst_91 : f32 to vector<18x32xf32>
    %175 = arith.mulf %174, %173 : vector<18x32xf32>
    %176 = math.tanh %175 : vector<18x32xf32>
    %cst_92 = arith.constant 1.000000e+00 : f32
    %177 = vector.broadcast %cst_92 : f32 to vector<18x32xf32>
    %178 = arith.addf %177, %176 : vector<18x32xf32>
    %179 = arith.mulf %168, %178 : vector<18x32xf32>
    %c0_93 = arith.constant 0 : index
    %c0_94 = arith.constant 0 : index
    %c0_95 = arith.constant 0 : index
    %180 = vector.load %arg5[%c0_93, %c0_94, %c0_95] : memref<4x32x32xf32, #tpu.memory_space<vmem>>, vector<1x32x32xf32>
    %181 = vector.shape_cast %180 : vector<1x32x32xf32> to vector<32x32xf32>
    %cst_96 = arith.constant dense<0.000000e+00> : vector<18x32xf32>
    %182 = tpu.matmul %179, %181, %cst_96 {dimension_numbers = #tpu.dot_dimension_numbers<[1], [0], [0], [1], [0, 0, 1, 1], [], []>} : vector<18x32xf32>, vector<32x32xf32>, vector<18x32xf32> -> vector<18x32xf32>
    %183 = arith.addf %141, %182 : vector<18x32xf32>
    %184 = vector.broadcast %14 : vector<1x32xf32> to vector<18x32xf32>
    %185 = arith.addf %183, %184 : vector<18x32xf32>
    %186 = vector.extract_strided_slice %0 {offsets = [48, 0], sizes = [8, 32], strides = [1, 1]} : vector<128x32xf32> to vector<8x32xf32>
    %187 = vector.extract_strided_slice %186 {offsets = [0, 0], sizes = [1, 32], strides = [1, 1]} : vector<8x32xf32> to vector<1x32xf32>
    %188 = vector.extract_strided_slice %186 {offsets = [1, 0], sizes = [1, 32], strides = [1, 1]} : vector<8x32xf32> to vector<1x32xf32>
    %189 = vector.extract_strided_slice %186 {offsets = [2, 0], sizes = [1, 32], strides = [1, 1]} : vector<8x32xf32> to vector<1x32xf32>
    %190 = vector.extract_strided_slice %186 {offsets = [3, 0], sizes = [1, 32], strides = [1, 1]} : vector<8x32xf32> to vector<1x32xf32>
    %191 = vector.extract_strided_slice %186 {offsets = [4, 0], sizes = [1, 32], strides = [1, 1]} : vector<8x32xf32> to vector<1x32xf32>
    %192 = vector.extract_strided_slice %186 {offsets = [5, 0], sizes = [1, 32], strides = [1, 1]} : vector<8x32xf32> to vector<1x32xf32>
    %193 = vector.extract_strided_slice %186 {offsets = [6, 0], sizes = [1, 32], strides = [1, 1]} : vector<8x32xf32> to vector<1x32xf32>
    %cst_97 = arith.constant dense<0.000000e+00> : vector<18xf32>
    %194 = vector.multi_reduction <add>, %185, %cst_97 [1] : vector<18x32xf32> to vector<18xf32>
    %195 = vector.shape_cast %194 : vector<18xf32> to vector<18x1xf32>
    %cst_98 = arith.constant 3.200000e+01 : f32
    %196 = vector.broadcast %cst_98 : f32 to vector<18x1xf32>
    %197 = arith.divf %195, %196 : vector<18x1xf32>
    %198 = vector.broadcast %197 : vector<18x1xf32> to vector<18x32xf32>
    %199 = arith.subf %185, %198 : vector<18x32xf32>
    %200 = arith.mulf %199, %199 : vector<18x32xf32>
    %cst_99 = arith.constant dense<0.000000e+00> : vector<18xf32>
    %201 = vector.multi_reduction <add>, %200, %cst_99 [1] : vector<18x32xf32> to vector<18xf32>
    %202 = vector.shape_cast %201 : vector<18xf32> to vector<18x1xf32>
    %cst_100 = arith.constant 3.200000e+01 : f32
    %203 = vector.broadcast %cst_100 : f32 to vector<18x1xf32>
    %204 = arith.divf %202, %203 : vector<18x1xf32>
    %cst_101 = arith.constant 9.99999974E-6 : f32
    %205 = vector.broadcast %cst_101 : f32 to vector<18x1xf32>
    %206 = arith.addf %204, %205 : vector<18x1xf32>
    %207 = math.rsqrt %206 : vector<18x1xf32>
    %208 = vector.broadcast %207 : vector<18x1xf32> to vector<18x32xf32>
    %209 = arith.mulf %199, %208 : vector<18x32xf32>
    %210 = vector.broadcast %187 : vector<1x32xf32> to vector<18x32xf32>
    %211 = arith.mulf %209, %210 : vector<18x32xf32>
    %212 = vector.broadcast %188 : vector<1x32xf32> to vector<18x32xf32>
    %213 = arith.addf %211, %212 : vector<18x32xf32>
    %c12 = arith.constant 12 : index
    %c0_102 = arith.constant 0 : index
    %c0_103 = arith.constant 0 : index
    %214 = vector.load %arg2[%c12, %c0_102, %c0_103] : memref<48x32x16xf32, #tpu.memory_space<vmem>>, vector<1x32x16xf32>
    %215 = vector.shape_cast %214 : vector<1x32x16xf32> to vector<32x16xf32>
    %cst_104 = arith.constant dense<0.000000e+00> : vector<18x16xf32>
    %216 = tpu.matmul %213, %215, %cst_104 {dimension_numbers = #tpu.dot_dimension_numbers<[1], [0], [0], [1], [0, 0, 1, 1], [], []>} : vector<18x32xf32>, vector<32x16xf32>, vector<18x16xf32> -> vector<18x16xf32>
    %c16 = arith.constant 16 : index
    %c0_105 = arith.constant 0 : index
    %c0_106 = arith.constant 0 : index
    %217 = vector.load %arg2[%c16, %c0_105, %c0_106] : memref<48x32x16xf32, #tpu.memory_space<vmem>>, vector<1x32x16xf32>
    %218 = vector.shape_cast %217 : vector<1x32x16xf32> to vector<32x16xf32>
    %cst_107 = arith.constant dense<0.000000e+00> : vector<18x16xf32>
    %219 = tpu.matmul %213, %218, %cst_107 {dimension_numbers = #tpu.dot_dimension_numbers<[1], [0], [0], [1], [0, 0, 1, 1], [], []>} : vector<18x32xf32>, vector<32x16xf32>, vector<18x16xf32> -> vector<18x16xf32>
    %c20 = arith.constant 20 : index
    %c0_108 = arith.constant 0 : index
    %c0_109 = arith.constant 0 : index
    %220 = vector.load %arg2[%c20, %c0_108, %c0_109] : memref<48x32x16xf32, #tpu.memory_space<vmem>>, vector<1x32x16xf32>
    %221 = vector.shape_cast %220 : vector<1x32x16xf32> to vector<32x16xf32>
    %cst_110 = arith.constant dense<0.000000e+00> : vector<18x16xf32>
    %222 = tpu.matmul %213, %221, %cst_110 {dimension_numbers = #tpu.dot_dimension_numbers<[1], [0], [0], [1], [0, 0, 1, 1], [], []>} : vector<18x32xf32>, vector<32x16xf32>, vector<18x16xf32> -> vector<18x16xf32>
    %cst_111 = arith.constant dense<0.000000e+00> : vector<18x18xf32>
    %223 = tpu.matmul %216, %219, %cst_111 {dimension_numbers = #tpu.dot_dimension_numbers<[1], [1], [0], [0], [0, 0, 1, 0], [], []>} : vector<18x16xf32>, vector<18x16xf32>, vector<18x18xf32> -> vector<18x18xf32>
    %224 = arith.addf %223, %4 : vector<18x18xf32>
    %cst_112 = arith.constant dense<0xFF800000> : vector<18xf32>
    %225 = vector.multi_reduction <maximumf>, %224, %cst_112 [1] : vector<18x18xf32> to vector<18xf32>
    %226 = vector.shape_cast %225 : vector<18xf32> to vector<18x1xf32>
    %227 = vector.broadcast %226 : vector<18x1xf32> to vector<18x18xf32>
    %228 = arith.subf %224, %227 : vector<18x18xf32>
    %229 = math.exp %228 : vector<18x18xf32>
    %cst_113 = arith.constant dense<0.000000e+00> : vector<18xf32>
    %230 = vector.multi_reduction <add>, %229, %cst_113 [1] : vector<18x18xf32> to vector<18xf32>
    %231 = vector.shape_cast %230 : vector<18xf32> to vector<18x1xf32>
    %232 = tpu.reciprocal %231 {approx = true} : vector<18x1xf32> -> vector<18x1xf32>
    %cst_114 = arith.constant dense<0.000000e+00> : vector<18x16xf32>
    %233 = tpu.matmul %229, %222, %cst_114 {dimension_numbers = #tpu.dot_dimension_numbers<[1], [0], [0], [1], [0, 0, 1, 1], [], []>} : vector<18x18xf32>, vector<18x16xf32>, vector<18x16xf32> -> vector<18x16xf32>
    %234 = vector.broadcast %232 : vector<18x1xf32> to vector<18x16xf32>
    %235 = arith.mulf %233, %234 : vector<18x16xf32>
    %c4_115 = arith.constant 4 : index
    %c0_116 = arith.constant 0 : index
    %c0_117 = arith.constant 0 : index
    %236 = vector.load %arg3[%c4_115, %c0_116, %c0_117] : memref<16x16x32xf32, #tpu.memory_space<vmem>>, vector<1x16x32xf32>
    %237 = vector.shape_cast %236 : vector<1x16x32xf32> to vector<16x32xf32>
    %cst_118 = arith.constant dense<0.000000e+00> : vector<18x32xf32>
    %238 = tpu.matmul %235, %237, %cst_118 {dimension_numbers = #tpu.dot_dimension_numbers<[1], [0], [0], [1], [0, 0, 1, 1], [], []>} : vector<18x16xf32>, vector<16x32xf32>, vector<18x32xf32> -> vector<18x32xf32>
    %c13 = arith.constant 13 : index
    %c0_119 = arith.constant 0 : index
    %c0_120 = arith.constant 0 : index
    %239 = vector.load %arg2[%c13, %c0_119, %c0_120] : memref<48x32x16xf32, #tpu.memory_space<vmem>>, vector<1x32x16xf32>
    %240 = vector.shape_cast %239 : vector<1x32x16xf32> to vector<32x16xf32>
    %cst_121 = arith.constant dense<0.000000e+00> : vector<18x16xf32>
    %241 = tpu.matmul %213, %240, %cst_121 {dimension_numbers = #tpu.dot_dimension_numbers<[1], [0], [0], [1], [0, 0, 1, 1], [], []>} : vector<18x32xf32>, vector<32x16xf32>, vector<18x16xf32> -> vector<18x16xf32>
    %c17 = arith.constant 17 : index
    %c0_122 = arith.constant 0 : index
    %c0_123 = arith.constant 0 : index
    %242 = vector.load %arg2[%c17, %c0_122, %c0_123] : memref<48x32x16xf32, #tpu.memory_space<vmem>>, vector<1x32x16xf32>
    %243 = vector.shape_cast %242 : vector<1x32x16xf32> to vector<32x16xf32>
    %cst_124 = arith.constant dense<0.000000e+00> : vector<18x16xf32>
    %244 = tpu.matmul %213, %243, %cst_124 {dimension_numbers = #tpu.dot_dimension_numbers<[1], [0], [0], [1], [0, 0, 1, 1], [], []>} : vector<18x32xf32>, vector<32x16xf32>, vector<18x16xf32> -> vector<18x16xf32>
    %c21 = arith.constant 21 : index
    %c0_125 = arith.constant 0 : index
    %c0_126 = arith.constant 0 : index
    %245 = vector.load %arg2[%c21, %c0_125, %c0_126] : memref<48x32x16xf32, #tpu.memory_space<vmem>>, vector<1x32x16xf32>
    %246 = vector.shape_cast %245 : vector<1x32x16xf32> to vector<32x16xf32>
    %cst_127 = arith.constant dense<0.000000e+00> : vector<18x16xf32>
    %247 = tpu.matmul %213, %246, %cst_127 {dimension_numbers = #tpu.dot_dimension_numbers<[1], [0], [0], [1], [0, 0, 1, 1], [], []>} : vector<18x32xf32>, vector<32x16xf32>, vector<18x16xf32> -> vector<18x16xf32>
    %cst_128 = arith.constant dense<0.000000e+00> : vector<18x18xf32>
    %248 = tpu.matmul %241, %244, %cst_128 {dimension_numbers = #tpu.dot_dimension_numbers<[1], [1], [0], [0], [0, 0, 1, 0], [], []>} : vector<18x16xf32>, vector<18x16xf32>, vector<18x18xf32> -> vector<18x18xf32>
    %249 = arith.addf %248, %4 : vector<18x18xf32>
    %cst_129 = arith.constant dense<0xFF800000> : vector<18xf32>
    %250 = vector.multi_reduction <maximumf>, %249, %cst_129 [1] : vector<18x18xf32> to vector<18xf32>
    %251 = vector.shape_cast %250 : vector<18xf32> to vector<18x1xf32>
    %252 = vector.broadcast %251 : vector<18x1xf32> to vector<18x18xf32>
    %253 = arith.subf %249, %252 : vector<18x18xf32>
    %254 = math.exp %253 : vector<18x18xf32>
    %cst_130 = arith.constant dense<0.000000e+00> : vector<18xf32>
    %255 = vector.multi_reduction <add>, %254, %cst_130 [1] : vector<18x18xf32> to vector<18xf32>
    %256 = vector.shape_cast %255 : vector<18xf32> to vector<18x1xf32>
    %257 = tpu.reciprocal %256 {approx = true} : vector<18x1xf32> -> vector<18x1xf32>
    %cst_131 = arith.constant dense<0.000000e+00> : vector<18x16xf32>
    %258 = tpu.matmul %254, %247, %cst_131 {dimension_numbers = #tpu.dot_dimension_numbers<[1], [0], [0], [1], [0, 0, 1, 1], [], []>} : vector<18x18xf32>, vector<18x16xf32>, vector<18x16xf32> -> vector<18x16xf32>
    %259 = vector.broadcast %257 : vector<18x1xf32> to vector<18x16xf32>
    %260 = arith.mulf %258, %259 : vector<18x16xf32>
    %c5_132 = arith.constant 5 : index
    %c0_133 = arith.constant 0 : index
    %c0_134 = arith.constant 0 : index
    %261 = vector.load %arg3[%c5_132, %c0_133, %c0_134] : memref<16x16x32xf32, #tpu.memory_space<vmem>>, vector<1x16x32xf32>
    %262 = vector.shape_cast %261 : vector<1x16x32xf32> to vector<16x32xf32>
    %cst_135 = arith.constant dense<0.000000e+00> : vector<18x32xf32>
    %263 = tpu.matmul %260, %262, %cst_135 {dimension_numbers = #tpu.dot_dimension_numbers<[1], [0], [0], [1], [0, 0, 1, 1], [], []>} : vector<18x16xf32>, vector<16x32xf32>, vector<18x32xf32> -> vector<18x32xf32>
    %264 = arith.addf %238, %263 : vector<18x32xf32>
    %c14 = arith.constant 14 : index
    %c0_136 = arith.constant 0 : index
    %c0_137 = arith.constant 0 : index
    %265 = vector.load %arg2[%c14, %c0_136, %c0_137] : memref<48x32x16xf32, #tpu.memory_space<vmem>>, vector<1x32x16xf32>
    %266 = vector.shape_cast %265 : vector<1x32x16xf32> to vector<32x16xf32>
    %cst_138 = arith.constant dense<0.000000e+00> : vector<18x16xf32>
    %267 = tpu.matmul %213, %266, %cst_138 {dimension_numbers = #tpu.dot_dimension_numbers<[1], [0], [0], [1], [0, 0, 1, 1], [], []>} : vector<18x32xf32>, vector<32x16xf32>, vector<18x16xf32> -> vector<18x16xf32>
    %c18 = arith.constant 18 : index
    %c0_139 = arith.constant 0 : index
    %c0_140 = arith.constant 0 : index
    %268 = vector.load %arg2[%c18, %c0_139, %c0_140] : memref<48x32x16xf32, #tpu.memory_space<vmem>>, vector<1x32x16xf32>
    %269 = vector.shape_cast %268 : vector<1x32x16xf32> to vector<32x16xf32>
    %cst_141 = arith.constant dense<0.000000e+00> : vector<18x16xf32>
    %270 = tpu.matmul %213, %269, %cst_141 {dimension_numbers = #tpu.dot_dimension_numbers<[1], [0], [0], [1], [0, 0, 1, 1], [], []>} : vector<18x32xf32>, vector<32x16xf32>, vector<18x16xf32> -> vector<18x16xf32>
    %c22 = arith.constant 22 : index
    %c0_142 = arith.constant 0 : index
    %c0_143 = arith.constant 0 : index
    %271 = vector.load %arg2[%c22, %c0_142, %c0_143] : memref<48x32x16xf32, #tpu.memory_space<vmem>>, vector<1x32x16xf32>
    %272 = vector.shape_cast %271 : vector<1x32x16xf32> to vector<32x16xf32>
    %cst_144 = arith.constant dense<0.000000e+00> : vector<18x16xf32>
    %273 = tpu.matmul %213, %272, %cst_144 {dimension_numbers = #tpu.dot_dimension_numbers<[1], [0], [0], [1], [0, 0, 1, 1], [], []>} : vector<18x32xf32>, vector<32x16xf32>, vector<18x16xf32> -> vector<18x16xf32>
    %cst_145 = arith.constant dense<0.000000e+00> : vector<18x18xf32>
    %274 = tpu.matmul %267, %270, %cst_145 {dimension_numbers = #tpu.dot_dimension_numbers<[1], [1], [0], [0], [0, 0, 1, 0], [], []>} : vector<18x16xf32>, vector<18x16xf32>, vector<18x18xf32> -> vector<18x18xf32>
    %275 = arith.addf %274, %4 : vector<18x18xf32>
    %cst_146 = arith.constant dense<0xFF800000> : vector<18xf32>
    %276 = vector.multi_reduction <maximumf>, %275, %cst_146 [1] : vector<18x18xf32> to vector<18xf32>
    %277 = vector.shape_cast %276 : vector<18xf32> to vector<18x1xf32>
    %278 = vector.broadcast %277 : vector<18x1xf32> to vector<18x18xf32>
    %279 = arith.subf %275, %278 : vector<18x18xf32>
    %280 = math.exp %279 : vector<18x18xf32>
    %cst_147 = arith.constant dense<0.000000e+00> : vector<18xf32>
    %281 = vector.multi_reduction <add>, %280, %cst_147 [1] : vector<18x18xf32> to vector<18xf32>
    %282 = vector.shape_cast %281 : vector<18xf32> to vector<18x1xf32>
    %283 = tpu.reciprocal %282 {approx = true} : vector<18x1xf32> -> vector<18x1xf32>
    %cst_148 = arith.constant dense<0.000000e+00> : vector<18x16xf32>
    %284 = tpu.matmul %280, %273, %cst_148 {dimension_numbers = #tpu.dot_dimension_numbers<[1], [0], [0], [1], [0, 0, 1, 1], [], []>} : vector<18x18xf32>, vector<18x16xf32>, vector<18x16xf32> -> vector<18x16xf32>
    %285 = vector.broadcast %283 : vector<18x1xf32> to vector<18x16xf32>
    %286 = arith.mulf %284, %285 : vector<18x16xf32>
    %c6_149 = arith.constant 6 : index
    %c0_150 = arith.constant 0 : index
    %c0_151 = arith.constant 0 : index
    %287 = vector.load %arg3[%c6_149, %c0_150, %c0_151] : memref<16x16x32xf32, #tpu.memory_space<vmem>>, vector<1x16x32xf32>
    %288 = vector.shape_cast %287 : vector<1x16x32xf32> to vector<16x32xf32>
    %cst_152 = arith.constant dense<0.000000e+00> : vector<18x32xf32>
    %289 = tpu.matmul %286, %288, %cst_152 {dimension_numbers = #tpu.dot_dimension_numbers<[1], [0], [0], [1], [0, 0, 1, 1], [], []>} : vector<18x16xf32>, vector<16x32xf32>, vector<18x32xf32> -> vector<18x32xf32>
    %290 = arith.addf %264, %289 : vector<18x32xf32>
    %c15 = arith.constant 15 : index
    %c0_153 = arith.constant 0 : index
    %c0_154 = arith.constant 0 : index
    %291 = vector.load %arg2[%c15, %c0_153, %c0_154] : memref<48x32x16xf32, #tpu.memory_space<vmem>>, vector<1x32x16xf32>
    %292 = vector.shape_cast %291 : vector<1x32x16xf32> to vector<32x16xf32>
    %cst_155 = arith.constant dense<0.000000e+00> : vector<18x16xf32>
    %293 = tpu.matmul %213, %292, %cst_155 {dimension_numbers = #tpu.dot_dimension_numbers<[1], [0], [0], [1], [0, 0, 1, 1], [], []>} : vector<18x32xf32>, vector<32x16xf32>, vector<18x16xf32> -> vector<18x16xf32>
    %c19 = arith.constant 19 : index
    %c0_156 = arith.constant 0 : index
    %c0_157 = arith.constant 0 : index
    %294 = vector.load %arg2[%c19, %c0_156, %c0_157] : memref<48x32x16xf32, #tpu.memory_space<vmem>>, vector<1x32x16xf32>
    %295 = vector.shape_cast %294 : vector<1x32x16xf32> to vector<32x16xf32>
    %cst_158 = arith.constant dense<0.000000e+00> : vector<18x16xf32>
    %296 = tpu.matmul %213, %295, %cst_158 {dimension_numbers = #tpu.dot_dimension_numbers<[1], [0], [0], [1], [0, 0, 1, 1], [], []>} : vector<18x32xf32>, vector<32x16xf32>, vector<18x16xf32> -> vector<18x16xf32>
    %c23 = arith.constant 23 : index
    %c0_159 = arith.constant 0 : index
    %c0_160 = arith.constant 0 : index
    %297 = vector.load %arg2[%c23, %c0_159, %c0_160] : memref<48x32x16xf32, #tpu.memory_space<vmem>>, vector<1x32x16xf32>
    %298 = vector.shape_cast %297 : vector<1x32x16xf32> to vector<32x16xf32>
    %cst_161 = arith.constant dense<0.000000e+00> : vector<18x16xf32>
    %299 = tpu.matmul %213, %298, %cst_161 {dimension_numbers = #tpu.dot_dimension_numbers<[1], [0], [0], [1], [0, 0, 1, 1], [], []>} : vector<18x32xf32>, vector<32x16xf32>, vector<18x16xf32> -> vector<18x16xf32>
    %cst_162 = arith.constant dense<0.000000e+00> : vector<18x18xf32>
    %300 = tpu.matmul %293, %296, %cst_162 {dimension_numbers = #tpu.dot_dimension_numbers<[1], [1], [0], [0], [0, 0, 1, 0], [], []>} : vector<18x16xf32>, vector<18x16xf32>, vector<18x18xf32> -> vector<18x18xf32>
    %301 = arith.addf %300, %4 : vector<18x18xf32>
    %cst_163 = arith.constant dense<0xFF800000> : vector<18xf32>
    %302 = vector.multi_reduction <maximumf>, %301, %cst_163 [1] : vector<18x18xf32> to vector<18xf32>
    %303 = vector.shape_cast %302 : vector<18xf32> to vector<18x1xf32>
    %304 = vector.broadcast %303 : vector<18x1xf32> to vector<18x18xf32>
    %305 = arith.subf %301, %304 : vector<18x18xf32>
    %306 = math.exp %305 : vector<18x18xf32>
    %cst_164 = arith.constant dense<0.000000e+00> : vector<18xf32>
    %307 = vector.multi_reduction <add>, %306, %cst_164 [1] : vector<18x18xf32> to vector<18xf32>
    %308 = vector.shape_cast %307 : vector<18xf32> to vector<18x1xf32>
    %309 = tpu.reciprocal %308 {approx = true} : vector<18x1xf32> -> vector<18x1xf32>
    %cst_165 = arith.constant dense<0.000000e+00> : vector<18x16xf32>
    %310 = tpu.matmul %306, %299, %cst_165 {dimension_numbers = #tpu.dot_dimension_numbers<[1], [0], [0], [1], [0, 0, 1, 1], [], []>} : vector<18x18xf32>, vector<18x16xf32>, vector<18x16xf32> -> vector<18x16xf32>
    %311 = vector.broadcast %309 : vector<18x1xf32> to vector<18x16xf32>
    %312 = arith.mulf %310, %311 : vector<18x16xf32>
    %c7_166 = arith.constant 7 : index
    %c0_167 = arith.constant 0 : index
    %c0_168 = arith.constant 0 : index
    %313 = vector.load %arg3[%c7_166, %c0_167, %c0_168] : memref<16x16x32xf32, #tpu.memory_space<vmem>>, vector<1x16x32xf32>
    %314 = vector.shape_cast %313 : vector<1x16x32xf32> to vector<16x32xf32>
    %cst_169 = arith.constant dense<0.000000e+00> : vector<18x32xf32>
    %315 = tpu.matmul %312, %314, %cst_169 {dimension_numbers = #tpu.dot_dimension_numbers<[1], [0], [0], [1], [0, 0, 1, 1], [], []>} : vector<18x16xf32>, vector<16x32xf32>, vector<18x32xf32> -> vector<18x32xf32>
    %316 = arith.addf %290, %315 : vector<18x32xf32>
    %317 = arith.addf %185, %316 : vector<18x32xf32>
    %318 = vector.broadcast %189 : vector<1x32xf32> to vector<18x32xf32>
    %319 = arith.addf %317, %318 : vector<18x32xf32>
    %cst_170 = arith.constant dense<0.000000e+00> : vector<18xf32>
    %320 = vector.multi_reduction <add>, %319, %cst_170 [1] : vector<18x32xf32> to vector<18xf32>
    %321 = vector.shape_cast %320 : vector<18xf32> to vector<18x1xf32>
    %cst_171 = arith.constant 3.200000e+01 : f32
    %322 = vector.broadcast %cst_171 : f32 to vector<18x1xf32>
    %323 = arith.divf %321, %322 : vector<18x1xf32>
    %324 = vector.broadcast %323 : vector<18x1xf32> to vector<18x32xf32>
    %325 = arith.subf %319, %324 : vector<18x32xf32>
    %326 = arith.mulf %325, %325 : vector<18x32xf32>
    %cst_172 = arith.constant dense<0.000000e+00> : vector<18xf32>
    %327 = vector.multi_reduction <add>, %326, %cst_172 [1] : vector<18x32xf32> to vector<18xf32>
    %328 = vector.shape_cast %327 : vector<18xf32> to vector<18x1xf32>
    %cst_173 = arith.constant 3.200000e+01 : f32
    %329 = vector.broadcast %cst_173 : f32 to vector<18x1xf32>
    %330 = arith.divf %328, %329 : vector<18x1xf32>
    %cst_174 = arith.constant 9.99999974E-6 : f32
    %331 = vector.broadcast %cst_174 : f32 to vector<18x1xf32>
    %332 = arith.addf %330, %331 : vector<18x1xf32>
    %333 = math.rsqrt %332 : vector<18x1xf32>
    %334 = vector.broadcast %333 : vector<18x1xf32> to vector<18x32xf32>
    %335 = arith.mulf %325, %334 : vector<18x32xf32>
    %336 = vector.broadcast %190 : vector<1x32xf32> to vector<18x32xf32>
    %337 = arith.mulf %335, %336 : vector<18x32xf32>
    %338 = vector.broadcast %191 : vector<1x32xf32> to vector<18x32xf32>
    %339 = arith.addf %337, %338 : vector<18x32xf32>
    %c1_175 = arith.constant 1 : index
    %c0_176 = arith.constant 0 : index
    %c0_177 = arith.constant 0 : index
    %340 = vector.load %arg4[%c1_175, %c0_176, %c0_177] : memref<4x32x32xf32, #tpu.memory_space<vmem>>, vector<1x32x32xf32>
    %341 = vector.shape_cast %340 : vector<1x32x32xf32> to vector<32x32xf32>
    %cst_178 = arith.constant dense<0.000000e+00> : vector<18x32xf32>
    %342 = tpu.matmul %339, %341, %cst_178 {dimension_numbers = #tpu.dot_dimension_numbers<[1], [0], [0], [1], [0, 0, 1, 1], [], []>} : vector<18x32xf32>, vector<32x32xf32>, vector<18x32xf32> -> vector<18x32xf32>
    %343 = vector.broadcast %193 : vector<1x32xf32> to vector<18x32xf32>
    %344 = arith.addf %342, %343 : vector<18x32xf32>
    %cst_179 = arith.constant 5.000000e-01 : f32
    %345 = vector.broadcast %cst_179 : f32 to vector<18x32xf32>
    %346 = arith.mulf %345, %344 : vector<18x32xf32>
    %cst_180 = arith.constant 4.471500e-02 : f32
    %347 = vector.broadcast %cst_180 : f32 to vector<18x32xf32>
    %348 = arith.mulf %347, %344 : vector<18x32xf32>
    %349 = arith.mulf %348, %344 : vector<18x32xf32>
    %350 = arith.mulf %349, %344 : vector<18x32xf32>
    %351 = arith.addf %344, %350 : vector<18x32xf32>
    %cst_181 = arith.constant 0.797884583 : f32
    %352 = vector.broadcast %cst_181 : f32 to vector<18x32xf32>
    %353 = arith.mulf %352, %351 : vector<18x32xf32>
    %354 = math.tanh %353 : vector<18x32xf32>
    %cst_182 = arith.constant 1.000000e+00 : f32
    %355 = vector.broadcast %cst_182 : f32 to vector<18x32xf32>
    %356 = arith.addf %355, %354 : vector<18x32xf32>
    %357 = arith.mulf %346, %356 : vector<18x32xf32>
    %c1_183 = arith.constant 1 : index
    %c0_184 = arith.constant 0 : index
    %c0_185 = arith.constant 0 : index
    %358 = vector.load %arg5[%c1_183, %c0_184, %c0_185] : memref<4x32x32xf32, #tpu.memory_space<vmem>>, vector<1x32x32xf32>
    %359 = vector.shape_cast %358 : vector<1x32x32xf32> to vector<32x32xf32>
    %cst_186 = arith.constant dense<0.000000e+00> : vector<18x32xf32>
    %360 = tpu.matmul %357, %359, %cst_186 {dimension_numbers = #tpu.dot_dimension_numbers<[1], [0], [0], [1], [0, 0, 1, 1], [], []>} : vector<18x32xf32>, vector<32x32xf32>, vector<18x32xf32> -> vector<18x32xf32>
    %361 = arith.addf %319, %360 : vector<18x32xf32>
    %362 = vector.broadcast %192 : vector<1x32xf32> to vector<18x32xf32>
    %363 = arith.addf %361, %362 : vector<18x32xf32>
    %364 = vector.extract_strided_slice %0 {offsets = [56, 0], sizes = [8, 32], strides = [1, 1]} : vector<128x32xf32> to vector<8x32xf32>
    %365 = vector.extract_strided_slice %364 {offsets = [0, 0], sizes = [1, 32], strides = [1, 1]} : vector<8x32xf32> to vector<1x32xf32>
    %366 = vector.extract_strided_slice %364 {offsets = [1, 0], sizes = [1, 32], strides = [1, 1]} : vector<8x32xf32> to vector<1x32xf32>
    %367 = vector.extract_strided_slice %364 {offsets = [2, 0], sizes = [1, 32], strides = [1, 1]} : vector<8x32xf32> to vector<1x32xf32>
    %368 = vector.extract_strided_slice %364 {offsets = [3, 0], sizes = [1, 32], strides = [1, 1]} : vector<8x32xf32> to vector<1x32xf32>
    %369 = vector.extract_strided_slice %364 {offsets = [4, 0], sizes = [1, 32], strides = [1, 1]} : vector<8x32xf32> to vector<1x32xf32>
    %370 = vector.extract_strided_slice %364 {offsets = [5, 0], sizes = [1, 32], strides = [1, 1]} : vector<8x32xf32> to vector<1x32xf32>
    %371 = vector.extract_strided_slice %364 {offsets = [6, 0], sizes = [1, 32], strides = [1, 1]} : vector<8x32xf32> to vector<1x32xf32>
    %372 = vector.extract_strided_slice %0 {offsets = [80, 0], sizes = [18, 32], strides = [1, 1]} : vector<128x32xf32> to vector<18x32xf32>
    %c1_187 = arith.constant 1 : index
    %c0_188 = arith.constant 0 : index
    %c0_189 = arith.constant 0 : index
    %373 = vector.load %arg6[%c1_187, %c0_188, %c0_189] : memref<5x18x18xf32, #tpu.memory_space<vmem>>, vector<1x18x18xf32>
    %374 = vector.shape_cast %373 : vector<1x18x18xf32> to vector<18x18xf32>
    %cst_190 = arith.constant dense<0.000000e+00> : vector<18x32xf32>
    %375 = tpu.matmul %374, %363, %cst_190 {dimension_numbers = #tpu.dot_dimension_numbers<[1], [0], [0], [1], [0, 0, 1, 1], [], []>} : vector<18x18xf32>, vector<18x32xf32>, vector<18x32xf32> -> vector<18x32xf32>
    %c3_191 = arith.constant 3 : index
    %c0_192 = arith.constant 0 : index
    %c0_193 = arith.constant 0 : index
    %376 = vector.load %arg6[%c3_191, %c0_192, %c0_193] : memref<5x18x18xf32, #tpu.memory_space<vmem>>, vector<1x18x18xf32>
    %377 = vector.shape_cast %376 : vector<1x18x18xf32> to vector<18x18xf32>
    %cst_194 = arith.constant dense<0.000000e+00> : vector<18x32xf32>
    %378 = tpu.matmul %377, %7, %cst_194 {dimension_numbers = #tpu.dot_dimension_numbers<[1], [0], [0], [1], [0, 0, 1, 1], [], []>} : vector<18x18xf32>, vector<18x32xf32>, vector<18x32xf32> -> vector<18x32xf32>
    %379 = arith.addf %375, %378 : vector<18x32xf32>
    %380 = arith.addf %379, %372 : vector<18x32xf32>
    %cst_195 = arith.constant dense<0.000000e+00> : vector<18xf32>
    %381 = vector.multi_reduction <add>, %380, %cst_195 [1] : vector<18x32xf32> to vector<18xf32>
    %382 = vector.shape_cast %381 : vector<18xf32> to vector<18x1xf32>
    %cst_196 = arith.constant 3.200000e+01 : f32
    %383 = vector.broadcast %cst_196 : f32 to vector<18x1xf32>
    %384 = arith.divf %382, %383 : vector<18x1xf32>
    %385 = vector.broadcast %384 : vector<18x1xf32> to vector<18x32xf32>
    %386 = arith.subf %380, %385 : vector<18x32xf32>
    %387 = arith.mulf %386, %386 : vector<18x32xf32>
    %cst_197 = arith.constant dense<0.000000e+00> : vector<18xf32>
    %388 = vector.multi_reduction <add>, %387, %cst_197 [1] : vector<18x32xf32> to vector<18xf32>
    %389 = vector.shape_cast %388 : vector<18xf32> to vector<18x1xf32>
    %cst_198 = arith.constant 3.200000e+01 : f32
    %390 = vector.broadcast %cst_198 : f32 to vector<18x1xf32>
    %391 = arith.divf %389, %390 : vector<18x1xf32>
    %cst_199 = arith.constant 9.99999974E-6 : f32
    %392 = vector.broadcast %cst_199 : f32 to vector<18x1xf32>
    %393 = arith.addf %391, %392 : vector<18x1xf32>
    %394 = math.rsqrt %393 : vector<18x1xf32>
    %395 = vector.broadcast %394 : vector<18x1xf32> to vector<18x32xf32>
    %396 = arith.mulf %386, %395 : vector<18x32xf32>
    %397 = vector.broadcast %365 : vector<1x32xf32> to vector<18x32xf32>
    %398 = arith.mulf %396, %397 : vector<18x32xf32>
    %399 = vector.broadcast %366 : vector<1x32xf32> to vector<18x32xf32>
    %400 = arith.addf %398, %399 : vector<18x32xf32>
    %c24 = arith.constant 24 : index
    %c0_200 = arith.constant 0 : index
    %c0_201 = arith.constant 0 : index
    %401 = vector.load %arg2[%c24, %c0_200, %c0_201] : memref<48x32x16xf32, #tpu.memory_space<vmem>>, vector<1x32x16xf32>
    %402 = vector.shape_cast %401 : vector<1x32x16xf32> to vector<32x16xf32>
    %cst_202 = arith.constant dense<0.000000e+00> : vector<18x16xf32>
    %403 = tpu.matmul %400, %402, %cst_202 {dimension_numbers = #tpu.dot_dimension_numbers<[1], [0], [0], [1], [0, 0, 1, 1], [], []>} : vector<18x32xf32>, vector<32x16xf32>, vector<18x16xf32> -> vector<18x16xf32>
    %c28 = arith.constant 28 : index
    %c0_203 = arith.constant 0 : index
    %c0_204 = arith.constant 0 : index
    %404 = vector.load %arg2[%c28, %c0_203, %c0_204] : memref<48x32x16xf32, #tpu.memory_space<vmem>>, vector<1x32x16xf32>
    %405 = vector.shape_cast %404 : vector<1x32x16xf32> to vector<32x16xf32>
    %cst_205 = arith.constant dense<0.000000e+00> : vector<18x16xf32>
    %406 = tpu.matmul %400, %405, %cst_205 {dimension_numbers = #tpu.dot_dimension_numbers<[1], [0], [0], [1], [0, 0, 1, 1], [], []>} : vector<18x32xf32>, vector<32x16xf32>, vector<18x16xf32> -> vector<18x16xf32>
    %c32 = arith.constant 32 : index
    %c0_206 = arith.constant 0 : index
    %c0_207 = arith.constant 0 : index
    %407 = vector.load %arg2[%c32, %c0_206, %c0_207] : memref<48x32x16xf32, #tpu.memory_space<vmem>>, vector<1x32x16xf32>
    %408 = vector.shape_cast %407 : vector<1x32x16xf32> to vector<32x16xf32>
    %cst_208 = arith.constant dense<0.000000e+00> : vector<18x16xf32>
    %409 = tpu.matmul %400, %408, %cst_208 {dimension_numbers = #tpu.dot_dimension_numbers<[1], [0], [0], [1], [0, 0, 1, 1], [], []>} : vector<18x32xf32>, vector<32x16xf32>, vector<18x16xf32> -> vector<18x16xf32>
    %cst_209 = arith.constant dense<0.000000e+00> : vector<18x18xf32>
    %410 = tpu.matmul %403, %406, %cst_209 {dimension_numbers = #tpu.dot_dimension_numbers<[1], [1], [0], [0], [0, 0, 1, 0], [], []>} : vector<18x16xf32>, vector<18x16xf32>, vector<18x18xf32> -> vector<18x18xf32>
    %411 = arith.addf %410, %4 : vector<18x18xf32>
    %cst_210 = arith.constant dense<0xFF800000> : vector<18xf32>
    %412 = vector.multi_reduction <maximumf>, %411, %cst_210 [1] : vector<18x18xf32> to vector<18xf32>
    %413 = vector.shape_cast %412 : vector<18xf32> to vector<18x1xf32>
    %414 = vector.broadcast %413 : vector<18x1xf32> to vector<18x18xf32>
    %415 = arith.subf %411, %414 : vector<18x18xf32>
    %416 = math.exp %415 : vector<18x18xf32>
    %cst_211 = arith.constant dense<0.000000e+00> : vector<18xf32>
    %417 = vector.multi_reduction <add>, %416, %cst_211 [1] : vector<18x18xf32> to vector<18xf32>
    %418 = vector.shape_cast %417 : vector<18xf32> to vector<18x1xf32>
    %419 = tpu.reciprocal %418 {approx = true} : vector<18x1xf32> -> vector<18x1xf32>
    %cst_212 = arith.constant dense<0.000000e+00> : vector<18x16xf32>
    %420 = tpu.matmul %416, %409, %cst_212 {dimension_numbers = #tpu.dot_dimension_numbers<[1], [0], [0], [1], [0, 0, 1, 1], [], []>} : vector<18x18xf32>, vector<18x16xf32>, vector<18x16xf32> -> vector<18x16xf32>
    %421 = vector.broadcast %419 : vector<18x1xf32> to vector<18x16xf32>
    %422 = arith.mulf %420, %421 : vector<18x16xf32>
    %c8_213 = arith.constant 8 : index
    %c0_214 = arith.constant 0 : index
    %c0_215 = arith.constant 0 : index
    %423 = vector.load %arg3[%c8_213, %c0_214, %c0_215] : memref<16x16x32xf32, #tpu.memory_space<vmem>>, vector<1x16x32xf32>
    %424 = vector.shape_cast %423 : vector<1x16x32xf32> to vector<16x32xf32>
    %cst_216 = arith.constant dense<0.000000e+00> : vector<18x32xf32>
    %425 = tpu.matmul %422, %424, %cst_216 {dimension_numbers = #tpu.dot_dimension_numbers<[1], [0], [0], [1], [0, 0, 1, 1], [], []>} : vector<18x16xf32>, vector<16x32xf32>, vector<18x32xf32> -> vector<18x32xf32>
    %c25 = arith.constant 25 : index
    %c0_217 = arith.constant 0 : index
    %c0_218 = arith.constant 0 : index
    %426 = vector.load %arg2[%c25, %c0_217, %c0_218] : memref<48x32x16xf32, #tpu.memory_space<vmem>>, vector<1x32x16xf32>
    %427 = vector.shape_cast %426 : vector<1x32x16xf32> to vector<32x16xf32>
    %cst_219 = arith.constant dense<0.000000e+00> : vector<18x16xf32>
    %428 = tpu.matmul %400, %427, %cst_219 {dimension_numbers = #tpu.dot_dimension_numbers<[1], [0], [0], [1], [0, 0, 1, 1], [], []>} : vector<18x32xf32>, vector<32x16xf32>, vector<18x16xf32> -> vector<18x16xf32>
    %c29 = arith.constant 29 : index
    %c0_220 = arith.constant 0 : index
    %c0_221 = arith.constant 0 : index
    %429 = vector.load %arg2[%c29, %c0_220, %c0_221] : memref<48x32x16xf32, #tpu.memory_space<vmem>>, vector<1x32x16xf32>
    %430 = vector.shape_cast %429 : vector<1x32x16xf32> to vector<32x16xf32>
    %cst_222 = arith.constant dense<0.000000e+00> : vector<18x16xf32>
    %431 = tpu.matmul %400, %430, %cst_222 {dimension_numbers = #tpu.dot_dimension_numbers<[1], [0], [0], [1], [0, 0, 1, 1], [], []>} : vector<18x32xf32>, vector<32x16xf32>, vector<18x16xf32> -> vector<18x16xf32>
    %c33 = arith.constant 33 : index
    %c0_223 = arith.constant 0 : index
    %c0_224 = arith.constant 0 : index
    %432 = vector.load %arg2[%c33, %c0_223, %c0_224] : memref<48x32x16xf32, #tpu.memory_space<vmem>>, vector<1x32x16xf32>
    %433 = vector.shape_cast %432 : vector<1x32x16xf32> to vector<32x16xf32>
    %cst_225 = arith.constant dense<0.000000e+00> : vector<18x16xf32>
    %434 = tpu.matmul %400, %433, %cst_225 {dimension_numbers = #tpu.dot_dimension_numbers<[1], [0], [0], [1], [0, 0, 1, 1], [], []>} : vector<18x32xf32>, vector<32x16xf32>, vector<18x16xf32> -> vector<18x16xf32>
    %cst_226 = arith.constant dense<0.000000e+00> : vector<18x18xf32>
    %435 = tpu.matmul %428, %431, %cst_226 {dimension_numbers = #tpu.dot_dimension_numbers<[1], [1], [0], [0], [0, 0, 1, 0], [], []>} : vector<18x16xf32>, vector<18x16xf32>, vector<18x18xf32> -> vector<18x18xf32>
    %436 = arith.addf %435, %4 : vector<18x18xf32>
    %cst_227 = arith.constant dense<0xFF800000> : vector<18xf32>
    %437 = vector.multi_reduction <maximumf>, %436, %cst_227 [1] : vector<18x18xf32> to vector<18xf32>
    %438 = vector.shape_cast %437 : vector<18xf32> to vector<18x1xf32>
    %439 = vector.broadcast %438 : vector<18x1xf32> to vector<18x18xf32>
    %440 = arith.subf %436, %439 : vector<18x18xf32>
    %441 = math.exp %440 : vector<18x18xf32>
    %cst_228 = arith.constant dense<0.000000e+00> : vector<18xf32>
    %442 = vector.multi_reduction <add>, %441, %cst_228 [1] : vector<18x18xf32> to vector<18xf32>
    %443 = vector.shape_cast %442 : vector<18xf32> to vector<18x1xf32>
    %444 = tpu.reciprocal %443 {approx = true} : vector<18x1xf32> -> vector<18x1xf32>
    %cst_229 = arith.constant dense<0.000000e+00> : vector<18x16xf32>
    %445 = tpu.matmul %441, %434, %cst_229 {dimension_numbers = #tpu.dot_dimension_numbers<[1], [0], [0], [1], [0, 0, 1, 1], [], []>} : vector<18x18xf32>, vector<18x16xf32>, vector<18x16xf32> -> vector<18x16xf32>
    %446 = vector.broadcast %444 : vector<18x1xf32> to vector<18x16xf32>
    %447 = arith.mulf %445, %446 : vector<18x16xf32>
    %c9_230 = arith.constant 9 : index
    %c0_231 = arith.constant 0 : index
    %c0_232 = arith.constant 0 : index
    %448 = vector.load %arg3[%c9_230, %c0_231, %c0_232] : memref<16x16x32xf32, #tpu.memory_space<vmem>>, vector<1x16x32xf32>
    %449 = vector.shape_cast %448 : vector<1x16x32xf32> to vector<16x32xf32>
    %cst_233 = arith.constant dense<0.000000e+00> : vector<18x32xf32>
    %450 = tpu.matmul %447, %449, %cst_233 {dimension_numbers = #tpu.dot_dimension_numbers<[1], [0], [0], [1], [0, 0, 1, 1], [], []>} : vector<18x16xf32>, vector<16x32xf32>, vector<18x32xf32> -> vector<18x32xf32>
    %451 = arith.addf %425, %450 : vector<18x32xf32>
    %c26 = arith.constant 26 : index
    %c0_234 = arith.constant 0 : index
    %c0_235 = arith.constant 0 : index
    %452 = vector.load %arg2[%c26, %c0_234, %c0_235] : memref<48x32x16xf32, #tpu.memory_space<vmem>>, vector<1x32x16xf32>
    %453 = vector.shape_cast %452 : vector<1x32x16xf32> to vector<32x16xf32>
    %cst_236 = arith.constant dense<0.000000e+00> : vector<18x16xf32>
    %454 = tpu.matmul %400, %453, %cst_236 {dimension_numbers = #tpu.dot_dimension_numbers<[1], [0], [0], [1], [0, 0, 1, 1], [], []>} : vector<18x32xf32>, vector<32x16xf32>, vector<18x16xf32> -> vector<18x16xf32>
    %c30 = arith.constant 30 : index
    %c0_237 = arith.constant 0 : index
    %c0_238 = arith.constant 0 : index
    %455 = vector.load %arg2[%c30, %c0_237, %c0_238] : memref<48x32x16xf32, #tpu.memory_space<vmem>>, vector<1x32x16xf32>
    %456 = vector.shape_cast %455 : vector<1x32x16xf32> to vector<32x16xf32>
    %cst_239 = arith.constant dense<0.000000e+00> : vector<18x16xf32>
    %457 = tpu.matmul %400, %456, %cst_239 {dimension_numbers = #tpu.dot_dimension_numbers<[1], [0], [0], [1], [0, 0, 1, 1], [], []>} : vector<18x32xf32>, vector<32x16xf32>, vector<18x16xf32> -> vector<18x16xf32>
    %c34 = arith.constant 34 : index
    %c0_240 = arith.constant 0 : index
    %c0_241 = arith.constant 0 : index
    %458 = vector.load %arg2[%c34, %c0_240, %c0_241] : memref<48x32x16xf32, #tpu.memory_space<vmem>>, vector<1x32x16xf32>
    %459 = vector.shape_cast %458 : vector<1x32x16xf32> to vector<32x16xf32>
    %cst_242 = arith.constant dense<0.000000e+00> : vector<18x16xf32>
    %460 = tpu.matmul %400, %459, %cst_242 {dimension_numbers = #tpu.dot_dimension_numbers<[1], [0], [0], [1], [0, 0, 1, 1], [], []>} : vector<18x32xf32>, vector<32x16xf32>, vector<18x16xf32> -> vector<18x16xf32>
    %cst_243 = arith.constant dense<0.000000e+00> : vector<18x18xf32>
    %461 = tpu.matmul %454, %457, %cst_243 {dimension_numbers = #tpu.dot_dimension_numbers<[1], [1], [0], [0], [0, 0, 1, 0], [], []>} : vector<18x16xf32>, vector<18x16xf32>, vector<18x18xf32> -> vector<18x18xf32>
    %462 = arith.addf %461, %4 : vector<18x18xf32>
    %cst_244 = arith.constant dense<0xFF800000> : vector<18xf32>
    %463 = vector.multi_reduction <maximumf>, %462, %cst_244 [1] : vector<18x18xf32> to vector<18xf32>
    %464 = vector.shape_cast %463 : vector<18xf32> to vector<18x1xf32>
    %465 = vector.broadcast %464 : vector<18x1xf32> to vector<18x18xf32>
    %466 = arith.subf %462, %465 : vector<18x18xf32>
    %467 = math.exp %466 : vector<18x18xf32>
    %cst_245 = arith.constant dense<0.000000e+00> : vector<18xf32>
    %468 = vector.multi_reduction <add>, %467, %cst_245 [1] : vector<18x18xf32> to vector<18xf32>
    %469 = vector.shape_cast %468 : vector<18xf32> to vector<18x1xf32>
    %470 = tpu.reciprocal %469 {approx = true} : vector<18x1xf32> -> vector<18x1xf32>
    %cst_246 = arith.constant dense<0.000000e+00> : vector<18x16xf32>
    %471 = tpu.matmul %467, %460, %cst_246 {dimension_numbers = #tpu.dot_dimension_numbers<[1], [0], [0], [1], [0, 0, 1, 1], [], []>} : vector<18x18xf32>, vector<18x16xf32>, vector<18x16xf32> -> vector<18x16xf32>
    %472 = vector.broadcast %470 : vector<18x1xf32> to vector<18x16xf32>
    %473 = arith.mulf %471, %472 : vector<18x16xf32>
    %c10_247 = arith.constant 10 : index
    %c0_248 = arith.constant 0 : index
    %c0_249 = arith.constant 0 : index
    %474 = vector.load %arg3[%c10_247, %c0_248, %c0_249] : memref<16x16x32xf32, #tpu.memory_space<vmem>>, vector<1x16x32xf32>
    %475 = vector.shape_cast %474 : vector<1x16x32xf32> to vector<16x32xf32>
    %cst_250 = arith.constant dense<0.000000e+00> : vector<18x32xf32>
    %476 = tpu.matmul %473, %475, %cst_250 {dimension_numbers = #tpu.dot_dimension_numbers<[1], [0], [0], [1], [0, 0, 1, 1], [], []>} : vector<18x16xf32>, vector<16x32xf32>, vector<18x32xf32> -> vector<18x32xf32>
    %477 = arith.addf %451, %476 : vector<18x32xf32>
    %c27 = arith.constant 27 : index
    %c0_251 = arith.constant 0 : index
    %c0_252 = arith.constant 0 : index
    %478 = vector.load %arg2[%c27, %c0_251, %c0_252] : memref<48x32x16xf32, #tpu.memory_space<vmem>>, vector<1x32x16xf32>
    %479 = vector.shape_cast %478 : vector<1x32x16xf32> to vector<32x16xf32>
    %cst_253 = arith.constant dense<0.000000e+00> : vector<18x16xf32>
    %480 = tpu.matmul %400, %479, %cst_253 {dimension_numbers = #tpu.dot_dimension_numbers<[1], [0], [0], [1], [0, 0, 1, 1], [], []>} : vector<18x32xf32>, vector<32x16xf32>, vector<18x16xf32> -> vector<18x16xf32>
    %c31 = arith.constant 31 : index
    %c0_254 = arith.constant 0 : index
    %c0_255 = arith.constant 0 : index
    %481 = vector.load %arg2[%c31, %c0_254, %c0_255] : memref<48x32x16xf32, #tpu.memory_space<vmem>>, vector<1x32x16xf32>
    %482 = vector.shape_cast %481 : vector<1x32x16xf32> to vector<32x16xf32>
    %cst_256 = arith.constant dense<0.000000e+00> : vector<18x16xf32>
    %483 = tpu.matmul %400, %482, %cst_256 {dimension_numbers = #tpu.dot_dimension_numbers<[1], [0], [0], [1], [0, 0, 1, 1], [], []>} : vector<18x32xf32>, vector<32x16xf32>, vector<18x16xf32> -> vector<18x16xf32>
    %c35 = arith.constant 35 : index
    %c0_257 = arith.constant 0 : index
    %c0_258 = arith.constant 0 : index
    %484 = vector.load %arg2[%c35, %c0_257, %c0_258] : memref<48x32x16xf32, #tpu.memory_space<vmem>>, vector<1x32x16xf32>
    %485 = vector.shape_cast %484 : vector<1x32x16xf32> to vector<32x16xf32>
    %cst_259 = arith.constant dense<0.000000e+00> : vector<18x16xf32>
    %486 = tpu.matmul %400, %485, %cst_259 {dimension_numbers = #tpu.dot_dimension_numbers<[1], [0], [0], [1], [0, 0, 1, 1], [], []>} : vector<18x32xf32>, vector<32x16xf32>, vector<18x16xf32> -> vector<18x16xf32>
    %cst_260 = arith.constant dense<0.000000e+00> : vector<18x18xf32>
    %487 = tpu.matmul %480, %483, %cst_260 {dimension_numbers = #tpu.dot_dimension_numbers<[1], [1], [0], [0], [0, 0, 1, 0], [], []>} : vector<18x16xf32>, vector<18x16xf32>, vector<18x18xf32> -> vector<18x18xf32>
    %488 = arith.addf %487, %4 : vector<18x18xf32>
    %cst_261 = arith.constant dense<0xFF800000> : vector<18xf32>
    %489 = vector.multi_reduction <maximumf>, %488, %cst_261 [1] : vector<18x18xf32> to vector<18xf32>
    %490 = vector.shape_cast %489 : vector<18xf32> to vector<18x1xf32>
    %491 = vector.broadcast %490 : vector<18x1xf32> to vector<18x18xf32>
    %492 = arith.subf %488, %491 : vector<18x18xf32>
    %493 = math.exp %492 : vector<18x18xf32>
    %cst_262 = arith.constant dense<0.000000e+00> : vector<18xf32>
    %494 = vector.multi_reduction <add>, %493, %cst_262 [1] : vector<18x18xf32> to vector<18xf32>
    %495 = vector.shape_cast %494 : vector<18xf32> to vector<18x1xf32>
    %496 = tpu.reciprocal %495 {approx = true} : vector<18x1xf32> -> vector<18x1xf32>
    %cst_263 = arith.constant dense<0.000000e+00> : vector<18x16xf32>
    %497 = tpu.matmul %493, %486, %cst_263 {dimension_numbers = #tpu.dot_dimension_numbers<[1], [0], [0], [1], [0, 0, 1, 1], [], []>} : vector<18x18xf32>, vector<18x16xf32>, vector<18x16xf32> -> vector<18x16xf32>
    %498 = vector.broadcast %496 : vector<18x1xf32> to vector<18x16xf32>
    %499 = arith.mulf %497, %498 : vector<18x16xf32>
    %c11_264 = arith.constant 11 : index
    %c0_265 = arith.constant 0 : index
    %c0_266 = arith.constant 0 : index
    %500 = vector.load %arg3[%c11_264, %c0_265, %c0_266] : memref<16x16x32xf32, #tpu.memory_space<vmem>>, vector<1x16x32xf32>
    %501 = vector.shape_cast %500 : vector<1x16x32xf32> to vector<16x32xf32>
    %cst_267 = arith.constant dense<0.000000e+00> : vector<18x32xf32>
    %502 = tpu.matmul %499, %501, %cst_267 {dimension_numbers = #tpu.dot_dimension_numbers<[1], [0], [0], [1], [0, 0, 1, 1], [], []>} : vector<18x16xf32>, vector<16x32xf32>, vector<18x32xf32> -> vector<18x32xf32>
    %503 = arith.addf %477, %502 : vector<18x32xf32>
    %504 = arith.addf %380, %503 : vector<18x32xf32>
    %505 = vector.broadcast %367 : vector<1x32xf32> to vector<18x32xf32>
    %506 = arith.addf %504, %505 : vector<18x32xf32>
    %cst_268 = arith.constant dense<0.000000e+00> : vector<18xf32>
    %507 = vector.multi_reduction <add>, %506, %cst_268 [1] : vector<18x32xf32> to vector<18xf32>
    %508 = vector.shape_cast %507 : vector<18xf32> to vector<18x1xf32>
    %cst_269 = arith.constant 3.200000e+01 : f32
    %509 = vector.broadcast %cst_269 : f32 to vector<18x1xf32>
    %510 = arith.divf %508, %509 : vector<18x1xf32>
    %511 = vector.broadcast %510 : vector<18x1xf32> to vector<18x32xf32>
    %512 = arith.subf %506, %511 : vector<18x32xf32>
    %513 = arith.mulf %512, %512 : vector<18x32xf32>
    %cst_270 = arith.constant dense<0.000000e+00> : vector<18xf32>
    %514 = vector.multi_reduction <add>, %513, %cst_270 [1] : vector<18x32xf32> to vector<18xf32>
    %515 = vector.shape_cast %514 : vector<18xf32> to vector<18x1xf32>
    %cst_271 = arith.constant 3.200000e+01 : f32
    %516 = vector.broadcast %cst_271 : f32 to vector<18x1xf32>
    %517 = arith.divf %515, %516 : vector<18x1xf32>
    %cst_272 = arith.constant 9.99999974E-6 : f32
    %518 = vector.broadcast %cst_272 : f32 to vector<18x1xf32>
    %519 = arith.addf %517, %518 : vector<18x1xf32>
    %520 = math.rsqrt %519 : vector<18x1xf32>
    %521 = vector.broadcast %520 : vector<18x1xf32> to vector<18x32xf32>
    %522 = arith.mulf %512, %521 : vector<18x32xf32>
    %523 = vector.broadcast %368 : vector<1x32xf32> to vector<18x32xf32>
    %524 = arith.mulf %522, %523 : vector<18x32xf32>
    %525 = vector.broadcast %369 : vector<1x32xf32> to vector<18x32xf32>
    %526 = arith.addf %524, %525 : vector<18x32xf32>
    %c2_273 = arith.constant 2 : index
    %c0_274 = arith.constant 0 : index
    %c0_275 = arith.constant 0 : index
    %527 = vector.load %arg4[%c2_273, %c0_274, %c0_275] : memref<4x32x32xf32, #tpu.memory_space<vmem>>, vector<1x32x32xf32>
    %528 = vector.shape_cast %527 : vector<1x32x32xf32> to vector<32x32xf32>
    %cst_276 = arith.constant dense<0.000000e+00> : vector<18x32xf32>
    %529 = tpu.matmul %526, %528, %cst_276 {dimension_numbers = #tpu.dot_dimension_numbers<[1], [0], [0], [1], [0, 0, 1, 1], [], []>} : vector<18x32xf32>, vector<32x32xf32>, vector<18x32xf32> -> vector<18x32xf32>
    %530 = vector.broadcast %371 : vector<1x32xf32> to vector<18x32xf32>
    %531 = arith.addf %529, %530 : vector<18x32xf32>
    %cst_277 = arith.constant 5.000000e-01 : f32
    %532 = vector.broadcast %cst_277 : f32 to vector<18x32xf32>
    %533 = arith.mulf %532, %531 : vector<18x32xf32>
    %cst_278 = arith.constant 4.471500e-02 : f32
    %534 = vector.broadcast %cst_278 : f32 to vector<18x32xf32>
    %535 = arith.mulf %534, %531 : vector<18x32xf32>
    %536 = arith.mulf %535, %531 : vector<18x32xf32>
    %537 = arith.mulf %536, %531 : vector<18x32xf32>
    %538 = arith.addf %531, %537 : vector<18x32xf32>
    %cst_279 = arith.constant 0.797884583 : f32
    %539 = vector.broadcast %cst_279 : f32 to vector<18x32xf32>
    %540 = arith.mulf %539, %538 : vector<18x32xf32>
    %541 = math.tanh %540 : vector<18x32xf32>
    %cst_280 = arith.constant 1.000000e+00 : f32
    %542 = vector.broadcast %cst_280 : f32 to vector<18x32xf32>
    %543 = arith.addf %542, %541 : vector<18x32xf32>
    %544 = arith.mulf %533, %543 : vector<18x32xf32>
    %c2_281 = arith.constant 2 : index
    %c0_282 = arith.constant 0 : index
    %c0_283 = arith.constant 0 : index
    %545 = vector.load %arg5[%c2_281, %c0_282, %c0_283] : memref<4x32x32xf32, #tpu.memory_space<vmem>>, vector<1x32x32xf32>
    %546 = vector.shape_cast %545 : vector<1x32x32xf32> to vector<32x32xf32>
    %cst_284 = arith.constant dense<0.000000e+00> : vector<18x32xf32>
    %547 = tpu.matmul %544, %546, %cst_284 {dimension_numbers = #tpu.dot_dimension_numbers<[1], [0], [0], [1], [0, 0, 1, 1], [], []>} : vector<18x32xf32>, vector<32x32xf32>, vector<18x32xf32> -> vector<18x32xf32>
    %548 = arith.addf %506, %547 : vector<18x32xf32>
    %549 = vector.broadcast %370 : vector<1x32xf32> to vector<18x32xf32>
    %550 = arith.addf %548, %549 : vector<18x32xf32>
    %551 = vector.extract_strided_slice %0 {offsets = [64, 0], sizes = [8, 32], strides = [1, 1]} : vector<128x32xf32> to vector<8x32xf32>
    %552 = vector.extract_strided_slice %551 {offsets = [0, 0], sizes = [1, 32], strides = [1, 1]} : vector<8x32xf32> to vector<1x32xf32>
    %553 = vector.extract_strided_slice %551 {offsets = [1, 0], sizes = [1, 32], strides = [1, 1]} : vector<8x32xf32> to vector<1x32xf32>
    %554 = vector.extract_strided_slice %551 {offsets = [2, 0], sizes = [1, 32], strides = [1, 1]} : vector<8x32xf32> to vector<1x32xf32>
    %555 = vector.extract_strided_slice %551 {offsets = [3, 0], sizes = [1, 32], strides = [1, 1]} : vector<8x32xf32> to vector<1x32xf32>
    %556 = vector.extract_strided_slice %551 {offsets = [4, 0], sizes = [1, 32], strides = [1, 1]} : vector<8x32xf32> to vector<1x32xf32>
    %557 = vector.extract_strided_slice %551 {offsets = [5, 0], sizes = [1, 32], strides = [1, 1]} : vector<8x32xf32> to vector<1x32xf32>
    %558 = vector.extract_strided_slice %551 {offsets = [6, 0], sizes = [1, 32], strides = [1, 1]} : vector<8x32xf32> to vector<1x32xf32>
    %559 = vector.extract_strided_slice %0 {offsets = [104, 0], sizes = [18, 32], strides = [1, 1]} : vector<128x32xf32> to vector<18x32xf32>
    %c2_285 = arith.constant 2 : index
    %c0_286 = arith.constant 0 : index
    %c0_287 = arith.constant 0 : index
    %560 = vector.load %arg6[%c2_285, %c0_286, %c0_287] : memref<5x18x18xf32, #tpu.memory_space<vmem>>, vector<1x18x18xf32>
    %561 = vector.shape_cast %560 : vector<1x18x18xf32> to vector<18x18xf32>
    %cst_288 = arith.constant dense<0.000000e+00> : vector<18x32xf32>
    %562 = tpu.matmul %561, %550, %cst_288 {dimension_numbers = #tpu.dot_dimension_numbers<[1], [0], [0], [1], [0, 0, 1, 1], [], []>} : vector<18x18xf32>, vector<18x32xf32>, vector<18x32xf32> -> vector<18x32xf32>
    %c4_289 = arith.constant 4 : index
    %c0_290 = arith.constant 0 : index
    %c0_291 = arith.constant 0 : index
    %563 = vector.load %arg6[%c4_289, %c0_290, %c0_291] : memref<5x18x18xf32, #tpu.memory_space<vmem>>, vector<1x18x18xf32>
    %564 = vector.shape_cast %563 : vector<1x18x18xf32> to vector<18x18xf32>
    %cst_292 = arith.constant dense<0.000000e+00> : vector<18x32xf32>
    %565 = tpu.matmul %564, %185, %cst_292 {dimension_numbers = #tpu.dot_dimension_numbers<[1], [0], [0], [1], [0, 0, 1, 1], [], []>} : vector<18x18xf32>, vector<18x32xf32>, vector<18x32xf32> -> vector<18x32xf32>
    %566 = arith.addf %562, %565 : vector<18x32xf32>
    %567 = arith.addf %566, %559 : vector<18x32xf32>
    %cst_293 = arith.constant dense<0.000000e+00> : vector<18xf32>
    %568 = vector.multi_reduction <add>, %567, %cst_293 [1] : vector<18x32xf32> to vector<18xf32>
    %569 = vector.shape_cast %568 : vector<18xf32> to vector<18x1xf32>
    %cst_294 = arith.constant 3.200000e+01 : f32
    %570 = vector.broadcast %cst_294 : f32 to vector<18x1xf32>
    %571 = arith.divf %569, %570 : vector<18x1xf32>
    %572 = vector.broadcast %571 : vector<18x1xf32> to vector<18x32xf32>
    %573 = arith.subf %567, %572 : vector<18x32xf32>
    %574 = arith.mulf %573, %573 : vector<18x32xf32>
    %cst_295 = arith.constant dense<0.000000e+00> : vector<18xf32>
    %575 = vector.multi_reduction <add>, %574, %cst_295 [1] : vector<18x32xf32> to vector<18xf32>
    %576 = vector.shape_cast %575 : vector<18xf32> to vector<18x1xf32>
    %cst_296 = arith.constant 3.200000e+01 : f32
    %577 = vector.broadcast %cst_296 : f32 to vector<18x1xf32>
    %578 = arith.divf %576, %577 : vector<18x1xf32>
    %cst_297 = arith.constant 9.99999974E-6 : f32
    %579 = vector.broadcast %cst_297 : f32 to vector<18x1xf32>
    %580 = arith.addf %578, %579 : vector<18x1xf32>
    %581 = math.rsqrt %580 : vector<18x1xf32>
    %582 = vector.broadcast %581 : vector<18x1xf32> to vector<18x32xf32>
    %583 = arith.mulf %573, %582 : vector<18x32xf32>
    %584 = vector.broadcast %552 : vector<1x32xf32> to vector<18x32xf32>
    %585 = arith.mulf %583, %584 : vector<18x32xf32>
    %586 = vector.broadcast %553 : vector<1x32xf32> to vector<18x32xf32>
    %587 = arith.addf %585, %586 : vector<18x32xf32>
    %c36 = arith.constant 36 : index
    %c0_298 = arith.constant 0 : index
    %c0_299 = arith.constant 0 : index
    %588 = vector.load %arg2[%c36, %c0_298, %c0_299] : memref<48x32x16xf32, #tpu.memory_space<vmem>>, vector<1x32x16xf32>
    %589 = vector.shape_cast %588 : vector<1x32x16xf32> to vector<32x16xf32>
    %cst_300 = arith.constant dense<0.000000e+00> : vector<18x16xf32>
    %590 = tpu.matmul %587, %589, %cst_300 {dimension_numbers = #tpu.dot_dimension_numbers<[1], [0], [0], [1], [0, 0, 1, 1], [], []>} : vector<18x32xf32>, vector<32x16xf32>, vector<18x16xf32> -> vector<18x16xf32>
    %c40 = arith.constant 40 : index
    %c0_301 = arith.constant 0 : index
    %c0_302 = arith.constant 0 : index
    %591 = vector.load %arg2[%c40, %c0_301, %c0_302] : memref<48x32x16xf32, #tpu.memory_space<vmem>>, vector<1x32x16xf32>
    %592 = vector.shape_cast %591 : vector<1x32x16xf32> to vector<32x16xf32>
    %cst_303 = arith.constant dense<0.000000e+00> : vector<18x16xf32>
    %593 = tpu.matmul %587, %592, %cst_303 {dimension_numbers = #tpu.dot_dimension_numbers<[1], [0], [0], [1], [0, 0, 1, 1], [], []>} : vector<18x32xf32>, vector<32x16xf32>, vector<18x16xf32> -> vector<18x16xf32>
    %c44 = arith.constant 44 : index
    %c0_304 = arith.constant 0 : index
    %c0_305 = arith.constant 0 : index
    %594 = vector.load %arg2[%c44, %c0_304, %c0_305] : memref<48x32x16xf32, #tpu.memory_space<vmem>>, vector<1x32x16xf32>
    %595 = vector.shape_cast %594 : vector<1x32x16xf32> to vector<32x16xf32>
    %cst_306 = arith.constant dense<0.000000e+00> : vector<18x16xf32>
    %596 = tpu.matmul %587, %595, %cst_306 {dimension_numbers = #tpu.dot_dimension_numbers<[1], [0], [0], [1], [0, 0, 1, 1], [], []>} : vector<18x32xf32>, vector<32x16xf32>, vector<18x16xf32> -> vector<18x16xf32>
    %cst_307 = arith.constant dense<0.000000e+00> : vector<18x18xf32>
    %597 = tpu.matmul %590, %593, %cst_307 {dimension_numbers = #tpu.dot_dimension_numbers<[1], [1], [0], [0], [0, 0, 1, 0], [], []>} : vector<18x16xf32>, vector<18x16xf32>, vector<18x18xf32> -> vector<18x18xf32>
    %598 = arith.addf %597, %4 : vector<18x18xf32>
    %cst_308 = arith.constant dense<0xFF800000> : vector<18xf32>
    %599 = vector.multi_reduction <maximumf>, %598, %cst_308 [1] : vector<18x18xf32> to vector<18xf32>
    %600 = vector.shape_cast %599 : vector<18xf32> to vector<18x1xf32>
    %601 = vector.broadcast %600 : vector<18x1xf32> to vector<18x18xf32>
    %602 = arith.subf %598, %601 : vector<18x18xf32>
    %603 = math.exp %602 : vector<18x18xf32>
    %cst_309 = arith.constant dense<0.000000e+00> : vector<18xf32>
    %604 = vector.multi_reduction <add>, %603, %cst_309 [1] : vector<18x18xf32> to vector<18xf32>
    %605 = vector.shape_cast %604 : vector<18xf32> to vector<18x1xf32>
    %606 = tpu.reciprocal %605 {approx = true} : vector<18x1xf32> -> vector<18x1xf32>
    %cst_310 = arith.constant dense<0.000000e+00> : vector<18x16xf32>
    %607 = tpu.matmul %603, %596, %cst_310 {dimension_numbers = #tpu.dot_dimension_numbers<[1], [0], [0], [1], [0, 0, 1, 1], [], []>} : vector<18x18xf32>, vector<18x16xf32>, vector<18x16xf32> -> vector<18x16xf32>
    %608 = vector.broadcast %606 : vector<18x1xf32> to vector<18x16xf32>
    %609 = arith.mulf %607, %608 : vector<18x16xf32>
    %c12_311 = arith.constant 12 : index
    %c0_312 = arith.constant 0 : index
    %c0_313 = arith.constant 0 : index
    %610 = vector.load %arg3[%c12_311, %c0_312, %c0_313] : memref<16x16x32xf32, #tpu.memory_space<vmem>>, vector<1x16x32xf32>
    %611 = vector.shape_cast %610 : vector<1x16x32xf32> to vector<16x32xf32>
    %cst_314 = arith.constant dense<0.000000e+00> : vector<18x32xf32>
    %612 = tpu.matmul %609, %611, %cst_314 {dimension_numbers = #tpu.dot_dimension_numbers<[1], [0], [0], [1], [0, 0, 1, 1], [], []>} : vector<18x16xf32>, vector<16x32xf32>, vector<18x32xf32> -> vector<18x32xf32>
    %c37 = arith.constant 37 : index
    %c0_315 = arith.constant 0 : index
    %c0_316 = arith.constant 0 : index
    %613 = vector.load %arg2[%c37, %c0_315, %c0_316] : memref<48x32x16xf32, #tpu.memory_space<vmem>>, vector<1x32x16xf32>
    %614 = vector.shape_cast %613 : vector<1x32x16xf32> to vector<32x16xf32>
    %cst_317 = arith.constant dense<0.000000e+00> : vector<18x16xf32>
    %615 = tpu.matmul %587, %614, %cst_317 {dimension_numbers = #tpu.dot_dimension_numbers<[1], [0], [0], [1], [0, 0, 1, 1], [], []>} : vector<18x32xf32>, vector<32x16xf32>, vector<18x16xf32> -> vector<18x16xf32>
    %c41 = arith.constant 41 : index
    %c0_318 = arith.constant 0 : index
    %c0_319 = arith.constant 0 : index
    %616 = vector.load %arg2[%c41, %c0_318, %c0_319] : memref<48x32x16xf32, #tpu.memory_space<vmem>>, vector<1x32x16xf32>
    %617 = vector.shape_cast %616 : vector<1x32x16xf32> to vector<32x16xf32>
    %cst_320 = arith.constant dense<0.000000e+00> : vector<18x16xf32>
    %618 = tpu.matmul %587, %617, %cst_320 {dimension_numbers = #tpu.dot_dimension_numbers<[1], [0], [0], [1], [0, 0, 1, 1], [], []>} : vector<18x32xf32>, vector<32x16xf32>, vector<18x16xf32> -> vector<18x16xf32>
    %c45 = arith.constant 45 : index
    %c0_321 = arith.constant 0 : index
    %c0_322 = arith.constant 0 : index
    %619 = vector.load %arg2[%c45, %c0_321, %c0_322] : memref<48x32x16xf32, #tpu.memory_space<vmem>>, vector<1x32x16xf32>
    %620 = vector.shape_cast %619 : vector<1x32x16xf32> to vector<32x16xf32>
    %cst_323 = arith.constant dense<0.000000e+00> : vector<18x16xf32>
    %621 = tpu.matmul %587, %620, %cst_323 {dimension_numbers = #tpu.dot_dimension_numbers<[1], [0], [0], [1], [0, 0, 1, 1], [], []>} : vector<18x32xf32>, vector<32x16xf32>, vector<18x16xf32> -> vector<18x16xf32>
    %cst_324 = arith.constant dense<0.000000e+00> : vector<18x18xf32>
    %622 = tpu.matmul %615, %618, %cst_324 {dimension_numbers = #tpu.dot_dimension_numbers<[1], [1], [0], [0], [0, 0, 1, 0], [], []>} : vector<18x16xf32>, vector<18x16xf32>, vector<18x18xf32> -> vector<18x18xf32>
    %623 = arith.addf %622, %4 : vector<18x18xf32>
    %cst_325 = arith.constant dense<0xFF800000> : vector<18xf32>
    %624 = vector.multi_reduction <maximumf>, %623, %cst_325 [1] : vector<18x18xf32> to vector<18xf32>
    %625 = vector.shape_cast %624 : vector<18xf32> to vector<18x1xf32>
    %626 = vector.broadcast %625 : vector<18x1xf32> to vector<18x18xf32>
    %627 = arith.subf %623, %626 : vector<18x18xf32>
    %628 = math.exp %627 : vector<18x18xf32>
    %cst_326 = arith.constant dense<0.000000e+00> : vector<18xf32>
    %629 = vector.multi_reduction <add>, %628, %cst_326 [1] : vector<18x18xf32> to vector<18xf32>
    %630 = vector.shape_cast %629 : vector<18xf32> to vector<18x1xf32>
    %631 = tpu.reciprocal %630 {approx = true} : vector<18x1xf32> -> vector<18x1xf32>
    %cst_327 = arith.constant dense<0.000000e+00> : vector<18x16xf32>
    %632 = tpu.matmul %628, %621, %cst_327 {dimension_numbers = #tpu.dot_dimension_numbers<[1], [0], [0], [1], [0, 0, 1, 1], [], []>} : vector<18x18xf32>, vector<18x16xf32>, vector<18x16xf32> -> vector<18x16xf32>
    %633 = vector.broadcast %631 : vector<18x1xf32> to vector<18x16xf32>
    %634 = arith.mulf %632, %633 : vector<18x16xf32>
    %c13_328 = arith.constant 13 : index
    %c0_329 = arith.constant 0 : index
    %c0_330 = arith.constant 0 : index
    %635 = vector.load %arg3[%c13_328, %c0_329, %c0_330] : memref<16x16x32xf32, #tpu.memory_space<vmem>>, vector<1x16x32xf32>
    %636 = vector.shape_cast %635 : vector<1x16x32xf32> to vector<16x32xf32>
    %cst_331 = arith.constant dense<0.000000e+00> : vector<18x32xf32>
    %637 = tpu.matmul %634, %636, %cst_331 {dimension_numbers = #tpu.dot_dimension_numbers<[1], [0], [0], [1], [0, 0, 1, 1], [], []>} : vector<18x16xf32>, vector<16x32xf32>, vector<18x32xf32> -> vector<18x32xf32>
    %638 = arith.addf %612, %637 : vector<18x32xf32>
    %c38 = arith.constant 38 : index
    %c0_332 = arith.constant 0 : index
    %c0_333 = arith.constant 0 : index
    %639 = vector.load %arg2[%c38, %c0_332, %c0_333] : memref<48x32x16xf32, #tpu.memory_space<vmem>>, vector<1x32x16xf32>
    %640 = vector.shape_cast %639 : vector<1x32x16xf32> to vector<32x16xf32>
    %cst_334 = arith.constant dense<0.000000e+00> : vector<18x16xf32>
    %641 = tpu.matmul %587, %640, %cst_334 {dimension_numbers = #tpu.dot_dimension_numbers<[1], [0], [0], [1], [0, 0, 1, 1], [], []>} : vector<18x32xf32>, vector<32x16xf32>, vector<18x16xf32> -> vector<18x16xf32>
    %c42 = arith.constant 42 : index
    %c0_335 = arith.constant 0 : index
    %c0_336 = arith.constant 0 : index
    %642 = vector.load %arg2[%c42, %c0_335, %c0_336] : memref<48x32x16xf32, #tpu.memory_space<vmem>>, vector<1x32x16xf32>
    %643 = vector.shape_cast %642 : vector<1x32x16xf32> to vector<32x16xf32>
    %cst_337 = arith.constant dense<0.000000e+00> : vector<18x16xf32>
    %644 = tpu.matmul %587, %643, %cst_337 {dimension_numbers = #tpu.dot_dimension_numbers<[1], [0], [0], [1], [0, 0, 1, 1], [], []>} : vector<18x32xf32>, vector<32x16xf32>, vector<18x16xf32> -> vector<18x16xf32>
    %c46 = arith.constant 46 : index
    %c0_338 = arith.constant 0 : index
    %c0_339 = arith.constant 0 : index
    %645 = vector.load %arg2[%c46, %c0_338, %c0_339] : memref<48x32x16xf32, #tpu.memory_space<vmem>>, vector<1x32x16xf32>
    %646 = vector.shape_cast %645 : vector<1x32x16xf32> to vector<32x16xf32>
    %cst_340 = arith.constant dense<0.000000e+00> : vector<18x16xf32>
    %647 = tpu.matmul %587, %646, %cst_340 {dimension_numbers = #tpu.dot_dimension_numbers<[1], [0], [0], [1], [0, 0, 1, 1], [], []>} : vector<18x32xf32>, vector<32x16xf32>, vector<18x16xf32> -> vector<18x16xf32>
    %cst_341 = arith.constant dense<0.000000e+00> : vector<18x18xf32>
    %648 = tpu.matmul %641, %644, %cst_341 {dimension_numbers = #tpu.dot_dimension_numbers<[1], [1], [0], [0], [0, 0, 1, 0], [], []>} : vector<18x16xf32>, vector<18x16xf32>, vector<18x18xf32> -> vector<18x18xf32>
    %649 = arith.addf %648, %4 : vector<18x18xf32>
    %cst_342 = arith.constant dense<0xFF800000> : vector<18xf32>
    %650 = vector.multi_reduction <maximumf>, %649, %cst_342 [1] : vector<18x18xf32> to vector<18xf32>
    %651 = vector.shape_cast %650 : vector<18xf32> to vector<18x1xf32>
    %652 = vector.broadcast %651 : vector<18x1xf32> to vector<18x18xf32>
    %653 = arith.subf %649, %652 : vector<18x18xf32>
    %654 = math.exp %653 : vector<18x18xf32>
    %cst_343 = arith.constant dense<0.000000e+00> : vector<18xf32>
    %655 = vector.multi_reduction <add>, %654, %cst_343 [1] : vector<18x18xf32> to vector<18xf32>
    %656 = vector.shape_cast %655 : vector<18xf32> to vector<18x1xf32>
    %657 = tpu.reciprocal %656 {approx = true} : vector<18x1xf32> -> vector<18x1xf32>
    %cst_344 = arith.constant dense<0.000000e+00> : vector<18x16xf32>
    %658 = tpu.matmul %654, %647, %cst_344 {dimension_numbers = #tpu.dot_dimension_numbers<[1], [0], [0], [1], [0, 0, 1, 1], [], []>} : vector<18x18xf32>, vector<18x16xf32>, vector<18x16xf32> -> vector<18x16xf32>
    %659 = vector.broadcast %657 : vector<18x1xf32> to vector<18x16xf32>
    %660 = arith.mulf %658, %659 : vector<18x16xf32>
    %c14_345 = arith.constant 14 : index
    %c0_346 = arith.constant 0 : index
    %c0_347 = arith.constant 0 : index
    %661 = vector.load %arg3[%c14_345, %c0_346, %c0_347] : memref<16x16x32xf32, #tpu.memory_space<vmem>>, vector<1x16x32xf32>
    %662 = vector.shape_cast %661 : vector<1x16x32xf32> to vector<16x32xf32>
    %cst_348 = arith.constant dense<0.000000e+00> : vector<18x32xf32>
    %663 = tpu.matmul %660, %662, %cst_348 {dimension_numbers = #tpu.dot_dimension_numbers<[1], [0], [0], [1], [0, 0, 1, 1], [], []>} : vector<18x16xf32>, vector<16x32xf32>, vector<18x32xf32> -> vector<18x32xf32>
    %664 = arith.addf %638, %663 : vector<18x32xf32>
    %c39 = arith.constant 39 : index
    %c0_349 = arith.constant 0 : index
    %c0_350 = arith.constant 0 : index
    %665 = vector.load %arg2[%c39, %c0_349, %c0_350] : memref<48x32x16xf32, #tpu.memory_space<vmem>>, vector<1x32x16xf32>
    %666 = vector.shape_cast %665 : vector<1x32x16xf32> to vector<32x16xf32>
    %cst_351 = arith.constant dense<0.000000e+00> : vector<18x16xf32>
    %667 = tpu.matmul %587, %666, %cst_351 {dimension_numbers = #tpu.dot_dimension_numbers<[1], [0], [0], [1], [0, 0, 1, 1], [], []>} : vector<18x32xf32>, vector<32x16xf32>, vector<18x16xf32> -> vector<18x16xf32>
    %c43 = arith.constant 43 : index
    %c0_352 = arith.constant 0 : index
    %c0_353 = arith.constant 0 : index
    %668 = vector.load %arg2[%c43, %c0_352, %c0_353] : memref<48x32x16xf32, #tpu.memory_space<vmem>>, vector<1x32x16xf32>
    %669 = vector.shape_cast %668 : vector<1x32x16xf32> to vector<32x16xf32>
    %cst_354 = arith.constant dense<0.000000e+00> : vector<18x16xf32>
    %670 = tpu.matmul %587, %669, %cst_354 {dimension_numbers = #tpu.dot_dimension_numbers<[1], [0], [0], [1], [0, 0, 1, 1], [], []>} : vector<18x32xf32>, vector<32x16xf32>, vector<18x16xf32> -> vector<18x16xf32>
    %c47 = arith.constant 47 : index
    %c0_355 = arith.constant 0 : index
    %c0_356 = arith.constant 0 : index
    %671 = vector.load %arg2[%c47, %c0_355, %c0_356] : memref<48x32x16xf32, #tpu.memory_space<vmem>>, vector<1x32x16xf32>
    %672 = vector.shape_cast %671 : vector<1x32x16xf32> to vector<32x16xf32>
    %cst_357 = arith.constant dense<0.000000e+00> : vector<18x16xf32>
    %673 = tpu.matmul %587, %672, %cst_357 {dimension_numbers = #tpu.dot_dimension_numbers<[1], [0], [0], [1], [0, 0, 1, 1], [], []>} : vector<18x32xf32>, vector<32x16xf32>, vector<18x16xf32> -> vector<18x16xf32>
    %cst_358 = arith.constant dense<0.000000e+00> : vector<18x18xf32>
    %674 = tpu.matmul %667, %670, %cst_358 {dimension_numbers = #tpu.dot_dimension_numbers<[1], [1], [0], [0], [0, 0, 1, 0], [], []>} : vector<18x16xf32>, vector<18x16xf32>, vector<18x18xf32> -> vector<18x18xf32>
    %675 = arith.addf %674, %4 : vector<18x18xf32>
    %cst_359 = arith.constant dense<0xFF800000> : vector<18xf32>
    %676 = vector.multi_reduction <maximumf>, %675, %cst_359 [1] : vector<18x18xf32> to vector<18xf32>
    %677 = vector.shape_cast %676 : vector<18xf32> to vector<18x1xf32>
    %678 = vector.broadcast %677 : vector<18x1xf32> to vector<18x18xf32>
    %679 = arith.subf %675, %678 : vector<18x18xf32>
    %680 = math.exp %679 : vector<18x18xf32>
    %cst_360 = arith.constant dense<0.000000e+00> : vector<18xf32>
    %681 = vector.multi_reduction <add>, %680, %cst_360 [1] : vector<18x18xf32> to vector<18xf32>
    %682 = vector.shape_cast %681 : vector<18xf32> to vector<18x1xf32>
    %683 = tpu.reciprocal %682 {approx = true} : vector<18x1xf32> -> vector<18x1xf32>
    %cst_361 = arith.constant dense<0.000000e+00> : vector<18x16xf32>
    %684 = tpu.matmul %680, %673, %cst_361 {dimension_numbers = #tpu.dot_dimension_numbers<[1], [0], [0], [1], [0, 0, 1, 1], [], []>} : vector<18x18xf32>, vector<18x16xf32>, vector<18x16xf32> -> vector<18x16xf32>
    %685 = vector.broadcast %683 : vector<18x1xf32> to vector<18x16xf32>
    %686 = arith.mulf %684, %685 : vector<18x16xf32>
    %c15_362 = arith.constant 15 : index
    %c0_363 = arith.constant 0 : index
    %c0_364 = arith.constant 0 : index
    %687 = vector.load %arg3[%c15_362, %c0_363, %c0_364] : memref<16x16x32xf32, #tpu.memory_space<vmem>>, vector<1x16x32xf32>
    %688 = vector.shape_cast %687 : vector<1x16x32xf32> to vector<16x32xf32>
    %cst_365 = arith.constant dense<0.000000e+00> : vector<18x32xf32>
    %689 = tpu.matmul %686, %688, %cst_365 {dimension_numbers = #tpu.dot_dimension_numbers<[1], [0], [0], [1], [0, 0, 1, 1], [], []>} : vector<18x16xf32>, vector<16x32xf32>, vector<18x32xf32> -> vector<18x32xf32>
    %690 = arith.addf %664, %689 : vector<18x32xf32>
    %691 = arith.addf %567, %690 : vector<18x32xf32>
    %692 = vector.broadcast %554 : vector<1x32xf32> to vector<18x32xf32>
    %693 = arith.addf %691, %692 : vector<18x32xf32>
    %cst_366 = arith.constant dense<0.000000e+00> : vector<18xf32>
    %694 = vector.multi_reduction <add>, %693, %cst_366 [1] : vector<18x32xf32> to vector<18xf32>
    %695 = vector.shape_cast %694 : vector<18xf32> to vector<18x1xf32>
    %cst_367 = arith.constant 3.200000e+01 : f32
    %696 = vector.broadcast %cst_367 : f32 to vector<18x1xf32>
    %697 = arith.divf %695, %696 : vector<18x1xf32>
    %698 = vector.broadcast %697 : vector<18x1xf32> to vector<18x32xf32>
    %699 = arith.subf %693, %698 : vector<18x32xf32>
    %700 = arith.mulf %699, %699 : vector<18x32xf32>
    %cst_368 = arith.constant dense<0.000000e+00> : vector<18xf32>
    %701 = vector.multi_reduction <add>, %700, %cst_368 [1] : vector<18x32xf32> to vector<18xf32>
    %702 = vector.shape_cast %701 : vector<18xf32> to vector<18x1xf32>
    %cst_369 = arith.constant 3.200000e+01 : f32
    %703 = vector.broadcast %cst_369 : f32 to vector<18x1xf32>
    %704 = arith.divf %702, %703 : vector<18x1xf32>
    %cst_370 = arith.constant 9.99999974E-6 : f32
    %705 = vector.broadcast %cst_370 : f32 to vector<18x1xf32>
    %706 = arith.addf %704, %705 : vector<18x1xf32>
    %707 = math.rsqrt %706 : vector<18x1xf32>
    %708 = vector.broadcast %707 : vector<18x1xf32> to vector<18x32xf32>
    %709 = arith.mulf %699, %708 : vector<18x32xf32>
    %710 = vector.broadcast %555 : vector<1x32xf32> to vector<18x32xf32>
    %711 = arith.mulf %709, %710 : vector<18x32xf32>
    %712 = vector.broadcast %556 : vector<1x32xf32> to vector<18x32xf32>
    %713 = arith.addf %711, %712 : vector<18x32xf32>
    %c3_371 = arith.constant 3 : index
    %c0_372 = arith.constant 0 : index
    %c0_373 = arith.constant 0 : index
    %714 = vector.load %arg4[%c3_371, %c0_372, %c0_373] : memref<4x32x32xf32, #tpu.memory_space<vmem>>, vector<1x32x32xf32>
    %715 = vector.shape_cast %714 : vector<1x32x32xf32> to vector<32x32xf32>
    %cst_374 = arith.constant dense<0.000000e+00> : vector<18x32xf32>
    %716 = tpu.matmul %713, %715, %cst_374 {dimension_numbers = #tpu.dot_dimension_numbers<[1], [0], [0], [1], [0, 0, 1, 1], [], []>} : vector<18x32xf32>, vector<32x32xf32>, vector<18x32xf32> -> vector<18x32xf32>
    %717 = vector.broadcast %558 : vector<1x32xf32> to vector<18x32xf32>
    %718 = arith.addf %716, %717 : vector<18x32xf32>
    %cst_375 = arith.constant 5.000000e-01 : f32
    %719 = vector.broadcast %cst_375 : f32 to vector<18x32xf32>
    %720 = arith.mulf %719, %718 : vector<18x32xf32>
    %cst_376 = arith.constant 4.471500e-02 : f32
    %721 = vector.broadcast %cst_376 : f32 to vector<18x32xf32>
    %722 = arith.mulf %721, %718 : vector<18x32xf32>
    %723 = arith.mulf %722, %718 : vector<18x32xf32>
    %724 = arith.mulf %723, %718 : vector<18x32xf32>
    %725 = arith.addf %718, %724 : vector<18x32xf32>
    %cst_377 = arith.constant 0.797884583 : f32
    %726 = vector.broadcast %cst_377 : f32 to vector<18x32xf32>
    %727 = arith.mulf %726, %725 : vector<18x32xf32>
    %728 = math.tanh %727 : vector<18x32xf32>
    %cst_378 = arith.constant 1.000000e+00 : f32
    %729 = vector.broadcast %cst_378 : f32 to vector<18x32xf32>
    %730 = arith.addf %729, %728 : vector<18x32xf32>
    %731 = arith.mulf %720, %730 : vector<18x32xf32>
    %c3_379 = arith.constant 3 : index
    %c0_380 = arith.constant 0 : index
    %c0_381 = arith.constant 0 : index
    %732 = vector.load %arg5[%c3_379, %c0_380, %c0_381] : memref<4x32x32xf32, #tpu.memory_space<vmem>>, vector<1x32x32xf32>
    %733 = vector.shape_cast %732 : vector<1x32x32xf32> to vector<32x32xf32>
    %cst_382 = arith.constant dense<0.000000e+00> : vector<18x32xf32>
    %734 = tpu.matmul %731, %733, %cst_382 {dimension_numbers = #tpu.dot_dimension_numbers<[1], [0], [0], [1], [0, 0, 1, 1], [], []>} : vector<18x32xf32>, vector<32x32xf32>, vector<18x32xf32> -> vector<18x32xf32>
    %735 = arith.addf %693, %734 : vector<18x32xf32>
    %736 = vector.broadcast %557 : vector<1x32xf32> to vector<18x32xf32>
    %737 = arith.addf %735, %736 : vector<18x32xf32>
    %738 = vector.extract_strided_slice %0 {offsets = [72, 0], sizes = [5, 32], strides = [1, 1]} : vector<128x32xf32> to vector<5x32xf32>
    %739 = vector.extract_strided_slice %0 {offsets = [77, 0], sizes = [1, 32], strides = [1, 1]} : vector<128x32xf32> to vector<1x32xf32>
    %740 = vector.extract_strided_slice %0 {offsets = [78, 0], sizes = [1, 32], strides = [1, 1]} : vector<128x32xf32> to vector<1x32xf32>
    %741 = vector.extract_strided_slice %0 {offsets = [79, 0], sizes = [1, 5], strides = [1, 1]} : vector<128x32xf32> to vector<1x5xf32>
    %cst_383 = arith.constant dense<0.000000e+00> : vector<18xf32>
    %742 = vector.multi_reduction <add>, %737, %cst_383 [1] : vector<18x32xf32> to vector<18xf32>
    %743 = vector.shape_cast %742 : vector<18xf32> to vector<18x1xf32>
    %cst_384 = arith.constant 3.200000e+01 : f32
    %744 = vector.broadcast %cst_384 : f32 to vector<18x1xf32>
    %745 = arith.divf %743, %744 : vector<18x1xf32>
    %746 = vector.broadcast %745 : vector<18x1xf32> to vector<18x32xf32>
    %747 = arith.subf %737, %746 : vector<18x32xf32>
    %748 = arith.mulf %747, %747 : vector<18x32xf32>
    %cst_385 = arith.constant dense<0.000000e+00> : vector<18xf32>
    %749 = vector.multi_reduction <add>, %748, %cst_385 [1] : vector<18x32xf32> to vector<18xf32>
    %750 = vector.shape_cast %749 : vector<18xf32> to vector<18x1xf32>
    %cst_386 = arith.constant 3.200000e+01 : f32
    %751 = vector.broadcast %cst_386 : f32 to vector<18x1xf32>
    %752 = arith.divf %750, %751 : vector<18x1xf32>
    %cst_387 = arith.constant 9.99999974E-6 : f32
    %753 = vector.broadcast %cst_387 : f32 to vector<18x1xf32>
    %754 = arith.addf %752, %753 : vector<18x1xf32>
    %755 = math.rsqrt %754 : vector<18x1xf32>
    %756 = vector.broadcast %755 : vector<18x1xf32> to vector<18x32xf32>
    %757 = arith.mulf %747, %756 : vector<18x32xf32>
    %758 = vector.broadcast %739 : vector<1x32xf32> to vector<18x32xf32>
    %759 = arith.mulf %757, %758 : vector<18x32xf32>
    %760 = vector.broadcast %740 : vector<1x32xf32> to vector<18x32xf32>
    %761 = arith.addf %759, %760 : vector<18x32xf32>
    %cst_388 = arith.constant dense<0.000000e+00> : vector<18x5xf32>
    %762 = tpu.matmul %761, %738, %cst_388 {dimension_numbers = #tpu.dot_dimension_numbers<[1], [1], [0], [0], [0, 0, 1, 0], [], []>} : vector<18x32xf32>, vector<5x32xf32>, vector<18x5xf32> -> vector<18x5xf32>
    %763 = vector.broadcast %741 : vector<1x5xf32> to vector<18x5xf32>
    %764 = arith.addf %762, %763 : vector<18x5xf32>
    %c0_389 = arith.constant 0 : index
    %c0_390 = arith.constant 0 : index
    %765 = vector.load %arg8[%c0_389, %c0_390] : memref<18x5xf32, #tpu.memory_space<vmem>>, vector<18x5xf32>
    tpu.vector_store %arg8[%c0_389, %c0_390], %764 {strides = array<i32>} : memref<18x5xf32, #tpu.memory_space<vmem>>, vector<18x5xf32>,
    return
  }
  func.func @transform_0(%arg0: i32) -> (i32, i32) {
    %c0_i32 = arith.constant 0 : i32
    %c0_i32_0 = arith.constant 0 : i32
    return %arg0, %c0_i32 : i32, i32
  }
  func.func @transform_1(%arg0: i32) -> (i32, i32, i32) {
    %c0_i32 = arith.constant 0 : i32
    %c0_i32_0 = arith.constant 0 : i32
    %c0_i32_1 = arith.constant 0 : i32
    %c0_i32_2 = arith.constant 0 : i32
    return %c0_i32, %c0_i32_0, %c0_i32_1 : i32, i32, i32
  }
  func.func @transform_2(%arg0: i32) -> (i32, i32, i32) {
    %c0_i32 = arith.constant 0 : i32
    %c0_i32_0 = arith.constant 0 : i32
    %c0_i32_1 = arith.constant 0 : i32
    %c0_i32_2 = arith.constant 0 : i32
    return %c0_i32, %c0_i32_0, %c0_i32_1 : i32, i32, i32
  }
  func.func @transform_3(%arg0: i32) -> (i32, i32, i32) {
    %c0_i32 = arith.constant 0 : i32
    %c0_i32_0 = arith.constant 0 : i32
    %c0_i32_1 = arith.constant 0 : i32
    %c0_i32_2 = arith.constant 0 : i32
    return %c0_i32, %c0_i32_0, %c0_i32_1 : i32, i32, i32
  }
  func.func @transform_4(%arg0: i32) -> (i32, i32, i32) {
    %c0_i32 = arith.constant 0 : i32
    %c0_i32_0 = arith.constant 0 : i32
    %c0_i32_1 = arith.constant 0 : i32
    %c0_i32_2 = arith.constant 0 : i32
    return %c0_i32, %c0_i32_0, %c0_i32_1 : i32, i32, i32
  }
  func.func @transform_5(%arg0: i32) -> (i32, i32, i32) {
    %c0_i32 = arith.constant 0 : i32
    %c0_i32_0 = arith.constant 0 : i32
    %c0_i32_1 = arith.constant 0 : i32
    %c0_i32_2 = arith.constant 0 : i32
    return %c0_i32, %c0_i32_0, %c0_i32_1 : i32, i32, i32
  }
  func.func @transform_6(%arg0: i32) -> (i32, i32) {
    %c0_i32 = arith.constant 0 : i32
    %c0_i32_0 = arith.constant 0 : i32
    %c0_i32_1 = arith.constant 0 : i32
    return %c0_i32, %c0_i32_0 : i32, i32
  }
  func.func @transform_7(%arg0: i32) -> (i32, i32) {
    %c0_i32 = arith.constant 0 : i32
    %c0_i32_0 = arith.constant 0 : i32
    return %arg0, %c0_i32 : i32, i32
  }
}

</mosaic_0001>

<bundles_post_ra>
// kernel: vit_forward.1
= control target key start
LH: loop header
LB: loop body
LE: loop exit
PB: predicated region body
PF: predicated region fallthrough
CT: control target
= control target key end

     0   :  { %v15119_v0 = vmov 0.0|0.0   ;;  %vm15120_vm0 = vmmov 0   ;;  %v15121_v3 = vmov 0.0   ;;  %vm48_vm1 = vcmask 130048   ;;  %s18094_s6 = inlined_call_operand.vmem [shape: f32[128,32], index: 6, kind: input, shape index: {}]   ;;  %s18095_s0 = inlined_call_operand.vmem [shape: f32[18,16], index: 0, kind: input, shape index: {}]   ;;  %s18096_s1 = inlined_call_operand.vmem [shape: f32[48,32,16], index: 1, kind: input, shape index: {}]   ;;  %s18097_s5 = inlined_call_operand.vmem [shape: f32[5,18,18], index: 5, kind: input, shape index: {}]   ;;  %s18098_s2 = inlined_call_operand.vmem [shape: f32[16,16,32], index: 2, kind: input, shape index: {}]   ;;  %s18099_s3 = inlined_call_operand.vmem [shape: f32[4,32,32], index: 3, kind: input, shape index: {}]   ;;  %s18100_s4 = inlined_call_operand.vmem [shape: f32[4,32,32], index: 4, kind: input, shape index: {}]   ;;  %s18101_s7 = inlined_call_operand.vmem [shape: f32[18,5], index: 7, kind: output, shape index: {}]  }
   0x1   :  { %14322 = vmatprep.subr.bf16.mxu0 %v15119_v0  ;;  %v29_v1 = vld [vmem:[%s18094_s6 + $0x18] sm:$0xff]  ;;  %v30_v2 = vld [vmem:[%s18094_s6 + $0x20] sm:$0xff]  ;;  %12602 = vmatprep.mubr.msk.f32.mxu0 %vm15120_vm0, %v15121_v3  ;;  %v46_v6 = vld [vmem:[%s18095_s0 + $0x8] sm:$0xff]  ;;  %vm138_vm2 = vcmask 261120   ;;  %vm145_vm3 = vcmask 254976   ;;  %v180_v52 = vlaneseq  ;;  %vm596_vm5 = vcmask 1041408  }
   0x2   :  { %v14323_v4 = vpack.c.bf16 %v30_v2, %v29_v1  ;;  %14325 = vmatprep.subr.bf16.mxu1 %v15119_v0  ;;  %12619 = vmatprep.mubr.msk.f32.mxu1 %vm15120_vm0, %v15121_v3  ;;  %v45_v5 = vld [vmem:[%s18095_s0] sm:$0xff]  ;;  %v47_v7 = vld [vmem:[%s18095_s0 + $0x10] sm:$0x3]  ;;  %v27_v12 = vld [vmem:[%s18094_s6 + $0x8] sm:$0xff]  ;;  %vm555_vm6 = vcmask 146432   ;;  %vm562_vm7 = vcmask 140288  }
   0x3   :  { %v26_v8 = vld [vmem:[%s18094_s6] sm:$0xff]  ;;  %v28_v17 = vld [vmem:[%s18094_s6 + $0x10] sm:$0xff]  ;;  %v195_v39 = vld [vmem:[%s18096_s1 + $0x8] sm:$0xff]  ;;  %v15252_v56 = vshrl.u32 %v180_v52, 7  ;;  %vm11239_vm8 = vcmask 39936   ;;  %vm11242_vm9 = vcmask 33792  }
   0x4   :  { %14324 = vmatpush3.bf16.msra.mxu0 %v14323_v4  ;;  %v194_v38 = vld [vmem:[%s18096_s1] sm:$0xff]  ;;  %v11255_v42 = vld [vmem:[%s18096_s1 + $0x88] sm:$0xff]  ;;  %v196_v44 = vld [vmem:[%s18096_s1 + $0x10] sm:$0xff] }
   0x5   :  { %14331 = vmatprep.subr.bf16.mxu0 %v15119_v0  ;;  %v11254_v40 = vld [vmem:[%s18096_s1 + $0x80] sm:$0xff]  ;;  %v14326_v41 = vpack.c.bf16 %v195_v39, %v194_v38  ;;  %v197_v45 = vld [vmem:[%s18096_s1 + $0x18] sm:$0xff]  ;;  %v11256_v46 = vld [vmem:[%s18096_s1 + $0x90] sm:$0xff]  ;;  %v15255_v60 = vsub.s32 0, %v15252_v56  ;;  %v15261_v63 = vsub.s32 1, %v15252_v56 }
   0x6   :  { %v14332_v43 = vpack.c.bf16 %v11255_v42, %v11254_v40  ;;  %v14329_v47 = vpack.c.bf16 %v197_v45, %v196_v44  ;;  %v11257_v48 = vld [vmem:[%s18096_s1 + $0x98] sm:$0xff]  ;;  %v31_v61 = vld [vmem:[%s18094_s6 + $0x28] sm:$0xff]  ;;  %vm15324_vm4 = vmpackc.low %vm48_vm1, %vm48_vm1 }
   0x7   :  { %12603 = vmatmul.mubr.msk.f32.vlgmr.msra.gmra.mrb[0].mxu0 %vm48_vm1, %v45_v5  ;;  %14327 = vmatpush3.bf16.msra.mxu1 %v14326_v41  ;;  %v14335_v49 = vpack.c.bf16 %v11257_v48, %v11256_v46  ;;  %v183_v1 = vrot.slane %v31_v61, %v15255_v60  ;;  %v190_v4 = vrot.slane %v31_v61, %v15261_v63  ;;  %v11278_v41 = vld [vmem:[%s18096_s1 + $0x20] sm:$0xff]  ;;  %v11279_v42 = vld [vmem:[%s18096_s1 + $0x28] sm:$0xff]  ;;  %v11281_v48 = vld [vmem:[%s18096_s1 + $0x38] sm:$0xff] }
   0x8   :  { %12605 = vmatprep.mubr.msk.f32.mxu0 %vm15120_vm0, %v15121_v3  ;;  %14333 = vmatpush3.bf16.msra.mxu0 %v14332_v43  ;;  %v14351_v44 = vpack.c.bf16 %v11279_v42, %v11278_v41  ;;  %v11292_v52 = vld [vmem:[%s18096_s1 + $0x120] sm:$0xff] }
   0x9   :  { %14328 = vmatprep.subr.bf16.mxu1 %v15119_v0  ;;  %14334 = vmatprep.subr.bf16.mxu0 %v15119_v0  ;;  %v11285_v42 = vld [vmem:[%s18096_s1 + $0xa0] sm:$0xff] }
   0xb   :  { %12606 = vmatmul.mubr.msk.f32.gmra.mrb[2].mxu0 %vm48_vm1, %v46_v6  ;;  %14330 = vmatpush3.bf16.msra.mxu1 %v14329_v47  ;;  %v11261_v6 = vld [vmem:[%s18096_s1 + $0x100] sm:$0xff]  ;;  %v11280_v47 = vld [vmem:[%s18096_s1 + $0x30] sm:$0xff] }
   0xc   :  { %12608 = vmatprep.mubr.msk.f32.mxu0 %vm15120_vm0, %v15121_v3  ;;  %14336 = vmatpush3.bf16.msra.mxu0 %v14335_v49 }
   0xd   :  { %14337 = vmatprep.subr.bf16.mxu1 %v15119_v0  ;;  %14343 = vmatprep.subr.bf16.mxu0 %v15119_v0 }
   0xf   :  { %12609 = vmatmul.mubr.msk.f32.gmra.mrb[4].mxu0 %vm48_vm1, %v47_v7  ;;  %v11262_v7 = vld [vmem:[%s18096_s1 + $0x108] sm:$0xff] }
  0x10   :  { %12636 = vmatprep.mubr.msk.f32.mxu0 %vm15120_vm0, %v15121_v3 }
  0xda   :  { %v124_v9 = vpop.f32.mrb[0].mxu0 }
  0xdb   :  { %v15196_v10 = vadd.f32 %v124_v9, %v26_v8  ;;  %v12604_v11 = vpop.f32.mrb[1].mxu0 }
  0xdd   :  { %v139_v13 = vsel %vm138_vm2, %v15196_v10, 0.0 }
  0xde   :  { %140 = vadd.xlane.f32.xlu0 %v139_v13  ;;  %v129_v14 = vpop.f32.mrb[2].mxu0  ;;  %v14338_v13 = vpack.c.bf16 %v11262_v7, %v11261_v6 }
  0xdf   :  { %v15203_v15 = vadd.f32 %v129_v14, %v27_v12  ;;  %v12607_v16 = vpop.f32.mrb[3].mxu0  ;;  %v11263_v14 = vld [vmem:[%s18096_s1 + $0x110] sm:$0xff] }
  0xe0   :  { %v11264_v16 = vld [vmem:[%s18096_s1 + $0x118] sm:$0xff] }
  0xe1   :  { %v142_v18 = vsel %vm138_vm2, %v15203_v15, 0.0 }
  0xe2   :  { %143 = vadd.xlane.f32.xlu0 %v142_v18  ;;  %v134_v19 = vpop.f32.mrb[4].mxu0 }
  0xe3   :  { %v15210_v20 = vadd.f32 %v134_v19, %v28_v17  ;;  %v12610_v21 = vpop.f32.mrb[5].mxu0 }
  0xe5   :  { %v146_v22 = vsel %vm145_vm3, %v15210_v20, 0.0 }
  0xe6   :  { %147 = vadd.xlane.f32.xlu1 %v146_v22  ;;  %v14341_v22 = vpack.c.bf16 %v11264_v16, %v11263_v14 }
 0x16b   :  { %v141_v23 = vpop.xlane.xlu0 %140 }
 0x16c   :  { %v150_v24 = vmul.f32 0.03125, %v141_v23 }
 0x16e   :  { %v153_v25 = vsub.f32 %v15196_v10, %v150_v24 }
 0x16f   :  { %v144_v26 = vpop.xlane.xlu0 %143 }
 0x170   :  { %v151_v27 = vmul.f32 0.03125, %v144_v26  ;;  %v156_v28 = vmul.f32 %v153_v25, %v153_v25 }
 0x172   :  { %v154_v29 = vsub.f32 %v15203_v15, %v151_v27  ;;  %v159_v30 = vsel %vm138_vm2, %v156_v28, 0.0 }
 0x173   :  { %160 = vadd.xlane.f32.xlu1 %v159_v30  ;;  %v148_v31 = vpop.xlane.xlu1 %147 }
 0x174   :  { %v152_v32 = vmul.f32 0.03125, %v148_v31  ;;  %v157_v33 = vmul.f32 %v154_v29, %v154_v29 }
 0x176   :  { %v15218_v34 = vsub.f32 %v15210_v20, %v152_v32  ;;  %v162_v35 = vsel %vm138_vm2, %v157_v33, 0.0 }
 0x177   :  { %163 = vadd.xlane.f32.xlu0 %v162_v35 }
 0x178   :  { %v158_v36 = vmul.f32 %v15218_v34, %v15218_v34 }
 0x17a   :  { %v165_v37 = vsel %vm145_vm3, %v158_v36, 0.0 }
 0x17b   :  { %166 = vadd.xlane.f32.xlu1 %v165_v37 }
 0x200   :  { %v161_v50 = vpop.xlane.xlu1 %160 }
 0x201   :  { %v168_v51 = vmul.f32 0.03125, %v161_v50  ;;  %v14354_v50 = vpack.c.bf16 %v11281_v48, %v11280_v47  ;;  %v11288_v47 = vld [vmem:[%s18096_s1 + $0xb8] sm:$0xff] }
 0x203   :  { %v171_v53 = vadd.f32 1e-05, %v168_v51 }
 0x204   :  { %v164_v54 = vpop.xlane.xlu0 %163 }
 0x205   :  { %14836 = vrsqrt.f32 %v171_v53  ;;  %v169_v55 = vmul.f32 0.03125, %v164_v54  ;;  %v11293_v53 = vld [vmem:[%s18096_s1 + $0x128] sm:$0xff] }
 0x206   :  { %v14363_v54 = vpack.c.bf16 %v11293_v53, %v11292_v52 }
 0x207   :  { %v172_v57 = vadd.f32 1e-05, %v169_v55  ;;  %v11294_v55 = vld [vmem:[%s18096_s1 + $0x130] sm:$0xff] }
 0x208   :  { %v167_v58 = vpop.xlane.xlu1 %166 }
 0x209   :  { %14838 = vrsqrt.f32 %v172_v57  ;;  %v170_v59 = vmul.f32 0.03125, %v167_v58  ;;  %v11295_v57 = vld [vmem:[%s18096_s1 + $0x138] sm:$0xff] }
 0x20a   :  { %v14366_v58 = vpack.c.bf16 %v11295_v57, %v11294_v55 }
 0x20b   :  { %v173_v62 = vadd.f32 1e-05, %v170_v59  ;;  %v15400_v59 = vld [vmem:[%s18097_s5] sm:$0xff] }
 0x20d   :  { %14840 = vrsqrt.f32 %v173_v62 }
 0x20f   :  { %v14837_v2 = vpop.eup %14836 }
 0x210   :  { %v177_v5 = vmul.f32 %v14837_v2, %v153_v25  ;;  %v15406_v2 = vld [vmem:[%s18097_s5 + $0x8] sm:$0xff] }
 0x212   :  { %v184_v8 = vmul.f32 %v183_v1, %v177_v5 }
 0x213   :  { %v14839_v9 = vpop.eup %14838 }
 0x214   :  { %v15271_v11 = vadd.f32 %v190_v4, %v184_v8  ;;  %v178_v12 = vmul.f32 %v14839_v9, %v154_v29  ;;  %v15413_v8 = vld [vmem:[%s18097_s5 + $0x10] sm:$0x3] }
 0x216   :  { %v185_v17 = vmul.f32 %v183_v1, %v178_v12  ;;  %12620 = vmatmul.mubr.msk.f32.vlgmr.msra.gmra.mrb[0].mxu1 %vm138_vm2, %v15271_v11  ;;  %12637 = vmatmul.mubr.msk.f32.vlgmr.msra.gmra.mrb[6].mxu0 %vm138_vm2, %v15271_v11 }
 0x217   :  { %v14841_v18 = vpop.eup %14840  ;;  %12622 = vmatprep.mubr.msk.f32.mxu1 %vm15120_vm0, %v15121_v3  ;;  %12639 = vmatprep.mubr.msk.f32.mxu0 %vm15120_vm0, %v15121_v3 }
 0x218   :  { %v15287_v19 = vadd.f32 %v190_v4, %v185_v17  ;;  %v179_v21 = vmul.f32 %v14841_v18, %v15218_v34  ;;  %14339 = vmatpush3.bf16.msra.mxu1 %v14338_v13 }
 0x219   :  { %14340 = vmatprep.subr.bf16.mxu1 %v15119_v0 }
 0x21a   :  { %v186_v23 = vmul.f32 %v183_v1, %v179_v21  ;;  %12623 = vmatmul.mubr.msk.f32.gmra.mrb[2].mxu1 %vm138_vm2, %v15287_v19  ;;  %12640 = vmatmul.mubr.msk.f32.gmra.mrb[8].mxu0 %vm138_vm2, %v15287_v19 }
 0x21b   :  { %12625 = vmatprep.mubr.msk.f32.mxu1 %vm15120_vm0, %v15121_v3  ;;  %12642 = vmatprep.mubr.msk.f32.mxu0 %vm15120_vm0, %v15121_v3 }
 0x21c   :  { %v15299_v24 = vadd.f32 %v190_v4, %v186_v23  ;;  %14342 = vmatpush3.bf16.msra.mxu1 %v14341_v22 }
 0x21d   :  { %14347 = vmatprep.subr.bf16.mxu1 %v15119_v0 }
 0x21e   :  { %12626 = vmatmul.mubr.msk.f32.gmra.mrb[4].mxu1 %vm138_vm2, %v15299_v24  ;;  %12643 = vmatmul.mubr.msk.f32.gmra.mrb[10].mxu0 %vm138_vm2, %v15299_v24 }
 0x21f   :  { %12653 = vmatprep.mubr.msk.f32.mxu1 %vm15120_vm0, %v15121_v3  ;;  %12668 = vmatprep.mubr.msk.f32.mxu0 %vm15120_vm0, %v15121_v3 }
 0x222   :  { %12654 = vmatmul.mubr.msk.f32.vlgmr.msra.gmra.mrb[6].mxu1 %vm138_vm2, %v15271_v11 }
 0x223   :  { %12656 = vmatprep.mubr.msk.f32.mxu1 %vm15120_vm0, %v15121_v3 }
 0x226   :  { %12657 = vmatmul.mubr.msk.f32.gmra.mrb[8].mxu1 %vm138_vm2, %v15287_v19 }
 0x227   :  { %12659 = vmatprep.mubr.msk.f32.mxu1 %vm15120_vm0, %v15121_v3 }
 0x22a   :  { %12660 = vmatmul.mubr.msk.f32.gmra.mrb[10].mxu1 %vm138_vm2, %v15299_v24 }
 0x22b   :  { %12683 = vmatprep.mubr.msk.f32.mxu1 %vm15120_vm0, %v15121_v3 }
 0x2e9   :  { %v273_v25 = vpop.f32.mrb[0].mxu1  ;;  %v358_v26 = vpop.f32.mrb[6].mxu0 }
 0x2ea   :  { %v12621_v27 = vpop.f32.mrb[1].mxu1  ;;  %v12638_v28 = vpop.f32.mrb[7].mxu0 }
 0x2ed   :  { %v278_v29 = vpop.f32.mrb[2].mxu1  ;;  %v363_v30 = vpop.f32.mrb[8].mxu0 }
 0x2ee   :  { %v14344_v32 = vpack.c.bf16 %v363_v30, %v358_v26  ;;  %v12624_v33 = vpop.f32.mrb[3].mxu1  ;;  %v12641_v34 = vpop.f32.mrb[9].mxu0 }
 0x2f0   :  { %14346 = vmatpush3.bf16.xpose.msk.msra.mxu0 %vm15324_vm4, %v14344_v32 }
 0x2f1   :  { %v283_v35 = vpop.f32.mrb[4].mxu1  ;;  %v368_v36 = vpop.f32.mrb[10].mxu0  ;;  %12666 = vmatprep.subr.mxu0 %v15121_v3 }
 0x2f2   :  { %v12627_v37 = vpop.f32.mrb[5].mxu1  ;;  %v12644_v38 = vpop.f32.mrb[11].mxu0 }
 0x2f5   :  { %v443_v39 = vpop.f32.mrb[6].mxu1 }
 0x2f6   :  { %v12655_v40 = vpop.f32.mrb[7].mxu1 }
 0x2f8   :  { %12667 = vmatpush3.xpose.msk.msra.mxu0 %vm48_vm1, %v368_v36 }
 0x2f9   :  { %v448_v43 = vpop.f32.mrb[8].mxu1  ;;  %14350 = vmatprep.subr.bf16.mxu0 %v15119_v0 }
 0x2fa   :  { %v14348_v45 = vpack.c.bf16 %v448_v43, %v443_v39  ;;  %v12658_v46 = vpop.f32.mrb[9].mxu1  ;;  %v11286_v43 = vld [vmem:[%s18096_s1 + $0xa8] sm:$0xff] }
 0x2fb   :  { %12669 = vmatmul.mubr.msk.f32.vlgmr.msra.gmra.mrb[12].mxu0 %vm48_vm1, %v273_v25  ;;  %v11287_v46 = vld [vmem:[%s18096_s1 + $0xb0] sm:$0xff] }
 0x2fc   :  { %14349 = vmatpush3.bf16.msra.mxu1 %v14348_v45  ;;  %12671 = vmatprep.mubr.msk.f32.mxu0 %vm15120_vm0, %v15121_v3  ;;  %v14357_v45 = vpack.c.bf16 %v11286_v43, %v11285_v42  ;;  %v684_v42 = vld [vmem:[%s18098_s2 + $0x8] sm:$0xff] }
 0x2fd   :  { %v453_v49 = vpop.f32.mrb[10].mxu1  ;;  %12681 = vmatprep.subr.mxu1 %v15121_v3  ;;  %14352 = vmatpush3.bf16.msra.mxu0 %v14351_v44 }
 0x2fe   :  { %v12661_v51 = vpop.f32.mrb[11].mxu1  ;;  %14353 = vmatprep.subr.bf16.mxu0 %v15119_v0 }
 0x2ff   :  { %12672 = vmatmul.mubr.msk.f32.gmra.mrb[14].mxu0 %vm48_vm1, %v278_v29 }
 0x300   :  { %12682 = vmatpush3.msk.msra.mxu1 %vm596_vm5, %v453_v49  ;;  %12674 = vmatprep.mubr.msk.f32.mxu0 %vm15120_vm0, %v15121_v3  ;;  %v14360_v49 = vpack.c.bf16 %v11288_v47, %v11287_v46 }
 0x301   :  { %14355 = vmatpush3.bf16.msra.mxu0 %v14354_v50  ;;  %14356 = vmatprep.subr.bf16.mxu1 %v15119_v0 }
 0x302   :  { %14362 = vmatprep.subr.bf16.mxu0 %v15119_v0 }
 0x303   :  { %12675 = vmatmul.mubr.msk.f32.gmra.mrb[16].mxu0 %vm48_vm1, %v283_v35 }
 0x304   :  { %12700 = vmatprep.mubr.msk.f32.mxu0 %vm15120_vm0, %v15121_v3 }
 0x307   :  { %12701 = vmatmul.mubr.msk.f32.vlgmr.msra.gmra.mrb[18].mxu0 %vm138_vm2, %v15271_v11 }
 0x308   :  { %12703 = vmatprep.mubr.msk.f32.mxu0 %vm15120_vm0, %v15121_v3  ;;  %14364 = vmatpush3.bf16.msra.mxu0 %v14363_v54 }
 0x309   :  { %14365 = vmatprep.subr.bf16.mxu0 %v15119_v0 }
 0x30b   :  { %12704 = vmatmul.mubr.msk.f32.gmra.mrb[20].mxu0 %vm138_vm2, %v15287_v19 }
 0x30c   :  { %12706 = vmatprep.mubr.msk.f32.mxu0 %vm15120_vm0, %v15121_v3  ;;  %14367 = vmatpush3.bf16.msra.mxu0 %v14366_v58 }
 0x30d   :  { %14372 = vmatprep.subr.bf16.mxu0 %v15119_v0 }
 0x30f   :  { %12707 = vmatmul.mubr.msk.f32.gmra.mrb[22].mxu0 %vm138_vm2, %v15299_v24 }
 0x310   :  { %12734 = vmatprep.mubr.msk.f32.mxu0 %vm15120_vm0, %v15121_v3 }
 0x313   :  { %12735 = vmatmul.mubr.msk.f32.vlgmr.msra.gmra.mrb[24].mxu0 %vm138_vm2, %v15271_v11 }
 0x314   :  { %12737 = vmatprep.mubr.msk.f32.mxu0 %vm15120_vm0, %v15121_v3 }
 0x317   :  { %12738 = vmatmul.mubr.msk.f32.gmra.mrb[26].mxu0 %vm138_vm2, %v15287_v19 }
 0x318   :  { %12740 = vmatprep.mubr.msk.f32.mxu0 %vm15120_vm0, %v15121_v3 }
 0x31b   :  { %12741 = vmatmul.mubr.msk.f32.gmra.mrb[28].mxu0 %vm138_vm2, %v15299_v24 }
 0x31c   :  { %12764 = vmatprep.mubr.msk.f32.mxu0 %vm15120_vm0, %v15121_v3 }
 0x3ce   :  { %v541_v61 = vpop.f32.mrb[12].mxu0 }
 0x3cf   :  { %v12670_v62 = vpop.f32.mrb[13].mxu0  ;;  %v542_v1 = vadd.f32 %v541_v61, %v15400_v59 }
 0x3d1   :  { %v556_v4 = vsel %vm555_vm6, %v542_v1, -inf }
 0x3d2   :  { %557 = vmax.xlane.f32.xlu0 %v556_v4  ;;  %v546_v5 = vpop.f32.mrb[14].mxu0 }
 0x3d3   :  { %v12673_v6 = vpop.f32.mrb[15].mxu0  ;;  %v547_v7 = vadd.f32 %v546_v5, %v15406_v2 }
 0x3d5   :  { %v559_v9 = vsel %vm555_vm6, %v547_v7, -inf }
 0x3d6   :  { %560 = vmax.xlane.f32.xlu1 %v559_v9  ;;  %v551_v12 = vpop.f32.mrb[16].mxu0 }
 0x3d7   :  { %v12676_v13 = vpop.f32.mrb[17].mxu0  ;;  %v552_v14 = vadd.f32 %v551_v12, %v15413_v8 }
 0x3d9   :  { %v563_v16 = vsel %vm562_vm7, %v552_v14, -inf }
 0x3da   :  { %564 = vmax.xlane.f32.xlu0 %v563_v16  ;;  %v15418_v17 = vpop.f32.mrb[18].mxu0 }
 0x3db   :  { %v12702_v18 = vpop.f32.mrb[19].mxu0 }
 0x3de   :  { %v15420_v21 = vpop.f32.mrb[20].mxu0 }
 0x3df   :  { %v12705_v22 = vpop.f32.mrb[21].mxu0 }
 0x3e2   :  { %v15422_v23 = vpop.f32.mrb[22].mxu0 }
 0x3e3   :  { %v12708_v25 = vpop.f32.mrb[23].mxu0 }
 0x3e6   :  { %v926_v26 = vpop.f32.mrb[24].mxu0 }
 0x3e7   :  { %v12736_v27 = vpop.f32.mrb[25].mxu0 }
 0x3ea   :  { %v931_v28 = vpop.f32.mrb[26].mxu0 }
 0x3eb   :  { %v14373_v29 = vpack.c.bf16 %v931_v28, %v926_v26  ;;  %v12739_v30 = vpop.f32.mrb[27].mxu0 }
 0x3ed   :  { %14374 = vmatpush3.bf16.msra.mxu0 %v14373_v29 }
 0x3ee   :  { %v936_v32 = vpop.f32.mrb[28].mxu0  ;;  %12762 = vmatprep.subr.mxu0 %v15121_v3 }
 0x3ef   :  { %v12742_v33 = vpop.f32.mrb[29].mxu0 }
 0x3f1   :  { %12763 = vmatpush3.msk.msra.mxu0 %vm596_vm5, %v936_v32 }
 0x3f2   :  { %14378 = vmatprep.subr.bf16.mxu0 %v15119_v0 }
 0x45f   :  { %v558_v34 = vpop.xlane.xlu0 %557 }
 0x460   :  { %v566_v35 = vsub.f32 %v542_v1, %v558_v34 }
 0x462   :  { %v569_v36 = vmul.f32 1.442695, %v566_v35 }
 0x463   :  { %v561_v37 = vpop.xlane.xlu1 %560 }
 0x464   :  { %14842 = vpow2.f32 %v569_v36  ;;  %v567_v38 = vsub.f32 %v547_v7, %v561_v37 }
 0x466   :  { %v571_v39 = vmul.f32 1.442695, %v567_v38 }
 0x467   :  { %v565_v40 = vpop.xlane.xlu0 %564 }
 0x468   :  { %14844 = vpow2.f32 %v571_v39  ;;  %v568_v41 = vsub.f32 %v552_v14, %v565_v40 }
 0x46a   :  { %v573_v44 = vmul.f32 1.442695, %v568_v41  ;;  %v683_v41 = vld [vmem:[%s18098_s2] sm:$0xff] }
 0x46c   :  { %14846 = vpow2.f32 %v573_v44  ;;  %v14379_v44 = vpack.c.bf16 %v684_v42, %v683_v41 }
 0x46e   :  { %v14843_v48 = vpop.eup %14842 }
 0x46f   :  { %12684 = vmatmul.mubr.msk.f32.vlgmr.msra.gmra.mrb[12].mxu1 %vm555_vm6, %v14843_v48  ;;  %v575_v26 = vsel %vm555_vm6, %v14843_v48, 0.0 }
 0x470   :  { %12686 = vmatprep.mubr.msk.f32.mxu1 %vm15120_vm0, %v15121_v3  ;;  %14358 = vmatpush3.bf16.msra.mxu1 %v14357_v45 }
 0x471   :  { %14359 = vmatprep.subr.bf16.mxu1 %v15119_v0 }
 0x472   :  { %v14845_v50 = vpop.eup %14844 }
 0x473   :  { %12687 = vmatmul.mubr.msk.f32.gmra.mrb[14].mxu1 %vm555_vm6, %v14845_v50  ;;  %v578_v29 = vsel %vm555_vm6, %v14845_v50, 0.0 }
 0x474   :  { %12689 = vmatprep.mubr.msk.f32.mxu1 %vm15120_vm0, %v15121_v3  ;;  %14361 = vmatpush3.bf16.msra.mxu1 %v14360_v49 }
 0x475   :  { %14368 = vmatprep.subr.bf16.mxu1 %v15119_v0 }
 0x476   :  { %v14847_v51 = vpop.eup %14846 }
 0x477   :  { %12690 = vmatmul.mubr.msk.f32.gmra.mrb[16].mxu1 %vm555_vm6, %v14847_v51  ;;  %v581_v28 = vsel %vm562_vm7, %v14847_v51, 0.0  ;;  %v11324_v51 = vld [vmem:[%s18096_s1 + $0xc0] sm:$0xff] }
 0x478   :  { %12717 = vmatprep.mubr.msk.f32.mxu1 %vm15120_vm0, %v15121_v3 }
 0x47b   :  { %12718 = vmatmul.mubr.msk.f32.vlgmr.msra.gmra.mrb[18].mxu1 %vm138_vm2, %v15271_v11 }
 0x47c   :  { %12720 = vmatprep.mubr.msk.f32.mxu1 %vm15120_vm0, %v15121_v3 }
 0x47f   :  { %12721 = vmatmul.mubr.msk.f32.gmra.mrb[20].mxu1 %vm138_vm2, %v15287_v19 }
 0x480   :  { %12723 = vmatprep.mubr.msk.f32.mxu1 %vm15120_vm0, %v15121_v3 }
 0x483   :  { %12724 = vmatmul.mubr.msk.f32.gmra.mrb[22].mxu1 %vm138_vm2, %v15299_v24 }
 0x484   :  { %12749 = vmatprep.mubr.msk.f32.mxu1 %vm15120_vm0, %v15121_v3 }
 0x542   :  { %v15462_v52 = vpop.f32.mrb[12].mxu1 }
 0x543   :  { %v12685_v53 = vpop.f32.mrb[13].mxu1 }
 0x544   :  { %v11325_v53 = vld [vmem:[%s18096_s1 + $0xc8] sm:$0xff] }
 0x546   :  { %v15464_v54 = vpop.f32.mrb[14].mxu1 }
 0x547   :  { %v12688_v55 = vpop.f32.mrb[15].mxu1 }
 0x54a   :  { %v15466_v57 = vpop.f32.mrb[16].mxu1 }
 0x54b   :  { %v12691_v58 = vpop.f32.mrb[17].mxu1 }
 0x54e   :  { %v841_v61 = vpop.f32.mrb[18].mxu1 }
 0x54f   :  { %v12719_v62 = vpop.f32.mrb[19].mxu1 }
 0x552   :  { %v846_v1 = vpop.f32.mrb[20].mxu1 }
 0x553   :  { %v14369_v4 = vpack.c.bf16 %v846_v1, %v841_v61  ;;  %v12722_v5 = vpop.f32.mrb[21].mxu1  ;;  %v14388_v61 = vpack.c.bf16 %v11325_v53, %v11324_v51  ;;  %v11326_v1 = vld [vmem:[%s18096_s1 + $0xd0] sm:$0xff] }
 0x555   :  { %14371 = vmatpush3.bf16.xpose.msk.msra.mxu1 %vm15324_vm4, %v14369_v4  ;;  %v11327_v4 = vld [vmem:[%s18096_s1 + $0xd8] sm:$0xff] }
 0x556   :  { %v851_v6 = vpop.f32.mrb[22].mxu1  ;;  %12747 = vmatprep.subr.mxu1 %v15121_v3 }
 0x557   :  { %v12725_v7 = vpop.f32.mrb[23].mxu1 }
 0x55d   :  { %12748 = vmatpush3.xpose.msk.msra.mxu1 %vm48_vm1, %v851_v6  ;;  %v14391_v6 = vpack.c.bf16 %v11327_v4, %v11326_v1 }
 0x55e   :  { %14375 = vmatprep.subr.bf16.mxu1 %v15119_v0 }
 0x560   :  { %12750 = vmatmul.mubr.msk.f32.vlgmr.msra.gmra.mrb[24].mxu1 %vm48_vm1, %v15418_v17 }
 0x561   :  { %12752 = vmatprep.mubr.msk.f32.mxu1 %vm15120_vm0, %v15121_v3 }
 0x564   :  { %12753 = vmatmul.mubr.msk.f32.gmra.mrb[26].mxu1 %vm48_vm1, %v15420_v21 }
 0x565   :  { %12755 = vmatprep.mubr.msk.f32.mxu1 %vm15120_vm0, %v15121_v3 }
 0x568   :  { %12756 = vmatmul.mubr.msk.f32.gmra.mrb[28].mxu1 %vm48_vm1, %v15422_v23 }
 0x569   :  { %12777 = vmatprep.mubr.msk.f32.mxu1 %vm15120_vm0, %v15121_v3 }
 0x633   :  { %v1024_v9 = vpop.f32.mrb[24].mxu1 }
 0x634   :  { %v12751_v12 = vpop.f32.mrb[25].mxu1  ;;  %v1025_v13 = vadd.f32 %v1024_v9, %v15400_v59 }
 0x635   :  { %v11310_v12 = vld [vmem:[%s18098_s2 + $0x18] sm:$0xff] }
 0x636   :  { %v1038_v14 = vsel %vm555_vm6, %v1025_v13, -inf }
 0x637   :  { %1039 = vmax.xlane.f32.xlu1 %v1038_v14  ;;  %v1029_v16 = vpop.f32.mrb[26].mxu1 }
 0x638   :  { %v12754_v17 = vpop.f32.mrb[27].mxu1  ;;  %v1030_v18 = vadd.f32 %v1029_v16, %v15406_v2 }
 0x639   :  { %v11317_v17 = vld [vmem:[%s18096_s1 + $0x40] sm:$0xff] }
 0x63a   :  { %v1041_v21 = vsel %vm555_vm6, %v1030_v18, -inf }
 0x63b   :  { %1042 = vmax.xlane.f32.xlu0 %v1041_v21  ;;  %v1034_v22 = vpop.f32.mrb[28].mxu1 }
 0x63c   :  { %v12757_v25 = vpop.f32.mrb[29].mxu1  ;;  %v1035_v23 = vadd.f32 %v1034_v22, %v15413_v8 }
 0x63e   :  { %v1044_v27 = vsel %vm562_vm7, %v1035_v23, -inf }
 0x63f   :  { %576 = vadd.xlane.f32.xlu0 %v575_v26  ;;  %1045 = vmax.xlane.f32.xlu1 %v1044_v27  ;;  %v11319_v27 = vld [vmem:[%s18096_s1 + $0x50] sm:$0xff] }
 0x643   :  { %582 = vadd.xlane.f32.xlu0 %v581_v28  ;;  %579 = vadd.xlane.f32.xlu1 %v578_v29  ;;  %v11320_v28 = vld [vmem:[%s18096_s1 + $0x58] sm:$0xff] }
 0x6c4   :  { %v1040_v30 = vpop.xlane.xlu1 %1039 }
 0x6c5   :  { %v1047_v32 = vsub.f32 %v1025_v13, %v1040_v30 }
 0x6c7   :  { %v1050_v33 = vmul.f32 1.442695, %v1047_v32  ;;  %v14385_v32 = vpack.c.bf16 %v11320_v28, %v11319_v27 }
 0x6c8   :  { %v1043_v34 = vpop.xlane.xlu0 %1042 }
 0x6c9   :  { %14848 = vpow2.f32 %v1050_v33  ;;  %v1048_v35 = vsub.f32 %v1030_v18, %v1043_v34  ;;  %v11318_v18 = vld [vmem:[%s18096_s1 + $0x48] sm:$0xff] }
 0x6ca   :  { %v14382_v25 = vpack.c.bf16 %v11318_v18, %v11317_v17 }
 0x6cb   :  { %v1052_v36 = vmul.f32 1.442695, %v1048_v35 }
 0x6cc   :  { %v1046_v37 = vpop.xlane.xlu1 %1045  ;;  %v577_v38 = vpop.xlane.xlu0 %576 }
 0x6cd   :  { %14850 = vpow2.f32 %v1052_v36  ;;  %v1049_v39 = vsub.f32 %v1035_v23, %v1046_v37 }
 0x6ce   :  { %14852 = vrcp.f32 %v577_v38 }
 0x6cf   :  { %v1054_v40 = vmul.f32 1.442695, %v1049_v39  ;;  %v11331_v39 = vld [vmem:[%s18096_s1 + $0x140] sm:$0xff] }
 0x6d0   :  { %v580_v43 = vpop.xlane.xlu1 %579  ;;  %v583_v47 = vpop.xlane.xlu0 %582 }
 0x6d1   :  { %14854 = vpow2.f32 %v1054_v40  ;;  %v11332_v40 = vld [vmem:[%s18096_s1 + $0x148] sm:$0xff] }
 0x6d2   :  { %14856 = vrcp.f32 %v580_v43  ;;  %v14394_v42 = vpack.c.bf16 %v11332_v40, %v11331_v39 }
 0x6d3   :  { %v14849_v45 = vpop.eup %14848  ;;  %14858 = vrcp.f32 %v583_v47 }
 0x6d4   :  { %12765 = vmatmul.mubr.msk.f32.vlgmr.msra.gmra.mrb[30].mxu0 %vm555_vm6, %v14849_v45  ;;  %v1056_v46 = vsel %vm555_vm6, %v14849_v45, 0.0  ;;  %v11334_v45 = vld [vmem:[%s18096_s1 + $0x158] sm:$0xff] }
 0x6d5   :  { %1057 = vadd.xlane.f32.xlu1 %v1056_v46  ;;  %12767 = vmatprep.mubr.msk.f32.mxu0 %vm15120_vm0, %v15121_v3 }
 0x6d6   :  { %14380 = vmatpush3.bf16.msra.mxu0 %v14379_v44  ;;  %v11333_v44 = vld [vmem:[%s18096_s1 + $0x150] sm:$0xff] }
 0x6d7   :  { %v14851_v48 = vpop.eup %14850  ;;  %14387 = vmatprep.subr.bf16.mxu0 %v15119_v0  ;;  %v14397_v47 = vpack.c.bf16 %v11334_v45, %v11333_v44 }
 0x6d8   :  { %12768 = vmatmul.mubr.msk.f32.gmra.mrb[32].mxu0 %vm555_vm6, %v14851_v48  ;;  %v1059_v49 = vsel %vm555_vm6, %v14851_v48, 0.0  ;;  %v14853_v50 = vpop.eup %14852 }
 0x6d9   :  { %1060 = vadd.xlane.f32.xlu0 %v1059_v49  ;;  %12770 = vmatprep.mubr.msk.f32.mxu0 %vm15120_vm0, %v15121_v3  ;;  %v680_v62 = vmul.f32 %v14853_v50, %v15462_v52 }
 0x6db   :  { %v14855_v55 = vpop.eup %14854 }
 0x6dc   :  { %12771 = vmatmul.mubr.msk.f32.gmra.mrb[34].mxu0 %vm555_vm6, %v14855_v55  ;;  %v1062_v58 = vsel %vm562_vm7, %v14855_v55, 0.0  ;;  %v14857_v5 = vpop.eup %14856 }
 0x6dd   :  { %1063 = vadd.xlane.f32.xlu1 %v1062_v58  ;;  %12790 = vmatprep.mubr.msk.f32.mxu0 %vm15120_vm0, %v15121_v3  ;;  %v681_v7 = vmul.f32 %v14857_v5, %v15464_v54  ;;  %v14859_v52 = vpop.eup %14858  ;;  %v11309_v54 = vld [vmem:[%s18098_s2 + $0x10] sm:$0xff] }
 0x6de   :  { %v682_v9 = vmul.f32 %v14859_v52, %v15466_v57  ;;  %v14376_v13 = vpack.c.bf16 %v11310_v12, %v11309_v54 }
 0x6e0   :  { %12791 = vmatmul.mubr.msk.f32.vlgmr.msra.gmra.mrb[36].mxu0 %vm48_vm1, %v680_v62  ;;  %14377 = vmatpush3.bf16.msra.mxu1 %v14376_v13 }
 0x6e1   :  { %12793 = vmatprep.mubr.msk.f32.mxu0 %vm15120_vm0, %v15121_v3  ;;  %14389 = vmatpush3.bf16.msra.mxu0 %v14388_v61 }
 0x6e2   :  { %14390 = vmatprep.subr.bf16.mxu0 %v15119_v0  ;;  %14381 = vmatprep.subr.bf16.mxu1 %v15119_v0 }
 0x6e4   :  { %12794 = vmatmul.mubr.msk.f32.gmra.mrb[38].mxu0 %vm48_vm1, %v681_v7 }
 0x6e5   :  { %12796 = vmatprep.mubr.msk.f32.mxu0 %vm15120_vm0, %v15121_v3  ;;  %14392 = vmatpush3.bf16.msra.mxu0 %v14391_v6 }
 0x6e6   :  { %14399 = vmatprep.subr.bf16.mxu0 %v15119_v0 }
 0x6e8   :  { %12797 = vmatmul.mubr.msk.f32.gmra.mrb[40].mxu0 %vm48_vm1, %v682_v9 }
 0x6e9   :  { %12824 = vmatprep.mubr.msk.f32.mxu0 %vm15120_vm0, %v15121_v3 }
 0x6ec   :  { %12825 = vmatmul.mubr.msk.f32.vlgmr.msra.gmra.mrb[42].mxu0 %vm138_vm2, %v15271_v11 }
 0x6ed   :  { %12827 = vmatprep.mubr.msk.f32.mxu0 %vm15120_vm0, %v15121_v3 }
 0x6f0   :  { %12828 = vmatmul.mubr.msk.f32.gmra.mrb[44].mxu0 %vm138_vm2, %v15287_v19 }
 0x6f1   :  { %12830 = vmatprep.mubr.msk.f32.mxu0 %vm15120_vm0, %v15121_v3 }
 0x6f4   :  { %12831 = vmatmul.mubr.msk.f32.gmra.mrb[46].mxu0 %vm138_vm2, %v15299_v24 }
 0x6f5   :  { %12856 = vmatprep.mubr.msk.f32.mxu0 %vm15120_vm0, %v15121_v3 }
 0x762   :  { %v1058_v57 = vpop.xlane.xlu1 %1057 }
 0x763   :  { %14860 = vrcp.f32 %v1058_v57 }
 0x766   :  { %v1061_v14 = vpop.xlane.xlu0 %1060 }
 0x767   :  { %14862 = vrcp.f32 %v1061_v14 }
 0x76a   :  { %v1064_v16 = vpop.xlane.xlu1 %1063 }
 0x76b   :  { %14864 = vrcp.f32 %v1064_v16 }
 0x76d   :  { %v14861_v21 = vpop.eup %14860 }
 0x771   :  { %v14863_v29 = vpop.eup %14862 }
 0x775   :  { %v14865_v35 = vpop.eup %14864 }
 0x7a7   :  { %v1146_v22 = vpop.f32.mrb[30].mxu0 }
 0x7a8   :  { %v1160_v23 = vmul.f32 %v14861_v21, %v1146_v22  ;;  %v12766_v26 = vpop.f32.mrb[31].mxu0 }
 0x7aa   :  { %12778 = vmatmul.mubr.msk.f32.vlgmr.msra.gmra.mrb[30].mxu1 %vm48_vm1, %v1160_v23 }
 0x7ab   :  { %v1151_v30 = vpop.f32.mrb[32].mxu0  ;;  %12780 = vmatprep.mubr.msk.f32.mxu1 %vm15120_vm0, %v15121_v3  ;;  %14383 = vmatpush3.bf16.msra.mxu1 %v14382_v25 }
 0x7ac   :  { %v1161_v33 = vmul.f32 %v14863_v29, %v1151_v30  ;;  %v12769_v34 = vpop.f32.mrb[33].mxu0  ;;  %14384 = vmatprep.subr.bf16.mxu1 %v15119_v0 }
 0x7ae   :  { %12781 = vmatmul.mubr.msk.f32.gmra.mrb[32].mxu1 %vm48_vm1, %v1161_v33 }
 0x7af   :  { %v1156_v36 = vpop.f32.mrb[34].mxu0  ;;  %12783 = vmatprep.mubr.msk.f32.mxu1 %vm15120_vm0, %v15121_v3  ;;  %14386 = vmatpush3.bf16.msra.mxu1 %v14385_v32 }
 0x7b0   :  { %v1162_v37 = vmul.f32 %v14865_v35, %v1156_v36  ;;  %v12772_v38 = vpop.f32.mrb[35].mxu0  ;;  %14393 = vmatprep.subr.bf16.mxu1 %v15119_v0 }
 0x7b2   :  { %12784 = vmatmul.mubr.msk.f32.gmra.mrb[34].mxu1 %vm48_vm1, %v1162_v37 }
 0x7b3   :  { %v1330_v41 = vpop.f32.mrb[36].mxu0  ;;  %12807 = vmatprep.mubr.msk.f32.mxu1 %vm15120_vm0, %v15121_v3 }
 0x7b4   :  { %v12792_v43 = vpop.f32.mrb[37].mxu0 }
 0x7b6   :  { %12808 = vmatmul.mubr.msk.f32.vlgmr.msra.gmra.mrb[36].mxu1 %vm138_vm2, %v15271_v11 }
 0x7b7   :  { %v1335_v46 = vpop.f32.mrb[38].mxu0  ;;  %12810 = vmatprep.mubr.msk.f32.mxu1 %vm15120_vm0, %v15121_v3  ;;  %14395 = vmatpush3.bf16.msra.mxu1 %v14394_v42 }
 0x7b8   :  { %v12795_v48 = vpop.f32.mrb[39].mxu0  ;;  %14396 = vmatprep.subr.bf16.mxu1 %v15119_v0 }
 0x7ba   :  { %12811 = vmatmul.mubr.msk.f32.gmra.mrb[38].mxu1 %vm138_vm2, %v15287_v19 }
 0x7bb   :  { %v1340_v49 = vpop.f32.mrb[40].mxu0  ;;  %12813 = vmatprep.mubr.msk.f32.mxu1 %vm15120_vm0, %v15121_v3  ;;  %14398 = vmatpush3.bf16.msra.mxu1 %v14397_v47 }
 0x7bc   :  { %v12798_v50 = vpop.f32.mrb[41].mxu0  ;;  %14403 = vmatprep.subr.bf16.mxu1 %v15119_v0 }
 0x7be   :  { %12814 = vmatmul.mubr.msk.f32.gmra.mrb[40].mxu1 %vm138_vm2, %v15299_v24 }
 0x7bf   :  { %v1500_v51 = vpop.f32.mrb[42].mxu0  ;;  %12841 = vmatprep.mubr.msk.f32.mxu1 %vm15120_vm0, %v15121_v3 }
 0x7c0   :  { %v12826_v53 = vpop.f32.mrb[43].mxu0 }
 0x7c1   :  { %v11353_v53 = vld [vmem:[%s18096_s1 + $0x60] sm:$0xff] }
 0x7c2   :  { %12842 = vmatmul.mubr.msk.f32.vlgmr.msra.gmra.mrb[42].mxu1 %vm138_vm2, %v15271_v11 }
 0x7c3   :  { %v1505_v55 = vpop.f32.mrb[44].mxu0  ;;  %12844 = vmatprep.mubr.msk.f32.mxu1 %vm15120_vm0, %v15121_v3 }
 0x7c4   :  { %v14400_v58 = vpack.c.bf16 %v1505_v55, %v1500_v51  ;;  %v12829_v61 = vpop.f32.mrb[45].mxu0  ;;  %v11354_v55 = vld [vmem:[%s18096_s1 + $0x68] sm:$0xff] }
 0x7c6   :  { %12845 = vmatmul.mubr.msk.f32.gmra.mrb[44].mxu1 %vm138_vm2, %v15287_v19  ;;  %14402 = vmatpush3.bf16.xpose.msk.msra.mxu0 %vm15324_vm4, %v14400_v58  ;;  %v14410_v58 = vpack.c.bf16 %v11354_v55, %v11353_v53 }
 0x7c7   :  { %v1510_v62 = vpop.f32.mrb[46].mxu0  ;;  %12847 = vmatprep.mubr.msk.f32.mxu1 %vm15120_vm0, %v15121_v3  ;;  %12854 = vmatprep.subr.mxu0 %v15121_v3 }
 0x7c8   :  { %v12832_v1 = vpop.f32.mrb[47].mxu0 }
 0x7c9   :  { %v11356_v1 = vld [vmem:[%s18096_s1 + $0x78] sm:$0xff] }
 0x7ca   :  { %12848 = vmatmul.mubr.msk.f32.gmra.mrb[46].mxu1 %vm138_vm2, %v15299_v24 }
 0x7cb   :  { %12871 = vmatprep.mubr.msk.f32.mxu1 %vm15120_vm0, %v15121_v3 }
 0x7ce   :  { %12855 = vmatpush3.xpose.msk.msra.mxu0 %vm48_vm1, %v1510_v62  ;;  %v11355_v62 = vld [vmem:[%s18096_s1 + $0x70] sm:$0xff] }
 0x7cf   :  { %14406 = vmatprep.subr.bf16.mxu0 %v15119_v0 }
 0x87d   :  { %v1241_v4 = vpop.f32.mrb[30].mxu1 }
 0x87e   :  { %v15624_v5 = vadd.f32 %v1330_v41, %v1241_v4  ;;  %v12779_v6 = vpop.f32.mrb[31].mxu1 }
 0x87f   :  { %v14413_v6 = vpack.c.bf16 %v11356_v1, %v11355_v62 }
 0x881   :  { %v1246_v7 = vpop.f32.mrb[32].mxu1 }
 0x882   :  { %v15626_v52 = vadd.f32 %v1335_v46, %v1246_v7  ;;  %v12782_v9 = vpop.f32.mrb[33].mxu1 }
 0x885   :  { %v1251_v54 = vpop.f32.mrb[34].mxu1 }
 0x886   :  { %v15628_v12 = vadd.f32 %v1340_v49, %v1251_v54  ;;  %v12785_v13 = vpop.f32.mrb[35].mxu1  ;;  %v11367_v54 = vld [vmem:[%s18096_s1 + $0x160] sm:$0xff] }
 0x887   :  { %v11368_v13 = vld [vmem:[%s18096_s1 + $0x168] sm:$0xff] }
 0x889   :  { %v1415_v57 = vpop.f32.mrb[36].mxu1 }
 0x88a   :  { %v12809_v14 = vpop.f32.mrb[37].mxu1  ;;  %12857 = vmatmul.mubr.msk.f32.vlgmr.msra.gmra.mrb[48].mxu0 %vm48_vm1, %v1415_v57 }
 0x88b   :  { %12859 = vmatprep.mubr.msk.f32.mxu0 %vm15120_vm0, %v15121_v3 }
 0x88d   :  { %v1420_v16 = vpop.f32.mrb[38].mxu1 }
 0x88e   :  { %v12812_v17 = vpop.f32.mrb[39].mxu1  ;;  %12860 = vmatmul.mubr.msk.f32.gmra.mrb[50].mxu0 %vm48_vm1, %v1420_v16  ;;  %v14422_v16 = vpack.c.bf16 %v11368_v13, %v11367_v54 }
 0x88f   :  { %12862 = vmatprep.mubr.msk.f32.mxu0 %vm15120_vm0, %v15121_v3  ;;  %v11369_v17 = vld [vmem:[%s18096_s1 + $0x170] sm:$0xff] }
 0x891   :  { %v1425_v18 = vpop.f32.mrb[40].mxu1 }
 0x892   :  { %v12815_v21 = vpop.f32.mrb[41].mxu1  ;;  %12863 = vmatmul.mubr.msk.f32.gmra.mrb[52].mxu0 %vm48_vm1, %v1425_v18  ;;  %v11370_v18 = vld [vmem:[%s18096_s1 + $0x178] sm:$0xff] }
 0x893   :  { %12884 = vmatprep.mubr.msk.f32.mxu0 %vm15120_vm0, %v15121_v3  ;;  %v14425_v21 = vpack.c.bf16 %v11370_v18, %v11369_v17 }
 0x895   :  { %v1585_v22 = vpop.f32.mrb[42].mxu1 }
 0x896   :  { %v12843_v25 = vpop.f32.mrb[43].mxu1 }
 0x897   :  { %v11349_v25 = vld [vmem:[%s18098_s2 + $0x28] sm:$0xff] }
 0x899   :  { %v1590_v23 = vpop.f32.mrb[44].mxu1 }
 0x89a   :  { %v14404_v26 = vpack.c.bf16 %v1590_v23, %v1585_v22  ;;  %v12846_v27 = vpop.f32.mrb[45].mxu1  ;;  %v11348_v22 = vld [vmem:[%s18098_s2 + $0x20] sm:$0xff] }
 0x89b   :  { %v14407_v23 = vpack.c.bf16 %v11349_v25, %v11348_v22 }
 0x89c   :  { %14405 = vmatpush3.bf16.msra.mxu1 %v14404_v26 }
 0x89d   :  { %v1595_v28 = vpop.f32.mrb[46].mxu1  ;;  %12869 = vmatprep.subr.mxu1 %v15121_v3  ;;  %14408 = vmatpush3.bf16.msra.mxu0 %v14407_v23 }
 0x89e   :  { %v12849_v29 = vpop.f32.mrb[47].mxu1  ;;  %14415 = vmatprep.subr.bf16.mxu0 %v15119_v0 }
 0x89f   :  { %v11360_v29 = vld [vmem:[%s18096_s1 + $0xe0] sm:$0xff] }
 0x8a0   :  { %12870 = vmatpush3.msk.msra.mxu1 %vm596_vm5, %v1595_v28 }
 0x8a1   :  { %14409 = vmatprep.subr.bf16.mxu1 %v15119_v0 }
 0x95d   :  { %v1683_v30 = vpop.f32.mrb[48].mxu0 }
 0x95e   :  { %v12858_v32 = vpop.f32.mrb[49].mxu0  ;;  %v1684_v33 = vadd.f32 %v1683_v30, %v15400_v59  ;;  %v11361_v30 = vld [vmem:[%s18096_s1 + $0xe8] sm:$0xff] }
 0x960   :  { %v1697_v34 = vsel %vm555_vm6, %v1684_v33, -inf }
 0x961   :  { %1698 = vmax.xlane.f32.xlu0 %v1697_v34  ;;  %v1688_v35 = vpop.f32.mrb[50].mxu0  ;;  %v14416_v34 = vpack.c.bf16 %v11361_v30, %v11360_v29 }
 0x962   :  { %v12861_v36 = vpop.f32.mrb[51].mxu0  ;;  %v1689_v37 = vadd.f32 %v1688_v35, %v15406_v2 }
 0x964   :  { %v1700_v38 = vsel %vm555_vm6, %v1689_v37, -inf }
 0x965   :  { %1701 = vmax.xlane.f32.xlu1 %v1700_v38  ;;  %v1693_v39 = vpop.f32.mrb[52].mxu0  ;;  %v11363_v38 = vld [vmem:[%s18096_s1 + $0xf8] sm:$0xff] }
 0x966   :  { %v12864_v40 = vpop.f32.mrb[53].mxu0  ;;  %v1694_v41 = vadd.f32 %v1693_v39, %v15413_v8 }
 0x968   :  { %v1703_v42 = vsel %vm562_vm7, %v1694_v41, -inf }
 0x969   :  { %1704 = vmax.xlane.f32.xlu0 %v1703_v42 }
 0x9ee   :  { %v1699_v43 = vpop.xlane.xlu0 %1698 }
 0x9ef   :  { %v1706_v44 = vsub.f32 %v1684_v33, %v1699_v43 }
 0x9f1   :  { %v1709_v45 = vmul.f32 1.442695, %v1706_v44 }
 0x9f2   :  { %v1702_v46 = vpop.xlane.xlu1 %1701 }
 0x9f3   :  { %14866 = vpow2.f32 %v1709_v45  ;;  %v1707_v47 = vsub.f32 %v1689_v37, %v1702_v46  ;;  %v11362_v37 = vld [vmem:[%s18096_s1 + $0xf0] sm:$0xff] }
 0x9f5   :  { %v1711_v48 = vmul.f32 1.442695, %v1707_v47 }
 0x9f6   :  { %v1705_v49 = vpop.xlane.xlu0 %1704 }
 0x9f7   :  { %14868 = vpow2.f32 %v1711_v48  ;;  %v1708_v50 = vsub.f32 %v1694_v41, %v1705_v49  ;;  %v14419_v41 = vpack.c.bf16 %v11363_v38, %v11362_v37 }
 0x9f9   :  { %v1713_v51 = vmul.f32 1.442695, %v1708_v50 }
 0x9fb   :  { %14870 = vpow2.f32 %v1713_v51 }
 0x9fd   :  { %v14867_v61 = vpop.eup %14866 }
 0x9fe   :  { %12872 = vmatmul.mubr.msk.f32.vlgmr.msra.gmra.mrb[48].mxu1 %vm555_vm6, %v14867_v61  ;;  %v1715_v4 = vsel %vm555_vm6, %v14867_v61, 0.0 }
 0x9ff   :  { %1716 = vadd.xlane.f32.xlu1 %v1715_v4  ;;  %12874 = vmatprep.mubr.msk.f32.mxu1 %vm15120_vm0, %v15121_v3 }
 0xa00   :  { %14411 = vmatpush3.bf16.msra.mxu1 %v14410_v58 }
 0xa01   :  { %v14869_v7 = vpop.eup %14868  ;;  %14412 = vmatprep.subr.bf16.mxu1 %v15119_v0 }
 0xa02   :  { %12875 = vmatmul.mubr.msk.f32.gmra.mrb[50].mxu1 %vm555_vm6, %v14869_v7  ;;  %v1718_v9 = vsel %vm555_vm6, %v14869_v7, 0.0 }
 0xa03   :  { %1719 = vadd.xlane.f32.xlu0 %v1718_v9  ;;  %12877 = vmatprep.mubr.msk.f32.mxu1 %vm15120_vm0, %v15121_v3 }
 0xa04   :  { %14414 = vmatpush3.bf16.msra.mxu1 %v14413_v6 }
 0xa05   :  { %v14871_v57 = vpop.eup %14870  ;;  %14421 = vmatprep.subr.bf16.mxu1 %v15119_v0 }
 0xa06   :  { %12878 = vmatmul.mubr.msk.f32.gmra.mrb[52].mxu1 %vm555_vm6, %v14871_v57  ;;  %v1721_v14 = vsel %vm562_vm7, %v14871_v57, 0.0 }
 0xa07   :  { %1722 = vadd.xlane.f32.xlu1 %v1721_v14  ;;  %12901 = vmatprep.mubr.msk.f32.mxu1 %vm15120_vm0, %v15121_v3 }
 0xa0a   :  { %12902 = vmatmul.mubr.msk.f32.vlgmr.msra.gmra.mrb[54].mxu1 %vm138_vm2, %v15271_v11 }
 0xa0b   :  { %12904 = vmatprep.mubr.msk.f32.mxu1 %vm15120_vm0, %v15121_v3  ;;  %14423 = vmatpush3.bf16.msra.mxu1 %v14422_v16 }
 0xa0c   :  { %14424 = vmatprep.subr.bf16.mxu1 %v15119_v0 }
 0xa0e   :  { %12905 = vmatmul.mubr.msk.f32.gmra.mrb[56].mxu1 %vm138_vm2, %v15287_v19 }
 0xa0f   :  { %12907 = vmatprep.mubr.msk.f32.mxu1 %vm15120_vm0, %v15121_v3  ;;  %14426 = vmatpush3.bf16.msra.mxu1 %v14425_v21 }
 0xa10   :  { %14431 = vmatprep.subr.bf16.mxu1 %v15119_v0 }
 0xa12   :  { %12908 = vmatmul.mubr.msk.f32.gmra.mrb[58].mxu1 %vm138_vm2, %v15299_v24 }
 0xa13   :  { %12935 = vmatprep.mubr.msk.f32.mxu1 %vm15120_vm0, %v15121_v3 }
 0xa16   :  { %12936 = vmatmul.mubr.msk.f32.vlgmr.msra.gmra.mrb[60].mxu1 %vm138_vm2, %v15271_v11 }
 0xa17   :  { %12938 = vmatprep.mubr.msk.f32.mxu1 %vm15120_vm0, %v15121_v3 }
 0xa1a   :  { %12939 = vmatmul.mubr.msk.f32.gmra.mrb[62].mxu1 %vm138_vm2, %v15287_v19 }
 0xa1b   :  { %12941 = vmatprep.mubr.msk.f32.mxu1 %vm15120_vm0, %v15121_v3 }
 0xa1e   :  { %12942 = vmatmul.mubr.msk.f32.gmra.mrb[64].mxu1 %vm138_vm2, %v15299_v24 }
 0xa1f   :  { %12965 = vmatprep.mubr.msk.f32.mxu1 %vm15120_vm0, %v15121_v3 }
 0xa8c   :  { %v1717_v26 = vpop.xlane.xlu1 %1716 }
 0xa8d   :  { %14872 = vrcp.f32 %v1717_v26 }
 0xa90   :  { %v1720_v27 = vpop.xlane.xlu0 %1719 }
 0xa91   :  { %14874 = vrcp.f32 %v1720_v27 }
 0xa94   :  { %v1723_v28 = vpop.xlane.xlu1 %1722 }
 0xa95   :  { %14876 = vrcp.f32 %v1723_v28 }
 0xa97   :  { %v14873_v32 = vpop.eup %14872 }
 0xa9b   :  { %v14875_v39 = vpop.eup %14874 }
 0xa9f   :  { %v14877_v44 = vpop.eup %14876 }
 0xad1   :  { %v1805_v33 = vpop.f32.mrb[48].mxu1 }
 0xad2   :  { %v1819_v35 = vmul.f32 %v14873_v32, %v1805_v33  ;;  %v12873_v36 = vpop.f32.mrb[49].mxu1 }
 0xad4   :  { %12885 = vmatmul.mubr.msk.f32.vlgmr.msra.gmra.mrb[54].mxu0 %vm48_vm1, %v1819_v35 }
 0xad5   :  { %v1810_v40 = vpop.f32.mrb[50].mxu1  ;;  %12887 = vmatprep.mubr.msk.f32.mxu0 %vm15120_vm0, %v15121_v3  ;;  %14417 = vmatpush3.bf16.msra.mxu0 %v14416_v34 }
 0xad6   :  { %v1820_v42 = vmul.f32 %v14875_v39, %v1810_v40  ;;  %v12876_v43 = vpop.f32.mrb[51].mxu1  ;;  %14418 = vmatprep.subr.bf16.mxu0 %v15119_v0 }
 0xad8   :  { %12888 = vmatmul.mubr.msk.f32.gmra.mrb[56].mxu0 %vm48_vm1, %v1820_v42 }
 0xad9   :  { %v1815_v45 = vpop.f32.mrb[52].mxu1  ;;  %12890 = vmatprep.mubr.msk.f32.mxu0 %vm15120_vm0, %v15121_v3  ;;  %14420 = vmatpush3.bf16.msra.mxu0 %v14419_v41 }
 0xada   :  { %v1821_v46 = vmul.f32 %v14877_v44, %v1815_v45  ;;  %v12879_v47 = vpop.f32.mrb[53].mxu1  ;;  %14427 = vmatprep.subr.bf16.mxu0 %v15119_v0 }
 0xadc   :  { %12891 = vmatmul.mubr.msk.f32.gmra.mrb[58].mxu0 %vm48_vm1, %v1821_v46 }
 0xadd   :  { %v1988_v48 = vpop.f32.mrb[54].mxu1  ;;  %12918 = vmatprep.mubr.msk.f32.mxu0 %vm15120_vm0, %v15121_v3 }
 0xade   :  { %v12903_v49 = vpop.f32.mrb[55].mxu1 }
 0xadf   :  { %v11384_v49 = vld [vmem:[%s18098_s2 + $0x30] sm:$0xff] }
 0xae0   :  { %12919 = vmatmul.mubr.msk.f32.vlgmr.msra.gmra.mrb[60].mxu0 %vm138_vm2, %v15271_v11 }
 0xae1   :  { %v1993_v50 = vpop.f32.mrb[56].mxu1  ;;  %12921 = vmatprep.mubr.msk.f32.mxu0 %vm15120_vm0, %v15121_v3 }
 0xae2   :  { %v12906_v51 = vpop.f32.mrb[57].mxu1 }
 0xae4   :  { %12922 = vmatmul.mubr.msk.f32.gmra.mrb[62].mxu0 %vm138_vm2, %v15287_v19 }
 0xae5   :  { %v1998_v53 = vpop.f32.mrb[58].mxu1  ;;  %12924 = vmatprep.mubr.msk.f32.mxu0 %vm15120_vm0, %v15121_v3 }
 0xae6   :  { %v12909_v55 = vpop.f32.mrb[59].mxu1 }
 0xae8   :  { %12925 = vmatmul.mubr.msk.f32.gmra.mrb[64].mxu0 %vm138_vm2, %v15299_v24 }
 0xae9   :  { %v2158_v58 = vpop.f32.mrb[60].mxu1  ;;  %12950 = vmatprep.mubr.msk.f32.mxu0 %vm15120_vm0, %v15121_v3 }
 0xaea   :  { %v12937_v11 = vpop.f32.mrb[61].mxu1 }
 0xaed   :  { %v2163_v61 = vpop.f32.mrb[62].mxu1 }
 0xaee   :  { %v14432_v62 = vpack.c.bf16 %v2163_v61, %v2158_v58  ;;  %v12940_v1 = vpop.f32.mrb[63].mxu1 }
 0xaf0   :  { %14433 = vmatpush3.bf16.msra.mxu1 %v14432_v62 }
 0xaf1   :  { %v2168_v4 = vpop.f32.mrb[64].mxu1  ;;  %12963 = vmatprep.subr.mxu1 %v15121_v3 }
 0xaf2   :  { %v12943_v19 = vpop.f32.mrb[65].mxu1 }
 0xaf4   :  { %12964 = vmatpush3.msk.msra.mxu1 %vm596_vm5, %v2168_v4 }
 0xaf5   :  { %14437 = vmatprep.subr.bf16.mxu1 %v15119_v0 }
 0xba7   :  { %v1900_v6 = vpop.f32.mrb[54].mxu0 }
 0xba8   :  { %v15758_v24 = vadd.f32 %v1900_v6, %v15624_v5  ;;  %v12886_v7 = vpop.f32.mrb[55].mxu0 }
 0xbab   :  { %v1905_v9 = vpop.f32.mrb[56].mxu0 }
 0xbac   :  { %v12889_v54 = vpop.f32.mrb[57].mxu0  ;;  %v15761_v13 = vadd.f32 %v1905_v9, %v15626_v52 }
 0xbaf   :  { %v1910_v57 = vpop.f32.mrb[58].mxu0 }
 0xbb0   :  { %v12892_v14 = vpop.f32.mrb[59].mxu0  ;;  %v15764_v16 = vadd.f32 %v1910_v57, %v15628_v12 }
 0xbb3   :  { %v2073_v17 = vpop.f32.mrb[60].mxu0 }
 0xbb4   :  { %v12920_v18 = vpop.f32.mrb[61].mxu0 }
 0xbb7   :  { %v2078_v21 = vpop.f32.mrb[62].mxu0 }
 0xbb8   :  { %v14428_v22 = vpack.c.bf16 %v2078_v21, %v2073_v17  ;;  %v12923_v25 = vpop.f32.mrb[63].mxu0  ;;  %v15815_v17 = vsub.s32 2, %v15252_v56 }
 0xbb9   :  { %v15821_v25 = vld [vmem:[%s18094_s6 + $0x28] sm:$0xff] }
 0xbba   :  { %14430 = vmatpush3.bf16.xpose.msk.msra.mxu0 %vm15324_vm4, %v14428_v22 }
 0xbbb   :  { %v2083_v5 = vpop.f32.mrb[64].mxu0  ;;  %12948 = vmatprep.subr.mxu0 %v15121_v3 }
 0xbbc   :  { %v12926_v23 = vpop.f32.mrb[65].mxu0 }
 0xbc2   :  { %12949 = vmatpush3.xpose.msk.msra.mxu0 %vm48_vm1, %v2083_v5  ;;  %v2496_v5 = vrot.slane %v15821_v25, %v15815_v17 }
 0xbc3   :  { %14434 = vmatprep.subr.bf16.mxu0 %v15119_v0 }
 0xbc5   :  { %12951 = vmatmul.mubr.msk.f32.vlgmr.msra.gmra.mrb[66].mxu0 %vm48_vm1, %v1988_v48 }
 0xbc6   :  { %12953 = vmatprep.mubr.msk.f32.mxu0 %vm15120_vm0, %v15121_v3 }
 0xbc9   :  { %12954 = vmatmul.mubr.msk.f32.gmra.mrb[68].mxu0 %vm48_vm1, %v1993_v50  ;;  %v11385_v50 = vld [vmem:[%s18098_s2 + $0x38] sm:$0xff] }
 0xbca   :  { %12956 = vmatprep.mubr.msk.f32.mxu0 %vm15120_vm0, %v15121_v3  ;;  %v14435_v51 = vpack.c.bf16 %v11385_v50, %v11384_v49  ;;  %v2554_v49 = vld [vmem:[%s18099_s3 + $0x8] sm:$0xff] }
 0xbcc   :  { %14436 = vmatpush3.bf16.msra.mxu0 %v14435_v51  ;;  %v2555_v51 = vld [vmem:[%s18099_s3 + $0x10] sm:$0xff] }
 0xbcd   :  { %12957 = vmatmul.mubr.msk.f32.gmra.mrb[70].mxu0 %vm48_vm1, %v1998_v53  ;;  %14443 = vmatprep.subr.bf16.mxu0 %v15119_v0 }
 0xbce   :  { %12978 = vmatprep.mubr.msk.f32.mxu0 %vm15120_vm0, %v15121_v3 }
 0xc98   :  { %v2256_v52 = vpop.f32.mrb[66].mxu0 }
 0xc99   :  { %v12952_v12 = vpop.f32.mrb[67].mxu0  ;;  %v2257_v26 = vadd.f32 %v2256_v52, %v15400_v59 }
 0xc9b   :  { %v2270_v27 = vsel %vm555_vm6, %v2257_v26, -inf }
 0xc9c   :  { %2271 = vmax.xlane.f32.xlu0 %v2270_v27  ;;  %v2261_v28 = vpop.f32.mrb[68].mxu0 }
 0xc9d   :  { %v12955_v29 = vpop.f32.mrb[69].mxu0  ;;  %v2262_v30 = vadd.f32 %v2261_v28, %v15406_v2 }
 0xc9f   :  { %v2273_v32 = vsel %vm555_vm6, %v2262_v30, -inf }
 0xca0   :  { %2274 = vmax.xlane.f32.xlu1 %v2273_v32  ;;  %v2266_v33 = vpop.f32.mrb[70].mxu0 }
 0xca1   :  { %v12958_v34 = vpop.f32.mrb[71].mxu0  ;;  %v2267_v35 = vadd.f32 %v2266_v33, %v15413_v8 }
 0xca3   :  { %v2276_v36 = vsel %vm562_vm7, %v2267_v35, -inf }
 0xca4   :  { %2277 = vmax.xlane.f32.xlu0 %v2276_v36 }
 0xd29   :  { %v2272_v37 = vpop.xlane.xlu0 %2271 }
 0xd2a   :  { %v2279_v38 = vsub.f32 %v2257_v26, %v2272_v37 }
 0xd2c   :  { %v2282_v59 = vmul.f32 1.442695, %v2279_v38 }
 0xd2d   :  { %v2275_v39 = vpop.xlane.xlu1 %2274 }
 0xd2e   :  { %14878 = vpow2.f32 %v2282_v59  ;;  %v2280_v40 = vsub.f32 %v2262_v30, %v2275_v39 }
 0xd30   :  { %v2284_v41 = vmul.f32 1.442695, %v2280_v40 }
 0xd31   :  { %v2278_v42 = vpop.xlane.xlu0 %2277 }
 0xd32   :  { %14880 = vpow2.f32 %v2284_v41  ;;  %v2281_v2 = vsub.f32 %v2267_v35, %v2278_v42 }
 0xd34   :  { %v2286_v43 = vmul.f32 1.442695, %v2281_v2 }
 0xd36   :  { %14882 = vpow2.f32 %v2286_v43 }
 0xd38   :  { %v14879_v44 = vpop.eup %14878 }
 0xd39   :  { %12966 = vmatmul.mubr.msk.f32.vlgmr.msra.gmra.mrb[66].mxu1 %vm555_vm6, %v14879_v44  ;;  %v2288_v8 = vsel %vm555_vm6, %v14879_v44, 0.0 }
 0xd3a   :  { %2289 = vadd.xlane.f32.xlu1 %v2288_v8  ;;  %12968 = vmatprep.mubr.msk.f32.mxu1 %vm15120_vm0, %v15121_v3 }
 0xd3c   :  { %v14881_v45 = vpop.eup %14880 }
 0xd3d   :  { %12969 = vmatmul.mubr.msk.f32.gmra.mrb[68].mxu1 %vm555_vm6, %v14881_v45  ;;  %v2291_v46 = vsel %vm555_vm6, %v14881_v45, 0.0 }
 0xd3e   :  { %2292 = vadd.xlane.f32.xlu0 %v2291_v46  ;;  %12971 = vmatprep.mubr.msk.f32.mxu1 %vm15120_vm0, %v15121_v3 }
 0xd40   :  { %v14883_v47 = vpop.eup %14882 }
 0xd41   :  { %12972 = vmatmul.mubr.msk.f32.gmra.mrb[70].mxu1 %vm555_vm6, %v14883_v47  ;;  %v2294_v48 = vsel %vm562_vm7, %v14883_v47, 0.0 }
 0xd42   :  { %2295 = vadd.xlane.f32.xlu1 %v2294_v48  ;;  %12995 = vmatprep.mubr.msk.f32.mxu1 %vm15120_vm0, %v15121_v3  ;;  %v2553_v48 = vld [vmem:[%s18099_s3] sm:$0xff] }
 0xd43   :  { %v14438_v50 = vpack.c.bf16 %v2554_v49, %v2553_v48 }
 0xd45   :  { %14439 = vmatpush3.bf16.msra.mxu1 %v14438_v50 }
 0xd46   :  { %14440 = vmatprep.subr.bf16.mxu1 %v15119_v0 }
 0xdc7   :  { %v2290_v53 = vpop.xlane.xlu1 %2289 }
 0xdc8   :  { %14884 = vrcp.f32 %v2290_v53  ;;  %v2556_v53 = vld [vmem:[%s18099_s3 + $0x18] sm:$0xff] }
 0xdcb   :  { %v2293_v55 = vpop.xlane.xlu0 %2292 }
 0xdcc   :  { %14886 = vrcp.f32 %v2293_v55  ;;  %v14441_v55 = vpack.c.bf16 %v2556_v53, %v2555_v51 }
 0xdce   :  { %14442 = vmatpush3.bf16.msra.mxu1 %v14441_v55 }
 0xdcf   :  { %v2296_v58 = vpop.xlane.xlu1 %2295  ;;  %14449 = vmatprep.subr.bf16.mxu1 %v15119_v0 }
 0xdd0   :  { %14888 = vrcp.f32 %v2296_v58 }
 0xdd2   :  { %v14885_v11 = vpop.eup %14884 }
 0xdd6   :  { %v14887_v4 = vpop.eup %14886 }
 0xdda   :  { %v14889_v9 = vpop.eup %14888 }
 0xe0c   :  { %v2378_v61 = vpop.f32.mrb[66].mxu1 }
 0xe0d   :  { %v2392_v62 = vmul.f32 %v14885_v11, %v2378_v61  ;;  %v12967_v1 = vpop.f32.mrb[67].mxu1 }
 0xe0f   :  { %12979 = vmatmul.mubr.msk.f32.vlgmr.msra.gmra.mrb[72].mxu0 %vm48_vm1, %v2392_v62 }
 0xe10   :  { %v2383_v19 = vpop.f32.mrb[68].mxu1  ;;  %12981 = vmatprep.mubr.msk.f32.mxu0 %vm15120_vm0, %v15121_v3 }
 0xe11   :  { %v2393_v6 = vmul.f32 %v14887_v4, %v2383_v19  ;;  %v12970_v7 = vpop.f32.mrb[69].mxu1 }
 0xe12   :  { %v15863_v7 = vsub.s32 3, %v15252_v56 }
 0xe13   :  { %12982 = vmatmul.mubr.msk.f32.gmra.mrb[74].mxu0 %vm48_vm1, %v2393_v6 }
 0xe14   :  { %v2388_v54 = vpop.f32.mrb[70].mxu1  ;;  %12984 = vmatprep.mubr.msk.f32.mxu0 %vm15120_vm0, %v15121_v3 }
 0xe15   :  { %v2394_v57 = vmul.f32 %v14889_v9, %v2388_v54  ;;  %v12973_v14 = vpop.f32.mrb[71].mxu1  ;;  %v15866_v54 = vsub.s32 4, %v15252_v56 }
 0xe17   :  { %12985 = vmatmul.mubr.msk.f32.gmra.mrb[76].mxu0 %vm48_vm1, %v2394_v57  ;;  %v2542_v57 = vrot.slane %v15821_v25, %v15863_v7 }
 0xe18   :  { %13012 = vmatprep.mubr.msk.f32.mxu0 %vm15120_vm0, %v15121_v3 }
 0xee2   :  { %v2473_v18 = vpop.f32.mrb[72].mxu0 }
 0xee3   :  { %v2487_v21 = vadd.f32 %v2473_v18, %v15758_v24  ;;  %v12980_v22 = vpop.f32.mrb[73].mxu0 }
 0xee5   :  { %v2490_v23 = vadd.f32 %v2487_v21, %v15196_v10  ;;  %v2549_v21 = vrot.slane %v15821_v25, %v15866_v54 }
 0xee6   :  { %v2478_v52 = vpop.f32.mrb[74].mxu0 }
 0xee7   :  { %v2488_v12 = vadd.f32 %v2478_v52, %v15761_v13  ;;  %v12983_v26 = vpop.f32.mrb[75].mxu0  ;;  %v15827_v27 = vadd.f32 %v2496_v5, %v2490_v23 }
 0xee9   :  { %v2491_v28 = vadd.f32 %v2488_v12, %v15203_v15  ;;  %v2500_v24 = vsel %vm138_vm2, %v15827_v27, 0.0 }
 0xeea   :  { %2501 = vadd.xlane.f32.xlu0 %v2500_v24  ;;  %v2483_v29 = vpop.f32.mrb[76].mxu0 }
 0xeeb   :  { %v15832_v30 = vadd.f32 %v2496_v5, %v2491_v28  ;;  %v2489_v32 = vadd.f32 %v2483_v29, %v15764_v16  ;;  %v12986_v33 = vpop.f32.mrb[77].mxu0 }
 0xeec   :  { %v2677_v33 = vld [vmem:[%s18100_s4] sm:$0xff] }
 0xeed   :  { %v2492_v34 = vadd.f32 %v2489_v32, %v15210_v20  ;;  %v2503_v13 = vsel %vm138_vm2, %v15832_v30, 0.0 }
 0xeee   :  { %2504 = vadd.xlane.f32.xlu1 %v2503_v13  ;;  %v2679_v13 = vld [vmem:[%s18100_s4 + $0x10] sm:$0xff] }
 0xeef   :  { %v15838_v35 = vadd.f32 %v2496_v5, %v2492_v34  ;;  %v2678_v34 = vld [vmem:[%s18100_s4 + $0x8] sm:$0xff] }
 0xef1   :  { %v2506_v36 = vsel %vm145_vm3, %v15838_v35, 0.0 }
 0xef2   :  { %2507 = vadd.xlane.f32.xlu0 %v2506_v36  ;;  %v14444_v36 = vpack.c.bf16 %v2678_v34, %v2677_v33 }
 0xef4   :  { %14445 = vmatpush3.bf16.msra.mxu0 %v14444_v36 }
 0xef5   :  { %14446 = vmatprep.subr.bf16.mxu0 %v15119_v0 }
 0xf77   :  { %v2502_v37 = vpop.xlane.xlu0 %2501 }
 0xf78   :  { %v2509_v38 = vmul.f32 0.03125, %v2502_v37  ;;  %v2680_v37 = vld [vmem:[%s18100_s4 + $0x18] sm:$0xff] }
 0xf7a   :  { %v2512_v59 = vsub.f32 %v15827_v27, %v2509_v38  ;;  %v14447_v38 = vpack.c.bf16 %v2680_v37, %v2679_v13 }
 0xf7b   :  { %v2505_v39 = vpop.xlane.xlu1 %2504 }
 0xf7c   :  { %v2510_v40 = vmul.f32 0.03125, %v2505_v39  ;;  %v2515_v16 = vmul.f32 %v2512_v59, %v2512_v59  ;;  %14448 = vmatpush3.bf16.msra.mxu0 %v14447_v38 }
 0xf7d   :  { %14455 = vmatprep.subr.bf16.mxu0 %v15119_v0 }
 0xf7e   :  { %v2513_v41 = vsub.f32 %v15832_v30, %v2510_v40  ;;  %v2518_v42 = vsel %vm138_vm2, %v2515_v16, 0.0 }
 0xf7f   :  { %2519 = vadd.xlane.f32.xlu1 %v2518_v42  ;;  %v2508_v2 = vpop.xlane.xlu0 %2507 }
 0xf80   :  { %v2511_v43 = vmul.f32 0.03125, %v2508_v2  ;;  %v2516_v44 = vmul.f32 %v2513_v41, %v2513_v41 }
 0xf82   :  { %v2514_v8 = vsub.f32 %v15838_v35, %v2511_v43  ;;  %v2521_v45 = vsel %vm138_vm2, %v2516_v44, 0.0 }
 0xf83   :  { %2522 = vadd.xlane.f32.xlu0 %v2521_v45 }
 0xf84   :  { %v2517_v46 = vmul.f32 %v2514_v8, %v2514_v8 }
 0xf86   :  { %v2524_v47 = vsel %vm145_vm3, %v2517_v46, 0.0 }
 0xf87   :  { %2525 = vadd.xlane.f32.xlu1 %v2524_v47 }
0x100c   :  { %v2520_v58 = vpop.xlane.xlu1 %2519 }
0x100d   :  { %v2527_v11 = vmul.f32 0.03125, %v2520_v58 }
0x100f   :  { %v2530_v61 = vadd.f32 1e-05, %v2527_v11 }
0x1010   :  { %v2523_v62 = vpop.xlane.xlu0 %2522 }
0x1011   :  { %14890 = vrsqrt.f32 %v2530_v61  ;;  %v2528_v1 = vmul.f32 0.03125, %v2523_v62 }
0x1013   :  { %v2531_v4 = vadd.f32 1e-05, %v2528_v1 }
0x1014   :  { %v2526_v19 = vpop.xlane.xlu1 %2525 }
0x1015   :  { %14892 = vrsqrt.f32 %v2531_v4  ;;  %v2529_v6 = vmul.f32 0.03125, %v2526_v19 }
0x1017   :  { %v2532_v9 = vadd.f32 1e-05, %v2529_v6 }
0x1019   :  { %14894 = vrsqrt.f32 %v2532_v9 }
0x101b   :  { %v14891_v14 = vpop.eup %14890 }
0x101c   :  { %v2536_v18 = vmul.f32 %v14891_v14, %v2512_v59  ;;  %v15896_v59 = vsub.s32 6, %v15252_v56 }
0x101e   :  { %v2543_v22 = vmul.f32 %v2542_v57, %v2536_v18  ;;  %v2560_v39 = vrot.slane %v15821_v25, %v15896_v59 }
0x101f   :  { %v14893_v5 = vpop.eup %14892 }
0x1020   :  { %v2550_v23 = vadd.f32 %v2549_v21, %v2543_v22  ;;  %v2537_v52 = vmul.f32 %v14893_v5, %v2513_v41 }
0x1022   :  { %12996 = vmatmul.mubr.msk.f32.vlgmr.msra.gmra.mrb[72].mxu1 %vm138_vm2, %v2550_v23  ;;  %v2544_v12 = vmul.f32 %v2542_v57, %v2537_v52 }
0x1023   :  { %v14895_v26 = vpop.eup %14894  ;;  %12998 = vmatprep.mubr.msk.f32.mxu1 %vm15120_vm0, %v15121_v3 }
0x1024   :  { %v2551_v28 = vadd.f32 %v2549_v21, %v2544_v12  ;;  %v2538_v24 = vmul.f32 %v14895_v26, %v2514_v8 }
0x1026   :  { %12999 = vmatmul.mubr.msk.f32.gmra.mrb[74].mxu1 %vm138_vm2, %v2551_v28  ;;  %v2545_v29 = vmul.f32 %v2542_v57, %v2538_v24  ;;  %v15910_v28 = vsub.s32 5, %v15252_v56 }
0x1027   :  { %13001 = vmatprep.mubr.msk.f32.mxu1 %vm15120_vm0, %v15121_v3 }
0x1028   :  { %v2552_v32 = vadd.f32 %v2549_v21, %v2545_v29  ;;  %v2776_v24 = vrot.slane %v15821_v25, %v15910_v28 }
0x102a   :  { %13002 = vmatmul.mubr.msk.f32.gmra.mrb[76].mxu1 %vm138_vm2, %v2552_v32 }
0x102b   :  { %13029 = vmatprep.mubr.msk.f32.mxu1 %vm15120_vm0, %v15121_v3 }
0x10f5   :  { %v2636_v40 = vpop.f32.mrb[72].mxu1 }
0x10f6   :  { %v2637_v16 = vadd.f32 %v2636_v40, %v2560_v39  ;;  %v12997_v41 = vpop.f32.mrb[73].mxu1 }
0x10f8   :  { %v2653_v42 = vmul.f32 0.044715, %v2637_v16  ;;  %v2650_v9 = vmul.f32 0.5, %v2637_v16 }
0x10f9   :  { %v2641_v2 = vpop.f32.mrb[74].mxu1 }
0x10fa   :  { %v2656_v43 = vmul.f32 %v2653_v42, %v2637_v16  ;;  %v2642_v44 = vadd.f32 %v2641_v2, %v2560_v39  ;;  %v13000_v8 = vpop.f32.mrb[75].mxu1 }
0x10fc   :  { %v2659_v45 = vmul.f32 %v2656_v43, %v2637_v16  ;;  %v2654_v46 = vmul.f32 0.044715, %v2642_v44  ;;  %v2651_v21 = vmul.f32 0.5, %v2642_v44 }
0x10fd   :  { %v2646_v47 = vpop.f32.mrb[76].mxu1 }
0x10fe   :  { %v2662_v48 = vadd.f32 %v2659_v45, %v2637_v16  ;;  %v2657_v49 = vmul.f32 %v2654_v46, %v2642_v44  ;;  %v2647_v50 = vadd.f32 %v2646_v47, %v2560_v39  ;;  %v13003_v51 = vpop.f32.mrb[77].mxu1 }
0x1100   :  { %v2665_v53 = vmul.f32 0.7978846, %v2662_v48  ;;  %v2660_v55 = vmul.f32 %v2657_v49, %v2642_v44  ;;  %v2655_v58 = vmul.f32 0.044715, %v2647_v50  ;;  %v2652_v52 = vmul.f32 0.5, %v2647_v50 }
0x1102   :  { %14896 = vtanh.f32 %v2665_v53  ;;  %v2663_v11 = vadd.f32 %v2660_v55, %v2642_v44  ;;  %v2658_v61 = vmul.f32 %v2655_v58, %v2647_v50  ;;  %v11395_v58 = vld [vmem:[%s18096_s1 + $0x180] sm:$0xff] }
0x1104   :  { %v2661_v62 = vmul.f32 %v2658_v61, %v2647_v50  ;;  %v2666_v1 = vmul.f32 0.7978846, %v2663_v11  ;;  %v11396_v11 = vld [vmem:[%s18096_s1 + $0x188] sm:$0xff]  ;;  %v11402_v61 = vld [vmem:[%s18096_s1 + $0x200] sm:$0xff] }
0x1106   :  { %v2664_v4 = vadd.f32 %v2661_v62, %v2647_v50  ;;  %14898 = vtanh.f32 %v2666_v1  ;;  %v14450_v62 = vpack.c.bf16 %v11396_v11, %v11395_v58  ;;  %v11403_v1 = vld [vmem:[%s18096_s1 + $0x208] sm:$0xff] }
0x1108   :  { %v2667_v19 = vmul.f32 0.7978846, %v2664_v4  ;;  %v14456_v4 = vpack.c.bf16 %v11403_v1, %v11402_v61  ;;  %14451 = vmatpush3.bf16.msra.mxu1 %v14450_v62 }
0x1109   :  { %14452 = vmatprep.subr.bf16.mxu1 %v15119_v0 }
0x110a   :  { %14900 = vtanh.f32 %v2667_v19  ;;  %v11397_v19 = vld [vmem:[%s18096_s1 + $0x190] sm:$0xff] }
0x110c   :  { %v14897_v6 = vpop.eup %14896 }
0x110d   :  { %v2671_v57 = vadd.f32 1.0, %v14897_v6  ;;  %v11398_v6 = vld [vmem:[%s18096_s1 + $0x198] sm:$0xff] }
0x110f   :  { %v2674_v14 = vmul.f32 %v2671_v57, %v2650_v9  ;;  %v11404_v9 = vld [vmem:[%s18096_s1 + $0x210] sm:$0xff]  ;;  %v14453_v57 = vpack.c.bf16 %v11398_v6, %v11397_v19 }
0x1110   :  { %v14899_v18 = vpop.eup %14898 }
0x1111   :  { %13013 = vmatmul.mubr.msk.f32.vlgmr.msra.gmra.mrb[78].mxu0 %vm138_vm2, %v2674_v14  ;;  %v2672_v22 = vadd.f32 1.0, %v14899_v18  ;;  %v11405_v14 = vld [vmem:[%s18096_s1 + $0x218] sm:$0xff]  ;;  %14454 = vmatpush3.bf16.msra.mxu1 %v14453_v57 }
0x1112   :  { %13015 = vmatprep.mubr.msk.f32.mxu0 %vm15120_vm0, %v15121_v3  ;;  %14457 = vmatpush3.bf16.msra.mxu0 %v14456_v4  ;;  %v14459_v18 = vpack.c.bf16 %v11405_v14, %v11404_v9  ;;  %v11428_v14 = vld [vmem:[%s18096_s1 + $0x1a0] sm:$0xff] }
0x1113   :  { %v2675_v5 = vmul.f32 %v2672_v22, %v2651_v21  ;;  %14458 = vmatprep.subr.bf16.mxu0 %v15119_v0  ;;  %14461 = vmatprep.subr.bf16.mxu1 %v15119_v0 }
0x1114   :  { %v14901_v23 = vpop.eup %14900 }
0x1115   :  { %13016 = vmatmul.mubr.msk.f32.gmra.mrb[80].mxu0 %vm138_vm2, %v2675_v5  ;;  %v2673_v12 = vadd.f32 1.0, %v14901_v23 }
0x1116   :  { %13018 = vmatprep.mubr.msk.f32.mxu0 %vm15120_vm0, %v15121_v3  ;;  %14460 = vmatpush3.bf16.msra.mxu0 %v14459_v18  ;;  %v11429_v18 = vld [vmem:[%s18096_s1 + $0x1a8] sm:$0xff] }
0x1117   :  { %v2676_v26 = vmul.f32 %v2673_v12, %v2652_v52  ;;  %14467 = vmatprep.subr.bf16.mxu0 %v15119_v0 }
0x1119   :  { %13019 = vmatmul.mubr.msk.f32.gmra.mrb[82].mxu0 %vm138_vm2, %v2676_v26 }
0x111a   :  { %13046 = vmatprep.mubr.msk.f32.mxu0 %vm15120_vm0, %v15121_v3 }
0x11e4   :  { %v2756_v29 = vpop.f32.mrb[78].mxu0 }
0x11e5   :  { %v2770_v32 = vadd.f32 %v2756_v29, %v15827_v27  ;;  %v13014_v33 = vpop.f32.mrb[79].mxu0  ;;  %v32_v29 = vld [vmem:[%s18094_s6 + $0x30] sm:$0xff] }
0x11e6   :  { %v2822_v33 = vrot.slane %v32_v29, %v15255_v60 }
0x11e7   :  { %v15915_v34 = vadd.f32 %v2776_v24, %v2770_v32 }
0x11e8   :  { %v2761_v13 = vpop.f32.mrb[80].mxu0 }
0x11e9   :  { %v2771_v36 = vadd.f32 %v2761_v13, %v15832_v30  ;;  %v13017_v37 = vpop.f32.mrb[81].mxu0  ;;  %v2780_v38 = vsel %vm138_vm2, %v15915_v34, 0.0 }
0x11ea   :  { %2781 = vadd.xlane.f32.xlu0 %v2780_v38  ;;  %v11409_v38 = vld [vmem:[%s18096_s1 + $0x280] sm:$0xff] }
0x11eb   :  { %v15920_v39 = vadd.f32 %v2776_v24, %v2771_v36  ;;  %v2829_v36 = vrot.slane %v32_v29, %v15261_v63 }
0x11ec   :  { %v2766_v40 = vpop.f32.mrb[82].mxu0 }
0x11ed   :  { %v2772_v16 = vadd.f32 %v2766_v40, %v15838_v35  ;;  %v13020_v25 = vpop.f32.mrb[83].mxu0  ;;  %v2783_v27 = vsel %vm138_vm2, %v15920_v39, 0.0  ;;  %v11410_v40 = vld [vmem:[%s18096_s1 + $0x288] sm:$0xff] }
0x11ee   :  { %2784 = vadd.xlane.f32.xlu1 %v2783_v27 }
0x11ef   :  { %v15925_v41 = vadd.f32 %v2776_v24, %v2772_v16 }
0x11f1   :  { %v2786_v30 = vsel %vm145_vm3, %v15925_v41, 0.0 }
0x11f2   :  { %2787 = vadd.xlane.f32.xlu0 %v2786_v30 }
0x1277   :  { %v2782_v42 = vpop.xlane.xlu0 %2781 }
0x1278   :  { %v2789_v2 = vmul.f32 0.03125, %v2782_v42  ;;  %v14462_v42 = vpack.c.bf16 %v11410_v40, %v11409_v38 }
0x127a   :  { %v2792_v43 = vsub.f32 %v15915_v34, %v2789_v2  ;;  %v11411_v2 = vld [vmem:[%s18096_s1 + $0x290] sm:$0xff] }
0x127b   :  { %v2785_v44 = vpop.xlane.xlu1 %2784 }
0x127c   :  { %v2790_v8 = vmul.f32 0.03125, %v2785_v44  ;;  %v2795_v45 = vmul.f32 %v2792_v43, %v2792_v43 }
0x127e   :  { %v2793_v35 = vsub.f32 %v15920_v39, %v2790_v8  ;;  %v2798_v46 = vsel %vm138_vm2, %v2795_v45, 0.0 }
0x127f   :  { %2799 = vadd.xlane.f32.xlu1 %v2798_v46  ;;  %v2788_v47 = vpop.xlane.xlu0 %2787 }
0x1280   :  { %v2791_v48 = vmul.f32 0.03125, %v2788_v47  ;;  %v2796_v49 = vmul.f32 %v2793_v35, %v2793_v35 }
0x1282   :  { %v2794_v50 = vsub.f32 %v15925_v41, %v2791_v48  ;;  %v2801_v51 = vsel %vm138_vm2, %v2796_v49, 0.0 }
0x1283   :  { %2802 = vadd.xlane.f32.xlu0 %v2801_v51 }
0x1284   :  { %v2797_v53 = vmul.f32 %v2794_v50, %v2794_v50 }
0x1286   :  { %v2804_v55 = vsel %vm145_vm3, %v2797_v53, 0.0 }
0x1287   :  { %2805 = vadd.xlane.f32.xlu1 %v2804_v55 }
0x130c   :  { %v2800_v21 = vpop.xlane.xlu1 %2799 }
0x130d   :  { %v2807_v22 = vmul.f32 0.03125, %v2800_v21 }
0x130f   :  { %v2810_v5 = vadd.f32 1e-05, %v2807_v22  ;;  %v14475_v22 = vpack.c.bf16 %v11429_v18, %v11428_v14 }
0x1310   :  { %v2803_v23 = vpop.xlane.xlu0 %2802 }
0x1311   :  { %14902 = vrsqrt.f32 %v2810_v5  ;;  %v2808_v52 = vmul.f32 0.03125, %v2803_v23 }
0x1313   :  { %v2811_v12 = vadd.f32 1e-05, %v2808_v52  ;;  %v11430_v52 = vld [vmem:[%s18096_s1 + $0x1b0] sm:$0xff] }
0x1314   :  { %v2806_v26 = vpop.xlane.xlu1 %2805 }
0x1315   :  { %14904 = vrsqrt.f32 %v2811_v12  ;;  %v2809_v24 = vmul.f32 0.03125, %v2806_v26  ;;  %v11431_v12 = vld [vmem:[%s18096_s1 + $0x1b8] sm:$0xff] }
0x1317   :  { %v2812_v32 = vadd.f32 1e-05, %v2809_v24  ;;  %v14478_v24 = vpack.c.bf16 %v11431_v12, %v11430_v52 }
0x1319   :  { %14906 = vrsqrt.f32 %v2812_v32  ;;  %v11442_v32 = vld [vmem:[%s18096_s1 + $0x2a0] sm:$0xff] }
0x131b   :  { %v14903_v13 = vpop.eup %14902 }
0x131c   :  { %v2816_v37 = vmul.f32 %v14903_v13, %v2792_v43  ;;  %v11412_v43 = vld [vmem:[%s18096_s1 + $0x298] sm:$0xff] }
0x131d   :  { %v14465_v46 = vpack.c.bf16 %v11412_v43, %v11411_v2  ;;  %v16103_v43 = vld [vmem:[%s18097_s5 + $0x8] sm:$0xff] }
0x131e   :  { %v2823_v16 = vmul.f32 %v2822_v33, %v2816_v37  ;;  %v11445_v37 = vld [vmem:[%s18096_s1 + $0x2b8] sm:$0xff] }
0x131f   :  { %v14905_v25 = vpop.eup %14904 }
0x1320   :  { %v15974_v27 = vadd.f32 %v2829_v36, %v2823_v16  ;;  %v2817_v30 = vmul.f32 %v14905_v25, %v2793_v35  ;;  %v16096_v16 = vld [vmem:[%s18097_s5] sm:$0xff] }
0x1322   :  { %v2824_v44 = vmul.f32 %v2822_v33, %v2817_v30  ;;  %13030 = vmatmul.mubr.msk.f32.vlgmr.msra.gmra.mrb[78].mxu1 %vm138_vm2, %v15974_v27  ;;  %13047 = vmatmul.mubr.msk.f32.vlgmr.msra.gmra.mrb[84].mxu0 %vm138_vm2, %v15974_v27 }
0x1323   :  { %v14907_v8 = vpop.eup %14906  ;;  %13032 = vmatprep.mubr.msk.f32.mxu1 %vm15120_vm0, %v15121_v3  ;;  %13049 = vmatprep.mubr.msk.f32.mxu0 %vm15120_vm0, %v15121_v3 }
0x1324   :  { %v15990_v45 = vadd.f32 %v2829_v36, %v2824_v44  ;;  %v2818_v35 = vmul.f32 %v14907_v8, %v2794_v50  ;;  %14463 = vmatpush3.bf16.msra.mxu1 %v14462_v42 }
0x1325   :  { %14464 = vmatprep.subr.bf16.mxu1 %v15119_v0 }
0x1326   :  { %v2825_v47 = vmul.f32 %v2822_v33, %v2818_v35  ;;  %13033 = vmatmul.mubr.msk.f32.gmra.mrb[80].mxu1 %vm138_vm2, %v15990_v45  ;;  %13050 = vmatmul.mubr.msk.f32.gmra.mrb[86].mxu0 %vm138_vm2, %v15990_v45  ;;  %v11443_v33 = vld [vmem:[%s18096_s1 + $0x2a8] sm:$0xff] }
0x1327   :  { %13035 = vmatprep.mubr.msk.f32.mxu1 %vm15120_vm0, %v15121_v3  ;;  %13052 = vmatprep.mubr.msk.f32.mxu0 %vm15120_vm0, %v15121_v3  ;;  %v14487_v13 = vpack.c.bf16 %v11443_v33, %v11442_v32 }
0x1328   :  { %v16001_v48 = vadd.f32 %v2829_v36, %v2825_v47  ;;  %14466 = vmatpush3.bf16.msra.mxu1 %v14465_v46  ;;  %v11444_v36 = vld [vmem:[%s18096_s1 + $0x2b0] sm:$0xff] }
0x1329   :  { %14471 = vmatprep.subr.bf16.mxu1 %v15119_v0  ;;  %v14490_v38 = vpack.c.bf16 %v11445_v37, %v11444_v36  ;;  %v16110_v47 = vld [vmem:[%s18097_s5 + $0x10] sm:$0x3]  ;;  %v11438_v36 = vld [vmem:[%s18096_s1 + $0x238] sm:$0xff] }
0x132a   :  { %13036 = vmatmul.mubr.msk.f32.gmra.mrb[82].mxu1 %vm138_vm2, %v16001_v48  ;;  %13053 = vmatmul.mubr.msk.f32.gmra.mrb[88].mxu0 %vm138_vm2, %v16001_v48 }
0x132b   :  { %13063 = vmatprep.mubr.msk.f32.mxu1 %vm15120_vm0, %v15121_v3  ;;  %13078 = vmatprep.mubr.msk.f32.mxu0 %vm15120_vm0, %v15121_v3 }
0x132e   :  { %13064 = vmatmul.mubr.msk.f32.vlgmr.msra.gmra.mrb[84].mxu1 %vm138_vm2, %v15974_v27 }
0x132f   :  { %13066 = vmatprep.mubr.msk.f32.mxu1 %vm15120_vm0, %v15121_v3 }
0x1332   :  { %13067 = vmatmul.mubr.msk.f32.gmra.mrb[86].mxu1 %vm138_vm2, %v15990_v45 }
0x1333   :  { %13069 = vmatprep.mubr.msk.f32.mxu1 %vm15120_vm0, %v15121_v3 }
0x1336   :  { %13070 = vmatmul.mubr.msk.f32.gmra.mrb[88].mxu1 %vm138_vm2, %v16001_v48 }
0x1337   :  { %13093 = vmatprep.mubr.msk.f32.mxu1 %vm15120_vm0, %v15121_v3 }
0x13f5   :  { %v2913_v49 = vpop.f32.mrb[78].mxu1  ;;  %v2998_v50 = vpop.f32.mrb[84].mxu0 }
0x13f6   :  { %v13031_v51 = vpop.f32.mrb[79].mxu1  ;;  %v13048_v53 = vpop.f32.mrb[85].mxu0 }
0x13f9   :  { %v2918_v55 = vpop.f32.mrb[80].mxu1  ;;  %v3003_v58 = vpop.f32.mrb[86].mxu0 }
0x13fa   :  { %v14468_v11 = vpack.c.bf16 %v3003_v58, %v2998_v50  ;;  %v13034_v61 = vpop.f32.mrb[81].mxu1  ;;  %v13051_v62 = vpop.f32.mrb[87].mxu0 }
0x13fc   :  { %14470 = vmatpush3.bf16.xpose.msk.msra.mxu0 %vm15324_vm4, %v14468_v11 }
0x13fd   :  { %v2923_v1 = vpop.f32.mrb[82].mxu1  ;;  %v3008_v4 = vpop.f32.mrb[88].mxu0  ;;  %13076 = vmatprep.subr.mxu0 %v15121_v3 }
0x13fe   :  { %v13037_v19 = vpop.f32.mrb[83].mxu1  ;;  %v13054_v6 = vpop.f32.mrb[89].mxu0 }
0x1401   :  { %v3083_v9 = vpop.f32.mrb[84].mxu1 }
0x1402   :  { %v13065_v57 = vpop.f32.mrb[85].mxu1 }
0x1404   :  { %13077 = vmatpush3.xpose.msk.msra.mxu0 %vm48_vm1, %v3008_v4 }
0x1405   :  { %v3088_v21 = vpop.f32.mrb[86].mxu1  ;;  %14474 = vmatprep.subr.bf16.mxu0 %v15119_v0 }
0x1406   :  { %v14472_v5 = vpack.c.bf16 %v3088_v21, %v3083_v9  ;;  %v13068_v23 = vpop.f32.mrb[87].mxu1 }
0x1407   :  { %13079 = vmatmul.mubr.msk.f32.vlgmr.msra.gmra.mrb[90].mxu0 %vm48_vm1, %v2913_v49 }
0x1408   :  { %14473 = vmatpush3.bf16.msra.mxu1 %v14472_v5  ;;  %13081 = vmatprep.mubr.msk.f32.mxu0 %vm15120_vm0, %v15121_v3 }
0x1409   :  { %v3093_v26 = vpop.f32.mrb[88].mxu1  ;;  %13091 = vmatprep.subr.mxu1 %v15121_v3  ;;  %14476 = vmatpush3.bf16.msra.mxu0 %v14475_v22 }
0x140a   :  { %v13071_v29 = vpop.f32.mrb[89].mxu1  ;;  %14477 = vmatprep.subr.bf16.mxu0 %v15119_v0 }
0x140b   :  { %13082 = vmatmul.mubr.msk.f32.gmra.mrb[92].mxu0 %vm48_vm1, %v2918_v55  ;;  %v11436_v29 = vld [vmem:[%s18096_s1 + $0x228] sm:$0xff] }
0x140c   :  { %13092 = vmatpush3.msk.msra.mxu1 %vm596_vm5, %v3093_v26  ;;  %13084 = vmatprep.mubr.msk.f32.mxu0 %vm15120_vm0, %v15121_v3 }
0x140d   :  { %14479 = vmatpush3.bf16.msra.mxu0 %v14478_v24  ;;  %14480 = vmatprep.subr.bf16.mxu1 %v15119_v0  ;;  %v11435_v24 = vld [vmem:[%s18096_s1 + $0x220] sm:$0xff] }
0x140e   :  { %14486 = vmatprep.subr.bf16.mxu0 %v15119_v0  ;;  %v14481_v33 = vpack.c.bf16 %v11436_v29, %v11435_v24 }
0x140f   :  { %13085 = vmatmul.mubr.msk.f32.gmra.mrb[94].mxu0 %vm48_vm1, %v2923_v1 }
0x1410   :  { %13110 = vmatprep.mubr.msk.f32.mxu0 %vm15120_vm0, %v15121_v3 }
0x1413   :  { %13111 = vmatmul.mubr.msk.f32.vlgmr.msra.gmra.mrb[96].mxu0 %vm138_vm2, %v15974_v27 }
0x1414   :  { %13113 = vmatprep.mubr.msk.f32.mxu0 %vm15120_vm0, %v15121_v3  ;;  %14488 = vmatpush3.bf16.msra.mxu0 %v14487_v13  ;;  %v11437_v13 = vld [vmem:[%s18096_s1 + $0x230] sm:$0xff] }
0x1415   :  { %14489 = vmatprep.subr.bf16.mxu0 %v15119_v0 }
0x1417   :  { %13114 = vmatmul.mubr.msk.f32.gmra.mrb[98].mxu0 %vm138_vm2, %v15990_v45 }
0x1418   :  { %13116 = vmatprep.mubr.msk.f32.mxu0 %vm15120_vm0, %v15121_v3  ;;  %14491 = vmatpush3.bf16.msra.mxu0 %v14490_v38  ;;  %v14484_v38 = vpack.c.bf16 %v11438_v36, %v11437_v13 }
0x1419   :  { %14496 = vmatprep.subr.bf16.mxu0 %v15119_v0 }
0x141b   :  { %13117 = vmatmul.mubr.msk.f32.gmra.mrb[100].mxu0 %vm138_vm2, %v16001_v48 }
0x141c   :  { %13144 = vmatprep.mubr.msk.f32.mxu0 %vm15120_vm0, %v15121_v3 }
0x141f   :  { %13145 = vmatmul.mubr.msk.f32.vlgmr.msra.gmra.mrb[102].mxu0 %vm138_vm2, %v15974_v27 }
0x1420   :  { %13147 = vmatprep.mubr.msk.f32.mxu0 %vm15120_vm0, %v15121_v3 }
0x1423   :  { %13148 = vmatmul.mubr.msk.f32.gmra.mrb[104].mxu0 %vm138_vm2, %v15990_v45 }
0x1424   :  { %13150 = vmatprep.mubr.msk.f32.mxu0 %vm15120_vm0, %v15121_v3 }
0x1427   :  { %13151 = vmatmul.mubr.msk.f32.gmra.mrb[106].mxu0 %vm138_vm2, %v16001_v48 }
0x1428   :  { %13174 = vmatprep.mubr.msk.f32.mxu0 %vm15120_vm0, %v15121_v3 }
0x14da   :  { %v3181_v40 = vpop.f32.mrb[90].mxu0 }
0x14db   :  { %v3182_v25 = vadd.f32 %v16096_v16, %v3181_v40  ;;  %v13080_v30 = vpop.f32.mrb[91].mxu0 }
0x14dd   :  { %v3195_v42 = vsel %vm555_vm6, %v3182_v25, -inf }
0x14de   :  { %3196 = vmax.xlane.f32.xlu0 %v3195_v42  ;;  %v3186_v2 = vpop.f32.mrb[92].mxu0 }
0x14df   :  { %v3187_v44 = vadd.f32 %v16103_v43, %v3186_v2  ;;  %v13083_v8 = vpop.f32.mrb[93].mxu0 }
0x14e1   :  { %v3198_v35 = vsel %vm555_vm6, %v3187_v44, -inf }
0x14e2   :  { %3199 = vmax.xlane.f32.xlu1 %v3198_v35  ;;  %v3191_v46 = vpop.f32.mrb[94].mxu0 }
0x14e3   :  { %v3192_v49 = vadd.f32 %v16110_v47, %v3191_v46  ;;  %v13086_v50 = vpop.f32.mrb[95].mxu0 }
0x14e5   :  { %v3201_v51 = vsel %vm562_vm7, %v3192_v49, -inf }
0x14e6   :  { %3202 = vmax.xlane.f32.xlu0 %v3201_v51  ;;  %v16114_v53 = vpop.f32.mrb[96].mxu0 }
0x14e7   :  { %v13112_v55 = vpop.f32.mrb[97].mxu0 }
0x14ea   :  { %v16116_v58 = vpop.f32.mrb[98].mxu0 }
0x14eb   :  { %v13115_v11 = vpop.f32.mrb[99].mxu0 }
0x14ee   :  { %v16118_v61 = vpop.f32.mrb[100].mxu0 }
0x14ef   :  { %v13118_v62 = vpop.f32.mrb[101].mxu0 }
0x14f2   :  { %v3564_v1 = vpop.f32.mrb[102].mxu0 }
0x14f3   :  { %v13146_v4 = vpop.f32.mrb[103].mxu0 }
0x14f6   :  { %v3569_v19 = vpop.f32.mrb[104].mxu0 }
0x14f7   :  { %v14497_v6 = vpack.c.bf16 %v3569_v19, %v3564_v1  ;;  %v13149_v9 = vpop.f32.mrb[105].mxu0 }
0x14f9   :  { %14498 = vmatpush3.bf16.msra.mxu0 %v14497_v6 }
0x14fa   :  { %v3574_v57 = vpop.f32.mrb[106].mxu0  ;;  %13172 = vmatprep.subr.mxu0 %v15121_v3 }
0x14fb   :  { %v13152_v14 = vpop.f32.mrb[107].mxu0 }
0x14fd   :  { %13173 = vmatpush3.msk.msra.mxu0 %vm596_vm5, %v3574_v57 }
0x14fe   :  { %14502 = vmatprep.subr.bf16.mxu0 %v15119_v0 }
0x156b   :  { %v3197_v18 = vpop.xlane.xlu0 %3196 }
0x156c   :  { %v3204_v21 = vsub.f32 %v3182_v25, %v3197_v18 }
0x156e   :  { %v3207_v22 = vmul.f32 1.442695, %v3204_v21 }
0x156f   :  { %v3200_v5 = vpop.xlane.xlu1 %3199 }
0x1570   :  { %14908 = vpow2.f32 %v3207_v22  ;;  %v3205_v23 = vsub.f32 %v3187_v44, %v3200_v5 }
0x1572   :  { %v3209_v52 = vmul.f32 1.442695, %v3205_v23 }
0x1573   :  { %v3203_v12 = vpop.xlane.xlu0 %3202 }
0x1574   :  { %14910 = vpow2.f32 %v3209_v52  ;;  %v3206_v26 = vsub.f32 %v3192_v49, %v3203_v12 }
0x1576   :  { %v3211_v32 = vmul.f32 1.442695, %v3206_v26 }
0x1578   :  { %14912 = vpow2.f32 %v3211_v32 }
0x157a   :  { %v14909_v37 = vpop.eup %14908 }
0x157b   :  { %13094 = vmatmul.mubr.msk.f32.vlgmr.msra.gmra.mrb[90].mxu1 %vm555_vm6, %v14909_v37  ;;  %v3213_v21 = vsel %vm555_vm6, %v14909_v37, 0.0 }
0x157c   :  { %13096 = vmatprep.mubr.msk.f32.mxu1 %vm15120_vm0, %v15121_v3  ;;  %14482 = vmatpush3.bf16.msra.mxu1 %v14481_v33 }
0x157d   :  { %14483 = vmatprep.subr.bf16.mxu1 %v15119_v0 }
0x157e   :  { %v14911_v40 = vpop.eup %14910 }
0x157f   :  { %13097 = vmatmul.mubr.msk.f32.gmra.mrb[92].mxu1 %vm555_vm6, %v14911_v40  ;;  %v3216_v23 = vsel %vm555_vm6, %v14911_v40, 0.0  ;;  %v11427_v40 = vld [vmem:[%s18098_s2 + $0x48] sm:$0xff] }
0x1580   :  { %13099 = vmatprep.mubr.msk.f32.mxu1 %vm15120_vm0, %v15121_v3  ;;  %14485 = vmatpush3.bf16.msra.mxu1 %v14484_v38  ;;  %v11426_v38 = vld [vmem:[%s18098_s2 + $0x40] sm:$0xff] }
0x1581   :  { %14492 = vmatprep.subr.bf16.mxu1 %v15119_v0 }
0x1582   :  { %v14913_v25 = vpop.eup %14912 }
0x1583   :  { %13100 = vmatmul.mubr.msk.f32.gmra.mrb[94].mxu1 %vm555_vm6, %v14913_v25  ;;  %v3219_v5 = vsel %vm562_vm7, %v14913_v25, 0.0 }
0x1584   :  { %13127 = vmatprep.mubr.msk.f32.mxu1 %vm15120_vm0, %v15121_v3 }
0x1587   :  { %13128 = vmatmul.mubr.msk.f32.vlgmr.msra.gmra.mrb[96].mxu1 %vm138_vm2, %v15974_v27 }
0x1588   :  { %13130 = vmatprep.mubr.msk.f32.mxu1 %vm15120_vm0, %v15121_v3 }
0x158b   :  { %13131 = vmatmul.mubr.msk.f32.gmra.mrb[98].mxu1 %vm138_vm2, %v15990_v45 }
0x158c   :  { %13133 = vmatprep.mubr.msk.f32.mxu1 %vm15120_vm0, %v15121_v3 }
0x158f   :  { %13134 = vmatmul.mubr.msk.f32.gmra.mrb[100].mxu1 %vm138_vm2, %v16001_v48 }
0x1590   :  { %13159 = vmatprep.mubr.msk.f32.mxu1 %vm15120_vm0, %v15121_v3 }
0x164e   :  { %v16158_v30 = vpop.f32.mrb[90].mxu1 }
0x164f   :  { %v13095_v42 = vpop.f32.mrb[91].mxu1 }
0x1650   :  { %v14503_v42 = vpack.c.bf16 %v11427_v40, %v11426_v38 }
0x1652   :  { %v16160_v2 = vpop.f32.mrb[92].mxu1 }
0x1653   :  { %v13098_v44 = vpop.f32.mrb[93].mxu1 }
0x1656   :  { %v16162_v8 = vpop.f32.mrb[94].mxu1 }
0x1657   :  { %v13101_v35 = vpop.f32.mrb[95].mxu1 }
0x165a   :  { %v3479_v46 = vpop.f32.mrb[96].mxu1 }
0x165b   :  { %v13129_v49 = vpop.f32.mrb[97].mxu1 }
0x165e   :  { %v3484_v50 = vpop.f32.mrb[98].mxu1 }
0x165f   :  { %v14493_v51 = vpack.c.bf16 %v3484_v50, %v3479_v46  ;;  %v13132_v55 = vpop.f32.mrb[99].mxu1 }
0x1660   :  { %v11474_v55 = vld [vmem:[%s18096_s1 + $0x240] sm:$0xff] }
0x1661   :  { %14495 = vmatpush3.bf16.xpose.msk.msra.mxu1 %vm15324_vm4, %v14493_v51 }
0x1662   :  { %v3489_v11 = vpop.f32.mrb[100].mxu1  ;;  %13157 = vmatprep.subr.mxu1 %v15121_v3 }
0x1663   :  { %v13135_v62 = vpop.f32.mrb[101].mxu1 }
0x1669   :  { %13158 = vmatpush3.xpose.msk.msra.mxu1 %vm48_vm1, %v3489_v11  ;;  %v11475_v11 = vld [vmem:[%s18096_s1 + $0x248] sm:$0xff] }
0x166a   :  { %14499 = vmatprep.subr.bf16.mxu1 %v15119_v0 }
0x166c   :  { %13160 = vmatmul.mubr.msk.f32.vlgmr.msra.gmra.mrb[102].mxu1 %vm48_vm1, %v16114_v53 }
0x166d   :  { %13162 = vmatprep.mubr.msk.f32.mxu1 %vm15120_vm0, %v15121_v3 }
0x1670   :  { %13163 = vmatmul.mubr.msk.f32.gmra.mrb[104].mxu1 %vm48_vm1, %v16116_v58 }
0x1671   :  { %13165 = vmatprep.mubr.msk.f32.mxu1 %vm15120_vm0, %v15121_v3 }
0x1674   :  { %13166 = vmatmul.mubr.msk.f32.gmra.mrb[106].mxu1 %vm48_vm1, %v16118_v61 }
0x1675   :  { %13187 = vmatprep.mubr.msk.f32.mxu1 %vm15120_vm0, %v15121_v3 }
0x173f   :  { %v3662_v1 = vpop.f32.mrb[102].mxu1 }
0x1740   :  { %v3663_v4 = vadd.f32 %v16096_v16, %v3662_v1  ;;  %v13161_v19 = vpop.f32.mrb[103].mxu1 }
0x1742   :  { %v3676_v53 = vsel %vm555_vm6, %v3663_v4, -inf }
0x1743   :  { %3677 = vmax.xlane.f32.xlu1 %v3676_v53  ;;  %v3667_v6 = vpop.f32.mrb[104].mxu1  ;;  %v11476_v53 = vld [vmem:[%s18096_s1 + $0x250] sm:$0xff] }
0x1744   :  { %v3668_v9 = vadd.f32 %v16103_v43, %v3667_v6  ;;  %v13164_v58 = vpop.f32.mrb[105].mxu1  ;;  %v11477_v6 = vld [vmem:[%s18096_s1 + $0x258] sm:$0xff] }
0x1745   :  { %v14515_v58 = vpack.c.bf16 %v11477_v6, %v11476_v53 }
0x1746   :  { %v3679_v57 = vsel %vm555_vm6, %v3668_v9, -inf }
0x1747   :  { %3680 = vmax.xlane.f32.xlu0 %v3679_v57  ;;  %v3672_v14 = vpop.f32.mrb[106].mxu1 }
0x1748   :  { %v3673_v61 = vadd.f32 %v16110_v47, %v3672_v14  ;;  %v13167_v18 = vpop.f32.mrb[107].mxu1 }
0x174a   :  { %v3682_v22 = vsel %vm562_vm7, %v3673_v61, -inf }
0x174b   :  { %3214 = vadd.xlane.f32.xlu0 %v3213_v21  ;;  %3683 = vmax.xlane.f32.xlu1 %v3682_v22 }
0x174f   :  { %3220 = vadd.xlane.f32.xlu0 %v3219_v5  ;;  %3217 = vadd.xlane.f32.xlu1 %v3216_v23  ;;  %v11467_v5 = vld [vmem:[%s18096_s1 + $0x1c0] sm:$0xff]  ;;  %v11468_v23 = vld [vmem:[%s18096_s1 + $0x1c8] sm:$0xff] }
0x17d0   :  { %v3678_v52 = vpop.xlane.xlu1 %3677 }
0x17d1   :  { %v3685_v12 = vsub.f32 %v3663_v4, %v3678_v52  ;;  %v14512_v4 = vpack.c.bf16 %v11475_v11, %v11474_v55  ;;  %v11483_v11 = vld [vmem:[%s18096_s1 + $0x2d0] sm:$0xff] }
0x17d3   :  { %v3688_v26 = vmul.f32 1.442695, %v3685_v12 }
0x17d4   :  { %v3681_v24 = vpop.xlane.xlu0 %3680 }
0x17d5   :  { %14914 = vpow2.f32 %v3688_v26  ;;  %v3686_v29 = vsub.f32 %v3668_v9, %v3681_v24  ;;  %v14506_v26 = vpack.c.bf16 %v11468_v23, %v11467_v5 }
0x17d7   :  { %v3690_v32 = vmul.f32 1.442695, %v3686_v29 }
0x17d8   :  { %v3684_v33 = vpop.xlane.xlu1 %3683  ;;  %v3215_v13 = vpop.xlane.xlu0 %3214 }
0x17d9   :  { %14916 = vpow2.f32 %v3690_v32  ;;  %v3687_v36 = vsub.f32 %v3673_v61, %v3684_v33  ;;  %v11460_v61 = vld [vmem:[%s18098_s2 + $0x58] sm:$0xff]  ;;  %v11469_v32 = vld [vmem:[%s18096_s1 + $0x1d0] sm:$0xff] }
0x17da   :  { %14918 = vrcp.f32 %v3215_v13  ;;  %v11470_v33 = vld [vmem:[%s18096_s1 + $0x1d8] sm:$0xff] }
0x17db   :  { %v3692_v37 = vmul.f32 1.442695, %v3687_v36 }
0x17dc   :  { %v3218_v25 = vpop.xlane.xlu1 %3217  ;;  %v3221_v46 = vpop.xlane.xlu0 %3220 }
0x17dd   :  { %14920 = vpow2.f32 %v3692_v37  ;;  %v14509_v37 = vpack.c.bf16 %v11470_v33, %v11469_v32 }
0x17de   :  { %14922 = vrcp.f32 %v3218_v25 }
0x17df   :  { %v14915_v44 = vpop.eup %14914  ;;  %14924 = vrcp.f32 %v3221_v46  ;;  %v11481_v46 = vld [vmem:[%s18096_s1 + $0x2c0] sm:$0xff] }
0x17e0   :  { %13175 = vmatmul.mubr.msk.f32.vlgmr.msra.gmra.mrb[108].mxu0 %vm555_vm6, %v14915_v44  ;;  %v3694_v35 = vsel %vm555_vm6, %v14915_v44, 0.0 }
0x17e1   :  { %3695 = vadd.xlane.f32.xlu1 %v3694_v35  ;;  %13177 = vmatprep.mubr.msk.f32.mxu0 %vm15120_vm0, %v15121_v3 }
0x17e2   :  { %14504 = vmatpush3.bf16.msra.mxu0 %v14503_v42 }
0x17e3   :  { %v14917_v49 = vpop.eup %14916  ;;  %14511 = vmatprep.subr.bf16.mxu0 %v15119_v0 }
0x17e4   :  { %13178 = vmatmul.mubr.msk.f32.gmra.mrb[110].mxu0 %vm555_vm6, %v14917_v49  ;;  %v3697_v50 = vsel %vm555_vm6, %v14917_v49, 0.0  ;;  %v14919_v51 = vpop.eup %14918  ;;  %v11482_v49 = vld [vmem:[%s18096_s1 + $0x2c8] sm:$0xff] }
0x17e5   :  { %3698 = vadd.xlane.f32.xlu0 %v3697_v50  ;;  %13180 = vmatprep.mubr.msk.f32.mxu0 %vm15120_vm0, %v15121_v3  ;;  %v3317_v19 = vmul.f32 %v14919_v51, %v16158_v30  ;;  %v14518_v51 = vpack.c.bf16 %v11482_v49, %v11481_v46 }
0x17e7   :  { %v14921_v62 = vpop.eup %14920 }
0x17e8   :  { %13181 = vmatmul.mubr.msk.f32.gmra.mrb[112].mxu0 %vm555_vm6, %v14921_v62  ;;  %v3700_v1 = vsel %vm562_vm7, %v14921_v62, 0.0  ;;  %v14923_v9 = vpop.eup %14922  ;;  %v11484_v62 = vld [vmem:[%s18096_s1 + $0x2d8] sm:$0xff] }
0x17e9   :  { %3701 = vadd.xlane.f32.xlu1 %v3700_v1  ;;  %13200 = vmatprep.mubr.msk.f32.mxu0 %vm15120_vm0, %v15121_v3  ;;  %v3318_v57 = vmul.f32 %v14923_v9, %v16160_v2  ;;  %v14925_v30 = vpop.eup %14924  ;;  %v11459_v2 = vld [vmem:[%s18098_s2 + $0x50] sm:$0xff] }
0x17ea   :  { %v3319_v14 = vmul.f32 %v14925_v30, %v16162_v8  ;;  %v14500_v18 = vpack.c.bf16 %v11460_v61, %v11459_v2 }
0x17ec   :  { %13201 = vmatmul.mubr.msk.f32.vlgmr.msra.gmra.mrb[114].mxu0 %vm48_vm1, %v3317_v19  ;;  %14501 = vmatpush3.bf16.msra.mxu1 %v14500_v18 }
0x17ed   :  { %13203 = vmatprep.mubr.msk.f32.mxu0 %vm15120_vm0, %v15121_v3  ;;  %14513 = vmatpush3.bf16.msra.mxu0 %v14512_v4  ;;  %v14521_v4 = vpack.c.bf16 %v11484_v62, %v11483_v11 }
0x17ee   :  { %14514 = vmatprep.subr.bf16.mxu0 %v15119_v0  ;;  %14505 = vmatprep.subr.bf16.mxu1 %v15119_v0 }
0x17f0   :  { %13204 = vmatmul.mubr.msk.f32.gmra.mrb[116].mxu0 %vm48_vm1, %v3318_v57 }
0x17f1   :  { %13206 = vmatprep.mubr.msk.f32.mxu0 %vm15120_vm0, %v15121_v3  ;;  %14516 = vmatpush3.bf16.msra.mxu0 %v14515_v58 }
0x17f2   :  { %14523 = vmatprep.subr.bf16.mxu0 %v15119_v0 }
0x17f4   :  { %13207 = vmatmul.mubr.msk.f32.gmra.mrb[118].mxu0 %vm48_vm1, %v3319_v14 }
0x17f5   :  { %13234 = vmatprep.mubr.msk.f32.mxu0 %vm15120_vm0, %v15121_v3 }
0x17f8   :  { %13235 = vmatmul.mubr.msk.f32.vlgmr.msra.gmra.mrb[120].mxu0 %vm138_vm2, %v15974_v27 }
0x17f9   :  { %13237 = vmatprep.mubr.msk.f32.mxu0 %vm15120_vm0, %v15121_v3 }
0x17fc   :  { %13238 = vmatmul.mubr.msk.f32.gmra.mrb[122].mxu0 %vm138_vm2, %v15990_v45 }
0x17fd   :  { %13240 = vmatprep.mubr.msk.f32.mxu0 %vm15120_vm0, %v15121_v3 }
0x1800   :  { %13241 = vmatmul.mubr.msk.f32.gmra.mrb[124].mxu0 %vm138_vm2, %v16001_v48 }
0x1801   :  { %13266 = vmatprep.mubr.msk.f32.mxu0 %vm15120_vm0, %v15121_v3 }
0x186e   :  { %v3696_v8 = vpop.xlane.xlu1 %3695 }
0x186f   :  { %14926 = vrcp.f32 %v3696_v8 }
0x1872   :  { %v3699_v21 = vpop.xlane.xlu0 %3698 }
0x1873   :  { %14928 = vrcp.f32 %v3699_v21 }
0x1876   :  { %v3702_v22 = vpop.xlane.xlu1 %3701 }
0x1877   :  { %14930 = vrcp.f32 %v3702_v22 }
0x1879   :  { %v14927_v52 = vpop.eup %14926 }
0x187d   :  { %v14929_v13 = vpop.eup %14928 }
0x1881   :  { %v14931_v25 = vpop.eup %14930 }
0x18b3   :  { %v3784_v12 = vpop.f32.mrb[108].mxu0 }
0x18b4   :  { %v3798_v24 = vmul.f32 %v14927_v52, %v3784_v12  ;;  %v13176_v29 = vpop.f32.mrb[109].mxu0 }
0x18b6   :  { %13188 = vmatmul.mubr.msk.f32.vlgmr.msra.gmra.mrb[108].mxu1 %vm48_vm1, %v3798_v24 }
0x18b7   :  { %v3789_v36 = vpop.f32.mrb[110].mxu0  ;;  %13190 = vmatprep.mubr.msk.f32.mxu1 %vm15120_vm0, %v15121_v3  ;;  %14507 = vmatpush3.bf16.msra.mxu1 %v14506_v26 }
0x18b8   :  { %v3799_v38 = vmul.f32 %v14929_v13, %v3789_v36  ;;  %v13179_v40 = vpop.f32.mrb[111].mxu0  ;;  %14508 = vmatprep.subr.bf16.mxu1 %v15119_v0 }
0x18ba   :  { %13191 = vmatmul.mubr.msk.f32.gmra.mrb[110].mxu1 %vm48_vm1, %v3799_v38 }
0x18bb   :  { %v3794_v42 = vpop.f32.mrb[112].mxu0  ;;  %13193 = vmatprep.mubr.msk.f32.mxu1 %vm15120_vm0, %v15121_v3  ;;  %14510 = vmatpush3.bf16.msra.mxu1 %v14509_v37 }
0x18bc   :  { %v3800_v44 = vmul.f32 %v14931_v25, %v3794_v42  ;;  %v13182_v35 = vpop.f32.mrb[113].mxu0  ;;  %14517 = vmatprep.subr.bf16.mxu1 %v15119_v0 }
0x18be   :  { %13194 = vmatmul.mubr.msk.f32.gmra.mrb[112].mxu1 %vm48_vm1, %v3800_v44 }
0x18bf   :  { %v3968_v50 = vpop.f32.mrb[114].mxu0  ;;  %13217 = vmatprep.mubr.msk.f32.mxu1 %vm15120_vm0, %v15121_v3 }
0x18c0   :  { %v13202_v55 = vpop.f32.mrb[115].mxu0 }
0x18c2   :  { %13218 = vmatmul.mubr.msk.f32.vlgmr.msra.gmra.mrb[114].mxu1 %vm138_vm2, %v15974_v27 }
0x18c3   :  { %v3973_v1 = vpop.f32.mrb[116].mxu0  ;;  %13220 = vmatprep.mubr.msk.f32.mxu1 %vm15120_vm0, %v15121_v3  ;;  %14519 = vmatpush3.bf16.msra.mxu1 %v14518_v51 }
0x18c4   :  { %v13205_v19 = vpop.f32.mrb[117].mxu0  ;;  %14520 = vmatprep.subr.bf16.mxu1 %v15119_v0 }
0x18c6   :  { %13221 = vmatmul.mubr.msk.f32.gmra.mrb[116].mxu1 %vm138_vm2, %v15990_v45 }
0x18c7   :  { %v3978_v53 = vpop.f32.mrb[118].mxu0  ;;  %13223 = vmatprep.mubr.msk.f32.mxu1 %vm15120_vm0, %v15121_v3  ;;  %14522 = vmatpush3.bf16.msra.mxu1 %v14521_v4 }
0x18c8   :  { %v13208_v6 = vpop.f32.mrb[119].mxu0  ;;  %14527 = vmatprep.subr.bf16.mxu1 %v15119_v0 }
0x18ca   :  { %13224 = vmatmul.mubr.msk.f32.gmra.mrb[118].mxu1 %vm138_vm2, %v16001_v48 }
0x18cb   :  { %v4138_v9 = vpop.f32.mrb[120].mxu0  ;;  %13251 = vmatprep.mubr.msk.f32.mxu1 %vm15120_vm0, %v15121_v3 }
0x18cc   :  { %v13236_v58 = vpop.f32.mrb[121].mxu0 }
0x18ce   :  { %13252 = vmatmul.mubr.msk.f32.vlgmr.msra.gmra.mrb[120].mxu1 %vm138_vm2, %v15974_v27 }
0x18cf   :  { %v4143_v57 = vpop.f32.mrb[122].mxu0  ;;  %13254 = vmatprep.mubr.msk.f32.mxu1 %vm15120_vm0, %v15121_v3 }
0x18d0   :  { %v14524_v30 = vpack.c.bf16 %v4143_v57, %v4138_v9  ;;  %v13239_v14 = vpop.f32.mrb[123].mxu0 }
0x18d2   :  { %13255 = vmatmul.mubr.msk.f32.gmra.mrb[122].mxu1 %vm138_vm2, %v15990_v45  ;;  %14526 = vmatpush3.bf16.xpose.msk.msra.mxu0 %vm15324_vm4, %v14524_v30 }
0x18d3   :  { %v4148_v2 = vpop.f32.mrb[124].mxu0  ;;  %13257 = vmatprep.mubr.msk.f32.mxu1 %vm15120_vm0, %v15121_v3  ;;  %13264 = vmatprep.subr.mxu0 %v15121_v3 }
0x18d4   :  { %v13242_v61 = vpop.f32.mrb[125].mxu0 }
0x18d6   :  { %13258 = vmatmul.mubr.msk.f32.gmra.mrb[124].mxu1 %vm138_vm2, %v16001_v48 }
0x18d7   :  { %13281 = vmatprep.mubr.msk.f32.mxu1 %vm15120_vm0, %v15121_v3 }
0x18da   :  { %13265 = vmatpush3.xpose.msk.msra.mxu0 %vm48_vm1, %v4148_v2 }
0x18db   :  { %14530 = vmatprep.subr.bf16.mxu0 %v15119_v0 }
0x1989   :  { %v3879_v18 = vpop.f32.mrb[108].mxu1 }
0x198a   :  { %v16320_v8 = vadd.f32 %v3968_v50, %v3879_v18  ;;  %v13189_v21 = vpop.f32.mrb[109].mxu1 }
0x198d   :  { %v3884_v22 = vpop.f32.mrb[110].mxu1 }
0x198e   :  { %v16322_v5 = vadd.f32 %v3973_v1, %v3884_v22  ;;  %v13192_v23 = vpop.f32.mrb[111].mxu1  ;;  %v11503_v22 = vld [vmem:[%s18096_s1 + $0x1e0] sm:$0xff] }
0x198f   :  { %v11504_v23 = vld [vmem:[%s18096_s1 + $0x1e8] sm:$0xff] }
0x1991   :  { %v3889_v52 = vpop.f32.mrb[112].mxu1 }
0x1992   :  { %v16324_v12 = vadd.f32 %v3978_v53, %v3889_v52  ;;  %v13195_v26 = vpop.f32.mrb[113].mxu1  ;;  %v14534_v52 = vpack.c.bf16 %v11504_v23, %v11503_v22 }
0x1995   :  { %v4053_v24 = vpop.f32.mrb[114].mxu1 }
0x1996   :  { %v13219_v29 = vpop.f32.mrb[115].mxu1  ;;  %13267 = vmatmul.mubr.msk.f32.vlgmr.msra.gmra.mrb[126].mxu0 %vm48_vm1, %v4053_v24  ;;  %v11505_v24 = vld [vmem:[%s18096_s1 + $0x1f0] sm:$0xff] }
0x1997   :  { %13269 = vmatprep.mubr.msk.f32.mxu0 %vm15120_vm0, %v15121_v3  ;;  %v11506_v29 = vld [vmem:[%s18096_s1 + $0x1f8] sm:$0xff] }
0x1999   :  { %v4058_v32 = vpop.f32.mrb[116].mxu1 }
0x199a   :  { %v13222_v33 = vpop.f32.mrb[117].mxu1  ;;  %13270 = vmatmul.mubr.msk.f32.gmra.mrb[128].mxu0 %vm48_vm1, %v4058_v32 }
0x199b   :  { %13272 = vmatprep.mubr.msk.f32.mxu0 %vm15120_vm0, %v15121_v3  ;;  %v14537_v33 = vpack.c.bf16 %v11506_v29, %v11505_v24 }
0x199d   :  { %v4063_v13 = vpop.f32.mrb[118].mxu1 }
0x199e   :  { %v13225_v36 = vpop.f32.mrb[119].mxu1  ;;  %13273 = vmatmul.mubr.msk.f32.gmra.mrb[130].mxu0 %vm48_vm1, %v4063_v13 }
0x199f   :  { %13294 = vmatprep.mubr.msk.f32.mxu0 %vm15120_vm0, %v15121_v3 }
0x19a1   :  { %v4223_v37 = vpop.f32.mrb[120].mxu1 }
0x19a2   :  { %v13253_v38 = vpop.f32.mrb[121].mxu1 }
0x19a3   :  { %v11518_v38 = vld [vmem:[%s18096_s1 + $0x2e8] sm:$0xff] }
0x19a5   :  { %v4228_v40 = vpop.f32.mrb[122].mxu1 }
0x19a6   :  { %v14528_v25 = vpack.c.bf16 %v4228_v40, %v4223_v37  ;;  %v13256_v42 = vpop.f32.mrb[123].mxu1  ;;  %v11517_v37 = vld [vmem:[%s18096_s1 + $0x2e0] sm:$0xff] }
0x19a7   :  { %v14546_v42 = vpack.c.bf16 %v11518_v38, %v11517_v37 }
0x19a8   :  { %14529 = vmatpush3.bf16.msra.mxu1 %v14528_v25 }
0x19a9   :  { %v4233_v44 = vpop.f32.mrb[124].mxu1  ;;  %13279 = vmatprep.subr.mxu1 %v15121_v3 }
0x19aa   :  { %v13259_v35 = vpop.f32.mrb[125].mxu1 }
0x19ab   :  { %v11520_v35 = vld [vmem:[%s18096_s1 + $0x2f8] sm:$0xff] }
0x19ac   :  { %13280 = vmatpush3.msk.msra.mxu1 %vm596_vm5, %v4233_v44  ;;  %v11519_v44 = vld [vmem:[%s18096_s1 + $0x2f0] sm:$0xff] }
0x19ad   :  { %14533 = vmatprep.subr.bf16.mxu1 %v15119_v0 }
0x1a69   :  { %v4321_v46 = vpop.f32.mrb[126].mxu0 }
0x1a6a   :  { %v4322_v49 = vadd.f32 %v16096_v16, %v4321_v46  ;;  %v13268_v50 = vpop.f32.mrb[127].mxu0  ;;  %v14549_v46 = vpack.c.bf16 %v11520_v35, %v11519_v44 }
0x1a6b   :  { %v11499_v50 = vld [vmem:[%s18098_s2 + $0x68] sm:$0xff] }
0x1a6c   :  { %v4335_v51 = vsel %vm555_vm6, %v4322_v49, -inf }
0x1a6d   :  { %4336 = vmax.xlane.f32.xlu0 %v4335_v51  ;;  %v4326_v55 = vpop.f32.mrb[128].mxu0 }
0x1a6e   :  { %v4327_v11 = vadd.f32 %v16103_v43, %v4326_v55  ;;  %v13271_v62 = vpop.f32.mrb[129].mxu0 }
0x1a70   :  { %v4338_v1 = vsel %vm555_vm6, %v4327_v11, -inf }
0x1a71   :  { %4339 = vmax.xlane.f32.xlu1 %v4338_v1  ;;  %v4331_v4 = vpop.f32.mrb[130].mxu0  ;;  %v11510_v1 = vld [vmem:[%s18096_s1 + $0x260] sm:$0xff] }
0x1a72   :  { %v4332_v19 = vadd.f32 %v16110_v47, %v4331_v4  ;;  %v13274_v53 = vpop.f32.mrb[131].mxu0  ;;  %v11511_v4 = vld [vmem:[%s18096_s1 + $0x268] sm:$0xff] }
0x1a74   :  { %v4341_v6 = vsel %vm562_vm7, %v4332_v19, -inf }
0x1a75   :  { %4342 = vmax.xlane.f32.xlu0 %v4341_v6  ;;  %v14540_v6 = vpack.c.bf16 %v11511_v4, %v11510_v1 }
0x1afa   :  { %v4337_v9 = vpop.xlane.xlu0 %4336 }
0x1afb   :  { %v4344_v58 = vsub.f32 %v4322_v49, %v4337_v9  ;;  %v11498_v49 = vld [vmem:[%s18098_s2 + $0x60] sm:$0xff] }
0x1afc   :  { %v14531_v51 = vpack.c.bf16 %v11499_v50, %v11498_v49 }
0x1afd   :  { %v4347_v57 = vmul.f32 1.442695, %v4344_v58 }
0x1afe   :  { %v4340_v30 = vpop.xlane.xlu1 %4339  ;;  %14532 = vmatpush3.bf16.msra.mxu0 %v14531_v51 }
0x1aff   :  { %14932 = vpow2.f32 %v4347_v57  ;;  %v4345_v14 = vsub.f32 %v4327_v11, %v4340_v30  ;;  %14539 = vmatprep.subr.bf16.mxu0 %v15119_v0  ;;  %v11512_v57 = vld [vmem:[%s18096_s1 + $0x270] sm:$0xff]  ;;  %v11513_v30 = vld [vmem:[%s18096_s1 + $0x278] sm:$0xff] }
0x1b01   :  { %v4349_v2 = vmul.f32 1.442695, %v4345_v14 }
0x1b02   :  { %v4343_v61 = vpop.xlane.xlu0 %4342 }
0x1b03   :  { %14934 = vpow2.f32 %v4349_v2  ;;  %v4346_v18 = vsub.f32 %v4332_v19, %v4343_v61  ;;  %v14543_v61 = vpack.c.bf16 %v11513_v30, %v11512_v57 }
0x1b05   :  { %v4351_v21 = vmul.f32 1.442695, %v4346_v18 }
0x1b07   :  { %14936 = vpow2.f32 %v4351_v21 }
0x1b09   :  { %v14933_v26 = vpop.eup %14932 }
0x1b0a   :  { %13282 = vmatmul.mubr.msk.f32.vlgmr.msra.gmra.mrb[126].mxu1 %vm555_vm6, %v14933_v26  ;;  %v4353_v32 = vsel %vm555_vm6, %v14933_v26, 0.0 }
0x1b0b   :  { %4354 = vadd.xlane.f32.xlu1 %v4353_v32  ;;  %13284 = vmatprep.mubr.msk.f32.mxu1 %vm15120_vm0, %v15121_v3 }
0x1b0c   :  { %14535 = vmatpush3.bf16.msra.mxu1 %v14534_v52 }
0x1b0d   :  { %v14935_v13 = vpop.eup %14934  ;;  %14536 = vmatprep.subr.bf16.mxu1 %v15119_v0 }
0x1b0e   :  { %13285 = vmatmul.mubr.msk.f32.gmra.mrb[128].mxu1 %vm555_vm6, %v14935_v13  ;;  %v4356_v36 = vsel %vm555_vm6, %v14935_v13, 0.0 }
0x1b0f   :  { %4357 = vadd.xlane.f32.xlu0 %v4356_v36  ;;  %13287 = vmatprep.mubr.msk.f32.mxu1 %vm15120_vm0, %v15121_v3 }
0x1b10   :  { %14538 = vmatpush3.bf16.msra.mxu1 %v14537_v33 }
0x1b11   :  { %v14937_v40 = vpop.eup %14936  ;;  %14545 = vmatprep.subr.bf16.mxu1 %v15119_v0 }
0x1b12   :  { %13288 = vmatmul.mubr.msk.f32.gmra.mrb[130].mxu1 %vm555_vm6, %v14937_v40  ;;  %v4359_v25 = vsel %vm562_vm7, %v14937_v40, 0.0 }
0x1b13   :  { %4360 = vadd.xlane.f32.xlu1 %v4359_v25  ;;  %13311 = vmatprep.mubr.msk.f32.mxu1 %vm15120_vm0, %v15121_v3 }
0x1b16   :  { %13312 = vmatmul.mubr.msk.f32.vlgmr.msra.gmra.mrb[132].mxu1 %vm138_vm2, %v15974_v27 }
0x1b17   :  { %13314 = vmatprep.mubr.msk.f32.mxu1 %vm15120_vm0, %v15121_v3  ;;  %14547 = vmatpush3.bf16.msra.mxu1 %v14546_v42 }
0x1b18   :  { %14548 = vmatprep.subr.bf16.mxu1 %v15119_v0 }
0x1b1a   :  { %13315 = vmatmul.mubr.msk.f32.gmra.mrb[134].mxu1 %vm138_vm2, %v15990_v45 }
0x1b1b   :  { %13317 = vmatprep.mubr.msk.f32.mxu1 %vm15120_vm0, %v15121_v3  ;;  %14550 = vmatpush3.bf16.msra.mxu1 %v14549_v46 }
0x1b1c   :  { %14555 = vmatprep.subr.bf16.mxu1 %v15119_v0 }
0x1b1e   :  { %13318 = vmatmul.mubr.msk.f32.gmra.mrb[136].mxu1 %vm138_vm2, %v16001_v48 }
0x1b1f   :  { %13345 = vmatprep.mubr.msk.f32.mxu1 %vm15120_vm0, %v15121_v3 }
0x1b22   :  { %13346 = vmatmul.mubr.msk.f32.vlgmr.msra.gmra.mrb[138].mxu1 %vm138_vm2, %v15974_v27 }
0x1b23   :  { %13348 = vmatprep.mubr.msk.f32.mxu1 %vm15120_vm0, %v15121_v3 }
0x1b26   :  { %13349 = vmatmul.mubr.msk.f32.gmra.mrb[140].mxu1 %vm138_vm2, %v15990_v45 }
0x1b27   :  { %13351 = vmatprep.mubr.msk.f32.mxu1 %vm15120_vm0, %v15121_v3 }
0x1b2a   :  { %13352 = vmatmul.mubr.msk.f32.gmra.mrb[142].mxu1 %vm138_vm2, %v16001_v48 }
0x1b2b   :  { %13375 = vmatprep.mubr.msk.f32.mxu1 %vm15120_vm0, %v15121_v3 }
0x1b98   :  { %v4355_v55 = vpop.xlane.xlu1 %4354 }
0x1b99   :  { %14938 = vrcp.f32 %v4355_v55 }
0x1b9c   :  { %v4358_v11 = vpop.xlane.xlu0 %4357 }
0x1b9d   :  { %14940 = vrcp.f32 %v4358_v11 }
0x1ba0   :  { %v4361_v62 = vpop.xlane.xlu1 %4360 }
0x1ba1   :  { %14942 = vrcp.f32 %v4361_v62 }
0x1ba3   :  { %v14939_v19 = vpop.eup %14938 }
0x1ba7   :  { %v14941_v14 = vpop.eup %14940 }
0x1bab   :  { %v14943_v22 = vpop.eup %14942 }
0x1bdd   :  { %v4443_v53 = vpop.f32.mrb[126].mxu1 }
0x1bde   :  { %v4457_v9 = vmul.f32 %v14939_v19, %v4443_v53  ;;  %v13283_v58 = vpop.f32.mrb[127].mxu1 }
0x1be0   :  { %13295 = vmatmul.mubr.msk.f32.vlgmr.msra.gmra.mrb[132].mxu0 %vm48_vm1, %v4457_v9 }
0x1be1   :  { %v4448_v2 = vpop.f32.mrb[128].mxu1  ;;  %13297 = vmatprep.mubr.msk.f32.mxu0 %vm15120_vm0, %v15121_v3  ;;  %14541 = vmatpush3.bf16.msra.mxu0 %v14540_v6 }
0x1be2   :  { %v4458_v18 = vmul.f32 %v14941_v14, %v4448_v2  ;;  %v13286_v21 = vpop.f32.mrb[129].mxu1  ;;  %14542 = vmatprep.subr.bf16.mxu0 %v15119_v0 }
0x1be4   :  { %13298 = vmatmul.mubr.msk.f32.gmra.mrb[134].mxu0 %vm48_vm1, %v4458_v18 }
0x1be5   :  { %v4453_v23 = vpop.f32.mrb[130].mxu1  ;;  %13300 = vmatprep.mubr.msk.f32.mxu0 %vm15120_vm0, %v15121_v3  ;;  %14544 = vmatpush3.bf16.msra.mxu0 %v14543_v61 }
0x1be6   :  { %v4459_v52 = vmul.f32 %v14943_v22, %v4453_v23  ;;  %v13289_v26 = vpop.f32.mrb[131].mxu1  ;;  %14551 = vmatprep.subr.bf16.mxu0 %v15119_v0 }
0x1be8   :  { %13301 = vmatmul.mubr.msk.f32.gmra.mrb[136].mxu0 %vm48_vm1, %v4459_v52 }
0x1be9   :  { %v4626_v24 = vpop.f32.mrb[132].mxu1  ;;  %13328 = vmatprep.mubr.msk.f32.mxu0 %vm15120_vm0, %v15121_v3 }
0x1bea   :  { %v13313_v29 = vpop.f32.mrb[133].mxu1 }
0x1bec   :  { %13329 = vmatmul.mubr.msk.f32.vlgmr.msra.gmra.mrb[138].mxu0 %vm138_vm2, %v15974_v27 }
0x1bed   :  { %v4631_v32 = vpop.f32.mrb[134].mxu1  ;;  %13331 = vmatprep.mubr.msk.f32.mxu0 %vm15120_vm0, %v15121_v3 }
0x1bee   :  { %v13316_v33 = vpop.f32.mrb[135].mxu1 }
0x1bf0   :  { %13332 = vmatmul.mubr.msk.f32.gmra.mrb[140].mxu0 %vm138_vm2, %v15990_v45 }
0x1bf1   :  { %v4636_v13 = vpop.f32.mrb[136].mxu1  ;;  %13334 = vmatprep.mubr.msk.f32.mxu0 %vm15120_vm0, %v15121_v3 }
0x1bf2   :  { %v13319_v36 = vpop.f32.mrb[137].mxu1 }
0x1bf4   :  { %13335 = vmatmul.mubr.msk.f32.gmra.mrb[142].mxu0 %vm138_vm2, %v16001_v48 }
0x1bf5   :  { %v4796_v37 = vpop.f32.mrb[138].mxu1  ;;  %13360 = vmatprep.mubr.msk.f32.mxu0 %vm15120_vm0, %v15121_v3 }
0x1bf6   :  { %v13347_v27 = vpop.f32.mrb[139].mxu1 }
0x1bf9   :  { %v4801_v38 = vpop.f32.mrb[140].mxu1 }
0x1bfa   :  { %v14556_v40 = vpack.c.bf16 %v4801_v38, %v4796_v37  ;;  %v13350_v25 = vpop.f32.mrb[141].mxu1 }
0x1bfb   :  { %v11535_v25 = vld [vmem:[%s18098_s2 + $0x78] sm:$0xff] }
0x1bfc   :  { %14557 = vmatpush3.bf16.msra.mxu1 %v14556_v40  ;;  %v11534_v40 = vld [vmem:[%s18098_s2 + $0x70] sm:$0xff] }
0x1bfd   :  { %v4806_v42 = vpop.f32.mrb[142].mxu1  ;;  %13373 = vmatprep.subr.mxu1 %v15121_v3 }
0x1bfe   :  { %v13353_v45 = vpop.f32.mrb[143].mxu1 }
0x1c00   :  { %13374 = vmatpush3.msk.msra.mxu1 %vm596_vm5, %v4806_v42  ;;  %v14559_v42 = vpack.c.bf16 %v11535_v25, %v11534_v40 }
0x1c01   :  { %14561 = vmatprep.subr.bf16.mxu1 %v15119_v0 }
0x1cb3   :  { %v4538_v44 = vpop.f32.mrb[132].mxu0 }
0x1cb4   :  { %v16454_v48 = vadd.f32 %v4538_v44, %v16320_v8  ;;  %v13296_v35 = vpop.f32.mrb[133].mxu0 }
0x1cb7   :  { %v4543_v46 = vpop.f32.mrb[134].mxu0 }
0x1cb8   :  { %v16457_v49 = vadd.f32 %v4543_v46, %v16322_v5  ;;  %v13299_v50 = vpop.f32.mrb[135].mxu0 }
0x1cbb   :  { %v4548_v51 = vpop.f32.mrb[136].mxu0 }
0x1cbc   :  { %v16460_v55 = vadd.f32 %v4548_v51, %v16324_v12  ;;  %v13302_v11 = vpop.f32.mrb[137].mxu0 }
0x1cbf   :  { %v4711_v62 = vpop.f32.mrb[138].mxu0 }
0x1cc0   :  { %v13330_v1 = vpop.f32.mrb[139].mxu0 }
0x1cc3   :  { %v4716_v4 = vpop.f32.mrb[140].mxu0 }
0x1cc4   :  { %v14552_v19 = vpack.c.bf16 %v4716_v4, %v4711_v62  ;;  %v13333_v53 = vpop.f32.mrb[141].mxu0 }
0x1cc6   :  { %14554 = vmatpush3.bf16.xpose.msk.msra.mxu0 %vm15324_vm4, %v14552_v19 }
0x1cc7   :  { %v4721_v8 = vpop.f32.mrb[142].mxu0  ;;  %13358 = vmatprep.subr.mxu0 %v15121_v3 }
0x1cc8   :  { %v13336_v6 = vpop.f32.mrb[143].mxu0 }
0x1cce   :  { %13359 = vmatpush3.xpose.msk.msra.mxu0 %vm48_vm1, %v4721_v8 }
0x1ccf   :  { %14558 = vmatprep.subr.bf16.mxu0 %v15119_v0 }
0x1cd1   :  { %13361 = vmatmul.mubr.msk.f32.vlgmr.msra.gmra.mrb[144].mxu0 %vm48_vm1, %v4626_v24 }
0x1cd2   :  { %13363 = vmatprep.mubr.msk.f32.mxu0 %vm15120_vm0, %v15121_v3  ;;  %14560 = vmatpush3.bf16.msra.mxu0 %v14559_v42 }
0x1cd3   :  { %14567 = vmatprep.subr.bf16.mxu0 %v15119_v0 }
0x1cd5   :  { %13364 = vmatmul.mubr.msk.f32.gmra.mrb[146].mxu0 %vm48_vm1, %v4631_v32 }
0x1cd6   :  { %13366 = vmatprep.mubr.msk.f32.mxu0 %vm15120_vm0, %v15121_v3 }
0x1cd9   :  { %13367 = vmatmul.mubr.msk.f32.gmra.mrb[148].mxu0 %vm48_vm1, %v4636_v13 }
0x1cda   :  { %13388 = vmatprep.mubr.msk.f32.mxu0 %vm15120_vm0, %v15121_v3 }
0x1da4   :  { %v4894_v5 = vpop.f32.mrb[144].mxu0 }
0x1da5   :  { %v4895_v12 = vadd.f32 %v16096_v16, %v4894_v5  ;;  %v13362_v9 = vpop.f32.mrb[145].mxu0 }
0x1da7   :  { %v4908_v58 = vsel %vm555_vm6, %v4895_v12, -inf }
0x1da8   :  { %4909 = vmax.xlane.f32.xlu0 %v4908_v58  ;;  %v4899_v57 = vpop.f32.mrb[146].mxu0  ;;  %v16514_v58 = vld [vmem:[%s18094_s6 + $0x30] sm:$0xff] }
0x1da9   :  { %v4900_v30 = vadd.f32 %v16103_v43, %v4899_v57  ;;  %v13365_v14 = vpop.f32.mrb[147].mxu0  ;;  %v5134_v57 = vrot.slane %v16514_v58, %v15815_v17 }
0x1dab   :  { %v4911_v2 = vsel %vm555_vm6, %v4900_v30, -inf }
0x1dac   :  { %4912 = vmax.xlane.f32.xlu1 %v4911_v2  ;;  %v4904_v61 = vpop.f32.mrb[148].mxu0 }
0x1dad   :  { %v4905_v18 = vadd.f32 %v16110_v47, %v4904_v61  ;;  %v13368_v21 = vpop.f32.mrb[149].mxu0 }
0x1daf   :  { %v4914_v22 = vsel %vm562_vm7, %v4905_v18, -inf }
0x1db0   :  { %4915 = vmax.xlane.f32.xlu0 %v4914_v22 }
0x1e35   :  { %v4910_v23 = vpop.xlane.xlu0 %4909 }
0x1e36   :  { %v4917_v16 = vsub.f32 %v4895_v12, %v4910_v23 }
0x1e38   :  { %v4920_v52 = vmul.f32 1.442695, %v4917_v16 }
0x1e39   :  { %v4913_v26 = vpop.xlane.xlu1 %4912 }
0x1e3a   :  { %14944 = vpow2.f32 %v4920_v52  ;;  %v4918_v24 = vsub.f32 %v4900_v30, %v4913_v26 }
0x1e3c   :  { %v4922_v29 = vmul.f32 1.442695, %v4918_v24 }
0x1e3d   :  { %v4916_v32 = vpop.xlane.xlu0 %4915 }
0x1e3e   :  { %14946 = vpow2.f32 %v4922_v29  ;;  %v4919_v43 = vsub.f32 %v4905_v18, %v4916_v32 }
0x1e40   :  { %v4924_v33 = vmul.f32 1.442695, %v4919_v43 }
0x1e42   :  { %14948 = vpow2.f32 %v4924_v33 }
0x1e44   :  { %v14945_v13 = vpop.eup %14944 }
0x1e45   :  { %13376 = vmatmul.mubr.msk.f32.vlgmr.msra.gmra.mrb[144].mxu1 %vm555_vm6, %v14945_v13  ;;  %v4926_v47 = vsel %vm555_vm6, %v14945_v13, 0.0 }
0x1e46   :  { %4927 = vadd.xlane.f32.xlu1 %v4926_v47  ;;  %13378 = vmatprep.mubr.msk.f32.mxu1 %vm15120_vm0, %v15121_v3 }
0x1e48   :  { %v14947_v36 = vpop.eup %14946 }
0x1e49   :  { %13379 = vmatmul.mubr.msk.f32.gmra.mrb[146].mxu1 %vm555_vm6, %v14947_v36  ;;  %v4929_v37 = vsel %vm555_vm6, %v14947_v36, 0.0 }
0x1e4a   :  { %4930 = vadd.xlane.f32.xlu0 %v4929_v37  ;;  %13381 = vmatprep.mubr.msk.f32.mxu1 %vm15120_vm0, %v15121_v3 }
0x1e4c   :  { %v14949_v27 = vpop.eup %14948 }
0x1e4d   :  { %13382 = vmatmul.mubr.msk.f32.gmra.mrb[148].mxu1 %vm555_vm6, %v14949_v27  ;;  %v4932_v38 = vsel %vm562_vm7, %v14949_v27, 0.0 }
0x1e4e   :  { %4933 = vadd.xlane.f32.xlu1 %v4932_v38  ;;  %13405 = vmatprep.mubr.msk.f32.mxu1 %vm15120_vm0, %v15121_v3 }
0x1ed3   :  { %v4928_v45 = vpop.xlane.xlu1 %4927 }
0x1ed4   :  { %14950 = vrcp.f32 %v4928_v45 }
0x1ed7   :  { %v4931_v44 = vpop.xlane.xlu0 %4930 }
0x1ed8   :  { %14952 = vrcp.f32 %v4931_v44 }
0x1edb   :  { %v4934_v35 = vpop.xlane.xlu1 %4933 }
0x1edc   :  { %14954 = vrcp.f32 %v4934_v35 }
0x1ede   :  { %v14951_v46 = vpop.eup %14950 }
0x1ee2   :  { %v14953_v62 = vpop.eup %14952 }
0x1ee6   :  { %v14955_v53 = vpop.eup %14954 }
0x1f18   :  { %v5016_v50 = vpop.f32.mrb[144].mxu1 }
0x1f19   :  { %v5030_v51 = vmul.f32 %v14951_v46, %v5016_v50  ;;  %v13377_v11 = vpop.f32.mrb[145].mxu1  ;;  %v11539_v46 = vld [vmem:[%s18099_s3 + $0x20] sm:$0xff]  ;;  %v11540_v50 = vld [vmem:[%s18099_s3 + $0x28] sm:$0xff] }
0x1f1a   :  { %v11541_v11 = vld [vmem:[%s18099_s3 + $0x30] sm:$0xff] }
0x1f1b   :  { %13389 = vmatmul.mubr.msk.f32.vlgmr.msra.gmra.mrb[150].mxu0 %vm48_vm1, %v5030_v51  ;;  %v14562_v51 = vpack.c.bf16 %v11540_v50, %v11539_v46 }
0x1f1c   :  { %v5021_v1 = vpop.f32.mrb[146].mxu1  ;;  %13391 = vmatprep.mubr.msk.f32.mxu0 %vm15120_vm0, %v15121_v3 }
0x1f1d   :  { %v5031_v4 = vmul.f32 %v14953_v62, %v5021_v1  ;;  %v13380_v19 = vpop.f32.mrb[147].mxu1  ;;  %14563 = vmatpush3.bf16.msra.mxu1 %v14562_v51  ;;  %v11542_v62 = vld [vmem:[%s18099_s3 + $0x38] sm:$0xff] }
0x1f1e   :  { %14564 = vmatprep.subr.bf16.mxu1 %v15119_v0  ;;  %v14565_v1 = vpack.c.bf16 %v11542_v62, %v11541_v11 }
0x1f1f   :  { %13392 = vmatmul.mubr.msk.f32.gmra.mrb[152].mxu0 %vm48_vm1, %v5031_v4 }
0x1f20   :  { %v5026_v8 = vpop.f32.mrb[148].mxu1  ;;  %13394 = vmatprep.mubr.msk.f32.mxu0 %vm15120_vm0, %v15121_v3 }
0x1f21   :  { %v5032_v6 = vmul.f32 %v14955_v53, %v5026_v8  ;;  %v13383_v5 = vpop.f32.mrb[149].mxu1  ;;  %14566 = vmatpush3.bf16.msra.mxu1 %v14565_v1 }
0x1f22   :  { %14573 = vmatprep.subr.bf16.mxu1 %v15119_v0 }
0x1f23   :  { %13395 = vmatmul.mubr.msk.f32.gmra.mrb[154].mxu0 %vm48_vm1, %v5032_v6 }
0x1f24   :  { %13422 = vmatprep.mubr.msk.f32.mxu0 %vm15120_vm0, %v15121_v3 }
0x1fee   :  { %v5111_v12 = vpop.f32.mrb[150].mxu0 }
0x1fef   :  { %v5125_v9 = vadd.f32 %v5111_v12, %v16454_v48  ;;  %v13390_v30 = vpop.f32.mrb[151].mxu0 }
0x1ff0   :  { %v5180_v30 = vrot.slane %v16514_v58, %v15863_v7 }
0x1ff1   :  { %v5128_v14 = vadd.f32 %v5125_v9, %v15915_v34 }
0x1ff2   :  { %v5116_v2 = vpop.f32.mrb[152].mxu0 }
0x1ff3   :  { %v16519_v61 = vadd.f32 %v5134_v57, %v5128_v14  ;;  %v5126_v18 = vadd.f32 %v5116_v2, %v16457_v49  ;;  %v13393_v21 = vpop.f32.mrb[153].mxu0  ;;  %v5187_v2 = vrot.slane %v16514_v58, %v15866_v54 }
0x1ff5   :  { %v5129_v22 = vadd.f32 %v5126_v18, %v15920_v39  ;;  %v5138_v48 = vsel %vm138_vm2, %v16519_v61, 0.0 }
0x1ff6   :  { %5139 = vadd.xlane.f32.xlu0 %v5138_v48  ;;  %v5121_v23 = vpop.f32.mrb[154].mxu0 }
0x1ff7   :  { %v16525_v16 = vadd.f32 %v5134_v57, %v5129_v22  ;;  %v5127_v52 = vadd.f32 %v5121_v23, %v16460_v55  ;;  %v13396_v26 = vpop.f32.mrb[155].mxu0 }
0x1ff9   :  { %v5130_v24 = vadd.f32 %v5127_v52, %v15925_v41  ;;  %v5141_v29 = vsel %vm138_vm2, %v16525_v16, 0.0  ;;  %v14574_v52 = vpack.c.bf16 %v15203_v15, %v15196_v10  ;;  %v11546_v15 = vld [vmem:[%s18100_s4 + $0x20] sm:$0xff] }
0x1ffa   :  { %5142 = vadd.xlane.f32.xlu1 %v5141_v29 }
0x1ffb   :  { %v16531_v49 = vadd.f32 %v5134_v57, %v5130_v24 }
0x1ffd   :  { %v5144_v32 = vsel %vm145_vm3, %v16531_v49, 0.0 }
0x1ffe   :  { %5145 = vadd.xlane.f32.xlu0 %v5144_v32 }
0x2083   :  { %v5140_v43 = vpop.xlane.xlu0 %5139 }
0x2084   :  { %v5147_v33 = vmul.f32 0.03125, %v5140_v43 }
0x2086   :  { %v5150_v13 = vsub.f32 %v16519_v61, %v5147_v33  ;;  %v11547_v33 = vld [vmem:[%s18100_s4 + $0x28] sm:$0xff] }
0x2087   :  { %v5143_v47 = vpop.xlane.xlu1 %5142 }
0x2088   :  { %v5148_v36 = vmul.f32 0.03125, %v5143_v47  ;;  %v5153_v55 = vmul.f32 %v5150_v13, %v5150_v13  ;;  %v11549_v47 = vld [vmem:[%s18100_s4 + $0x38] sm:$0xff] }
0x208a   :  { %v5151_v37 = vsub.f32 %v16525_v16, %v5148_v36  ;;  %v5156_v27 = vsel %vm138_vm2, %v5153_v55, 0.0  ;;  %v5199_v55 = vrot.slane %v16514_v58, %v15896_v59 }
0x208b   :  { %5157 = vadd.xlane.f32.xlu1 %v5156_v27  ;;  %v5146_v38 = vpop.xlane.xlu0 %5145 }
0x208c   :  { %v5149_v40 = vmul.f32 0.03125, %v5146_v38  ;;  %v5154_v25 = vmul.f32 %v5151_v37, %v5151_v37 }
0x208e   :  { %v5152_v42 = vsub.f32 %v16531_v49, %v5149_v40  ;;  %v5159_v45 = vsel %vm138_vm2, %v5154_v25, 0.0 }
0x208f   :  { %5160 = vadd.xlane.f32.xlu0 %v5159_v45 }
0x2090   :  { %v5155_v44 = vmul.f32 %v5152_v42, %v5152_v42 }
0x2092   :  { %v5162_v35 = vsel %vm145_vm3, %v5155_v44, 0.0 }
0x2093   :  { %5163 = vadd.xlane.f32.xlu1 %v5162_v35 }
0x2118   :  { %v5158_v4 = vpop.xlane.xlu1 %5157 }
0x2119   :  { %v5165_v19 = vmul.f32 0.03125, %v5158_v4 }
0x211b   :  { %v5168_v53 = vadd.f32 1e-05, %v5165_v19 }
0x211c   :  { %v5161_v8 = vpop.xlane.xlu0 %5160 }
0x211d   :  { %14956 = vrsqrt.f32 %v5168_v53  ;;  %v5166_v6 = vmul.f32 0.03125, %v5161_v8 }
0x211f   :  { %v5169_v5 = vadd.f32 1e-05, %v5166_v6 }
0x2120   :  { %v5164_v12 = vpop.xlane.xlu1 %5163 }
0x2121   :  { %14958 = vrsqrt.f32 %v5169_v5  ;;  %v5167_v9 = vmul.f32 0.03125, %v5164_v12 }
0x2123   :  { %v5170_v57 = vadd.f32 1e-05, %v5167_v9 }
0x2125   :  { %14960 = vrsqrt.f32 %v5170_v57 }
0x2127   :  { %v14957_v14 = vpop.eup %14956 }
0x2128   :  { %v5174_v18 = vmul.f32 %v14957_v14, %v5150_v13  ;;  %v11548_v13 = vld [vmem:[%s18100_s4 + $0x30] sm:$0xff] }
0x2129   :  { %v14571_v36 = vpack.c.bf16 %v11549_v47, %v11548_v13  ;;  %v5416_v13 = vrot.slane %v16514_v58, %v15910_v28  ;;  %v11554_v58 = vld [vmem:[%s18097_s5 + $0x20] sm:$0xff] }
0x212a   :  { %v5181_v21 = vmul.f32 %v5180_v30, %v5174_v18 }
0x212b   :  { %v14959_v22 = vpop.eup %14958 }
0x212c   :  { %v5188_v48 = vadd.f32 %v5187_v2, %v5181_v21  ;;  %v5175_v23 = vmul.f32 %v14959_v22, %v5151_v37 }
0x212e   :  { %13406 = vmatmul.mubr.msk.f32.vlgmr.msra.gmra.mrb[150].mxu1 %vm138_vm2, %v5188_v48  ;;  %v5182_v26 = vmul.f32 %v5180_v30, %v5175_v23 }
0x212f   :  { %v14961_v24 = vpop.eup %14960  ;;  %14575 = vmatpush3.bf16.msra.mxu1 %v14574_v52  ;;  %13408 = vmatprep.mubr.msk.f32.mxu1 %vm15120_vm0, %v15121_v3 }
0x2130   :  { %13435 = vmatprep.subr.mxu1 %v15121_v3  ;;  %v5189_v29 = vadd.f32 %v5187_v2, %v5182_v26  ;;  %v5176_v32 = vmul.f32 %v14961_v24, %v5152_v42 }
0x2132   :  { %13409 = vmatmul.mubr.msk.f32.gmra.mrb[152].mxu1 %vm138_vm2, %v5189_v29  ;;  %v5183_v43 = vmul.f32 %v5180_v30, %v5176_v32  ;;  %v11556_v32 = vld [vmem:[%s18097_s5 + $0x48] sm:$0xff] }
0x2133   :  { %13436 = vmatpush3.msk.msra.mxu1 %vm596_vm5, %v15210_v20  ;;  %13411 = vmatprep.mubr.msk.f32.mxu1 %vm15120_vm0, %v15121_v3  ;;  %v14568_v20 = vpack.c.bf16 %v11547_v33, %v11546_v15 }
0x2134   :  { %v5190_v10 = vadd.f32 %v5187_v2, %v5183_v43  ;;  %14579 = vmatprep.subr.bf16.mxu1 %v15119_v0  ;;  %v11557_v43 = vld [vmem:[%s18097_s5 + $0x50] sm:$0xff] }
0x2135   :  { %14569 = vmatpush3.bf16.msra.mxu0 %v14568_v20 }
0x2136   :  { %13412 = vmatmul.mubr.msk.f32.gmra.mrb[154].mxu1 %vm138_vm2, %v5190_v10  ;;  %14570 = vmatprep.subr.bf16.mxu0 %v15119_v0  ;;  %v11558_v10 = vld [vmem:[%s18097_s5 + $0x58] sm:$0x3] }
0x2137   :  { %13437 = vmatprep.mubr.msk.f32.mxu1 %vm15120_vm0, %v15121_v3 }
0x2139   :  { %14572 = vmatpush3.bf16.msra.mxu0 %v14571_v36 }
0x213a   :  { %14576 = vmatprep.subr.bf16.mxu0 %v15119_v0  ;;  %13438 = vmatmul.mubr.msk.f32.vlgmr.msra.gmra.mrb[156].mxu1 %vm555_vm6, %v11556_v32 }
0x213b   :  { %13440 = vmatprep.mubr.msk.f32.mxu1 %vm15120_vm0, %v15121_v3 }
0x213e   :  { %13441 = vmatmul.mubr.msk.f32.gmra.mrb[158].mxu1 %vm555_vm6, %v11557_v43 }
0x213f   :  { %13443 = vmatprep.mubr.msk.f32.mxu1 %vm15120_vm0, %v15121_v3 }
0x2142   :  { %13444 = vmatmul.mubr.msk.f32.gmra.mrb[160].mxu1 %vm555_vm6, %v11558_v10 }
0x2143   :  { %13469 = vmatprep.mubr.msk.f32.mxu1 %vm15120_vm0, %v15121_v3 }
0x2201   :  { %v5275_v37 = vpop.f32.mrb[150].mxu1 }
0x2202   :  { %v5276_v27 = vadd.f32 %v5275_v37, %v5199_v55  ;;  %v13407_v38 = vpop.f32.mrb[151].mxu1 }
0x2204   :  { %v5292_v40 = vmul.f32 0.044715, %v5276_v27  ;;  %v5289_v14 = vmul.f32 0.5, %v5276_v27 }
0x2205   :  { %v5280_v25 = vpop.f32.mrb[152].mxu1 }
0x2206   :  { %v5295_v42 = vmul.f32 %v5292_v40, %v5276_v27  ;;  %v5281_v45 = vadd.f32 %v5280_v25, %v5199_v55  ;;  %v13410_v44 = vpop.f32.mrb[153].mxu1 }
0x2208   :  { %v5298_v35 = vmul.f32 %v5295_v42, %v5276_v27  ;;  %v5293_v46 = vmul.f32 0.044715, %v5281_v45  ;;  %v5290_v22 = vmul.f32 0.5, %v5281_v45 }
0x2209   :  { %v5285_v50 = vpop.f32.mrb[154].mxu1 }
0x220a   :  { %v5301_v51 = vadd.f32 %v5298_v35, %v5276_v27  ;;  %v5296_v11 = vmul.f32 %v5293_v46, %v5281_v45  ;;  %v5286_v62 = vadd.f32 %v5285_v50, %v5199_v55  ;;  %v13413_v1 = vpop.f32.mrb[155].mxu1 }
0x220c   :  { %v5304_v4 = vmul.f32 0.7978846, %v5301_v51  ;;  %v5299_v19 = vmul.f32 %v5296_v11, %v5281_v45  ;;  %v5294_v53 = vmul.f32 0.044715, %v5286_v62  ;;  %v5291_v26 = vmul.f32 0.5, %v5286_v62  ;;  %v36_v11 = vld [vmem:[%s18094_s6 + $0x50] sm:$0xff] }
0x220e   :  { %14962 = vtanh.f32 %v5304_v4  ;;  %v5302_v8 = vadd.f32 %v5299_v19, %v5281_v45  ;;  %v5297_v6 = vmul.f32 %v5294_v53, %v5286_v62  ;;  %v37_v53 = vld [vmem:[%s18094_s6 + $0x58] sm:$0xff] }
0x2210   :  { %v5300_v5 = vmul.f32 %v5297_v6, %v5286_v62  ;;  %v5305_v12 = vmul.f32 0.7978846, %v5302_v8 }
0x2212   :  { %v5303_v9 = vadd.f32 %v5300_v5, %v5286_v62  ;;  %14964 = vtanh.f32 %v5305_v12 }
0x2214   :  { %v5306_v57 = vmul.f32 0.7978846, %v5303_v9 }
0x2216   :  { %14966 = vtanh.f32 %v5306_v57  ;;  %v38_v57 = vld [vmem:[%s18094_s6 + $0x60] sm:$0xff] }
0x2218   :  { %v14963_v30 = vpop.eup %14962 }
0x2219   :  { %v5310_v2 = vadd.f32 1.0, %v14963_v30 }
0x221b   :  { %v5313_v18 = vmul.f32 %v5310_v2, %v5289_v14 }
0x221c   :  { %v14965_v21 = vpop.eup %14964 }
0x221d   :  { %13423 = vmatmul.mubr.msk.f32.vlgmr.msra.gmra.mrb[156].mxu0 %vm138_vm2, %v5313_v18  ;;  %v5311_v48 = vadd.f32 1.0, %v14965_v21 }
0x221e   :  { %13425 = vmatprep.mubr.msk.f32.mxu0 %vm15120_vm0, %v15121_v3 }
0x221f   :  { %v5314_v23 = vmul.f32 %v5311_v48, %v5290_v22 }
0x2220   :  { %v14967_v52 = vpop.eup %14966 }
0x2221   :  { %13426 = vmatmul.mubr.msk.f32.gmra.mrb[158].mxu0 %vm138_vm2, %v5314_v23  ;;  %v5312_v24 = vadd.f32 1.0, %v14967_v52 }
0x2222   :  { %13428 = vmatprep.mubr.msk.f32.mxu0 %vm15120_vm0, %v15121_v3 }
0x2223   :  { %v5315_v29 = vmul.f32 %v5312_v24, %v5291_v26 }
0x2225   :  { %13429 = vmatmul.mubr.msk.f32.gmra.mrb[160].mxu0 %vm138_vm2, %v5315_v29 }
0x2226   :  { %13452 = vmatprep.mubr.msk.f32.mxu0 %vm15120_vm0, %v15121_v3 }
0x22f0   :  { %v5396_v15 = vpop.f32.mrb[156].mxu0 }
0x22f1   :  { %v13424_v33 = vpop.f32.mrb[157].mxu0  ;;  %v5410_v20 = vadd.f32 %v5396_v15, %v16519_v61  ;;  %v11553_v61 = vld [vmem:[%s18097_s5 + $0x18] sm:$0xff] }
0x22f3   :  { %v5417_v37 = vadd.f32 %v5416_v13, %v5410_v20 }
0x22f4   :  { %v5401_v47 = vpop.f32.mrb[158].mxu0 }
0x22f5   :  { %v5411_v36 = vadd.f32 %v5401_v47, %v16525_v16  ;;  %v13427_v55 = vpop.f32.mrb[159].mxu0  ;;  %v11555_v16 = vld [vmem:[%s18097_s5 + $0x28] sm:$0x3] }
0x22f6   :  { %v11567_v55 = vld [vmem:[%s18096_s1 + $0x300] sm:$0xff] }
0x22f7   :  { %v5418_v27 = vadd.f32 %v5416_v13, %v5411_v36 }
0x22f8   :  { %v5406_v38 = vpop.f32.mrb[160].mxu0 }
0x22f9   :  { %v14577_v40 = vpack.c.bf16 %v5418_v27, %v5417_v37  ;;  %v5412_v25 = vadd.f32 %v5406_v38, %v16531_v49  ;;  %v13430_v42 = vpop.f32.mrb[161].mxu0  ;;  %v5506_v49 = vpop.f32.mrb[156].mxu1  ;;  %v11568_v37 = vld [vmem:[%s18096_s1 + $0x308] sm:$0xff]  ;;  %v11574_v27 = vld [vmem:[%s18096_s1 + $0x380] sm:$0xff] }
0x22fa   :  { %v13439_v44 = vpop.f32.mrb[157].mxu1  ;;  %v14580_v38 = vpack.c.bf16 %v11568_v37, %v11567_v55  ;;  %v11569_v42 = vld [vmem:[%s18096_s1 + $0x310] sm:$0xff] }
0x22fb   :  { %14578 = vmatpush3.bf16.msra.mxu0 %v14577_v40  ;;  %v5419_v45 = vadd.f32 %v5416_v13, %v5412_v25  ;;  %v5511_v35 = vpop.f32.mrb[158].mxu1  ;;  %v11575_v40 = vld [vmem:[%s18096_s1 + $0x388] sm:$0xff] }
0x22fc   :  { %13450 = vmatprep.subr.mxu0 %v15121_v3  ;;  %v13442_v46 = vpop.f32.mrb[159].mxu1  ;;  %v14586_v25 = vpack.c.bf16 %v11575_v40, %v11574_v27  ;;  %14581 = vmatpush3.bf16.msra.mxu1 %v14580_v38 }
0x22fd   :  { %v5516_v50 = vpop.f32.mrb[160].mxu1  ;;  %14582 = vmatprep.subr.bf16.mxu1 %v15119_v0 }
0x22fe   :  { %v13445_v51 = vpop.f32.mrb[161].mxu1 }
0x22ff   :  { %13451 = vmatpush3.msk.msra.mxu0 %vm596_vm5, %v5419_v45  ;;  %v11570_v45 = vld [vmem:[%s18096_s1 + $0x318] sm:$0xff] }
0x2300   :  { %13453 = vmatmul.mubr.msk.f32.vlgmr.msra.gmra.mrb[162].mxu0 %vm555_vm6, %v11553_v61  ;;  %14585 = vmatprep.subr.bf16.mxu0 %v15119_v0  ;;  %v11576_v61 = vld [vmem:[%s18096_s1 + $0x390] sm:$0xff] }
0x2301   :  { %13455 = vmatprep.mubr.msk.f32.mxu0 %vm15120_vm0, %v15121_v3  ;;  %14587 = vmatpush3.bf16.msra.mxu0 %v14586_v25 }
0x2302   :  { %14588 = vmatprep.subr.bf16.mxu0 %v15119_v0 }
0x2304   :  { %13456 = vmatmul.mubr.msk.f32.gmra.mrb[164].mxu0 %vm555_vm6, %v11554_v58  ;;  %v14583_v58 = vpack.c.bf16 %v11570_v45, %v11569_v42 }
0x2305   :  { %13458 = vmatprep.mubr.msk.f32.mxu0 %vm15120_vm0, %v15121_v3 }
0x2306   :  { %14584 = vmatpush3.bf16.msra.mxu1 %v14583_v58 }
0x2307   :  { %14591 = vmatprep.subr.bf16.mxu1 %v15119_v0 }
0x2308   :  { %13459 = vmatmul.mubr.msk.f32.gmra.mrb[166].mxu0 %vm555_vm6, %v11555_v16  ;;  %v11577_v16 = vld [vmem:[%s18096_s1 + $0x398] sm:$0xff] }
0x2309   :  { %13486 = vmatprep.mubr.msk.f32.mxu0 %vm15120_vm0, %v15121_v3 }
0x23d3   :  { %v5598_v62 = vpop.f32.mrb[162].mxu0 }
0x23d4   :  { %v5599_v1 = vadd.f32 %v5598_v62, %v5506_v49  ;;  %v13454_v4 = vpop.f32.mrb[163].mxu0  ;;  %v14589_v49 = vpack.c.bf16 %v11577_v16, %v11576_v61  ;;  %v11600_v16 = vld [vmem:[%s18096_s1 + $0x320] sm:$0xff] }
0x23d5   :  { %v33_v4 = vld [vmem:[%s18094_s6 + $0x38] sm:$0xff] }
0x23d6   :  { %v16646_v19 = vadd.f32 %v5599_v1, %v36_v11  ;;  %14590 = vmatpush3.bf16.msra.mxu0 %v14589_v49  ;;  %v11601_v49 = vld [vmem:[%s18096_s1 + $0x328] sm:$0xff] }
0x23d7   :  { %v5603_v8 = vpop.f32.mrb[164].mxu0  ;;  %14597 = vmatprep.subr.bf16.mxu0 %v15119_v0 }
0x23d8   :  { %v5604_v6 = vadd.f32 %v5603_v8, %v5511_v35  ;;  %v13457_v5 = vpop.f32.mrb[165].mxu0  ;;  %v5615_v12 = vsel %vm138_vm2, %v16646_v19, 0.0  ;;  %v5657_v8 = vrot.slane %v33_v4, %v15255_v60 }
0x23d9   :  { %5616 = vadd.xlane.f32.xlu0 %v5615_v12  ;;  %v5664_v5 = vrot.slane %v33_v4, %v15261_v63 }
0x23da   :  { %v16653_v9 = vadd.f32 %v5604_v6, %v37_v53 }
0x23db   :  { %v5608_v30 = vpop.f32.mrb[166].mxu0 }
0x23dc   :  { %v5609_v14 = vadd.f32 %v5608_v30, %v5516_v50  ;;  %v5618_v2 = vsel %vm138_vm2, %v16653_v9, 0.0  ;;  %v13460_v18 = vpop.f32.mrb[167].mxu0  ;;  %v11582_v30 = vld [vmem:[%s18096_s1 + $0x408] sm:$0xff] }
0x23dd   :  { %5619 = vadd.xlane.f32.xlu1 %v5618_v2 }
0x23de   :  { %v16660_v21 = vadd.f32 %v5609_v14, %v38_v57  ;;  %v11581_v57 = vld [vmem:[%s18096_s1 + $0x400] sm:$0xff] }
0x23e0   :  { %v5621_v22 = vsel %vm145_vm3, %v16660_v21, 0.0 }
0x23e1   :  { %5622 = vadd.xlane.f32.xlu0 %v5621_v22 }
0x2466   :  { %v5617_v48 = vpop.xlane.xlu0 %5616 }
0x2467   :  { %v5624_v23 = vmul.f32 0.03125, %v5617_v48  ;;  %v14592_v48 = vpack.c.bf16 %v11582_v30, %v11581_v57 }
0x2469   :  { %v5627_v52 = vsub.f32 %v16646_v19, %v5624_v23  ;;  %v11583_v23 = vld [vmem:[%s18096_s1 + $0x410] sm:$0xff] }
0x246a   :  { %v5620_v26 = vpop.xlane.xlu1 %5619 }
0x246b   :  { %v5625_v24 = vmul.f32 0.03125, %v5620_v26  ;;  %v5630_v29 = vmul.f32 %v5627_v52, %v5627_v52 }
0x246d   :  { %v5628_v32 = vsub.f32 %v16653_v9, %v5625_v24  ;;  %v5633_v43 = vsel %vm138_vm2, %v5630_v29, 0.0 }
0x246e   :  { %5634 = vadd.xlane.f32.xlu1 %v5633_v43  ;;  %v5623_v10 = vpop.xlane.xlu0 %5622 }
0x246f   :  { %v5626_v15 = vmul.f32 0.03125, %v5623_v10  ;;  %v5631_v33 = vmul.f32 %v5628_v32, %v5628_v32 }
0x2471   :  { %v5629_v20 = vsub.f32 %v16660_v21, %v5626_v15  ;;  %v5636_v13 = vsel %vm138_vm2, %v5631_v33, 0.0 }
0x2472   :  { %5637 = vadd.xlane.f32.xlu0 %v5636_v13 }
0x2473   :  { %v5632_v47 = vmul.f32 %v5629_v20, %v5629_v20 }
0x2475   :  { %v5639_v36 = vsel %vm145_vm3, %v5632_v47, 0.0 }
0x2476   :  { %5640 = vadd.xlane.f32.xlu1 %v5639_v36 }
0x24fb   :  { %v5635_v44 = vpop.xlane.xlu1 %5634 }
0x24fc   :  { %v5642_v35 = vmul.f32 0.03125, %v5635_v44 }
0x24fe   :  { %v5645_v46 = vadd.f32 1e-05, %v5642_v35  ;;  %v14605_v35 = vpack.c.bf16 %v11601_v49, %v11600_v16 }
0x24ff   :  { %v5638_v50 = vpop.xlane.xlu0 %5637 }
0x2500   :  { %14968 = vrsqrt.f32 %v5645_v46  ;;  %v5643_v51 = vmul.f32 0.03125, %v5638_v50 }
0x2502   :  { %v5646_v11 = vadd.f32 1e-05, %v5643_v51  ;;  %v11602_v51 = vld [vmem:[%s18096_s1 + $0x330] sm:$0xff] }
0x2503   :  { %v5641_v62 = vpop.xlane.xlu1 %5640 }
0x2504   :  { %14970 = vrsqrt.f32 %v5646_v11  ;;  %v5644_v1 = vmul.f32 0.03125, %v5641_v62  ;;  %v11603_v11 = vld [vmem:[%s18096_s1 + $0x338] sm:$0xff] }
0x2506   :  { %v5647_v53 = vadd.f32 1e-05, %v5644_v1  ;;  %v14608_v1 = vpack.c.bf16 %v11603_v11, %v11602_v51 }
0x2508   :  { %14972 = vrsqrt.f32 %v5647_v53  ;;  %v11614_v53 = vld [vmem:[%s18096_s1 + $0x420] sm:$0xff] }
0x250a   :  { %v14969_v6 = vpop.eup %14968 }
0x250b   :  { %v5651_v12 = vmul.f32 %v14969_v6, %v5627_v52  ;;  %v11584_v52 = vld [vmem:[%s18096_s1 + $0x418] sm:$0xff] }
0x250c   :  { %v14595_v43 = vpack.c.bf16 %v11584_v52, %v11583_v23  ;;  %v16838_v52 = vld [vmem:[%s18097_s5 + $0x8] sm:$0xff] }
0x250d   :  { %v5658_v14 = vmul.f32 %v5657_v8, %v5651_v12  ;;  %v11617_v12 = vld [vmem:[%s18096_s1 + $0x438] sm:$0xff] }
0x250e   :  { %v14971_v2 = vpop.eup %14970 }
0x250f   :  { %v16709_v18 = vadd.f32 %v5664_v5, %v5658_v14  ;;  %v5652_v22 = vmul.f32 %v14971_v2, %v5628_v32  ;;  %v16831_v14 = vld [vmem:[%s18097_s5] sm:$0xff] }
0x2511   :  { %v5659_v26 = vmul.f32 %v5657_v8, %v5652_v22  ;;  %13470 = vmatmul.mubr.msk.f32.vlgmr.msra.gmra.mrb[162].mxu1 %vm138_vm2, %v16709_v18  ;;  %13487 = vmatmul.mubr.msk.f32.vlgmr.msra.gmra.mrb[168].mxu0 %vm138_vm2, %v16709_v18 }
0x2512   :  { %v14973_v24 = vpop.eup %14972  ;;  %13472 = vmatprep.mubr.msk.f32.mxu1 %vm15120_vm0, %v15121_v3  ;;  %13489 = vmatprep.mubr.msk.f32.mxu0 %vm15120_vm0, %v15121_v3 }
0x2513   :  { %v16725_v29 = vadd.f32 %v5664_v5, %v5659_v26  ;;  %v5653_v32 = vmul.f32 %v14973_v24, %v5629_v20  ;;  %14593 = vmatpush3.bf16.msra.mxu1 %v14592_v48 }
0x2514   :  { %14594 = vmatprep.subr.bf16.mxu1 %v15119_v0 }
0x2515   :  { %v5660_v10 = vmul.f32 %v5657_v8, %v5653_v32  ;;  %13473 = vmatmul.mubr.msk.f32.gmra.mrb[164].mxu1 %vm138_vm2, %v16725_v29  ;;  %13490 = vmatmul.mubr.msk.f32.gmra.mrb[170].mxu0 %vm138_vm2, %v16725_v29  ;;  %v11615_v8 = vld [vmem:[%s18096_s1 + $0x428] sm:$0xff] }
0x2516   :  { %13475 = vmatprep.mubr.msk.f32.mxu1 %vm15120_vm0, %v15121_v3  ;;  %13492 = vmatprep.mubr.msk.f32.mxu0 %vm15120_vm0, %v15121_v3  ;;  %v14617_v6 = vpack.c.bf16 %v11615_v8, %v11614_v53 }
0x2517   :  { %v16736_v15 = vadd.f32 %v5664_v5, %v5660_v10  ;;  %14596 = vmatpush3.bf16.msra.mxu1 %v14595_v43  ;;  %v11616_v5 = vld [vmem:[%s18096_s1 + $0x430] sm:$0xff] }
0x2518   :  { %14601 = vmatprep.subr.bf16.mxu1 %v15119_v0  ;;  %v14620_v57 = vpack.c.bf16 %v11617_v12, %v11616_v5  ;;  %v16845_v10 = vld [vmem:[%s18097_s5 + $0x10] sm:$0x3]  ;;  %v11610_v5 = vld [vmem:[%s18096_s1 + $0x3b8] sm:$0xff] }
0x2519   :  { %13476 = vmatmul.mubr.msk.f32.gmra.mrb[166].mxu1 %vm138_vm2, %v16736_v15  ;;  %13493 = vmatmul.mubr.msk.f32.gmra.mrb[172].mxu0 %vm138_vm2, %v16736_v15 }
0x251a   :  { %13503 = vmatprep.mubr.msk.f32.mxu1 %vm15120_vm0, %v15121_v3  ;;  %13518 = vmatprep.mubr.msk.f32.mxu0 %vm15120_vm0, %v15121_v3 }
0x251d   :  { %13504 = vmatmul.mubr.msk.f32.vlgmr.msra.gmra.mrb[168].mxu1 %vm138_vm2, %v16709_v18 }
0x251e   :  { %13506 = vmatprep.mubr.msk.f32.mxu1 %vm15120_vm0, %v15121_v3 }
0x2521   :  { %13507 = vmatmul.mubr.msk.f32.gmra.mrb[170].mxu1 %vm138_vm2, %v16725_v29 }
0x2522   :  { %13509 = vmatprep.mubr.msk.f32.mxu1 %vm15120_vm0, %v15121_v3 }
0x2525   :  { %13510 = vmatmul.mubr.msk.f32.gmra.mrb[172].mxu1 %vm138_vm2, %v16736_v15 }
0x2526   :  { %13533 = vmatprep.mubr.msk.f32.mxu1 %vm15120_vm0, %v15121_v3 }
0x25e4   :  { %v5748_v33 = vpop.f32.mrb[162].mxu1  ;;  %v5833_v20 = vpop.f32.mrb[168].mxu0 }
0x25e5   :  { %v13471_v13 = vpop.f32.mrb[163].mxu1  ;;  %v13488_v47 = vpop.f32.mrb[169].mxu0 }
0x25e8   :  { %v5753_v36 = vpop.f32.mrb[164].mxu1  ;;  %v5838_v55 = vpop.f32.mrb[170].mxu0 }
0x25e9   :  { %v14598_v37 = vpack.c.bf16 %v5838_v55, %v5833_v20  ;;  %v13474_v27 = vpop.f32.mrb[165].mxu1  ;;  %v13491_v38 = vpop.f32.mrb[171].mxu0 }
0x25eb   :  { %14600 = vmatpush3.bf16.xpose.msk.msra.mxu0 %vm15324_vm4, %v14598_v37 }
0x25ec   :  { %v5758_v40 = vpop.f32.mrb[166].mxu1  ;;  %v5843_v25 = vpop.f32.mrb[172].mxu0  ;;  %13516 = vmatprep.subr.mxu0 %v15121_v3 }
0x25ed   :  { %v13477_v42 = vpop.f32.mrb[167].mxu1  ;;  %v13494_v45 = vpop.f32.mrb[173].mxu0 }
0x25f0   :  { %v5918_v61 = vpop.f32.mrb[168].mxu1 }
0x25f1   :  { %v13505_v58 = vpop.f32.mrb[169].mxu1 }
0x25f3   :  { %13517 = vmatpush3.xpose.msk.msra.mxu0 %vm48_vm1, %v5843_v25 }
0x25f4   :  { %v5923_v44 = vpop.f32.mrb[170].mxu1  ;;  %14604 = vmatprep.subr.bf16.mxu0 %v15119_v0 }
0x25f5   :  { %v14602_v46 = vpack.c.bf16 %v5923_v44, %v5918_v61  ;;  %v13508_v50 = vpop.f32.mrb[171].mxu1 }
0x25f6   :  { %13519 = vmatmul.mubr.msk.f32.vlgmr.msra.gmra.mrb[174].mxu0 %vm48_vm1, %v5748_v33 }
0x25f7   :  { %14603 = vmatpush3.bf16.msra.mxu1 %v14602_v46  ;;  %13521 = vmatprep.mubr.msk.f32.mxu0 %vm15120_vm0, %v15121_v3 }
0x25f8   :  { %v5928_v62 = vpop.f32.mrb[172].mxu1  ;;  %13531 = vmatprep.subr.mxu1 %v15121_v3  ;;  %14606 = vmatpush3.bf16.msra.mxu0 %v14605_v35 }
0x25f9   :  { %v13511_v4 = vpop.f32.mrb[173].mxu1  ;;  %14607 = vmatprep.subr.bf16.mxu0 %v15119_v0 }
0x25fa   :  { %13522 = vmatmul.mubr.msk.f32.gmra.mrb[176].mxu0 %vm48_vm1, %v5753_v36  ;;  %v11608_v4 = vld [vmem:[%s18096_s1 + $0x3a8] sm:$0xff] }
0x25fb   :  { %13532 = vmatpush3.msk.msra.mxu1 %vm596_vm5, %v5928_v62  ;;  %13524 = vmatprep.mubr.msk.f32.mxu0 %vm15120_vm0, %v15121_v3 }
0x25fc   :  { %14609 = vmatpush3.bf16.msra.mxu0 %v14608_v1  ;;  %14610 = vmatprep.subr.bf16.mxu1 %v15119_v0  ;;  %v11607_v1 = vld [vmem:[%s18096_s1 + $0x3a0] sm:$0xff] }
0x25fd   :  { %14616 = vmatprep.subr.bf16.mxu0 %v15119_v0  ;;  %v14611_v8 = vpack.c.bf16 %v11608_v4, %v11607_v1 }
0x25fe   :  { %13525 = vmatmul.mubr.msk.f32.gmra.mrb[178].mxu0 %vm48_vm1, %v5758_v40 }
0x25ff   :  { %13550 = vmatprep.mubr.msk.f32.mxu0 %vm15120_vm0, %v15121_v3 }
0x2602   :  { %13551 = vmatmul.mubr.msk.f32.vlgmr.msra.gmra.mrb[180].mxu0 %vm138_vm2, %v16709_v18 }
0x2603   :  { %13553 = vmatprep.mubr.msk.f32.mxu0 %vm15120_vm0, %v15121_v3  ;;  %14618 = vmatpush3.bf16.msra.mxu0 %v14617_v6  ;;  %v11609_v6 = vld [vmem:[%s18096_s1 + $0x3b0] sm:$0xff] }
0x2604   :  { %14619 = vmatprep.subr.bf16.mxu0 %v15119_v0 }
0x2606   :  { %13554 = vmatmul.mubr.msk.f32.gmra.mrb[182].mxu0 %vm138_vm2, %v16725_v29 }
0x2607   :  { %13556 = vmatprep.mubr.msk.f32.mxu0 %vm15120_vm0, %v15121_v3  ;;  %14621 = vmatpush3.bf16.msra.mxu0 %v14620_v57  ;;  %v14614_v57 = vpack.c.bf16 %v11610_v5, %v11609_v6 }
0x2608   :  { %14626 = vmatprep.subr.bf16.mxu0 %v15119_v0 }
0x260a   :  { %13557 = vmatmul.mubr.msk.f32.gmra.mrb[184].mxu0 %vm138_vm2, %v16736_v15 }
0x260b   :  { %13584 = vmatprep.mubr.msk.f32.mxu0 %vm15120_vm0, %v15121_v3 }
0x260e   :  { %13585 = vmatmul.mubr.msk.f32.vlgmr.msra.gmra.mrb[186].mxu0 %vm138_vm2, %v16709_v18 }
0x260f   :  { %13587 = vmatprep.mubr.msk.f32.mxu0 %vm15120_vm0, %v15121_v3 }
0x2612   :  { %13588 = vmatmul.mubr.msk.f32.gmra.mrb[188].mxu0 %vm138_vm2, %v16725_v29 }
0x2613   :  { %13590 = vmatprep.mubr.msk.f32.mxu0 %vm15120_vm0, %v15121_v3 }
0x2616   :  { %13591 = vmatmul.mubr.msk.f32.gmra.mrb[190].mxu0 %vm138_vm2, %v16736_v15 }
0x2617   :  { %13614 = vmatprep.mubr.msk.f32.mxu0 %vm15120_vm0, %v15121_v3 }
0x26c9   :  { %v6016_v30 = vpop.f32.mrb[174].mxu0 }
0x26ca   :  { %v6017_v2 = vadd.f32 %v16831_v14, %v6016_v30  ;;  %v13520_v22 = vpop.f32.mrb[175].mxu0 }
0x26cc   :  { %v6030_v48 = vsel %vm555_vm6, %v6017_v2, -inf }
0x26cd   :  { %6031 = vmax.xlane.f32.xlu0 %v6030_v48  ;;  %v6021_v23 = vpop.f32.mrb[176].mxu0 }
0x26ce   :  { %v6022_v26 = vadd.f32 %v16838_v52, %v6021_v23  ;;  %v13523_v24 = vpop.f32.mrb[177].mxu0 }
0x26d0   :  { %v6033_v32 = vsel %vm555_vm6, %v6022_v26, -inf }
0x26d1   :  { %6034 = vmax.xlane.f32.xlu1 %v6033_v32  ;;  %v6026_v43 = vpop.f32.mrb[178].mxu0 }
0x26d2   :  { %v6027_v33 = vadd.f32 %v16845_v10, %v6026_v43  ;;  %v13526_v20 = vpop.f32.mrb[179].mxu0 }
0x26d4   :  { %v6036_v13 = vsel %vm562_vm7, %v6027_v33, -inf }
0x26d5   :  { %6037 = vmax.xlane.f32.xlu0 %v6036_v13  ;;  %v16849_v47 = vpop.f32.mrb[180].mxu0 }
0x26d6   :  { %v13552_v36 = vpop.f32.mrb[181].mxu0 }
0x26d9   :  { %v16851_v55 = vpop.f32.mrb[182].mxu0 }
0x26da   :  { %v13555_v37 = vpop.f32.mrb[183].mxu0 }
0x26dd   :  { %v16853_v27 = vpop.f32.mrb[184].mxu0 }
0x26de   :  { %v13558_v38 = vpop.f32.mrb[185].mxu0 }
0x26e1   :  { %v6399_v40 = vpop.f32.mrb[186].mxu0 }
0x26e2   :  { %v13586_v25 = vpop.f32.mrb[187].mxu0 }
0x26e5   :  { %v6404_v42 = vpop.f32.mrb[188].mxu0 }
0x26e6   :  { %v14627_v45 = vpack.c.bf16 %v6404_v42, %v6399_v40  ;;  %v13589_v61 = vpop.f32.mrb[189].mxu0 }
0x26e8   :  { %14628 = vmatpush3.bf16.msra.mxu0 %v14627_v45 }
0x26e9   :  { %v6409_v58 = vpop.f32.mrb[190].mxu0  ;;  %13612 = vmatprep.subr.mxu0 %v15121_v3 }
0x26ea   :  { %v13592_v16 = vpop.f32.mrb[191].mxu0 }
0x26ec   :  { %13613 = vmatpush3.msk.msra.mxu0 %vm596_vm5, %v6409_v58 }
0x26ed   :  { %14632 = vmatprep.subr.bf16.mxu0 %v15119_v0 }
0x275a   :  { %v6032_v49 = vpop.xlane.xlu0 %6031 }
0x275b   :  { %v6039_v44 = vsub.f32 %v6017_v2, %v6032_v49 }
0x275d   :  { %v6042_v35 = vmul.f32 1.442695, %v6039_v44 }
0x275e   :  { %v6035_v46 = vpop.xlane.xlu1 %6034 }
0x275f   :  { %14974 = vpow2.f32 %v6042_v35  ;;  %v6040_v50 = vsub.f32 %v6022_v26, %v6035_v46 }
0x2761   :  { %v6044_v51 = vmul.f32 1.442695, %v6040_v50 }
0x2762   :  { %v6038_v11 = vpop.xlane.xlu0 %6037 }
0x2763   :  { %14976 = vpow2.f32 %v6044_v51  ;;  %v6041_v62 = vsub.f32 %v6027_v33, %v6038_v11 }
0x2765   :  { %v6046_v53 = vmul.f32 1.442695, %v6041_v62 }
0x2767   :  { %14978 = vpow2.f32 %v6046_v53 }
0x2769   :  { %v14975_v12 = vpop.eup %14974 }
0x276a   :  { %13534 = vmatmul.mubr.msk.f32.vlgmr.msra.gmra.mrb[174].mxu1 %vm555_vm6, %v14975_v12  ;;  %v6048_v44 = vsel %vm555_vm6, %v14975_v12, 0.0 }
0x276b   :  { %13536 = vmatprep.mubr.msk.f32.mxu1 %vm15120_vm0, %v15121_v3  ;;  %14612 = vmatpush3.bf16.msra.mxu1 %v14611_v8 }
0x276c   :  { %14613 = vmatprep.subr.bf16.mxu1 %v15119_v0 }
0x276d   :  { %v14977_v30 = vpop.eup %14976 }
0x276e   :  { %13537 = vmatmul.mubr.msk.f32.gmra.mrb[176].mxu1 %vm555_vm6, %v14977_v30  ;;  %v6051_v50 = vsel %vm555_vm6, %v14977_v30, 0.0  ;;  %v11599_v30 = vld [vmem:[%s18098_s2 + $0x88] sm:$0xff] }
0x276f   :  { %13539 = vmatprep.mubr.msk.f32.mxu1 %vm15120_vm0, %v15121_v3  ;;  %14615 = vmatpush3.bf16.msra.mxu1 %v14614_v57  ;;  %v11598_v57 = vld [vmem:[%s18098_s2 + $0x80] sm:$0xff] }
0x2770   :  { %14622 = vmatprep.subr.bf16.mxu1 %v15119_v0 }
0x2771   :  { %v14979_v2 = vpop.eup %14978 }
0x2772   :  { %13540 = vmatmul.mubr.msk.f32.gmra.mrb[178].mxu1 %vm555_vm6, %v14979_v2  ;;  %v6054_v46 = vsel %vm562_vm7, %v14979_v2, 0.0 }
0x2773   :  { %13567 = vmatprep.mubr.msk.f32.mxu1 %vm15120_vm0, %v15121_v3 }
0x2776   :  { %13568 = vmatmul.mubr.msk.f32.vlgmr.msra.gmra.mrb[180].mxu1 %vm138_vm2, %v16709_v18 }
0x2777   :  { %13570 = vmatprep.mubr.msk.f32.mxu1 %vm15120_vm0, %v15121_v3 }
0x277a   :  { %13571 = vmatmul.mubr.msk.f32.gmra.mrb[182].mxu1 %vm138_vm2, %v16725_v29 }
0x277b   :  { %13573 = vmatprep.mubr.msk.f32.mxu1 %vm15120_vm0, %v15121_v3 }
0x277e   :  { %13574 = vmatmul.mubr.msk.f32.gmra.mrb[184].mxu1 %vm138_vm2, %v16736_v15 }
0x277f   :  { %13599 = vmatprep.mubr.msk.f32.mxu1 %vm15120_vm0, %v15121_v3 }
0x283d   :  { %v16893_v22 = vpop.f32.mrb[174].mxu1 }
0x283e   :  { %v13535_v48 = vpop.f32.mrb[175].mxu1 }
0x283f   :  { %v14633_v48 = vpack.c.bf16 %v11599_v30, %v11598_v57 }
0x2841   :  { %v16895_v23 = vpop.f32.mrb[176].mxu1 }
0x2842   :  { %v13538_v26 = vpop.f32.mrb[177].mxu1 }
0x2845   :  { %v16897_v24 = vpop.f32.mrb[178].mxu1 }
0x2846   :  { %v13541_v32 = vpop.f32.mrb[179].mxu1 }
0x2849   :  { %v6314_v43 = vpop.f32.mrb[180].mxu1 }
0x284a   :  { %v13569_v33 = vpop.f32.mrb[181].mxu1 }
0x284d   :  { %v6319_v20 = vpop.f32.mrb[182].mxu1 }
0x284e   :  { %v14623_v13 = vpack.c.bf16 %v6319_v20, %v6314_v43  ;;  %v13572_v36 = vpop.f32.mrb[183].mxu1 }
0x284f   :  { %v11646_v36 = vld [vmem:[%s18096_s1 + $0x3c0] sm:$0xff] }
0x2850   :  { %14625 = vmatpush3.bf16.xpose.msk.msra.mxu1 %vm15324_vm4, %v14623_v13 }
0x2851   :  { %v6324_v37 = vpop.f32.mrb[184].mxu1  ;;  %13597 = vmatprep.subr.mxu1 %v15121_v3 }
0x2852   :  { %v13575_v38 = vpop.f32.mrb[185].mxu1 }
0x2858   :  { %13598 = vmatpush3.xpose.msk.msra.mxu1 %vm48_vm1, %v6324_v37  ;;  %v11647_v37 = vld [vmem:[%s18096_s1 + $0x3c8] sm:$0xff] }
0x2859   :  { %14629 = vmatprep.subr.bf16.mxu1 %v15119_v0 }
0x285b   :  { %13600 = vmatmul.mubr.msk.f32.vlgmr.msra.gmra.mrb[186].mxu1 %vm48_vm1, %v16849_v47 }
0x285c   :  { %13602 = vmatprep.mubr.msk.f32.mxu1 %vm15120_vm0, %v15121_v3 }
0x285f   :  { %13603 = vmatmul.mubr.msk.f32.gmra.mrb[188].mxu1 %vm48_vm1, %v16851_v55 }
0x2860   :  { %13605 = vmatprep.mubr.msk.f32.mxu1 %vm15120_vm0, %v15121_v3 }
0x2863   :  { %13606 = vmatmul.mubr.msk.f32.gmra.mrb[190].mxu1 %vm48_vm1, %v16853_v27 }
0x2864   :  { %13627 = vmatprep.mubr.msk.f32.mxu1 %vm15120_vm0, %v15121_v3 }
0x292e   :  { %v6497_v40 = vpop.f32.mrb[186].mxu1 }
0x292f   :  { %v6498_v25 = vadd.f32 %v16831_v14, %v6497_v40  ;;  %v13601_v42 = vpop.f32.mrb[187].mxu1 }
0x2931   :  { %v6511_v47 = vsel %vm555_vm6, %v6498_v25, -inf }
0x2932   :  { %6512 = vmax.xlane.f32.xlu1 %v6511_v47  ;;  %v6502_v45 = vpop.f32.mrb[188].mxu1  ;;  %v11648_v47 = vld [vmem:[%s18096_s1 + $0x3d0] sm:$0xff] }
0x2933   :  { %v6503_v61 = vadd.f32 %v16838_v52, %v6502_v45  ;;  %v13604_v55 = vpop.f32.mrb[189].mxu1  ;;  %v11649_v45 = vld [vmem:[%s18096_s1 + $0x3d8] sm:$0xff] }
0x2934   :  { %v14645_v55 = vpack.c.bf16 %v11649_v45, %v11648_v47 }
0x2935   :  { %v6514_v58 = vsel %vm555_vm6, %v6503_v61, -inf }
0x2936   :  { %6515 = vmax.xlane.f32.xlu0 %v6514_v58  ;;  %v6507_v16 = vpop.f32.mrb[190].mxu1 }
0x2937   :  { %v6508_v27 = vadd.f32 %v16845_v10, %v6507_v16  ;;  %v13607_v49 = vpop.f32.mrb[191].mxu1 }
0x2939   :  { %v6517_v35 = vsel %vm562_vm7, %v6508_v27, -inf }
0x293a   :  { %6049 = vadd.xlane.f32.xlu0 %v6048_v44  ;;  %6518 = vmax.xlane.f32.xlu1 %v6517_v35 }
0x293e   :  { %6055 = vadd.xlane.f32.xlu0 %v6054_v46  ;;  %6052 = vadd.xlane.f32.xlu1 %v6051_v50  ;;  %v11639_v46 = vld [vmem:[%s18096_s1 + $0x340] sm:$0xff]  ;;  %v11640_v50 = vld [vmem:[%s18096_s1 + $0x348] sm:$0xff] }
0x29bf   :  { %v6513_v51 = vpop.xlane.xlu1 %6512 }
0x29c0   :  { %v6520_v11 = vsub.f32 %v6498_v25, %v6513_v51  ;;  %v14642_v25 = vpack.c.bf16 %v11647_v37, %v11646_v36  ;;  %v11655_v37 = vld [vmem:[%s18096_s1 + $0x450] sm:$0xff] }
0x29c2   :  { %v6523_v62 = vmul.f32 1.442695, %v6520_v11 }
0x29c3   :  { %v6516_v1 = vpop.xlane.xlu0 %6515 }
0x29c4   :  { %14980 = vpow2.f32 %v6523_v62  ;;  %v6521_v4 = vsub.f32 %v6503_v61, %v6516_v1  ;;  %v14636_v62 = vpack.c.bf16 %v11640_v50, %v11639_v46 }
0x29c6   :  { %v6525_v53 = vmul.f32 1.442695, %v6521_v4 }
0x29c7   :  { %v6519_v8 = vpop.xlane.xlu1 %6518  ;;  %v6050_v6 = vpop.xlane.xlu0 %6049 }
0x29c8   :  { %14982 = vpow2.f32 %v6525_v53  ;;  %v6522_v5 = vsub.f32 %v6508_v27, %v6519_v8  ;;  %v11632_v27 = vld [vmem:[%s18098_s2 + $0x98] sm:$0xff]  ;;  %v11641_v53 = vld [vmem:[%s18096_s1 + $0x350] sm:$0xff] }
0x29c9   :  { %14984 = vrcp.f32 %v6050_v6  ;;  %v11642_v8 = vld [vmem:[%s18096_s1 + $0x358] sm:$0xff] }
0x29ca   :  { %v6527_v12 = vmul.f32 1.442695, %v6522_v5 }
0x29cb   :  { %v6053_v2 = vpop.xlane.xlu1 %6052  ;;  %v6056_v43 = vpop.xlane.xlu0 %6055 }
0x29cc   :  { %14986 = vpow2.f32 %v6527_v12  ;;  %v14639_v12 = vpack.c.bf16 %v11642_v8, %v11641_v53 }
0x29cd   :  { %14988 = vrcp.f32 %v6053_v2 }
0x29ce   :  { %v14981_v26 = vpop.eup %14980  ;;  %14990 = vrcp.f32 %v6056_v43  ;;  %v11653_v43 = vld [vmem:[%s18096_s1 + $0x440] sm:$0xff] }
0x29cf   :  { %13615 = vmatmul.mubr.msk.f32.vlgmr.msra.gmra.mrb[192].mxu0 %vm555_vm6, %v14981_v26  ;;  %v6529_v32 = vsel %vm555_vm6, %v14981_v26, 0.0 }
0x29d0   :  { %6530 = vadd.xlane.f32.xlu1 %v6529_v32  ;;  %13617 = vmatprep.mubr.msk.f32.mxu0 %vm15120_vm0, %v15121_v3 }
0x29d1   :  { %14634 = vmatpush3.bf16.msra.mxu0 %v14633_v48 }
0x29d2   :  { %v14983_v33 = vpop.eup %14982  ;;  %14641 = vmatprep.subr.bf16.mxu0 %v15119_v0 }
0x29d3   :  { %13618 = vmatmul.mubr.msk.f32.gmra.mrb[194].mxu0 %vm555_vm6, %v14983_v33  ;;  %v6532_v20 = vsel %vm555_vm6, %v14983_v33, 0.0  ;;  %v14985_v13 = vpop.eup %14984  ;;  %v11654_v33 = vld [vmem:[%s18096_s1 + $0x448] sm:$0xff] }
0x29d4   :  { %6533 = vadd.xlane.f32.xlu0 %v6532_v20  ;;  %13620 = vmatprep.mubr.msk.f32.mxu0 %vm15120_vm0, %v15121_v3  ;;  %v6152_v42 = vmul.f32 %v14985_v13, %v16893_v22  ;;  %v14648_v13 = vpack.c.bf16 %v11654_v33, %v11653_v43 }
0x29d6   :  { %v14987_v38 = vpop.eup %14986 }
0x29d7   :  { %13621 = vmatmul.mubr.msk.f32.gmra.mrb[196].mxu0 %vm555_vm6, %v14987_v38  ;;  %v6535_v40 = vsel %vm562_vm7, %v14987_v38, 0.0  ;;  %v14989_v61 = vpop.eup %14988  ;;  %v11656_v38 = vld [vmem:[%s18096_s1 + $0x458] sm:$0xff] }
0x29d8   :  { %6536 = vadd.xlane.f32.xlu1 %v6535_v40  ;;  %13640 = vmatprep.mubr.msk.f32.mxu0 %vm15120_vm0, %v15121_v3  ;;  %v6153_v58 = vmul.f32 %v14989_v61, %v16895_v23  ;;  %v14991_v22 = vpop.eup %14990  ;;  %v11631_v23 = vld [vmem:[%s18098_s2 + $0x90] sm:$0xff] }
0x29d9   :  { %v6154_v16 = vmul.f32 %v14991_v22, %v16897_v24  ;;  %v14630_v49 = vpack.c.bf16 %v11632_v27, %v11631_v23 }
0x29db   :  { %13641 = vmatmul.mubr.msk.f32.vlgmr.msra.gmra.mrb[198].mxu0 %vm48_vm1, %v6152_v42  ;;  %14631 = vmatpush3.bf16.msra.mxu1 %v14630_v49 }
0x29dc   :  { %13643 = vmatprep.mubr.msk.f32.mxu0 %vm15120_vm0, %v15121_v3  ;;  %14643 = vmatpush3.bf16.msra.mxu0 %v14642_v25  ;;  %v14651_v25 = vpack.c.bf16 %v11656_v38, %v11655_v37 }
0x29dd   :  { %14644 = vmatprep.subr.bf16.mxu0 %v15119_v0  ;;  %14635 = vmatprep.subr.bf16.mxu1 %v15119_v0 }
0x29df   :  { %13644 = vmatmul.mubr.msk.f32.gmra.mrb[200].mxu0 %vm48_vm1, %v6153_v58 }
0x29e0   :  { %13646 = vmatprep.mubr.msk.f32.mxu0 %vm15120_vm0, %v15121_v3  ;;  %14646 = vmatpush3.bf16.msra.mxu0 %v14645_v55 }
0x29e1   :  { %14653 = vmatprep.subr.bf16.mxu0 %v15119_v0 }
0x29e3   :  { %13647 = vmatmul.mubr.msk.f32.gmra.mrb[202].mxu0 %vm48_vm1, %v6154_v16 }
0x29e4   :  { %13674 = vmatprep.mubr.msk.f32.mxu0 %vm15120_vm0, %v15121_v3 }
0x29e7   :  { %13675 = vmatmul.mubr.msk.f32.vlgmr.msra.gmra.mrb[204].mxu0 %vm138_vm2, %v16709_v18 }
0x29e8   :  { %13677 = vmatprep.mubr.msk.f32.mxu0 %vm15120_vm0, %v15121_v3 }
0x29eb   :  { %13678 = vmatmul.mubr.msk.f32.gmra.mrb[206].mxu0 %vm138_vm2, %v16725_v29 }
0x29ec   :  { %13680 = vmatprep.mubr.msk.f32.mxu0 %vm15120_vm0, %v15121_v3 }
0x29ef   :  { %13681 = vmatmul.mubr.msk.f32.gmra.mrb[208].mxu0 %vm138_vm2, %v16736_v15 }
0x29f0   :  { %13706 = vmatprep.mubr.msk.f32.mxu0 %vm15120_vm0, %v15121_v3 }
0x2a5d   :  { %v6531_v24 = vpop.xlane.xlu1 %6530 }
0x2a5e   :  { %14992 = vrcp.f32 %v6531_v24 }
0x2a61   :  { %v6534_v44 = vpop.xlane.xlu0 %6533 }
0x2a62   :  { %14994 = vrcp.f32 %v6534_v44 }
0x2a65   :  { %v6537_v35 = vpop.xlane.xlu1 %6536 }
0x2a66   :  { %14996 = vrcp.f32 %v6537_v35 }
0x2a68   :  { %v14993_v51 = vpop.eup %14992 }
0x2a6c   :  { %v14995_v6 = vpop.eup %14994 }
0x2a70   :  { %v14997_v2 = vpop.eup %14996 }
0x2aa2   :  { %v6619_v11 = vpop.f32.mrb[192].mxu0 }
0x2aa3   :  { %v6633_v1 = vmul.f32 %v14993_v51, %v6619_v11  ;;  %v13616_v4 = vpop.f32.mrb[193].mxu0 }
0x2aa5   :  { %13628 = vmatmul.mubr.msk.f32.vlgmr.msra.gmra.mrb[192].mxu1 %vm48_vm1, %v6633_v1 }
0x2aa6   :  { %v6624_v5 = vpop.f32.mrb[194].mxu0  ;;  %13630 = vmatprep.mubr.msk.f32.mxu1 %vm15120_vm0, %v15121_v3  ;;  %14637 = vmatpush3.bf16.msra.mxu1 %v14636_v62 }
0x2aa7   :  { %v6634_v57 = vmul.f32 %v14995_v6, %v6624_v5  ;;  %v13619_v30 = vpop.f32.mrb[195].mxu0  ;;  %14638 = vmatprep.subr.bf16.mxu1 %v15119_v0 }
0x2aa9   :  { %13631 = vmatmul.mubr.msk.f32.gmra.mrb[194].mxu1 %vm48_vm1, %v6634_v57 }
0x2aaa   :  { %v6629_v48 = vpop.f32.mrb[196].mxu0  ;;  %13633 = vmatprep.mubr.msk.f32.mxu1 %vm15120_vm0, %v15121_v3  ;;  %14640 = vmatpush3.bf16.msra.mxu1 %v14639_v12 }
0x2aab   :  { %v6635_v26 = vmul.f32 %v14997_v2, %v6629_v48  ;;  %v13622_v32 = vpop.f32.mrb[197].mxu0  ;;  %14647 = vmatprep.subr.bf16.mxu1 %v15119_v0 }
0x2aad   :  { %13634 = vmatmul.mubr.msk.f32.gmra.mrb[196].mxu1 %vm48_vm1, %v6635_v26 }
0x2aae   :  { %v6803_v20 = vpop.f32.mrb[198].mxu0  ;;  %13657 = vmatprep.mubr.msk.f32.mxu1 %vm15120_vm0, %v15121_v3 }
0x2aaf   :  { %v13642_v36 = vpop.f32.mrb[199].mxu0 }
0x2ab1   :  { %13658 = vmatmul.mubr.msk.f32.vlgmr.msra.gmra.mrb[198].mxu1 %vm138_vm2, %v16709_v18 }
0x2ab2   :  { %v6808_v40 = vpop.f32.mrb[200].mxu0  ;;  %13660 = vmatprep.mubr.msk.f32.mxu1 %vm15120_vm0, %v15121_v3  ;;  %14649 = vmatpush3.bf16.msra.mxu1 %v14648_v13 }
0x2ab3   :  { %v13645_v42 = vpop.f32.mrb[201].mxu0  ;;  %14650 = vmatprep.subr.bf16.mxu1 %v15119_v0 }
0x2ab5   :  { %13661 = vmatmul.mubr.msk.f32.gmra.mrb[200].mxu1 %vm138_vm2, %v16725_v29 }
0x2ab6   :  { %v6813_v47 = vpop.f32.mrb[202].mxu0  ;;  %13663 = vmatprep.mubr.msk.f32.mxu1 %vm15120_vm0, %v15121_v3  ;;  %14652 = vmatpush3.bf16.msra.mxu1 %v14651_v25 }
0x2ab7   :  { %v13648_v45 = vpop.f32.mrb[203].mxu0  ;;  %14657 = vmatprep.subr.bf16.mxu1 %v15119_v0 }
0x2ab9   :  { %13664 = vmatmul.mubr.msk.f32.gmra.mrb[202].mxu1 %vm138_vm2, %v16736_v15 }
0x2aba   :  { %v6973_v61 = vpop.f32.mrb[204].mxu0  ;;  %13691 = vmatprep.mubr.msk.f32.mxu1 %vm15120_vm0, %v15121_v3 }
0x2abb   :  { %v13676_v55 = vpop.f32.mrb[205].mxu0 }
0x2abd   :  { %13692 = vmatmul.mubr.msk.f32.vlgmr.msra.gmra.mrb[204].mxu1 %vm138_vm2, %v16709_v18 }
0x2abe   :  { %v6978_v58 = vpop.f32.mrb[206].mxu0  ;;  %13694 = vmatprep.mubr.msk.f32.mxu1 %vm15120_vm0, %v15121_v3 }
0x2abf   :  { %v14654_v22 = vpack.c.bf16 %v6978_v58, %v6973_v61  ;;  %v13679_v16 = vpop.f32.mrb[207].mxu0 }
0x2ac1   :  { %13695 = vmatmul.mubr.msk.f32.gmra.mrb[206].mxu1 %vm138_vm2, %v16725_v29  ;;  %14656 = vmatpush3.bf16.xpose.msk.msra.mxu0 %vm15324_vm4, %v14654_v22 }
0x2ac2   :  { %v6983_v23 = vpop.f32.mrb[208].mxu0  ;;  %13697 = vmatprep.mubr.msk.f32.mxu1 %vm15120_vm0, %v15121_v3  ;;  %13704 = vmatprep.subr.mxu0 %v15121_v3 }
0x2ac3   :  { %v13682_v27 = vpop.f32.mrb[209].mxu0 }
0x2ac5   :  { %13698 = vmatmul.mubr.msk.f32.gmra.mrb[208].mxu1 %vm138_vm2, %v16736_v15 }
0x2ac6   :  { %13721 = vmatprep.mubr.msk.f32.mxu1 %vm15120_vm0, %v15121_v3 }
0x2ac9   :  { %13705 = vmatpush3.xpose.msk.msra.mxu0 %vm48_vm1, %v6983_v23 }
0x2aca   :  { %14660 = vmatprep.subr.bf16.mxu0 %v15119_v0 }
0x2b78   :  { %v6714_v49 = vpop.f32.mrb[192].mxu1 }
0x2b79   :  { %v17055_v24 = vadd.f32 %v6803_v20, %v6714_v49  ;;  %v13629_v44 = vpop.f32.mrb[193].mxu1 }
0x2b7c   :  { %v6719_v35 = vpop.f32.mrb[194].mxu1 }
0x2b7d   :  { %v17057_v46 = vadd.f32 %v6808_v40, %v6719_v35  ;;  %v13632_v50 = vpop.f32.mrb[195].mxu1  ;;  %v11675_v35 = vld [vmem:[%s18096_s1 + $0x360] sm:$0xff] }
0x2b7e   :  { %v11676_v50 = vld [vmem:[%s18096_s1 + $0x368] sm:$0xff] }
0x2b80   :  { %v6724_v51 = vpop.f32.mrb[196].mxu1 }
0x2b81   :  { %v17059_v11 = vadd.f32 %v6813_v47, %v6724_v51  ;;  %v13635_v62 = vpop.f32.mrb[197].mxu1  ;;  %v14664_v51 = vpack.c.bf16 %v11676_v50, %v11675_v35 }
0x2b84   :  { %v6888_v1 = vpop.f32.mrb[198].mxu1 }
0x2b85   :  { %v13659_v4 = vpop.f32.mrb[199].mxu1  ;;  %13707 = vmatmul.mubr.msk.f32.vlgmr.msra.gmra.mrb[210].mxu0 %vm48_vm1, %v6888_v1  ;;  %v11677_v1 = vld [vmem:[%s18096_s1 + $0x370] sm:$0xff] }
0x2b86   :  { %13709 = vmatprep.mubr.msk.f32.mxu0 %vm15120_vm0, %v15121_v3  ;;  %v11678_v4 = vld [vmem:[%s18096_s1 + $0x378] sm:$0xff] }
0x2b88   :  { %v6893_v53 = vpop.f32.mrb[200].mxu1 }
0x2b89   :  { %v13662_v8 = vpop.f32.mrb[201].mxu1  ;;  %13710 = vmatmul.mubr.msk.f32.gmra.mrb[212].mxu0 %vm48_vm1, %v6893_v53 }
0x2b8a   :  { %13712 = vmatprep.mubr.msk.f32.mxu0 %vm15120_vm0, %v15121_v3  ;;  %v14667_v8 = vpack.c.bf16 %v11678_v4, %v11677_v1 }
0x2b8c   :  { %v6898_v6 = vpop.f32.mrb[202].mxu1 }
0x2b8d   :  { %v13665_v5 = vpop.f32.mrb[203].mxu1  ;;  %13713 = vmatmul.mubr.msk.f32.gmra.mrb[214].mxu0 %vm48_vm1, %v6898_v6 }
0x2b8e   :  { %13734 = vmatprep.mubr.msk.f32.mxu0 %vm15120_vm0, %v15121_v3 }
0x2b90   :  { %v7058_v12 = vpop.f32.mrb[204].mxu1 }
0x2b91   :  { %v13693_v57 = vpop.f32.mrb[205].mxu1 }
0x2b92   :  { %v11690_v57 = vld [vmem:[%s18096_s1 + $0x468] sm:$0xff] }
0x2b94   :  { %v7063_v30 = vpop.f32.mrb[206].mxu1 }
0x2b95   :  { %v14658_v2 = vpack.c.bf16 %v7063_v30, %v7058_v12  ;;  %v13696_v48 = vpop.f32.mrb[207].mxu1  ;;  %v11689_v12 = vld [vmem:[%s18096_s1 + $0x460] sm:$0xff] }
0x2b96   :  { %v14676_v48 = vpack.c.bf16 %v11690_v57, %v11689_v12 }
0x2b97   :  { %14659 = vmatpush3.bf16.msra.mxu1 %v14658_v2 }
0x2b98   :  { %v7068_v26 = vpop.f32.mrb[208].mxu1  ;;  %13719 = vmatprep.subr.mxu1 %v15121_v3 }
0x2b99   :  { %v13699_v32 = vpop.f32.mrb[209].mxu1 }
0x2b9a   :  { %v11692_v32 = vld [vmem:[%s18096_s1 + $0x478] sm:$0xff] }
0x2b9b   :  { %13720 = vmatpush3.msk.msra.mxu1 %vm596_vm5, %v7068_v26  ;;  %v11691_v26 = vld [vmem:[%s18096_s1 + $0x470] sm:$0xff] }
0x2b9c   :  { %14663 = vmatprep.subr.bf16.mxu1 %v15119_v0 }
0x2c58   :  { %v7156_v43 = vpop.f32.mrb[210].mxu0 }
0x2c59   :  { %v7157_v33 = vadd.f32 %v16831_v14, %v7156_v43  ;;  %v13708_v20 = vpop.f32.mrb[211].mxu0  ;;  %v14679_v43 = vpack.c.bf16 %v11692_v32, %v11691_v26 }
0x2c5a   :  { %v11671_v20 = vld [vmem:[%s18098_s2 + $0xa8] sm:$0xff] }
0x2c5b   :  { %v7170_v13 = vsel %vm555_vm6, %v7157_v33, -inf }
0x2c5c   :  { %7171 = vmax.xlane.f32.xlu0 %v7170_v13  ;;  %v7161_v36 = vpop.f32.mrb[212].mxu0 }
0x2c5d   :  { %v7162_v37 = vadd.f32 %v16838_v52, %v7161_v36  ;;  %v13711_v38 = vpop.f32.mrb[213].mxu0 }
0x2c5f   :  { %v7173_v40 = vsel %vm555_vm6, %v7162_v37, -inf }
0x2c60   :  { %7174 = vmax.xlane.f32.xlu1 %v7173_v40  ;;  %v7166_v25 = vpop.f32.mrb[214].mxu0  ;;  %v11682_v40 = vld [vmem:[%s18096_s1 + $0x3e0] sm:$0xff] }
0x2c61   :  { %v7167_v42 = vadd.f32 %v16845_v10, %v7166_v25  ;;  %v13714_v47 = vpop.f32.mrb[215].mxu0  ;;  %v11683_v25 = vld [vmem:[%s18096_s1 + $0x3e8] sm:$0xff] }
0x2c63   :  { %v7176_v45 = vsel %vm562_vm7, %v7167_v42, -inf }
0x2c64   :  { %7177 = vmax.xlane.f32.xlu0 %v7176_v45  ;;  %v14670_v45 = vpack.c.bf16 %v11683_v25, %v11682_v40 }
0x2ce9   :  { %v7172_v61 = vpop.xlane.xlu0 %7171 }
0x2cea   :  { %v7179_v55 = vsub.f32 %v7157_v33, %v7172_v61  ;;  %v11670_v33 = vld [vmem:[%s18098_s2 + $0xa0] sm:$0xff] }
0x2ceb   :  { %v14661_v13 = vpack.c.bf16 %v11671_v20, %v11670_v33 }
0x2cec   :  { %v7182_v58 = vmul.f32 1.442695, %v7179_v55 }
0x2ced   :  { %v7175_v22 = vpop.xlane.xlu1 %7174  ;;  %14662 = vmatpush3.bf16.msra.mxu0 %v14661_v13 }
0x2cee   :  { %14998 = vpow2.f32 %v7182_v58  ;;  %v7180_v16 = vsub.f32 %v7162_v37, %v7175_v22  ;;  %14669 = vmatprep.subr.bf16.mxu0 %v15119_v0  ;;  %v11684_v58 = vld [vmem:[%s18096_s1 + $0x3f0] sm:$0xff]  ;;  %v11685_v22 = vld [vmem:[%s18096_s1 + $0x3f8] sm:$0xff] }
0x2cf0   :  { %v7184_v23 = vmul.f32 1.442695, %v7180_v16 }
0x2cf1   :  { %v7178_v27 = vpop.xlane.xlu0 %7177 }
0x2cf2   :  { %15000 = vpow2.f32 %v7184_v23  ;;  %v7181_v49 = vsub.f32 %v7167_v42, %v7178_v27  ;;  %v14673_v27 = vpack.c.bf16 %v11685_v22, %v11684_v58 }
0x2cf4   :  { %v7186_v44 = vmul.f32 1.442695, %v7181_v49 }
0x2cf6   :  { %15002 = vpow2.f32 %v7186_v44 }
0x2cf8   :  { %v14999_v62 = vpop.eup %14998 }
0x2cf9   :  { %13722 = vmatmul.mubr.msk.f32.vlgmr.msra.gmra.mrb[210].mxu1 %vm555_vm6, %v14999_v62  ;;  %v7188_v53 = vsel %vm555_vm6, %v14999_v62, 0.0 }
0x2cfa   :  { %7189 = vadd.xlane.f32.xlu1 %v7188_v53  ;;  %13724 = vmatprep.mubr.msk.f32.mxu1 %vm15120_vm0, %v15121_v3 }
0x2cfb   :  { %14665 = vmatpush3.bf16.msra.mxu1 %v14664_v51 }
0x2cfc   :  { %v15001_v6 = vpop.eup %15000  ;;  %14666 = vmatprep.subr.bf16.mxu1 %v15119_v0 }
0x2cfd   :  { %13725 = vmatmul.mubr.msk.f32.gmra.mrb[212].mxu1 %vm555_vm6, %v15001_v6  ;;  %v7191_v5 = vsel %vm555_vm6, %v15001_v6, 0.0 }
0x2cfe   :  { %7192 = vadd.xlane.f32.xlu0 %v7191_v5  ;;  %13727 = vmatprep.mubr.msk.f32.mxu1 %vm15120_vm0, %v15121_v3 }
0x2cff   :  { %14668 = vmatpush3.bf16.msra.mxu1 %v14667_v8 }
0x2d00   :  { %v15003_v30 = vpop.eup %15002  ;;  %14675 = vmatprep.subr.bf16.mxu1 %v15119_v0 }
0x2d01   :  { %13728 = vmatmul.mubr.msk.f32.gmra.mrb[214].mxu1 %vm555_vm6, %v15003_v30  ;;  %v7194_v2 = vsel %vm562_vm7, %v15003_v30, 0.0 }
0x2d02   :  { %7195 = vadd.xlane.f32.xlu1 %v7194_v2  ;;  %13751 = vmatprep.mubr.msk.f32.mxu1 %vm15120_vm0, %v15121_v3 }
0x2d05   :  { %13752 = vmatmul.mubr.msk.f32.vlgmr.msra.gmra.mrb[216].mxu1 %vm138_vm2, %v16709_v18 }
0x2d06   :  { %13754 = vmatprep.mubr.msk.f32.mxu1 %vm15120_vm0, %v15121_v3  ;;  %14677 = vmatpush3.bf16.msra.mxu1 %v14676_v48 }
0x2d07   :  { %14678 = vmatprep.subr.bf16.mxu1 %v15119_v0 }
0x2d09   :  { %13755 = vmatmul.mubr.msk.f32.gmra.mrb[218].mxu1 %vm138_vm2, %v16725_v29 }
0x2d0a   :  { %13757 = vmatprep.mubr.msk.f32.mxu1 %vm15120_vm0, %v15121_v3  ;;  %14680 = vmatpush3.bf16.msra.mxu1 %v14679_v43 }
0x2d0b   :  { %14685 = vmatprep.subr.bf16.mxu1 %v15119_v0 }
0x2d0d   :  { %13758 = vmatmul.mubr.msk.f32.gmra.mrb[220].mxu1 %vm138_vm2, %v16736_v15 }
0x2d0e   :  { %13785 = vmatprep.mubr.msk.f32.mxu1 %vm15120_vm0, %v15121_v3 }
0x2d11   :  { %13786 = vmatmul.mubr.msk.f32.vlgmr.msra.gmra.mrb[222].mxu1 %vm138_vm2, %v16709_v18 }
0x2d12   :  { %13788 = vmatprep.mubr.msk.f32.mxu1 %vm15120_vm0, %v15121_v3 }
0x2d15   :  { %13789 = vmatmul.mubr.msk.f32.gmra.mrb[224].mxu1 %vm138_vm2, %v16725_v29 }
0x2d16   :  { %13791 = vmatprep.mubr.msk.f32.mxu1 %vm15120_vm0, %v15121_v3 }
0x2d19   :  { %13792 = vmatmul.mubr.msk.f32.gmra.mrb[226].mxu1 %vm138_vm2, %v16736_v15 }
0x2d1a   :  { %13815 = vmatprep.mubr.msk.f32.mxu1 %vm15120_vm0, %v15121_v3 }
0x2d87   :  { %v7190_v36 = vpop.xlane.xlu1 %7189 }
0x2d88   :  { %15004 = vrcp.f32 %v7190_v36 }
0x2d8b   :  { %v7193_v37 = vpop.xlane.xlu0 %7192 }
0x2d8c   :  { %15006 = vrcp.f32 %v7193_v37 }
0x2d8f   :  { %v7196_v38 = vpop.xlane.xlu1 %7195 }
0x2d90   :  { %15008 = vrcp.f32 %v7196_v38 }
0x2d92   :  { %v15005_v42 = vpop.eup %15004 }
0x2d96   :  { %v15007_v16 = vpop.eup %15006 }
0x2d9a   :  { %v15009_v35 = vpop.eup %15008 }
0x2dcc   :  { %v7278_v47 = vpop.f32.mrb[210].mxu1 }
0x2dcd   :  { %v7292_v61 = vmul.f32 %v15005_v42, %v7278_v47  ;;  %v13723_v55 = vpop.f32.mrb[211].mxu1 }
0x2dcf   :  { %13735 = vmatmul.mubr.msk.f32.vlgmr.msra.gmra.mrb[216].mxu0 %vm48_vm1, %v7292_v61 }
0x2dd0   :  { %v7283_v23 = vpop.f32.mrb[212].mxu1  ;;  %13737 = vmatprep.mubr.msk.f32.mxu0 %vm15120_vm0, %v15121_v3  ;;  %14671 = vmatpush3.bf16.msra.mxu0 %v14670_v45 }
0x2dd1   :  { %v7293_v49 = vmul.f32 %v15007_v16, %v7283_v23  ;;  %v13726_v44 = vpop.f32.mrb[213].mxu1  ;;  %14672 = vmatprep.subr.bf16.mxu0 %v15119_v0 }
0x2dd3   :  { %13738 = vmatmul.mubr.msk.f32.gmra.mrb[218].mxu0 %vm48_vm1, %v7293_v49 }
0x2dd4   :  { %v7288_v50 = vpop.f32.mrb[214].mxu1  ;;  %13740 = vmatprep.mubr.msk.f32.mxu0 %vm15120_vm0, %v15121_v3  ;;  %14674 = vmatpush3.bf16.msra.mxu0 %v14673_v27 }
0x2dd5   :  { %v7294_v51 = vmul.f32 %v15009_v35, %v7288_v50  ;;  %v13729_v62 = vpop.f32.mrb[215].mxu1  ;;  %14681 = vmatprep.subr.bf16.mxu0 %v15119_v0 }
0x2dd7   :  { %13741 = vmatmul.mubr.msk.f32.gmra.mrb[220].mxu0 %vm48_vm1, %v7294_v51 }
0x2dd8   :  { %v7461_v1 = vpop.f32.mrb[216].mxu1  ;;  %13768 = vmatprep.mubr.msk.f32.mxu0 %vm15120_vm0, %v15121_v3 }
0x2dd9   :  { %v13753_v4 = vpop.f32.mrb[217].mxu1 }
0x2ddb   :  { %13769 = vmatmul.mubr.msk.f32.vlgmr.msra.gmra.mrb[222].mxu0 %vm138_vm2, %v16709_v18 }
0x2ddc   :  { %v7466_v53 = vpop.f32.mrb[218].mxu1  ;;  %13771 = vmatprep.mubr.msk.f32.mxu0 %vm15120_vm0, %v15121_v3 }
0x2ddd   :  { %v13756_v8 = vpop.f32.mrb[219].mxu1 }
0x2ddf   :  { %13772 = vmatmul.mubr.msk.f32.gmra.mrb[224].mxu0 %vm138_vm2, %v16725_v29 }
0x2de0   :  { %v7471_v6 = vpop.f32.mrb[220].mxu1  ;;  %13774 = vmatprep.mubr.msk.f32.mxu0 %vm15120_vm0, %v15121_v3 }
0x2de1   :  { %v13759_v5 = vpop.f32.mrb[221].mxu1 }
0x2de3   :  { %13775 = vmatmul.mubr.msk.f32.gmra.mrb[226].mxu0 %vm138_vm2, %v16736_v15 }
0x2de4   :  { %v7631_v12 = vpop.f32.mrb[222].mxu1  ;;  %13800 = vmatprep.mubr.msk.f32.mxu0 %vm15120_vm0, %v15121_v3 }
0x2de5   :  { %v13787_v18 = vpop.f32.mrb[223].mxu1 }
0x2de8   :  { %v7636_v57 = vpop.f32.mrb[224].mxu1 }
0x2de9   :  { %v14686_v30 = vpack.c.bf16 %v7636_v57, %v7631_v12  ;;  %v13790_v2 = vpop.f32.mrb[225].mxu1 }
0x2dea   :  { %v11707_v2 = vld [vmem:[%s18098_s2 + $0xb8] sm:$0xff] }
0x2deb   :  { %14687 = vmatpush3.bf16.msra.mxu1 %v14686_v30  ;;  %v11706_v30 = vld [vmem:[%s18098_s2 + $0xb0] sm:$0xff] }
0x2dec   :  { %v7641_v48 = vpop.f32.mrb[226].mxu1  ;;  %13813 = vmatprep.subr.mxu1 %v15121_v3 }
0x2ded   :  { %v13793_v29 = vpop.f32.mrb[227].mxu1 }
0x2def   :  { %13814 = vmatpush3.msk.msra.mxu1 %vm596_vm5, %v7641_v48  ;;  %v14689_v48 = vpack.c.bf16 %v11707_v2, %v11706_v30 }
0x2df0   :  { %14691 = vmatprep.subr.bf16.mxu1 %v15119_v0 }
0x2ea2   :  { %v7373_v26 = vpop.f32.mrb[216].mxu0 }
0x2ea3   :  { %v17189_v15 = vadd.f32 %v7373_v26, %v17055_v24  ;;  %v13736_v32 = vpop.f32.mrb[217].mxu0 }
0x2ea6   :  { %v7378_v43 = vpop.f32.mrb[218].mxu0 }
0x2ea7   :  { %v17192_v33 = vadd.f32 %v7378_v43, %v17057_v46  ;;  %v13739_v20 = vpop.f32.mrb[219].mxu0 }
0x2eaa   :  { %v7383_v13 = vpop.f32.mrb[220].mxu0 }
0x2eab   :  { %v17195_v36 = vadd.f32 %v7383_v13, %v17059_v11  ;;  %v13742_v37 = vpop.f32.mrb[221].mxu0 }
0x2eae   :  { %v7546_v38 = vpop.f32.mrb[222].mxu0 }
0x2eaf   :  { %v13770_v40 = vpop.f32.mrb[223].mxu0 }
0x2eb2   :  { %v7551_v25 = vpop.f32.mrb[224].mxu0 }
0x2eb3   :  { %v14682_v42 = vpack.c.bf16 %v7551_v25, %v7546_v38  ;;  %v13773_v47 = vpop.f32.mrb[225].mxu0 }
0x2eb5   :  { %14684 = vmatpush3.bf16.xpose.msk.msra.mxu0 %vm15324_vm4, %v14682_v42 }
0x2eb6   :  { %v7556_v24 = vpop.f32.mrb[226].mxu0  ;;  %13798 = vmatprep.subr.mxu0 %v15121_v3 }
0x2eb7   :  { %v13776_v45 = vpop.f32.mrb[227].mxu0 }
0x2ebd   :  { %13799 = vmatpush3.xpose.msk.msra.mxu0 %vm48_vm1, %v7556_v24 }
0x2ebe   :  { %14688 = vmatprep.subr.bf16.mxu0 %v15119_v0 }
0x2ec0   :  { %13801 = vmatmul.mubr.msk.f32.vlgmr.msra.gmra.mrb[228].mxu0 %vm48_vm1, %v7461_v1 }
0x2ec1   :  { %13803 = vmatprep.mubr.msk.f32.mxu0 %vm15120_vm0, %v15121_v3  ;;  %14690 = vmatpush3.bf16.msra.mxu0 %v14689_v48 }
0x2ec2   :  { %14697 = vmatprep.subr.bf16.mxu0 %v15119_v0 }
0x2ec4   :  { %13804 = vmatmul.mubr.msk.f32.gmra.mrb[230].mxu0 %vm48_vm1, %v7466_v53 }
0x2ec5   :  { %13806 = vmatprep.mubr.msk.f32.mxu0 %vm15120_vm0, %v15121_v3 }
0x2ec8   :  { %13807 = vmatmul.mubr.msk.f32.gmra.mrb[232].mxu0 %vm48_vm1, %v7471_v6 }
0x2ec9   :  { %13828 = vmatprep.mubr.msk.f32.mxu0 %vm15120_vm0, %v15121_v3 }
0x2f93   :  { %v7729_v46 = vpop.f32.mrb[228].mxu0 }
0x2f94   :  { %v7730_v11 = vadd.f32 %v16831_v14, %v7729_v46  ;;  %v13802_v61 = vpop.f32.mrb[229].mxu0 }
0x2f96   :  { %v7743_v55 = vsel %vm555_vm6, %v7730_v11, -inf }
0x2f97   :  { %7744 = vmax.xlane.f32.xlu0 %v7743_v55  ;;  %v7734_v58 = vpop.f32.mrb[230].mxu0  ;;  %v17249_v55 = vld [vmem:[%s18094_s6 + $0x38] sm:$0xff] }
0x2f98   :  { %v7735_v22 = vadd.f32 %v16838_v52, %v7734_v58  ;;  %v13805_v16 = vpop.f32.mrb[231].mxu0  ;;  %v7969_v58 = vrot.slane %v17249_v55, %v15815_v17 }
0x2f9a   :  { %v7746_v23 = vsel %vm555_vm6, %v7735_v22, -inf }
0x2f9b   :  { %7747 = vmax.xlane.f32.xlu1 %v7746_v23  ;;  %v7739_v27 = vpop.f32.mrb[232].mxu0 }
0x2f9c   :  { %v7740_v49 = vadd.f32 %v16845_v10, %v7739_v27  ;;  %v13808_v44 = vpop.f32.mrb[233].mxu0 }
0x2f9e   :  { %v7749_v35 = vsel %vm562_vm7, %v7740_v49, -inf }
0x2f9f   :  { %7750 = vmax.xlane.f32.xlu0 %v7749_v35 }
0x3024   :  { %v7745_v50 = vpop.xlane.xlu0 %7744 }
0x3025   :  { %v7752_v14 = vsub.f32 %v7730_v11, %v7745_v50 }
0x3027   :  { %v7755_v51 = vmul.f32 1.442695, %v7752_v14 }
0x3028   :  { %v7748_v62 = vpop.xlane.xlu1 %7747 }
0x3029   :  { %15010 = vpow2.f32 %v7755_v51  ;;  %v7753_v1 = vsub.f32 %v7735_v22, %v7748_v62 }
0x302b   :  { %v7757_v4 = vmul.f32 1.442695, %v7753_v1 }
0x302c   :  { %v7751_v53 = vpop.xlane.xlu0 %7750 }
0x302d   :  { %15012 = vpow2.f32 %v7757_v4  ;;  %v7754_v52 = vsub.f32 %v7740_v49, %v7751_v53 }
0x302f   :  { %v7759_v8 = vmul.f32 1.442695, %v7754_v52 }
0x3031   :  { %15014 = vpow2.f32 %v7759_v8 }
0x3033   :  { %v15011_v6 = vpop.eup %15010 }
0x3034   :  { %13816 = vmatmul.mubr.msk.f32.vlgmr.msra.gmra.mrb[228].mxu1 %vm555_vm6, %v15011_v6  ;;  %v7761_v10 = vsel %vm555_vm6, %v15011_v6, 0.0 }
0x3035   :  { %7762 = vadd.xlane.f32.xlu1 %v7761_v10  ;;  %13818 = vmatprep.mubr.msk.f32.mxu1 %vm15120_vm0, %v15121_v3 }
0x3037   :  { %v15013_v5 = vpop.eup %15012 }
0x3038   :  { %13819 = vmatmul.mubr.msk.f32.gmra.mrb[230].mxu1 %vm555_vm6, %v15013_v5  ;;  %v7764_v12 = vsel %vm555_vm6, %v15013_v5, 0.0 }
0x3039   :  { %7765 = vadd.xlane.f32.xlu0 %v7764_v12  ;;  %13821 = vmatprep.mubr.msk.f32.mxu1 %vm15120_vm0, %v15121_v3 }
0x303b   :  { %v15015_v18 = vpop.eup %15014 }
0x303c   :  { %13822 = vmatmul.mubr.msk.f32.gmra.mrb[232].mxu1 %vm555_vm6, %v15015_v18  ;;  %v7767_v57 = vsel %vm562_vm7, %v15015_v18, 0.0 }
0x303d   :  { %7768 = vadd.xlane.f32.xlu1 %v7767_v57  ;;  %13845 = vmatprep.mubr.msk.f32.mxu1 %vm15120_vm0, %v15121_v3 }
0x30c2   :  { %v7763_v29 = vpop.xlane.xlu1 %7762 }
0x30c3   :  { %15016 = vrcp.f32 %v7763_v29  ;;  %v11711_v29 = vld [vmem:[%s18099_s3 + $0x40] sm:$0xff] }
0x30c6   :  { %v7766_v26 = vpop.xlane.xlu0 %7765 }
0x30c7   :  { %15018 = vrcp.f32 %v7766_v26  ;;  %v11712_v26 = vld [vmem:[%s18099_s3 + $0x48] sm:$0xff] }
0x30ca   :  { %v7769_v32 = vpop.xlane.xlu1 %7768 }
0x30cb   :  { %15020 = vrcp.f32 %v7769_v32  ;;  %v14692_v32 = vpack.c.bf16 %v11712_v26, %v11711_v29 }
0x30cd   :  { %v15017_v43 = vpop.eup %15016  ;;  %14693 = vmatpush3.bf16.msra.mxu1 %v14692_v32 }
0x30ce   :  { %14694 = vmatprep.subr.bf16.mxu1 %v15119_v0 }
0x30d1   :  { %v15019_v38 = vpop.eup %15018 }
0x30d5   :  { %v15021_v47 = vpop.eup %15020 }
0x3107   :  { %v7851_v20 = vpop.f32.mrb[228].mxu1 }
0x3108   :  { %v7865_v13 = vmul.f32 %v15017_v43, %v7851_v20  ;;  %v13817_v37 = vpop.f32.mrb[229].mxu1  ;;  %v11713_v43 = vld [vmem:[%s18099_s3 + $0x50] sm:$0xff]  ;;  %v11714_v20 = vld [vmem:[%s18099_s3 + $0x58] sm:$0xff] }
0x310a   :  { %13829 = vmatmul.mubr.msk.f32.vlgmr.msra.gmra.mrb[234].mxu0 %vm48_vm1, %v7865_v13  ;;  %v14695_v13 = vpack.c.bf16 %v11714_v20, %v11713_v43 }
0x310b   :  { %v7856_v40 = vpop.f32.mrb[230].mxu1  ;;  %13831 = vmatprep.mubr.msk.f32.mxu0 %vm15120_vm0, %v15121_v3 }
0x310c   :  { %v7866_v25 = vmul.f32 %v15019_v38, %v7856_v40  ;;  %v13820_v42 = vpop.f32.mrb[231].mxu1  ;;  %14696 = vmatpush3.bf16.msra.mxu1 %v14695_v13 }
0x310d   :  { %14703 = vmatprep.subr.bf16.mxu1 %v15119_v0 }
0x310e   :  { %13832 = vmatmul.mubr.msk.f32.gmra.mrb[236].mxu0 %vm48_vm1, %v7866_v25 }
0x310f   :  { %v7861_v24 = vpop.f32.mrb[232].mxu1  ;;  %13834 = vmatprep.mubr.msk.f32.mxu0 %vm15120_vm0, %v15121_v3 }
0x3110   :  { %v7867_v45 = vmul.f32 %v15021_v47, %v7861_v24  ;;  %v13823_v46 = vpop.f32.mrb[233].mxu1 }
0x3112   :  { %13835 = vmatmul.mubr.msk.f32.gmra.mrb[238].mxu0 %vm48_vm1, %v7867_v45 }
0x3113   :  { %13862 = vmatprep.mubr.msk.f32.mxu0 %vm15120_vm0, %v15121_v3 }
0x31dd   :  { %v7946_v11 = vpop.f32.mrb[234].mxu0 }
0x31de   :  { %v7960_v61 = vadd.f32 %v7946_v11, %v17189_v15  ;;  %v13830_v22 = vpop.f32.mrb[235].mxu0  ;;  %v8015_v11 = vrot.slane %v17249_v55, %v15863_v7 }
0x31e0   :  { %v7963_v16 = vadd.f32 %v7960_v61, %v16646_v19 }
0x31e1   :  { %v7951_v23 = vpop.f32.mrb[236].mxu0 }
0x31e2   :  { %v17254_v27 = vadd.f32 %v7969_v58, %v7963_v16  ;;  %v7961_v49 = vadd.f32 %v7951_v23, %v17192_v33  ;;  %v13833_v44 = vpop.f32.mrb[237].mxu0 }
0x31e4   :  { %v7964_v35 = vadd.f32 %v7961_v49, %v16653_v9  ;;  %v7973_v15 = vsel %vm138_vm2, %v17254_v27, 0.0 }
0x31e5   :  { %7974 = vadd.xlane.f32.xlu0 %v7973_v15  ;;  %v7956_v50 = vpop.f32.mrb[238].mxu0 }
0x31e6   :  { %v17260_v14 = vadd.f32 %v7969_v58, %v7964_v35  ;;  %v7962_v51 = vadd.f32 %v7956_v50, %v17195_v36  ;;  %v13836_v62 = vpop.f32.mrb[239].mxu0  ;;  %v14704_v35 = vpack.c.bf16 %v15920_v39, %v15915_v34  ;;  %v11718_v39 = vld [vmem:[%s18100_s4 + $0x40] sm:$0xff] }
0x31e8   :  { %v7965_v19 = vadd.f32 %v7962_v51, %v16660_v21  ;;  %v7976_v1 = vsel %vm138_vm2, %v17260_v14, 0.0 }
0x31e9   :  { %7977 = vadd.xlane.f32.xlu1 %v7976_v1  ;;  %v11719_v1 = vld [vmem:[%s18100_s4 + $0x48] sm:$0xff] }
0x31ea   :  { %v17266_v33 = vadd.f32 %v7969_v58, %v7965_v19  ;;  %v8022_v58 = vrot.slane %v17249_v55, %v15866_v54 }
0x31ec   :  { %v7979_v9 = vsel %vm145_vm3, %v17266_v33, 0.0 }
0x31ed   :  { %7980 = vadd.xlane.f32.xlu0 %v7979_v9  ;;  %v11720_v9 = vld [vmem:[%s18100_s4 + $0x50] sm:$0xff] }
0x3272   :  { %v7975_v4 = vpop.xlane.xlu0 %7974 }
0x3273   :  { %v7982_v53 = vmul.f32 0.03125, %v7975_v4  ;;  %v11721_v4 = vld [vmem:[%s18100_s4 + $0x58] sm:$0xff] }
0x3275   :  { %v7985_v52 = vsub.f32 %v17254_v27, %v7982_v53  ;;  %v14701_v53 = vpack.c.bf16 %v11721_v4, %v11720_v9 }
0x3276   :  { %v7978_v8 = vpop.xlane.xlu1 %7977 }
0x3277   :  { %v7983_v6 = vmul.f32 0.03125, %v7978_v8  ;;  %v7988_v36 = vmul.f32 %v7985_v52, %v7985_v52 }
0x3279   :  { %v7986_v10 = vsub.f32 %v17260_v14, %v7983_v6  ;;  %v7991_v21 = vsel %vm138_vm2, %v7988_v36, 0.0 }
0x327a   :  { %7992 = vadd.xlane.f32.xlu1 %v7991_v21  ;;  %v7981_v5 = vpop.xlane.xlu0 %7980 }
0x327b   :  { %v7984_v12 = vmul.f32 0.03125, %v7981_v5  ;;  %v7989_v18 = vmul.f32 %v7986_v10, %v7986_v10 }
0x327d   :  { %v7987_v57 = vsub.f32 %v17266_v33, %v7984_v12  ;;  %v7994_v30 = vsel %vm138_vm2, %v7989_v18, 0.0 }
0x327e   :  { %7995 = vadd.xlane.f32.xlu0 %v7994_v30 }
0x327f   :  { %v7990_v2 = vmul.f32 %v7987_v57, %v7987_v57 }
0x3281   :  { %v7997_v48 = vsel %vm145_vm3, %v7990_v2, 0.0 }
0x3282   :  { %7998 = vadd.xlane.f32.xlu1 %v7997_v48 }
0x3307   :  { %v7993_v37 = vpop.xlane.xlu1 %7992 }
0x3308   :  { %v8000_v38 = vmul.f32 0.03125, %v7993_v37 }
0x330a   :  { %v8003_v40 = vadd.f32 1e-05, %v8000_v38 }
0x330b   :  { %v7996_v25 = vpop.xlane.xlu0 %7995 }
0x330c   :  { %15022 = vrsqrt.f32 %v8003_v40  ;;  %v8001_v42 = vmul.f32 0.03125, %v7996_v25 }
0x330e   :  { %v8004_v47 = vadd.f32 1e-05, %v8001_v42 }
0x330f   :  { %v7999_v24 = vpop.xlane.xlu1 %7998 }
0x3310   :  { %15024 = vrsqrt.f32 %v8004_v47  ;;  %v8002_v45 = vmul.f32 0.03125, %v7999_v24 }
0x3312   :  { %v8005_v46 = vadd.f32 1e-05, %v8002_v45 }
0x3314   :  { %15026 = vrsqrt.f32 %v8005_v46 }
0x3316   :  { %v15023_v61 = vpop.eup %15022 }
0x3317   :  { %v8009_v22 = vmul.f32 %v15023_v61, %v7985_v52  ;;  %v8034_v52 = vrot.slane %v17249_v55, %v15896_v59 }
0x3319   :  { %v8016_v16 = vmul.f32 %v8015_v11, %v8009_v22 }
0x331a   :  { %v15025_v23 = vpop.eup %15024 }
0x331b   :  { %v8023_v49 = vadd.f32 %v8022_v58, %v8016_v16  ;;  %v8010_v44 = vmul.f32 %v15025_v23, %v7986_v10 }
0x331d   :  { %13846 = vmatmul.mubr.msk.f32.vlgmr.msra.gmra.mrb[234].mxu1 %vm138_vm2, %v8023_v49  ;;  %v8017_v15 = vmul.f32 %v8015_v11, %v8010_v44 }
0x331e   :  { %v15027_v50 = vpop.eup %15026  ;;  %14705 = vmatpush3.bf16.msra.mxu1 %v14704_v35  ;;  %13848 = vmatprep.mubr.msk.f32.mxu1 %vm15120_vm0, %v15121_v3 }
0x331f   :  { %13875 = vmatprep.subr.mxu1 %v15121_v3  ;;  %v8024_v51 = vadd.f32 %v8022_v58, %v8017_v15  ;;  %v8011_v62 = vmul.f32 %v15027_v50, %v7987_v57  ;;  %v11728_v15 = vld [vmem:[%s18097_s5 + $0x60] sm:$0xff]  ;;  %v11729_v50 = vld [vmem:[%s18097_s5 + $0x68] sm:$0xff] }
0x3321   :  { %13849 = vmatmul.mubr.msk.f32.gmra.mrb[236].mxu1 %vm138_vm2, %v8024_v51  ;;  %v8018_v19 = vmul.f32 %v8015_v11, %v8011_v62  ;;  %v11730_v51 = vld [vmem:[%s18097_s5 + $0x70] sm:$0x3] }
0x3322   :  { %13876 = vmatpush3.msk.msra.mxu1 %vm596_vm5, %v15925_v41  ;;  %13851 = vmatprep.mubr.msk.f32.mxu1 %vm15120_vm0, %v15121_v3  ;;  %v14698_v41 = vpack.c.bf16 %v11719_v1, %v11718_v39  ;;  %v8251_v39 = vrot.slane %v17249_v55, %v15910_v28  ;;  %v11726_v55 = vld [vmem:[%s18097_s5 + $0x38] sm:$0xff] }
0x3323   :  { %v8025_v34 = vadd.f32 %v8022_v58, %v8018_v19  ;;  %14709 = vmatprep.subr.bf16.mxu1 %v15119_v0 }
0x3324   :  { %14699 = vmatpush3.bf16.msra.mxu0 %v14698_v41 }
0x3325   :  { %13852 = vmatmul.mubr.msk.f32.gmra.mrb[238].mxu1 %vm138_vm2, %v8025_v34  ;;  %14700 = vmatprep.subr.bf16.mxu0 %v15119_v0 }
0x3326   :  { %13877 = vmatprep.mubr.msk.f32.mxu1 %vm15120_vm0, %v15121_v3 }
0x3328   :  { %14702 = vmatpush3.bf16.msra.mxu0 %v14701_v53 }
0x3329   :  { %14706 = vmatprep.subr.bf16.mxu0 %v15119_v0  ;;  %13878 = vmatmul.mubr.msk.f32.vlgmr.msra.gmra.mrb[240].mxu1 %vm555_vm6, %v11728_v15 }
0x332a   :  { %13880 = vmatprep.mubr.msk.f32.mxu1 %vm15120_vm0, %v15121_v3 }
0x332d   :  { %13881 = vmatmul.mubr.msk.f32.gmra.mrb[242].mxu1 %vm555_vm6, %v11729_v50 }
0x332e   :  { %13883 = vmatprep.mubr.msk.f32.mxu1 %vm15120_vm0, %v15121_v3 }
0x3331   :  { %13884 = vmatmul.mubr.msk.f32.gmra.mrb[244].mxu1 %vm555_vm6, %v11730_v51 }
0x3332   :  { %13909 = vmatprep.mubr.msk.f32.mxu1 %vm15120_vm0, %v15121_v3 }
0x33f0   :  { %v8110_v8 = vpop.f32.mrb[234].mxu1 }
0x33f1   :  { %v8111_v6 = vadd.f32 %v8110_v8, %v8034_v52  ;;  %v13847_v36 = vpop.f32.mrb[235].mxu1 }
0x33f3   :  { %v8127_v10 = vmul.f32 0.044715, %v8111_v6  ;;  %v8124_v45 = vmul.f32 0.5, %v8111_v6 }
0x33f4   :  { %v8115_v21 = vpop.f32.mrb[236].mxu1 }
0x33f5   :  { %v8130_v5 = vmul.f32 %v8127_v10, %v8111_v6  ;;  %v8116_v12 = vadd.f32 %v8115_v21, %v8034_v52  ;;  %v13850_v18 = vpop.f32.mrb[237].mxu1 }
0x33f7   :  { %v8133_v57 = vmul.f32 %v8130_v5, %v8111_v6  ;;  %v8128_v30 = vmul.f32 0.044715, %v8116_v12  ;;  %v8125_v58 = vmul.f32 0.5, %v8116_v12 }
0x33f8   :  { %v8120_v2 = vpop.f32.mrb[238].mxu1 }
0x33f9   :  { %v8136_v48 = vadd.f32 %v8133_v57, %v8111_v6  ;;  %v8131_v29 = vmul.f32 %v8128_v30, %v8116_v12  ;;  %v8121_v26 = vadd.f32 %v8120_v2, %v8034_v52  ;;  %v13853_v32 = vpop.f32.mrb[239].mxu1  ;;  %v39_v30 = vld [vmem:[%s18094_s6 + $0x68] sm:$0xff] }
0x33fa   :  { %v40_v32 = vld [vmem:[%s18094_s6 + $0x70] sm:$0xff] }
0x33fb   :  { %v8139_v43 = vmul.f32 0.7978846, %v8136_v48  ;;  %v8134_v20 = vmul.f32 %v8131_v29, %v8116_v12  ;;  %v8129_v13 = vmul.f32 0.044715, %v8121_v26  ;;  %v8126_v49 = vmul.f32 0.5, %v8121_v26 }
0x33fd   :  { %15028 = vtanh.f32 %v8139_v43  ;;  %v8137_v37 = vadd.f32 %v8134_v20, %v8116_v12  ;;  %v8132_v38 = vmul.f32 %v8129_v13, %v8121_v26 }
0x33ff   :  { %v8135_v40 = vmul.f32 %v8132_v38, %v8121_v26  ;;  %v8140_v25 = vmul.f32 0.7978846, %v8137_v37 }
0x3401   :  { %v8138_v42 = vadd.f32 %v8135_v40, %v8121_v26  ;;  %15030 = vtanh.f32 %v8140_v25  ;;  %v41_v40 = vld [vmem:[%s18094_s6 + $0x78] sm:$0xff] }
0x3403   :  { %v8141_v47 = vmul.f32 0.7978846, %v8138_v42 }
0x3405   :  { %15032 = vtanh.f32 %v8141_v47 }
0x3407   :  { %v15029_v24 = vpop.eup %15028 }
0x3408   :  { %v8145_v46 = vadd.f32 1.0, %v15029_v24 }
0x340a   :  { %v8148_v11 = vmul.f32 %v8145_v46, %v8124_v45 }
0x340b   :  { %v15031_v61 = vpop.eup %15030 }
0x340c   :  { %13863 = vmatmul.mubr.msk.f32.vlgmr.msra.gmra.mrb[240].mxu0 %vm138_vm2, %v8148_v11  ;;  %v8146_v22 = vadd.f32 1.0, %v15031_v61 }
0x340d   :  { %13865 = vmatprep.mubr.msk.f32.mxu0 %vm15120_vm0, %v15121_v3 }
0x340e   :  { %v8149_v16 = vmul.f32 %v8146_v22, %v8125_v58 }
0x340f   :  { %v15033_v23 = vpop.eup %15032 }
0x3410   :  { %13866 = vmatmul.mubr.msk.f32.gmra.mrb[242].mxu0 %vm138_vm2, %v8149_v16  ;;  %v8147_v44 = vadd.f32 1.0, %v15033_v23 }
0x3411   :  { %13868 = vmatprep.mubr.msk.f32.mxu0 %vm15120_vm0, %v15121_v3 }
0x3412   :  { %v8150_v35 = vmul.f32 %v8147_v44, %v8126_v49 }
0x3414   :  { %13869 = vmatmul.mubr.msk.f32.gmra.mrb[244].mxu0 %vm138_vm2, %v8150_v35 }
0x3415   :  { %13892 = vmatprep.mubr.msk.f32.mxu0 %vm15120_vm0, %v15121_v3 }
0x34df   :  { %v8231_v62 = vpop.f32.mrb[240].mxu0 }
0x34e0   :  { %v13864_v19 = vpop.f32.mrb[241].mxu0  ;;  %v8245_v34 = vadd.f32 %v8231_v62, %v17254_v27  ;;  %v11725_v27 = vld [vmem:[%s18097_s5 + $0x30] sm:$0xff] }
0x34e2   :  { %v8252_v4 = vadd.f32 %v8251_v39, %v8245_v34 }
0x34e3   :  { %v8236_v1 = vpop.f32.mrb[242].mxu0 }
0x34e4   :  { %v8246_v41 = vadd.f32 %v8236_v1, %v17260_v14  ;;  %v13867_v9 = vpop.f32.mrb[243].mxu0  ;;  %v11727_v14 = vld [vmem:[%s18097_s5 + $0x40] sm:$0x3]  ;;  %v11740_v1 = vld [vmem:[%s18096_s1 + $0x488] sm:$0xff] }
0x34e6   :  { %v8253_v53 = vadd.f32 %v8251_v39, %v8246_v41  ;;  %v11746_v41 = vld [vmem:[%s18096_s1 + $0x500] sm:$0xff] }
0x34e7   :  { %v8241_v52 = vpop.f32.mrb[244].mxu0 }
0x34e8   :  { %v14707_v8 = vpack.c.bf16 %v8253_v53, %v8252_v4  ;;  %v8247_v6 = vadd.f32 %v8241_v52, %v17266_v33  ;;  %v13870_v36 = vpop.f32.mrb[245].mxu0  ;;  %v8341_v33 = vpop.f32.mrb[240].mxu1  ;;  %v11747_v4 = vld [vmem:[%s18096_s1 + $0x508] sm:$0xff]  ;;  %v11741_v52 = vld [vmem:[%s18096_s1 + $0x490] sm:$0xff] }
0x34e9   :  { %v13879_v21 = vpop.f32.mrb[241].mxu1  ;;  %v14716_v53 = vpack.c.bf16 %v11747_v4, %v11746_v41 }
0x34ea   :  { %14708 = vmatpush3.bf16.msra.mxu0 %v14707_v8  ;;  %v8254_v10 = vadd.f32 %v8251_v39, %v8247_v6  ;;  %v8346_v5 = vpop.f32.mrb[242].mxu1  ;;  %v11739_v39 = vld [vmem:[%s18096_s1 + $0x480] sm:$0xff]  ;;  %v11742_v8 = vld [vmem:[%s18096_s1 + $0x498] sm:$0xff]  ;;  %v11748_v6 = vld [vmem:[%s18096_s1 + $0x510] sm:$0xff] }
0x34eb   :  { %13890 = vmatprep.subr.mxu0 %v15121_v3  ;;  %v13882_v12 = vpop.f32.mrb[243].mxu1  ;;  %v14710_v9 = vpack.c.bf16 %v11740_v1, %v11739_v39  ;;  %v14713_v36 = vpack.c.bf16 %v11742_v8, %v11741_v52  ;;  %v11773_v52 = vld [vmem:[%s18096_s1 + $0x4a8] sm:$0xff] }
0x34ec   :  { %v8351_v18 = vpop.f32.mrb[244].mxu1 }
0x34ed   :  { %v13885_v57 = vpop.f32.mrb[245].mxu1  ;;  %14711 = vmatpush3.bf16.msra.mxu1 %v14710_v9 }
0x34ee   :  { %13891 = vmatpush3.msk.msra.mxu0 %vm596_vm5, %v8254_v10  ;;  %14712 = vmatprep.subr.bf16.mxu1 %v15119_v0  ;;  %v11749_v10 = vld [vmem:[%s18096_s1 + $0x518] sm:$0xff] }
0x34ef   :  { %13893 = vmatmul.mubr.msk.f32.vlgmr.msra.gmra.mrb[246].mxu0 %vm555_vm6, %v11725_v27  ;;  %14715 = vmatprep.subr.bf16.mxu0 %v15119_v0  ;;  %v14719_v27 = vpack.c.bf16 %v11749_v10, %v11748_v6 }
0x34f0   :  { %13895 = vmatprep.mubr.msk.f32.mxu0 %vm15120_vm0, %v15121_v3  ;;  %14717 = vmatpush3.bf16.msra.mxu0 %v14716_v53  ;;  %v11772_v53 = vld [vmem:[%s18096_s1 + $0x4a0] sm:$0xff] }
0x34f1   :  { %14718 = vmatprep.subr.bf16.mxu0 %v15119_v0  ;;  %14714 = vmatpush3.bf16.msra.mxu1 %v14713_v36  ;;  %v14735_v6 = vpack.c.bf16 %v11773_v52, %v11772_v53 }
0x34f2   :  { %14721 = vmatprep.subr.bf16.mxu1 %v15119_v0 }
0x34f3   :  { %13896 = vmatmul.mubr.msk.f32.gmra.mrb[248].mxu0 %vm555_vm6, %v11726_v55 }
0x34f4   :  { %13898 = vmatprep.mubr.msk.f32.mxu0 %vm15120_vm0, %v15121_v3  ;;  %14720 = vmatpush3.bf16.msra.mxu0 %v14719_v27  ;;  %v11774_v27 = vld [vmem:[%s18096_s1 + $0x4b0] sm:$0xff] }
0x34f5   :  { %14727 = vmatprep.subr.bf16.mxu0 %v15119_v0 }
0x34f7   :  { %13899 = vmatmul.mubr.msk.f32.gmra.mrb[250].mxu0 %vm555_vm6, %v11727_v14 }
0x34f8   :  { %13926 = vmatprep.mubr.msk.f32.mxu0 %vm15120_vm0, %v15121_v3 }
0x35c2   :  { %v8433_v2 = vpop.f32.mrb[246].mxu0 }
0x35c3   :  { %v8434_v48 = vadd.f32 %v8433_v2, %v8341_v33  ;;  %v13894_v29 = vpop.f32.mrb[247].mxu0 }
0x35c5   :  { %v17381_v26 = vadd.f32 %v8434_v48, %v39_v30  ;;  %v34_v30 = vld [vmem:[%s18094_s6 + $0x40] sm:$0xff] }
0x35c6   :  { %v8438_v43 = vpop.f32.mrb[248].mxu0  ;;  %v8492_v48 = vrot.slane %v34_v30, %v15255_v60  ;;  %v11755_v60 = vld [vmem:[%s18096_s1 + $0x590] sm:$0xff] }
0x35c7   :  { %v8439_v20 = vadd.f32 %v8438_v43, %v8346_v5  ;;  %v8450_v13 = vsel %vm138_vm2, %v17381_v26, 0.0  ;;  %v13897_v37 = vpop.f32.mrb[249].mxu0 }
0x35c8   :  { %8451 = vadd.xlane.f32.xlu0 %v8450_v13  ;;  %v11754_v13 = vld [vmem:[%s18096_s1 + $0x588] sm:$0xff] }
0x35c9   :  { %v17388_v38 = vadd.f32 %v8439_v20, %v40_v32  ;;  %v8499_v32 = vrot.slane %v34_v30, %v15261_v63  ;;  %v11753_v20 = vld [vmem:[%s18096_s1 + $0x580] sm:$0xff]  ;;  %v11756_v63 = vld [vmem:[%s18096_s1 + $0x598] sm:$0xff] }
0x35ca   :  { %v8443_v25 = vpop.f32.mrb[250].mxu0  ;;  %v11789_v30 = vld [vmem:[%s18096_s1 + $0x5b8] sm:$0xff] }
0x35cb   :  { %v8444_v42 = vadd.f32 %v8443_v25, %v8351_v18  ;;  %v8453_v47 = vsel %vm138_vm2, %v17388_v38, 0.0  ;;  %v13900_v24 = vpop.f32.mrb[251].mxu0 }
0x35cc   :  { %8454 = vadd.xlane.f32.xlu1 %v8453_v47  ;;  %v14722_v47 = vpack.c.bf16 %v11754_v13, %v11753_v20 }
0x35cd   :  { %v17395_v45 = vadd.f32 %v8444_v42, %v41_v40 }
0x35cf   :  { %v8456_v46 = vsel %vm145_vm3, %v17395_v45, 0.0 }
0x35d0   :  { %8457 = vadd.xlane.f32.xlu0 %v8456_v46 }
0x3655   :  { %v8452_v11 = vpop.xlane.xlu0 %8451 }
0x3656   :  { %v8459_v61 = vmul.f32 0.03125, %v8452_v11 }
0x3658   :  { %v8462_v58 = vsub.f32 %v17381_v26, %v8459_v61 }
0x3659   :  { %v8455_v22 = vpop.xlane.xlu1 %8454 }
0x365a   :  { %v8460_v16 = vmul.f32 0.03125, %v8455_v22  ;;  %v8465_v23 = vmul.f32 %v8462_v58, %v8462_v58 }
0x365c   :  { %v8463_v49 = vsub.f32 %v17388_v38, %v8460_v16  ;;  %v8468_v44 = vsel %vm138_vm2, %v8465_v23, 0.0 }
0x365d   :  { %8469 = vadd.xlane.f32.xlu1 %v8468_v44  ;;  %v8458_v35 = vpop.xlane.xlu0 %8457 }
0x365e   :  { %v8461_v15 = vmul.f32 0.03125, %v8458_v35  ;;  %v8466_v50 = vmul.f32 %v8463_v49, %v8463_v49 }
0x3660   :  { %v8464_v51 = vsub.f32 %v17395_v45, %v8461_v15  ;;  %v8471_v62 = vsel %vm138_vm2, %v8466_v50, 0.0 }
0x3661   :  { %8472 = vadd.xlane.f32.xlu0 %v8471_v62 }
0x3662   :  { %v8467_v19 = vmul.f32 %v8464_v51, %v8464_v51 }
0x3664   :  { %v8474_v34 = vsel %vm145_vm3, %v8467_v19, 0.0 }
0x3665   :  { %8475 = vadd.xlane.f32.xlu1 %v8474_v34 }
0x36ea   :  { %v8470_v55 = vpop.xlane.xlu1 %8469 }
0x36eb   :  { %v8477_v14 = vmul.f32 0.03125, %v8470_v55  ;;  %v11775_v55 = vld [vmem:[%s18096_s1 + $0x4b8] sm:$0xff] }
0x36ed   :  { %v8480_v33 = vadd.f32 1e-05, %v8477_v14 }
0x36ee   :  { %v8473_v21 = vpop.xlane.xlu0 %8472 }
0x36ef   :  { %15034 = vrsqrt.f32 %v8480_v33  ;;  %v8478_v5 = vmul.f32 0.03125, %v8473_v21  ;;  %v14738_v33 = vpack.c.bf16 %v11775_v55, %v11774_v27 }
0x36f1   :  { %v8481_v12 = vadd.f32 1e-05, %v8478_v5  ;;  %v11786_v5 = vld [vmem:[%s18096_s1 + $0x5a0] sm:$0xff] }
0x36f2   :  { %v8476_v18 = vpop.xlane.xlu1 %8475 }
0x36f3   :  { %15036 = vrsqrt.f32 %v8481_v12  ;;  %v8479_v57 = vmul.f32 0.03125, %v8476_v18  ;;  %v11787_v12 = vld [vmem:[%s18096_s1 + $0x5a8] sm:$0xff] }
0x36f4   :  { %v14747_v18 = vpack.c.bf16 %v11787_v12, %v11786_v5 }
0x36f5   :  { %v8482_v2 = vadd.f32 1e-05, %v8479_v57  ;;  %v11788_v57 = vld [vmem:[%s18096_s1 + $0x5b0] sm:$0xff] }
0x36f7   :  { %15038 = vrsqrt.f32 %v8482_v2  ;;  %v14750_v2 = vpack.c.bf16 %v11789_v30, %v11788_v57 }
0x36f9   :  { %v15035_v29 = vpop.eup %15034 }
0x36fa   :  { %v8486_v43 = vmul.f32 %v15035_v29, %v8462_v58  ;;  %v14725_v58 = vpack.c.bf16 %v11756_v63, %v11755_v60  ;;  %v17566_v29 = vld [vmem:[%s18097_s5] sm:$0xff]  ;;  %v17580_v63 = vld [vmem:[%s18097_s5 + $0x10] sm:$0x3] }
0x36fc   :  { %v8493_v37 = vmul.f32 %v8492_v48, %v8486_v43 }
0x36fd   :  { %v15037_v40 = vpop.eup %15036 }
0x36fe   :  { %v17444_v25 = vadd.f32 %v8499_v32, %v8493_v37  ;;  %v8487_v42 = vmul.f32 %v15037_v40, %v8463_v49  ;;  %v17573_v37 = vld [vmem:[%s18097_s5 + $0x8] sm:$0xff] }
0x3700   :  { %v8494_v24 = vmul.f32 %v8492_v48, %v8487_v42  ;;  %13910 = vmatmul.mubr.msk.f32.vlgmr.msra.gmra.mrb[246].mxu1 %vm138_vm2, %v17444_v25  ;;  %13927 = vmatmul.mubr.msk.f32.vlgmr.msra.gmra.mrb[252].mxu0 %vm138_vm2, %v17444_v25 }
0x3701   :  { %v15039_v46 = vpop.eup %15038  ;;  %13912 = vmatprep.mubr.msk.f32.mxu1 %vm15120_vm0, %v15121_v3  ;;  %13929 = vmatprep.mubr.msk.f32.mxu0 %vm15120_vm0, %v15121_v3 }
0x3702   :  { %v17460_v11 = vadd.f32 %v8499_v32, %v8494_v24  ;;  %v8488_v61 = vmul.f32 %v15039_v46, %v8464_v51  ;;  %14723 = vmatpush3.bf16.msra.mxu1 %v14722_v47 }
0x3703   :  { %14724 = vmatprep.subr.bf16.mxu1 %v15119_v0 }
0x3704   :  { %v8495_v22 = vmul.f32 %v8492_v48, %v8488_v61  ;;  %13913 = vmatmul.mubr.msk.f32.gmra.mrb[248].mxu1 %vm138_vm2, %v17460_v11  ;;  %13930 = vmatmul.mubr.msk.f32.gmra.mrb[254].mxu0 %vm138_vm2, %v17460_v11 }
0x3705   :  { %13915 = vmatprep.mubr.msk.f32.mxu1 %vm15120_vm0, %v15121_v3  ;;  %13932 = vmatprep.mubr.msk.f32.mxu0 %vm15120_vm0, %v15121_v3 }
0x3706   :  { %v17471_v16 = vadd.f32 %v8499_v32, %v8495_v22  ;;  %14726 = vmatpush3.bf16.msra.mxu1 %v14725_v58 }
0x3707   :  { %14731 = vmatprep.subr.bf16.mxu1 %v15119_v0 }
0x3708   :  { %13916 = vmatmul.mubr.msk.f32.gmra.mrb[250].mxu1 %vm138_vm2, %v17471_v16  ;;  %13933 = vmatmul.mubr.msk.f32.gmra.mrb[0].mxu0 %vm138_vm2, %v17471_v16 }
0x3709   :  { %13943 = vmatprep.mubr.msk.f32.mxu1 %vm15120_vm0, %v15121_v3  ;;  %13958 = vmatprep.mubr.msk.f32.mxu0 %vm15120_vm0, %v15121_v3 }
0x370c   :  { %13944 = vmatmul.mubr.msk.f32.vlgmr.msra.gmra.mrb[252].mxu1 %vm138_vm2, %v17444_v25 }
0x370d   :  { %13946 = vmatprep.mubr.msk.f32.mxu1 %vm15120_vm0, %v15121_v3 }
0x3710   :  { %13947 = vmatmul.mubr.msk.f32.gmra.mrb[254].mxu1 %vm138_vm2, %v17460_v11 }
0x3711   :  { %13949 = vmatprep.mubr.msk.f32.mxu1 %vm15120_vm0, %v15121_v3 }
0x3714   :  { %13950 = vmatmul.mubr.msk.f32.gmra.mrb[0].mxu1 %vm138_vm2, %v17471_v16 }
0x3715   :  { %13973 = vmatprep.mubr.msk.f32.mxu1 %vm15120_vm0, %v15121_v3 }
0x37d3   :  { %v8583_v23 = vpop.f32.mrb[246].mxu1  ;;  %v8668_v49 = vpop.f32.mrb[252].mxu0 }
0x37d4   :  { %v13911_v44 = vpop.f32.mrb[247].mxu1  ;;  %v13928_v35 = vpop.f32.mrb[253].mxu0 }
0x37d7   :  { %v8588_v15 = vpop.f32.mrb[248].mxu1  ;;  %v8673_v50 = vpop.f32.mrb[254].mxu0 }
0x37d8   :  { %v14728_v51 = vpack.c.bf16 %v8673_v50, %v8668_v49  ;;  %v13914_v62 = vpop.f32.mrb[249].mxu1  ;;  %v13931_v19 = vpop.f32.mrb[255].mxu0 }
0x37da   :  { %14730 = vmatpush3.bf16.xpose.msk.msra.mxu0 %vm15324_vm4, %v14728_v51 }
0x37db   :  { %v8593_v34 = vpop.f32.mrb[250].mxu1  ;;  %v8678_v39 = vpop.f32.mrb[0].mxu0  ;;  %13956 = vmatprep.subr.mxu0 %v15121_v3 }
0x37dc   :  { %v13917_v1 = vpop.f32.mrb[251].mxu1  ;;  %v13934_v41 = vpop.f32.mrb[1].mxu0 }
0x37df   :  { %v8753_v9 = vpop.f32.mrb[252].mxu1 }
0x37e0   :  { %v13945_v4 = vpop.f32.mrb[253].mxu1 }
0x37e2   :  { %13957 = vmatpush3.xpose.msk.msra.mxu0 %vm48_vm1, %v8678_v39 }
0x37e3   :  { %v8758_v8 = vpop.f32.mrb[254].mxu1  ;;  %14734 = vmatprep.subr.bf16.mxu0 %v15119_v0 }
0x37e4   :  { %v14732_v36 = vpack.c.bf16 %v8758_v8, %v8753_v9  ;;  %v13948_v10 = vpop.f32.mrb[255].mxu1 }
0x37e5   :  { %13959 = vmatmul.mubr.msk.f32.vlgmr.msra.gmra.mrb[2].mxu0 %vm48_vm1, %v8583_v23  ;;  %v11780_v10 = vld [vmem:[%s18096_s1 + $0x528] sm:$0xff] }
0x37e6   :  { %14733 = vmatpush3.bf16.msra.mxu1 %v14732_v36  ;;  %13961 = vmatprep.mubr.msk.f32.mxu0 %vm15120_vm0, %v15121_v3  ;;  %v11779_v36 = vld [vmem:[%s18096_s1 + $0x520] sm:$0xff] }
0x37e7   :  { %v8763_v14 = vpop.f32.mrb[0].mxu1  ;;  %13971 = vmatprep.subr.mxu1 %v15121_v3  ;;  %14736 = vmatpush3.bf16.msra.mxu0 %v14735_v6  ;;  %v14741_v55 = vpack.c.bf16 %v11780_v10, %v11779_v36 }
0x37e8   :  { %v13951_v21 = vpop.f32.mrb[1].mxu1  ;;  %14737 = vmatprep.subr.bf16.mxu0 %v15119_v0 }
0x37e9   :  { %13962 = vmatmul.mubr.msk.f32.gmra.mrb[4].mxu0 %vm48_vm1, %v8588_v15 }
0x37ea   :  { %13972 = vmatpush3.msk.msra.mxu1 %vm596_vm5, %v8763_v14  ;;  %13964 = vmatprep.mubr.msk.f32.mxu0 %vm15120_vm0, %v15121_v3  ;;  %v11781_v14 = vld [vmem:[%s18096_s1 + $0x530] sm:$0xff] }
0x37eb   :  { %14739 = vmatpush3.bf16.msra.mxu0 %v14738_v33  ;;  %14740 = vmatprep.subr.bf16.mxu1 %v15119_v0  ;;  %v11782_v33 = vld [vmem:[%s18096_s1 + $0x538] sm:$0xff] }
0x37ec   :  { %14746 = vmatprep.subr.bf16.mxu0 %v15119_v0  ;;  %v14744_v5 = vpack.c.bf16 %v11782_v33, %v11781_v14 }
0x37ed   :  { %13965 = vmatmul.mubr.msk.f32.gmra.mrb[6].mxu0 %vm48_vm1, %v8593_v34 }
0x37ee   :  { %13990 = vmatprep.mubr.msk.f32.mxu0 %vm15120_vm0, %v15121_v3 }
0x37f1   :  { %13991 = vmatmul.mubr.msk.f32.vlgmr.msra.gmra.mrb[8].mxu0 %vm138_vm2, %v17444_v25 }
0x37f2   :  { %13993 = vmatprep.mubr.msk.f32.mxu0 %vm15120_vm0, %v15121_v3  ;;  %14748 = vmatpush3.bf16.msra.mxu0 %v14747_v18 }
0x37f3   :  { %14749 = vmatprep.subr.bf16.mxu0 %v15119_v0 }
0x37f5   :  { %13994 = vmatmul.mubr.msk.f32.gmra.mrb[10].mxu0 %vm138_vm2, %v17460_v11 }
0x37f6   :  { %13996 = vmatprep.mubr.msk.f32.mxu0 %vm15120_vm0, %v15121_v3  ;;  %14751 = vmatpush3.bf16.msra.mxu0 %v14750_v2 }
0x37f7   :  { %14756 = vmatprep.subr.bf16.mxu0 %v15119_v0 }
0x37f9   :  { %13997 = vmatmul.mubr.msk.f32.gmra.mrb[12].mxu0 %vm138_vm2, %v17471_v16 }
0x37fa   :  { %14024 = vmatprep.mubr.msk.f32.mxu0 %vm15120_vm0, %v15121_v3 }
0x37fd   :  { %14025 = vmatmul.mubr.msk.f32.vlgmr.msra.gmra.mrb[14].mxu0 %vm138_vm2, %v17444_v25 }
0x37fe   :  { %14027 = vmatprep.mubr.msk.f32.mxu0 %vm15120_vm0, %v15121_v3 }
0x3801   :  { %14028 = vmatmul.mubr.msk.f32.gmra.mrb[16].mxu0 %vm138_vm2, %v17460_v11 }
0x3802   :  { %14030 = vmatprep.mubr.msk.f32.mxu0 %vm15120_vm0, %v15121_v3 }
0x3805   :  { %14031 = vmatmul.mubr.msk.f32.gmra.mrb[18].mxu0 %vm138_vm2, %v17471_v16 }
0x3806   :  { %14054 = vmatprep.mubr.msk.f32.mxu0 %vm15120_vm0, %v15121_v3 }
0x38b8   :  { %v8851_v48 = vpop.f32.mrb[2].mxu0 }
0x38b9   :  { %v8852_v32 = vadd.f32 %v17566_v29, %v8851_v48  ;;  %v13960_v43 = vpop.f32.mrb[3].mxu0 }
0x38bb   :  { %v8865_v20 = vsel %vm555_vm6, %v8852_v32, -inf }
0x38bc   :  { %8866 = vmax.xlane.f32.xlu0 %v8865_v20  ;;  %v8856_v13 = vpop.f32.mrb[4].mxu0 }
0x38bd   :  { %v8857_v40 = vadd.f32 %v17573_v37, %v8856_v13  ;;  %v13963_v42 = vpop.f32.mrb[5].mxu0 }
0x38bf   :  { %v8868_v47 = vsel %vm555_vm6, %v8857_v40, -inf }
0x38c0   :  { %8869 = vmax.xlane.f32.xlu1 %v8868_v47  ;;  %v8861_v60 = vpop.f32.mrb[6].mxu0 }
0x38c1   :  { %v8862_v24 = vadd.f32 %v17580_v63, %v8861_v60  ;;  %v13966_v46 = vpop.f32.mrb[7].mxu0 }
0x38c3   :  { %v8871_v61 = vsel %vm562_vm7, %v8862_v24, -inf }
0x38c4   :  { %8872 = vmax.xlane.f32.xlu0 %v8871_v61  ;;  %v17584_v58 = vpop.f32.mrb[8].mxu0 }
0x38c5   :  { %v13992_v22 = vpop.f32.mrb[9].mxu0 }
0x38c8   :  { %v17586_v23 = vpop.f32.mrb[10].mxu0 }
0x38c9   :  { %v13995_v49 = vpop.f32.mrb[11].mxu0 }
0x38cc   :  { %v17588_v44 = vpop.f32.mrb[12].mxu0 }
0x38cd   :  { %v13998_v35 = vpop.f32.mrb[13].mxu0 }
0x38d0   :  { %v9234_v15 = vpop.f32.mrb[14].mxu0 }
0x38d1   :  { %v14026_v50 = vpop.f32.mrb[15].mxu0 }
0x38d4   :  { %v9239_v51 = vpop.f32.mrb[16].mxu0 }
0x38d5   :  { %v14757_v62 = vpack.c.bf16 %v9239_v51, %v9234_v15  ;;  %v14029_v19 = vpop.f32.mrb[17].mxu0 }
0x38d7   :  { %14758 = vmatpush3.bf16.msra.mxu0 %v14757_v62 }
0x38d8   :  { %v9244_v34 = vpop.f32.mrb[18].mxu0  ;;  %14052 = vmatprep.subr.mxu0 %v15121_v3 }
0x38d9   :  { %v14032_v39 = vpop.f32.mrb[19].mxu0 }
0x38db   :  { %14053 = vmatpush3.msk.msra.mxu0 %vm596_vm5, %v9244_v34 }
0x38dc   :  { %14762 = vmatprep.subr.bf16.mxu0 %v15119_v0 }
0x3949   :  { %v8867_v1 = vpop.xlane.xlu0 %8866 }
0x394a   :  { %v8874_v41 = vsub.f32 %v8852_v32, %v8867_v1 }
0x394c   :  { %v8877_v9 = vmul.f32 1.442695, %v8874_v41 }
0x394d   :  { %v8870_v4 = vpop.xlane.xlu1 %8869 }
0x394e   :  { %15040 = vpow2.f32 %v8877_v9  ;;  %v8875_v53 = vsub.f32 %v8857_v40, %v8870_v4 }
0x3950   :  { %v8879_v52 = vmul.f32 1.442695, %v8875_v53 }
0x3951   :  { %v8873_v8 = vpop.xlane.xlu0 %8872 }
0x3952   :  { %15042 = vpow2.f32 %v8879_v52  ;;  %v8876_v6 = vsub.f32 %v8862_v24, %v8873_v8 }
0x3954   :  { %v8881_v27 = vmul.f32 1.442695, %v8876_v6 }
0x3956   :  { %15044 = vpow2.f32 %v8881_v27  ;;  %v11770_v27 = vld [vmem:[%s18098_s2 + $0xc0] sm:$0xff] }
0x3958   :  { %v15041_v21 = vpop.eup %15040 }
0x3959   :  { %13974 = vmatmul.mubr.msk.f32.vlgmr.msra.gmra.mrb[2].mxu1 %vm555_vm6, %v15041_v21  ;;  %v8883_v62 = vsel %vm555_vm6, %v15041_v21, 0.0 }
0x395a   :  { %13976 = vmatprep.mubr.msk.f32.mxu1 %vm15120_vm0, %v15121_v3  ;;  %14742 = vmatpush3.bf16.msra.mxu1 %v14741_v55  ;;  %v11771_v55 = vld [vmem:[%s18098_s2 + $0xc8] sm:$0xff] }
0x395b   :  { %14743 = vmatprep.subr.bf16.mxu1 %v15119_v0  ;;  %v14763_v33 = vpack.c.bf16 %v11771_v55, %v11770_v27  ;;  %v11825_v55 = vld [vmem:[%s18096_s1 + $0x5c0] sm:$0xff] }
0x395c   :  { %v15043_v12 = vpop.eup %15042 }
0x395d   :  { %13977 = vmatmul.mubr.msk.f32.gmra.mrb[4].mxu1 %vm555_vm6, %v15043_v12  ;;  %v8886_v39 = vsel %vm555_vm6, %v15043_v12, 0.0 }
0x395e   :  { %13979 = vmatprep.mubr.msk.f32.mxu1 %vm15120_vm0, %v15121_v3  ;;  %14745 = vmatpush3.bf16.msra.mxu1 %v14744_v5 }
0x395f   :  { %14752 = vmatprep.subr.bf16.mxu1 %v15119_v0 }
0x3960   :  { %v15045_v18 = vpop.eup %15044 }
0x3961   :  { %13980 = vmatmul.mubr.msk.f32.gmra.mrb[6].mxu1 %vm555_vm6, %v15045_v18  ;;  %v8889_v34 = vsel %vm562_vm7, %v15045_v18, 0.0 }
0x3962   :  { %14007 = vmatprep.mubr.msk.f32.mxu1 %vm15120_vm0, %v15121_v3 }
0x3965   :  { %14008 = vmatmul.mubr.msk.f32.vlgmr.msra.gmra.mrb[8].mxu1 %vm138_vm2, %v17444_v25 }
0x3966   :  { %14010 = vmatprep.mubr.msk.f32.mxu1 %vm15120_vm0, %v15121_v3 }
0x3969   :  { %14011 = vmatmul.mubr.msk.f32.gmra.mrb[10].mxu1 %vm138_vm2, %v17460_v11 }
0x396a   :  { %14013 = vmatprep.mubr.msk.f32.mxu1 %vm15120_vm0, %v15121_v3 }
0x396d   :  { %14014 = vmatmul.mubr.msk.f32.gmra.mrb[12].mxu1 %vm138_vm2, %v17471_v16 }
0x396e   :  { %14039 = vmatprep.mubr.msk.f32.mxu1 %vm15120_vm0, %v15121_v3 }
0x3a2c   :  { %v17628_v57 = vpop.f32.mrb[2].mxu1 }
0x3a2d   :  { %v13975_v30 = vpop.f32.mrb[3].mxu1 }
0x3a30   :  { %v17630_v2 = vpop.f32.mrb[4].mxu1 }
0x3a31   :  { %v13978_v48 = vpop.f32.mrb[5].mxu1 }
0x3a34   :  { %v17632_v32 = vpop.f32.mrb[6].mxu1 }
0x3a35   :  { %v13981_v43 = vpop.f32.mrb[7].mxu1 }
0x3a36   :  { %v11818_v43 = vld [vmem:[%s18096_s1 + $0x540] sm:$0xff] }
0x3a38   :  { %v9149_v20 = vpop.f32.mrb[8].mxu1 }
0x3a39   :  { %v14009_v13 = vpop.f32.mrb[9].mxu1 }
0x3a3c   :  { %v9154_v40 = vpop.f32.mrb[10].mxu1 }
0x3a3d   :  { %v14753_v42 = vpack.c.bf16 %v9154_v40, %v9149_v20  ;;  %v14012_v47 = vpop.f32.mrb[11].mxu1  ;;  %v11819_v20 = vld [vmem:[%s18096_s1 + $0x548] sm:$0xff] }
0x3a3f   :  { %14755 = vmatpush3.bf16.xpose.msk.msra.mxu1 %vm15324_vm4, %v14753_v42  ;;  %v14772_v42 = vpack.c.bf16 %v11819_v20, %v11818_v43 }
0x3a40   :  { %v9159_v60 = vpop.f32.mrb[12].mxu1  ;;  %14037 = vmatprep.subr.mxu1 %v15121_v3 }
0x3a41   :  { %v14015_v24 = vpop.f32.mrb[13].mxu1 }
0x3a42   :  { %v11821_v24 = vld [vmem:[%s18096_s1 + $0x558] sm:$0xff] }
0x3a47   :  { %14038 = vmatpush3.xpose.msk.msra.mxu1 %vm48_vm1, %v9159_v60  ;;  %v11820_v60 = vld [vmem:[%s18096_s1 + $0x550] sm:$0xff] }
0x3a48   :  { %14759 = vmatprep.subr.bf16.mxu1 %v15119_v0 }
0x3a4a   :  { %14040 = vmatmul.mubr.msk.f32.vlgmr.msra.gmra.mrb[14].mxu1 %vm48_vm1, %v17584_v58 }
0x3a4b   :  { %14042 = vmatprep.mubr.msk.f32.mxu1 %vm15120_vm0, %v15121_v3 }
0x3a4e   :  { %14043 = vmatmul.mubr.msk.f32.gmra.mrb[16].mxu1 %vm48_vm1, %v17586_v23 }
0x3a4f   :  { %14045 = vmatprep.mubr.msk.f32.mxu1 %vm15120_vm0, %v15121_v3 }
0x3a52   :  { %14046 = vmatmul.mubr.msk.f32.gmra.mrb[18].mxu1 %vm48_vm1, %v17588_v44 }
0x3a53   :  { %14067 = vmatprep.mubr.msk.f32.mxu1 %vm15120_vm0, %v15121_v3 }
0x3b1d   :  { %v9332_v46 = vpop.f32.mrb[14].mxu1 }
0x3b1e   :  { %v9333_v61 = vadd.f32 %v17566_v29, %v9332_v46  ;;  %v14041_v22 = vpop.f32.mrb[15].mxu1 }
0x3b20   :  { %v9346_v58 = vsel %vm555_vm6, %v9333_v61, -inf }
0x3b21   :  { %9347 = vmax.xlane.f32.xlu1 %v9346_v58  ;;  %v9337_v49 = vpop.f32.mrb[16].mxu1 }
0x3b22   :  { %v9338_v35 = vadd.f32 %v17573_v37, %v9337_v49  ;;  %v14044_v23 = vpop.f32.mrb[17].mxu1  ;;  %v11804_v49 = vld [vmem:[%s18098_s2 + $0xd8] sm:$0xff] }
0x3b24   :  { %v9349_v15 = vsel %vm555_vm6, %v9338_v35, -inf }
0x3b25   :  { %9350 = vmax.xlane.f32.xlu0 %v9349_v15  ;;  %v9342_v50 = vpop.f32.mrb[18].mxu1 }
0x3b26   :  { %v9343_v44 = vadd.f32 %v17580_v63, %v9342_v50  ;;  %v14047_v51 = vpop.f32.mrb[19].mxu1  ;;  %v11811_v50 = vld [vmem:[%s18096_s1 + $0x4c0] sm:$0xff] }
0x3b28   :  { %v9352_v19 = vsel %vm562_vm7, %v9343_v44, -inf }
0x3b29   :  { %8884 = vadd.xlane.f32.xlu0 %v8883_v62  ;;  %9353 = vmax.xlane.f32.xlu1 %v9352_v19 }
0x3b2d   :  { %8890 = vadd.xlane.f32.xlu0 %v8889_v34  ;;  %8887 = vadd.xlane.f32.xlu1 %v8886_v39 }
0x3bae   :  { %v9348_v1 = vpop.xlane.xlu1 %9347 }
0x3baf   :  { %v9355_v41 = vsub.f32 %v9333_v61, %v9348_v1  ;;  %v14775_v61 = vpack.c.bf16 %v11821_v24, %v11820_v60  ;;  %v11813_v1 = vld [vmem:[%s18096_s1 + $0x4d0] sm:$0xff] }
0x3bb1   :  { %v9358_v9 = vmul.f32 1.442695, %v9355_v41  ;;  %v11814_v41 = vld [vmem:[%s18096_s1 + $0x4d8] sm:$0xff] }
0x3bb2   :  { %v9351_v4 = vpop.xlane.xlu0 %9350 }
0x3bb3   :  { %15046 = vpow2.f32 %v9358_v9  ;;  %v9356_v53 = vsub.f32 %v9338_v35, %v9351_v4 }
0x3bb5   :  { %v9360_v52 = vmul.f32 1.442695, %v9356_v53  ;;  %v14769_v53 = vpack.c.bf16 %v11814_v41, %v11813_v1 }
0x3bb6   :  { %v9354_v8 = vpop.xlane.xlu1 %9353  ;;  %v8885_v6 = vpop.xlane.xlu0 %8884 }
0x3bb7   :  { %15048 = vpow2.f32 %v9360_v52  ;;  %v9357_v36 = vsub.f32 %v9343_v44, %v9354_v8  ;;  %v11812_v44 = vld [vmem:[%s18096_s1 + $0x4c8] sm:$0xff] }
0x3bb8   :  { %15050 = vrcp.f32 %v8885_v6  ;;  %v14766_v19 = vpack.c.bf16 %v11812_v44, %v11811_v50 }
0x3bb9   :  { %v9362_v10 = vmul.f32 1.442695, %v9357_v36 }
0x3bba   :  { %v8888_v14 = vpop.xlane.xlu1 %8887  ;;  %v8891_v12 = vpop.xlane.xlu0 %8890 }
0x3bbb   :  { %15052 = vpow2.f32 %v9362_v10 }
0x3bbc   :  { %15054 = vrcp.f32 %v8888_v14  ;;  %v11826_v14 = vld [vmem:[%s18096_s1 + $0x5c8] sm:$0xff] }
0x3bbd   :  { %v15047_v21 = vpop.eup %15046  ;;  %15056 = vrcp.f32 %v8891_v12  ;;  %v11827_v12 = vld [vmem:[%s18096_s1 + $0x5d0] sm:$0xff] }
0x3bbe   :  { %14055 = vmatmul.mubr.msk.f32.vlgmr.msra.gmra.mrb[20].mxu0 %vm555_vm6, %v15047_v21  ;;  %v9364_v5 = vsel %vm555_vm6, %v15047_v21, 0.0  ;;  %v14778_v21 = vpack.c.bf16 %v11826_v14, %v11825_v55 }
0x3bbf   :  { %9365 = vadd.xlane.f32.xlu1 %v9364_v5  ;;  %14057 = vmatprep.mubr.msk.f32.mxu0 %vm15120_vm0, %v15121_v3 }
0x3bc0   :  { %14764 = vmatpush3.bf16.msra.mxu0 %v14763_v33 }
0x3bc1   :  { %v15049_v18 = vpop.eup %15048  ;;  %14771 = vmatprep.subr.bf16.mxu0 %v15119_v0 }
0x3bc2   :  { %14058 = vmatmul.mubr.msk.f32.gmra.mrb[22].mxu0 %vm555_vm6, %v15049_v18  ;;  %v9367_v30 = vsel %vm555_vm6, %v15049_v18, 0.0  ;;  %v15051_v48 = vpop.eup %15050  ;;  %v11828_v18 = vld [vmem:[%s18096_s1 + $0x5d8] sm:$0xff] }
0x3bc3   :  { %9368 = vadd.xlane.f32.xlu0 %v9367_v30  ;;  %14060 = vmatprep.mubr.msk.f32.mxu0 %vm15120_vm0, %v15121_v3  ;;  %v8987_v47 = vmul.f32 %v15051_v48, %v17628_v57  ;;  %v14781_v48 = vpack.c.bf16 %v11828_v18, %v11827_v12 }
0x3bc5   :  { %v15053_v13 = vpop.eup %15052 }
0x3bc6   :  { %14061 = vmatmul.mubr.msk.f32.gmra.mrb[24].mxu0 %vm555_vm6, %v15053_v13  ;;  %v9370_v40 = vsel %vm562_vm7, %v15053_v13, 0.0  ;;  %v15055_v46 = vpop.eup %15054 }
0x3bc7   :  { %9371 = vadd.xlane.f32.xlu1 %v9370_v40  ;;  %14080 = vmatprep.mubr.msk.f32.mxu0 %vm15120_vm0, %v15121_v3  ;;  %v8988_v22 = vmul.f32 %v15055_v46, %v17630_v2  ;;  %v15057_v57 = vpop.eup %15056  ;;  %v11803_v2 = vld [vmem:[%s18098_s2 + $0xd0] sm:$0xff] }
0x3bc8   :  { %v8989_v58 = vmul.f32 %v15057_v57, %v17632_v32  ;;  %v14760_v35 = vpack.c.bf16 %v11804_v49, %v11803_v2 }
0x3bca   :  { %14081 = vmatmul.mubr.msk.f32.vlgmr.msra.gmra.mrb[26].mxu0 %vm48_vm1, %v8987_v47  ;;  %14761 = vmatpush3.bf16.msra.mxu1 %v14760_v35 }
0x3bcb   :  { %14083 = vmatprep.mubr.msk.f32.mxu0 %vm15120_vm0, %v15121_v3  ;;  %14773 = vmatpush3.bf16.msra.mxu0 %v14772_v42 }
0x3bcc   :  { %14774 = vmatprep.subr.bf16.mxu0 %v15119_v0  ;;  %14765 = vmatprep.subr.bf16.mxu1 %v15119_v0 }
0x3bce   :  { %14084 = vmatmul.mubr.msk.f32.gmra.mrb[28].mxu0 %vm48_vm1, %v8988_v22 }
0x3bcf   :  { %14086 = vmatprep.mubr.msk.f32.mxu0 %vm15120_vm0, %v15121_v3  ;;  %14776 = vmatpush3.bf16.msra.mxu0 %v14775_v61 }
0x3bd0   :  { %14783 = vmatprep.subr.bf16.mxu0 %v15119_v0 }
0x3bd2   :  { %14087 = vmatmul.mubr.msk.f32.gmra.mrb[30].mxu0 %vm48_vm1, %v8989_v58 }
0x3bd3   :  { %14114 = vmatprep.mubr.msk.f32.mxu0 %vm15120_vm0, %v15121_v3 }
0x3bd6   :  { %14115 = vmatmul.mubr.msk.f32.vlgmr.msra.gmra.mrb[32].mxu0 %vm138_vm2, %v17444_v25 }
0x3bd7   :  { %14117 = vmatprep.mubr.msk.f32.mxu0 %vm15120_vm0, %v15121_v3 }
0x3bda   :  { %14118 = vmatmul.mubr.msk.f32.gmra.mrb[34].mxu0 %vm138_vm2, %v17460_v11 }
0x3bdb   :  { %14120 = vmatprep.mubr.msk.f32.mxu0 %vm15120_vm0, %v15121_v3 }
0x3bde   :  { %14121 = vmatmul.mubr.msk.f32.gmra.mrb[36].mxu0 %vm138_vm2, %v17471_v16 }
0x3bdf   :  { %14146 = vmatprep.mubr.msk.f32.mxu0 %vm15120_vm0, %v15121_v3 }
0x3c4c   :  { %v9366_v32 = vpop.xlane.xlu1 %9365 }
0x3c4d   :  { %15058 = vrcp.f32 %v9366_v32 }
0x3c50   :  { %v9369_v23 = vpop.xlane.xlu0 %9368 }
0x3c51   :  { %15060 = vrcp.f32 %v9369_v23 }
0x3c54   :  { %v9372_v15 = vpop.xlane.xlu1 %9371 }
0x3c55   :  { %15062 = vrcp.f32 %v9372_v15 }
0x3c57   :  { %v15059_v51 = vpop.eup %15058 }
0x3c5b   :  { %v15061_v9 = vpop.eup %15060 }
0x3c5f   :  { %v15063_v6 = vpop.eup %15062 }
0x3c91   :  { %v9454_v62 = vpop.f32.mrb[20].mxu0 }
0x3c92   :  { %v9468_v34 = vmul.f32 %v15059_v51, %v9454_v62  ;;  %v14056_v39 = vpop.f32.mrb[21].mxu0 }
0x3c94   :  { %14068 = vmatmul.mubr.msk.f32.vlgmr.msra.gmra.mrb[20].mxu1 %vm48_vm1, %v9468_v34 }
0x3c95   :  { %v9459_v4 = vpop.f32.mrb[22].mxu0  ;;  %14070 = vmatprep.mubr.msk.f32.mxu1 %vm15120_vm0, %v15121_v3  ;;  %14767 = vmatpush3.bf16.msra.mxu1 %v14766_v19 }
0x3c96   :  { %v9469_v52 = vmul.f32 %v15061_v9, %v9459_v4  ;;  %v14059_v8 = vpop.f32.mrb[23].mxu0  ;;  %14768 = vmatprep.subr.bf16.mxu1 %v15119_v0 }
0x3c98   :  { %14071 = vmatmul.mubr.msk.f32.gmra.mrb[22].mxu1 %vm48_vm1, %v9469_v52 }
0x3c99   :  { %v9464_v36 = vpop.f32.mrb[24].mxu0  ;;  %14073 = vmatprep.mubr.msk.f32.mxu1 %vm15120_vm0, %v15121_v3  ;;  %14770 = vmatpush3.bf16.msra.mxu1 %v14769_v53 }
0x3c9a   :  { %v9470_v10 = vmul.f32 %v15063_v6, %v9464_v36  ;;  %v14062_v27 = vpop.f32.mrb[25].mxu0  ;;  %14777 = vmatprep.subr.bf16.mxu1 %v15119_v0 }
0x3c9c   :  { %14074 = vmatmul.mubr.msk.f32.gmra.mrb[24].mxu1 %vm48_vm1, %v9470_v10 }
0x3c9d   :  { %v9638_v33 = vpop.f32.mrb[26].mxu0  ;;  %14097 = vmatprep.mubr.msk.f32.mxu1 %vm15120_vm0, %v15121_v3 }
0x3c9e   :  { %v14082_v5 = vpop.f32.mrb[27].mxu0 }
0x3ca0   :  { %14098 = vmatmul.mubr.msk.f32.vlgmr.msra.gmra.mrb[26].mxu1 %vm138_vm2, %v17444_v25 }
0x3ca1   :  { %v9643_v30 = vpop.f32.mrb[28].mxu0  ;;  %14100 = vmatprep.mubr.msk.f32.mxu1 %vm15120_vm0, %v15121_v3  ;;  %14779 = vmatpush3.bf16.msra.mxu1 %v14778_v21 }
0x3ca2   :  { %v14085_v43 = vpop.f32.mrb[29].mxu0  ;;  %14780 = vmatprep.subr.bf16.mxu1 %v15119_v0 }
0x3ca4   :  { %14101 = vmatmul.mubr.msk.f32.gmra.mrb[28].mxu1 %vm138_vm2, %v17460_v11 }
0x3ca5   :  { %v9648_v20 = vpop.f32.mrb[30].mxu0  ;;  %14103 = vmatprep.mubr.msk.f32.mxu1 %vm15120_vm0, %v15121_v3  ;;  %14782 = vmatpush3.bf16.msra.mxu1 %v14781_v48 }
0x3ca6   :  { %v14088_v13 = vpop.f32.mrb[31].mxu0  ;;  %14787 = vmatprep.subr.bf16.mxu1 %v15119_v0 }
0x3ca8   :  { %14104 = vmatmul.mubr.msk.f32.gmra.mrb[30].mxu1 %vm138_vm2, %v17471_v16 }
0x3ca9   :  { %v9808_v40 = vpop.f32.mrb[32].mxu0  ;;  %14131 = vmatprep.mubr.msk.f32.mxu1 %vm15120_vm0, %v15121_v3 }
0x3caa   :  { %v14116_v42 = vpop.f32.mrb[33].mxu0 }
0x3cac   :  { %14132 = vmatmul.mubr.msk.f32.vlgmr.msra.gmra.mrb[32].mxu1 %vm138_vm2, %v17444_v25 }
0x3cad   :  { %v9813_v47 = vpop.f32.mrb[34].mxu0  ;;  %14134 = vmatprep.mubr.msk.f32.mxu1 %vm15120_vm0, %v15121_v3 }
0x3cae   :  { %v14784_v60 = vpack.c.bf16 %v9813_v47, %v9808_v40  ;;  %v14119_v24 = vpop.f32.mrb[35].mxu0 }
0x3caf   :  { %v11847_v24 = vld [vmem:[%s18096_s1 + $0x4e0] sm:$0xff] }
0x3cb0   :  { %14135 = vmatmul.mubr.msk.f32.gmra.mrb[34].mxu1 %vm138_vm2, %v17460_v11  ;;  %14786 = vmatpush3.bf16.xpose.msk.msra.mxu0 %vm15324_vm4, %v14784_v60 }
0x3cb1   :  { %v9818_v46 = vpop.f32.mrb[36].mxu0  ;;  %14137 = vmatprep.mubr.msk.f32.mxu1 %vm15120_vm0, %v15121_v3  ;;  %14144 = vmatprep.subr.mxu0 %v15121_v3 }
0x3cb2   :  { %v14122_v61 = vpop.f32.mrb[37].mxu0 }
0x3cb4   :  { %14138 = vmatmul.mubr.msk.f32.gmra.mrb[36].mxu1 %vm138_vm2, %v17471_v16 }
0x3cb5   :  { %14161 = vmatprep.mubr.msk.f32.mxu1 %vm15120_vm0, %v15121_v3 }
0x3cb8   :  { %14145 = vmatpush3.xpose.msk.msra.mxu0 %vm48_vm1, %v9818_v46  ;;  %v11848_v46 = vld [vmem:[%s18096_s1 + $0x4e8] sm:$0xff] }
0x3cb9   :  { %14790 = vmatprep.subr.bf16.mxu0 %v15119_v0  ;;  %v14794_v61 = vpack.c.bf16 %v11848_v46, %v11847_v24 }
0x3d67   :  { %v9549_v22 = vpop.f32.mrb[20].mxu1 }
0x3d68   :  { %v17790_v57 = vadd.f32 %v9638_v33, %v9549_v22  ;;  %v14069_v58 = vpop.f32.mrb[21].mxu1 }
0x3d69   :  { %v11849_v58 = vld [vmem:[%s18096_s1 + $0x4f0] sm:$0xff] }
0x3d6b   :  { %v9554_v2 = vpop.f32.mrb[22].mxu1 }
0x3d6c   :  { %v17792_v49 = vadd.f32 %v9643_v30, %v9554_v2  ;;  %v14072_v35 = vpop.f32.mrb[23].mxu1  ;;  %v11850_v2 = vld [vmem:[%s18096_s1 + $0x4f8] sm:$0xff] }
0x3d6f   :  { %v9559_v32 = vpop.f32.mrb[24].mxu1 }
0x3d70   :  { %v17794_v23 = vadd.f32 %v9648_v20, %v9559_v32  ;;  %v14075_v15 = vpop.f32.mrb[25].mxu1  ;;  %v14797_v32 = vpack.c.bf16 %v11850_v2, %v11849_v58 }
0x3d73   :  { %v9723_v50 = vpop.f32.mrb[26].mxu1 }
0x3d74   :  { %v14099_v44 = vpop.f32.mrb[27].mxu1  ;;  %14147 = vmatmul.mubr.msk.f32.vlgmr.msra.gmra.mrb[38].mxu0 %vm48_vm1, %v9723_v50 }
0x3d75   :  { %14149 = vmatprep.mubr.msk.f32.mxu0 %vm15120_vm0, %v15121_v3  ;;  %v11861_v44 = vld [vmem:[%s18096_s1 + $0x5e0] sm:$0xff] }
0x3d77   :  { %v9728_v51 = vpop.f32.mrb[28].mxu1 }
0x3d78   :  { %v14102_v62 = vpop.f32.mrb[29].mxu1  ;;  %14150 = vmatmul.mubr.msk.f32.gmra.mrb[40].mxu0 %vm48_vm1, %v9728_v51  ;;  %v11862_v51 = vld [vmem:[%s18096_s1 + $0x5e8] sm:$0xff] }
0x3d79   :  { %14152 = vmatprep.mubr.msk.f32.mxu0 %vm15120_vm0, %v15121_v3 }
0x3d7b   :  { %v9733_v19 = vpop.f32.mrb[30].mxu1 }
0x3d7c   :  { %v14105_v34 = vpop.f32.mrb[31].mxu1  ;;  %14153 = vmatmul.mubr.msk.f32.gmra.mrb[42].mxu0 %vm48_vm1, %v9733_v19 }
0x3d7d   :  { %14174 = vmatprep.mubr.msk.f32.mxu0 %vm15120_vm0, %v15121_v3  ;;  %v14806_v34 = vpack.c.bf16 %v11862_v51, %v11861_v44 }
0x3d7f   :  { %v9893_v39 = vpop.f32.mrb[32].mxu1 }
0x3d80   :  { %v14133_v1 = vpop.f32.mrb[33].mxu1 }
0x3d81   :  { %v11864_v1 = vld [vmem:[%s18096_s1 + $0x5f8] sm:$0xff] }
0x3d83   :  { %v9898_v41 = vpop.f32.mrb[34].mxu1 }
0x3d84   :  { %v14788_v9 = vpack.c.bf16 %v9898_v41, %v9893_v39  ;;  %v14136_v4 = vpop.f32.mrb[35].mxu1  ;;  %v11863_v39 = vld [vmem:[%s18096_s1 + $0x5f0] sm:$0xff] }
0x3d85   :  { %v14809_v41 = vpack.c.bf16 %v11864_v1, %v11863_v39  ;;  %v11843_v4 = vld [vmem:[%s18098_s2 + $0xe8] sm:$0xff] }
0x3d86   :  { %14789 = vmatpush3.bf16.msra.mxu1 %v14788_v9  ;;  %v11842_v9 = vld [vmem:[%s18098_s2 + $0xe0] sm:$0xff] }
0x3d87   :  { %v9903_v53 = vpop.f32.mrb[36].mxu1  ;;  %14159 = vmatprep.subr.mxu1 %v15121_v3 }
0x3d88   :  { %v14139_v52 = vpop.f32.mrb[37].mxu1 }
0x3d8a   :  { %14160 = vmatpush3.msk.msra.mxu1 %vm596_vm5, %v9903_v53  ;;  %v14791_v53 = vpack.c.bf16 %v11843_v4, %v11842_v9 }
0x3d8b   :  { %14793 = vmatprep.subr.bf16.mxu1 %v15119_v0 }
0x3d8c   :  { %14792 = vmatpush3.bf16.msra.mxu0 %v14791_v53 }
0x3d8d   :  { %14799 = vmatprep.subr.bf16.mxu0 %v15119_v0 }
0x3e47   :  { %v9991_v8 = vpop.f32.mrb[38].mxu0 }
0x3e48   :  { %v9992_v6 = vadd.f32 %v17566_v29, %v9991_v8  ;;  %v14148_v36 = vpop.f32.mrb[39].mxu0 }
0x3e49   :  { %v11854_v36 = vld [vmem:[%s18096_s1 + $0x560] sm:$0xff] }
0x3e4a   :  { %v10005_v10 = vsel %vm555_vm6, %v9992_v6, -inf }
0x3e4b   :  { %10006 = vmax.xlane.f32.xlu0 %v10005_v10  ;;  %v9996_v27 = vpop.f32.mrb[40].mxu0  ;;  %v11855_v10 = vld [vmem:[%s18096_s1 + $0x568] sm:$0xff] }
0x3e4c   :  { %v9997_v55 = vadd.f32 %v17573_v37, %v9996_v27  ;;  %v14151_v14 = vpop.f32.mrb[41].mxu0 }
0x3e4d   :  { %v14800_v14 = vpack.c.bf16 %v11855_v10, %v11854_v36 }
0x3e4e   :  { %v10008_v33 = vsel %vm555_vm6, %v9997_v55, -inf }
0x3e4f   :  { %10009 = vmax.xlane.f32.xlu1 %v10008_v33  ;;  %v10001_v21 = vpop.f32.mrb[42].mxu0 }
0x3e50   :  { %v10002_v5 = vadd.f32 %v17580_v63, %v10001_v21  ;;  %v14154_v12 = vpop.f32.mrb[43].mxu0 }
0x3e51   :  { %v11857_v12 = vld [vmem:[%s18096_s1 + $0x578] sm:$0xff] }
0x3e52   :  { %v10011_v18 = vsel %vm562_vm7, %v10002_v5, -inf }
0x3e53   :  { %10012 = vmax.xlane.f32.xlu0 %v10011_v18 }
0x3ed8   :  { %v10007_v30 = vpop.xlane.xlu0 %10006 }
0x3ed9   :  { %v10014_v48 = vsub.f32 %v9992_v6, %v10007_v30 }
0x3edb   :  { %v10017_v43 = vmul.f32 1.442695, %v10014_v48 }
0x3edc   :  { %v10010_v20 = vpop.xlane.xlu1 %10009 }
0x3edd   :  { %15064 = vpow2.f32 %v10017_v43  ;;  %v10015_v13 = vsub.f32 %v9997_v55, %v10010_v20 }
0x3edf   :  { %v10019_v40 = vmul.f32 1.442695, %v10015_v13 }
0x3ee0   :  { %v10013_v42 = vpop.xlane.xlu0 %10012 }
0x3ee1   :  { %15066 = vpow2.f32 %v10019_v40  ;;  %v10016_v47 = vsub.f32 %v10002_v5, %v10013_v42  ;;  %v11856_v5 = vld [vmem:[%s18096_s1 + $0x570] sm:$0xff] }
0x3ee2   :  { %v14803_v48 = vpack.c.bf16 %v11857_v12, %v11856_v5 }
0x3ee3   :  { %v10021_v60 = vmul.f32 1.442695, %v10016_v47 }
0x3ee5   :  { %15068 = vpow2.f32 %v10021_v60 }
0x3ee7   :  { %v15065_v22 = vpop.eup %15064 }
0x3ee8   :  { %14162 = vmatmul.mubr.msk.f32.vlgmr.msra.gmra.mrb[38].mxu1 %vm555_vm6, %v15065_v22  ;;  %v10023_v35 = vsel %vm555_vm6, %v15065_v22, 0.0 }
0x3ee9   :  { %10024 = vadd.xlane.f32.xlu1 %v10023_v35  ;;  %14164 = vmatprep.mubr.msk.f32.mxu1 %vm15120_vm0, %v15121_v3 }
0x3eea   :  { %14795 = vmatpush3.bf16.msra.mxu1 %v14794_v61 }
0x3eeb   :  { %v15067_v15 = vpop.eup %15066  ;;  %14796 = vmatprep.subr.bf16.mxu1 %v15119_v0 }
0x3eec   :  { %14165 = vmatmul.mubr.msk.f32.gmra.mrb[40].mxu1 %vm555_vm6, %v15067_v15  ;;  %v10026_v50 = vsel %vm555_vm6, %v15067_v15, 0.0 }
0x3eed   :  { %10027 = vadd.xlane.f32.xlu0 %v10026_v50  ;;  %14167 = vmatprep.mubr.msk.f32.mxu1 %vm15120_vm0, %v15121_v3 }
0x3eee   :  { %14798 = vmatpush3.bf16.msra.mxu1 %v14797_v32 }
0x3eef   :  { %v15069_v62 = vpop.eup %15068  ;;  %14805 = vmatprep.subr.bf16.mxu1 %v15119_v0 }
0x3ef0   :  { %14168 = vmatmul.mubr.msk.f32.gmra.mrb[42].mxu1 %vm555_vm6, %v15069_v62  ;;  %v10029_v19 = vsel %vm562_vm7, %v15069_v62, 0.0 }
0x3ef1   :  { %10030 = vadd.xlane.f32.xlu1 %v10029_v19  ;;  %14191 = vmatprep.mubr.msk.f32.mxu1 %vm15120_vm0, %v15121_v3 }
0x3ef4   :  { %14192 = vmatmul.mubr.msk.f32.vlgmr.msra.gmra.mrb[44].mxu1 %vm138_vm2, %v17444_v25 }
0x3ef5   :  { %14194 = vmatprep.mubr.msk.f32.mxu1 %vm15120_vm0, %v15121_v3  ;;  %14807 = vmatpush3.bf16.msra.mxu1 %v14806_v34 }
0x3ef6   :  { %14808 = vmatprep.subr.bf16.mxu1 %v15119_v0 }
0x3ef8   :  { %14195 = vmatmul.mubr.msk.f32.gmra.mrb[46].mxu1 %vm138_vm2, %v17460_v11 }
0x3ef9   :  { %14197 = vmatprep.mubr.msk.f32.mxu1 %vm15120_vm0, %v15121_v3  ;;  %14810 = vmatpush3.bf16.msra.mxu1 %v14809_v41 }
0x3efa   :  { %14815 = vmatprep.subr.bf16.mxu1 %v15119_v0 }
0x3efc   :  { %14198 = vmatmul.mubr.msk.f32.gmra.mrb[48].mxu1 %vm138_vm2, %v17471_v16 }
0x3efd   :  { %14225 = vmatprep.mubr.msk.f32.mxu1 %vm15120_vm0, %v15121_v3 }
0x3f00   :  { %14226 = vmatmul.mubr.msk.f32.vlgmr.msra.gmra.mrb[50].mxu1 %vm138_vm2, %v17444_v25 }
0x3f01   :  { %14228 = vmatprep.mubr.msk.f32.mxu1 %vm15120_vm0, %v15121_v3 }
0x3f04   :  { %14229 = vmatmul.mubr.msk.f32.gmra.mrb[52].mxu1 %vm138_vm2, %v17460_v11 }
0x3f05   :  { %14231 = vmatprep.mubr.msk.f32.mxu1 %vm15120_vm0, %v15121_v3 }
0x3f08   :  { %14232 = vmatmul.mubr.msk.f32.gmra.mrb[54].mxu1 %vm138_vm2, %v17471_v16 }
0x3f09   :  { %14255 = vmatprep.mubr.msk.f32.mxu1 %vm15120_vm0, %v15121_v3 }
0x3f76   :  { %v10025_v52 = vpop.xlane.xlu1 %10024 }
0x3f77   :  { %15070 = vrcp.f32 %v10025_v52 }
0x3f7a   :  { %v10028_v8 = vpop.xlane.xlu0 %10027 }
0x3f7b   :  { %15072 = vrcp.f32 %v10028_v8 }
0x3f7e   :  { %v10031_v6 = vpop.xlane.xlu1 %10030 }
0x3f7f   :  { %15074 = vrcp.f32 %v10031_v6 }
0x3f81   :  { %v15071_v27 = vpop.eup %15070 }
0x3f85   :  { %v15073_v18 = vpop.eup %15072 }
0x3f89   :  { %v15075_v13 = vpop.eup %15074 }
0x3fbb   :  { %v10113_v55 = vpop.f32.mrb[38].mxu1 }
0x3fbc   :  { %v10127_v33 = vmul.f32 %v15071_v27, %v10113_v55  ;;  %v14163_v21 = vpop.f32.mrb[39].mxu1 }
0x3fbe   :  { %14175 = vmatmul.mubr.msk.f32.vlgmr.msra.gmra.mrb[44].mxu0 %vm48_vm1, %v10127_v33 }
0x3fbf   :  { %v10118_v30 = vpop.f32.mrb[40].mxu1  ;;  %14177 = vmatprep.mubr.msk.f32.mxu0 %vm15120_vm0, %v15121_v3  ;;  %14801 = vmatpush3.bf16.msra.mxu0 %v14800_v14 }
0x3fc0   :  { %v10128_v43 = vmul.f32 %v15073_v18, %v10118_v30  ;;  %v14166_v20 = vpop.f32.mrb[41].mxu1  ;;  %14802 = vmatprep.subr.bf16.mxu0 %v15119_v0 }
0x3fc2   :  { %14178 = vmatmul.mubr.msk.f32.gmra.mrb[46].mxu0 %vm48_vm1, %v10128_v43 }
0x3fc3   :  { %v10123_v40 = vpop.f32.mrb[42].mxu1  ;;  %14180 = vmatprep.mubr.msk.f32.mxu0 %vm15120_vm0, %v15121_v3  ;;  %14804 = vmatpush3.bf16.msra.mxu0 %v14803_v48 }
0x3fc4   :  { %v10129_v42 = vmul.f32 %v15075_v13, %v10123_v40  ;;  %v14169_v47 = vpop.f32.mrb[43].mxu1  ;;  %14811 = vmatprep.subr.bf16.mxu0 %v15119_v0 }
0x3fc6   :  { %14181 = vmatmul.mubr.msk.f32.gmra.mrb[48].mxu0 %vm48_vm1, %v10129_v42 }
0x3fc7   :  { %v10296_v60 = vpop.f32.mrb[44].mxu1  ;;  %14208 = vmatprep.mubr.msk.f32.mxu0 %vm15120_vm0, %v15121_v3 }
0x3fc8   :  { %v14193_v24 = vpop.f32.mrb[45].mxu1 }
0x3fca   :  { %14209 = vmatmul.mubr.msk.f32.vlgmr.msra.gmra.mrb[50].mxu0 %vm138_vm2, %v17444_v25 }
0x3fcb   :  { %v10301_v46 = vpop.f32.mrb[46].mxu1  ;;  %14211 = vmatprep.mubr.msk.f32.mxu0 %vm15120_vm0, %v15121_v3 }
0x3fcc   :  { %v14196_v61 = vpop.f32.mrb[47].mxu1 }
0x3fcd   :  { %v11878_v61 = vld [vmem:[%s18098_s2 + $0xf0] sm:$0xff] }
0x3fce   :  { %14212 = vmatmul.mubr.msk.f32.gmra.mrb[52].mxu0 %vm138_vm2, %v17460_v11 }
0x3fcf   :  { %v10306_v22 = vpop.f32.mrb[48].mxu1  ;;  %14214 = vmatprep.mubr.msk.f32.mxu0 %vm15120_vm0, %v15121_v3 }
0x3fd0   :  { %v14199_v58 = vpop.f32.mrb[49].mxu1 }
0x3fd2   :  { %14215 = vmatmul.mubr.msk.f32.gmra.mrb[54].mxu0 %vm138_vm2, %v17471_v16 }
0x3fd3   :  { %v10466_v2 = vpop.f32.mrb[50].mxu1  ;;  %14240 = vmatprep.mubr.msk.f32.mxu0 %vm15120_vm0, %v15121_v3 }
0x3fd4   :  { %v14227_v25 = vpop.f32.mrb[51].mxu1 }
0x3fd7   :  { %v10471_v35 = vpop.f32.mrb[52].mxu1 }
0x3fd8   :  { %v14816_v32 = vpack.c.bf16 %v10471_v35, %v10466_v2  ;;  %v14230_v15 = vpop.f32.mrb[53].mxu1 }
0x3fda   :  { %14817 = vmatpush3.bf16.msra.mxu1 %v14816_v32 }
0x3fdb   :  { %v10476_v50 = vpop.f32.mrb[54].mxu1  ;;  %14253 = vmatprep.subr.mxu1 %v15121_v3 }
0x3fdc   :  { %v14233_v11 = vpop.f32.mrb[55].mxu1 }
0x3fde   :  { %14254 = vmatpush3.msk.msra.mxu1 %vm596_vm5, %v10476_v50 }
0x3fdf   :  { %14821 = vmatprep.subr.bf16.mxu1 %v15119_v0 }
0x4091   :  { %v10208_v44 = vpop.f32.mrb[44].mxu0 }
0x4092   :  { %v17924_v16 = vadd.f32 %v10208_v44, %v17790_v57  ;;  %v14176_v51 = vpop.f32.mrb[45].mxu0 }
0x4095   :  { %v10213_v62 = vpop.f32.mrb[46].mxu0 }
0x4096   :  { %v17927_v19 = vadd.f32 %v10213_v62, %v17792_v49  ;;  %v14179_v34 = vpop.f32.mrb[47].mxu0 }
0x4099   :  { %v10218_v39 = vpop.f32.mrb[48].mxu0 }
0x409a   :  { %v17930_v1 = vadd.f32 %v10218_v39, %v17794_v23  ;;  %v14182_v41 = vpop.f32.mrb[49].mxu0 }
0x409d   :  { %v10381_v9 = vpop.f32.mrb[50].mxu0 }
0x409e   :  { %v14210_v4 = vpop.f32.mrb[51].mxu0 }
0x40a1   :  { %v10386_v53 = vpop.f32.mrb[52].mxu0 }
0x40a2   :  { %v14812_v52 = vpack.c.bf16 %v10386_v53, %v10381_v9  ;;  %v14213_v8 = vpop.f32.mrb[53].mxu0 }
0x40a3   :  { %v17984_v8 = vld [vmem:[%s18094_s6 + $0x40] sm:$0xff] }
0x40a4   :  { %14814 = vmatpush3.bf16.xpose.msk.msra.mxu0 %vm15324_vm4, %v14812_v52 }
0x40a5   :  { %v10391_v57 = vpop.f32.mrb[54].mxu0  ;;  %14238 = vmatprep.subr.mxu0 %v15121_v3 }
0x40a6   :  { %v14216_v6 = vpop.f32.mrb[55].mxu0 }
0x40ac   :  { %14239 = vmatpush3.xpose.msk.msra.mxu0 %vm48_vm1, %v10391_v57  ;;  %v10804_v57 = vrot.slane %v17984_v8, %v15815_v17 }
0x40ad   :  { %14818 = vmatprep.subr.bf16.mxu0 %v15119_v0 }
0x40af   :  { %14241 = vmatmul.mubr.msk.f32.vlgmr.msra.gmra.mrb[56].mxu0 %vm48_vm1, %v10296_v60 }
0x40b0   :  { %14243 = vmatprep.mubr.msk.f32.mxu0 %vm15120_vm0, %v15121_v3 }
0x40b3   :  { %14244 = vmatmul.mubr.msk.f32.gmra.mrb[58].mxu0 %vm48_vm1, %v10301_v46 }
0x40b4   :  { %14246 = vmatprep.mubr.msk.f32.mxu0 %vm15120_vm0, %v15121_v3 }
0x40b7   :  { %14247 = vmatmul.mubr.msk.f32.gmra.mrb[60].mxu0 %vm48_vm1, %v10306_v22  ;;  %v11879_v22 = vld [vmem:[%s18098_s2 + $0xf8] sm:$0xff] }
0x40b8   :  { %14268 = vmatprep.mubr.msk.f32.mxu0 %vm15120_vm0, %v15121_v3  ;;  %v14819_v58 = vpack.c.bf16 %v11879_v22, %v11878_v61  ;;  %v11886_v61 = vld [vmem:[%s18099_s3 + $0x78] sm:$0xff] }
0x40ba   :  { %14820 = vmatpush3.bf16.msra.mxu0 %v14819_v58 }
0x40bb   :  { %14827 = vmatprep.subr.bf16.mxu0 %v15119_v0 }
0x4182   :  { %v10564_v31 = vpop.f32.mrb[56].mxu0 }
0x4183   :  { %v10565_v49 = vadd.f32 %v17566_v29, %v10564_v31  ;;  %v14242_v23 = vpop.f32.mrb[57].mxu0 }
0x4185   :  { %v10578_v36 = vsel %vm555_vm6, %v10565_v49, -inf }
0x4186   :  { %10579 = vmax.xlane.f32.xlu0 %v10578_v36  ;;  %v10569_v10 = vpop.f32.mrb[58].mxu0 }
0x4187   :  { %v10570_v27 = vadd.f32 %v17573_v37, %v10569_v10  ;;  %v14245_v55 = vpop.f32.mrb[59].mxu0 }
0x4189   :  { %v10581_v14 = vsel %vm555_vm6, %v10570_v27, -inf }
0x418a   :  { %10582 = vmax.xlane.f32.xlu1 %v10581_v14  ;;  %v10574_v33 = vpop.f32.mrb[60].mxu0 }
0x418b   :  { %v10575_v21 = vadd.f32 %v17580_v63, %v10574_v33  ;;  %v14248_v5 = vpop.f32.mrb[61].mxu0 }
0x418d   :  { %v10584_v12 = vsel %vm562_vm7, %v10575_v21, -inf }
0x418e   :  { %10585 = vmax.xlane.f32.xlu0 %v10584_v12 }
0x4213   :  { %v10580_v18 = vpop.xlane.xlu0 %10579 }
0x4214   :  { %v10587_v29 = vsub.f32 %v10565_v49, %v10580_v18 }
0x4216   :  { %v10590_v30 = vmul.f32 1.442695, %v10587_v29 }
0x4217   :  { %v10583_v48 = vpop.xlane.xlu1 %10582 }
0x4218   :  { %15076 = vpow2.f32 %v10590_v30  ;;  %v10588_v43 = vsub.f32 %v10570_v27, %v10583_v48 }
0x421a   :  { %v10592_v20 = vmul.f32 1.442695, %v10588_v43 }
0x421b   :  { %v10586_v13 = vpop.xlane.xlu0 %10585 }
0x421c   :  { %15078 = vpow2.f32 %v10592_v20  ;;  %v10589_v37 = vsub.f32 %v10575_v21, %v10586_v13 }
0x421e   :  { %v10594_v40 = vmul.f32 1.442695, %v10589_v37 }
0x4220   :  { %15080 = vpow2.f32 %v10594_v40 }
0x4222   :  { %v15077_v42 = vpop.eup %15076 }
0x4223   :  { %14256 = vmatmul.mubr.msk.f32.vlgmr.msra.gmra.mrb[56].mxu1 %vm555_vm6, %v15077_v42  ;;  %v10596_v63 = vsel %vm555_vm6, %v15077_v42, 0.0 }
0x4224   :  { %10597 = vadd.xlane.f32.xlu1 %v10596_v63  ;;  %14258 = vmatprep.mubr.msk.f32.mxu1 %vm15120_vm0, %v15121_v3 }
0x4226   :  { %v15079_v47 = vpop.eup %15078 }
0x4227   :  { %14259 = vmatmul.mubr.msk.f32.gmra.mrb[58].mxu1 %vm555_vm6, %v15079_v47  ;;  %v10599_v60 = vsel %vm555_vm6, %v15079_v47, 0.0  ;;  %v11883_v47 = vld [vmem:[%s18099_s3 + $0x60] sm:$0xff] }
0x4228   :  { %10600 = vadd.xlane.f32.xlu0 %v10599_v60  ;;  %14261 = vmatprep.mubr.msk.f32.mxu1 %vm15120_vm0, %v15121_v3  ;;  %v11884_v60 = vld [vmem:[%s18099_s3 + $0x68] sm:$0xff] }
0x422a   :  { %v15081_v24 = vpop.eup %15080 }
0x422b   :  { %14262 = vmatmul.mubr.msk.f32.gmra.mrb[60].mxu1 %vm555_vm6, %v15081_v24  ;;  %v10602_v46 = vsel %vm562_vm7, %v15081_v24, 0.0  ;;  %v14822_v24 = vpack.c.bf16 %v11884_v60, %v11883_v47 }
0x422c   :  { %10603 = vadd.xlane.f32.xlu1 %v10602_v46  ;;  %14285 = vmatprep.mubr.msk.f32.mxu1 %vm15120_vm0, %v15121_v3  ;;  %v11885_v46 = vld [vmem:[%s18099_s3 + $0x70] sm:$0xff] }
0x422d   :  { %14823 = vmatpush3.bf16.msra.mxu1 %v14822_v24  ;;  %v14825_v22 = vpack.c.bf16 %v11886_v61, %v11885_v46 }
0x422e   :  { %14824 = vmatprep.subr.bf16.mxu1 %v15119_v0 }
0x4231   :  { %14826 = vmatpush3.bf16.msra.mxu1 %v14825_v22 }
0x4232   :  { %14311 = vmatprep.subr.mxu1 %v15121_v3 }
0x42b1   :  { %v10598_v2 = vpop.xlane.xlu1 %10597 }
0x42b2   :  { %15082 = vrcp.f32 %v10598_v2 }
0x42b5   :  { %v10601_v25 = vpop.xlane.xlu0 %10600 }
0x42b6   :  { %15084 = vrcp.f32 %v10601_v25 }
0x42b9   :  { %v10604_v35 = vpop.xlane.xlu1 %10603 }
0x42ba   :  { %15086 = vrcp.f32 %v10604_v35 }
0x42bc   :  { %v15083_v32 = vpop.eup %15082 }
0x42c0   :  { %v15085_v44 = vpop.eup %15084 }
0x42c4   :  { %v15087_v39 = vpop.eup %15086 }
0x42f6   :  { %v10686_v15 = vpop.f32.mrb[56].mxu1 }
0x42f7   :  { %v10700_v50 = vmul.f32 %v15083_v32, %v10686_v15  ;;  %v14257_v11 = vpop.f32.mrb[57].mxu1 }
0x42f9   :  { %14269 = vmatmul.mubr.msk.f32.vlgmr.msra.gmra.mrb[62].mxu0 %vm48_vm1, %v10700_v50 }
0x42fa   :  { %v10691_v51 = vpop.f32.mrb[58].mxu1  ;;  %14271 = vmatprep.mubr.msk.f32.mxu0 %vm15120_vm0, %v15121_v3 }
0x42fb   :  { %v10701_v62 = vmul.f32 %v15085_v44, %v10691_v51  ;;  %v14260_v34 = vpop.f32.mrb[59].mxu1  ;;  %v10850_v51 = vrot.slane %v17984_v8, %v15863_v7 }
0x42fc   :  { %v10857_v34 = vrot.slane %v17984_v8, %v15866_v54  ;;  %v11890_v54 = vld [vmem:[%s18100_s4 + $0x60] sm:$0xff] }
0x42fd   :  { %14272 = vmatmul.mubr.msk.f32.gmra.mrb[64].mxu0 %vm48_vm1, %v10701_v62 }
0x42fe   :  { %v10696_v41 = vpop.f32.mrb[60].mxu1  ;;  %14274 = vmatprep.mubr.msk.f32.mxu0 %vm15120_vm0, %v15121_v3 }
0x42ff   :  { %v10702_v9 = vmul.f32 %v15087_v39, %v10696_v41  ;;  %v14263_v4 = vpop.f32.mrb[61].mxu1 }
0x4301   :  { %14275 = vmatmul.mubr.msk.f32.gmra.mrb[66].mxu0 %vm48_vm1, %v10702_v9 }
0x4302   :  { %14302 = vmatprep.mubr.msk.f32.mxu0 %vm15120_vm0, %v15121_v3 }
0x43cc   :  { %v10781_v53 = vpop.f32.mrb[62].mxu0 }
0x43cd   :  { %v10795_v52 = vadd.f32 %v10781_v53, %v17924_v16  ;;  %v14270_v6 = vpop.f32.mrb[63].mxu0 }
0x43cf   :  { %v10798_v31 = vadd.f32 %v10795_v52, %v17381_v26 }
0x43d0   :  { %v10786_v49 = vpop.f32.mrb[64].mxu0 }
0x43d1   :  { %v17989_v23 = vadd.f32 %v10804_v57, %v10798_v31  ;;  %v10796_v36 = vadd.f32 %v10786_v49, %v17927_v19  ;;  %v14273_v10 = vpop.f32.mrb[65].mxu0 }
0x43d3   :  { %v10799_v27 = vadd.f32 %v10796_v36, %v17388_v38  ;;  %v10808_v16 = vsel %vm138_vm2, %v17989_v23, 0.0  ;;  %v11891_v36 = vld [vmem:[%s18100_s4 + $0x68] sm:$0xff] }
0x43d4   :  { %10809 = vadd.xlane.f32.xlu0 %v10808_v16  ;;  %v10791_v55 = vpop.f32.mrb[66].mxu0  ;;  %v14828_v10 = vpack.c.bf16 %v11891_v36, %v11890_v54  ;;  %v11893_v16 = vld [vmem:[%s18100_s4 + $0x78] sm:$0xff] }
0x43d5   :  { %v17995_v14 = vadd.f32 %v10804_v57, %v10799_v27  ;;  %v10797_v17 = vadd.f32 %v10791_v55, %v17930_v1  ;;  %v14276_v33 = vpop.f32.mrb[67].mxu0  ;;  %v11892_v27 = vld [vmem:[%s18100_s4 + $0x70] sm:$0xff] }
0x43d6   :  { %14829 = vmatpush3.bf16.msra.mxu0 %v14828_v10  ;;  %v14831_v55 = vpack.c.bf16 %v11893_v16, %v11892_v27 }
0x43d7   :  { %v10800_v26 = vadd.f32 %v10797_v17, %v17395_v45  ;;  %v10811_v21 = vsel %vm138_vm2, %v17995_v14, 0.0  ;;  %14830 = vmatprep.subr.bf16.mxu0 %v15119_v0  ;;  %v10869_v17 = vrot.slane %v17984_v8, %v15896_v59 }
0x43d8   :  { %10812 = vadd.xlane.f32.xlu1 %v10811_v21 }
0x43d9   :  { %v18001_v19 = vadd.f32 %v10804_v57, %v10800_v26 }
0x43da   :  { %14832 = vmatpush3.bf16.msra.mxu0 %v14831_v55 }
0x43db   :  { %v10814_v38 = vsel %vm145_vm3, %v18001_v19, 0.0 }
0x43dc   :  { %10815 = vadd.xlane.f32.xlu0 %v10814_v38 }
0x4461   :  { %v10810_v5 = vpop.xlane.xlu0 %10809 }
0x4462   :  { %v10817_v12 = vmul.f32 0.03125, %v10810_v5 }
0x4464   :  { %v10820_v18 = vsub.f32 %v17989_v23, %v10817_v12 }
0x4465   :  { %v10813_v29 = vpop.xlane.xlu1 %10812 }
0x4466   :  { %v10818_v30 = vmul.f32 0.03125, %v10813_v29  ;;  %v10823_v1 = vmul.f32 %v10820_v18, %v10820_v18 }
0x4468   :  { %v10821_v48 = vsub.f32 %v17995_v14, %v10818_v30  ;;  %v10826_v45 = vsel %vm138_vm2, %v10823_v1, 0.0 }
0x4469   :  { %10827 = vadd.xlane.f32.xlu1 %v10826_v45  ;;  %v10816_v43 = vpop.xlane.xlu0 %10815 }
0x446a   :  { %v10819_v20 = vmul.f32 0.03125, %v10816_v43  ;;  %v10824_v13 = vmul.f32 %v10821_v48, %v10821_v48 }
0x446c   :  { %v10822_v37 = vsub.f32 %v18001_v19, %v10819_v20  ;;  %v10829_v40 = vsel %vm138_vm2, %v10824_v13, 0.0 }
0x446d   :  { %10830 = vadd.xlane.f32.xlu0 %v10829_v40 }
0x446e   :  { %v10825_v42 = vmul.f32 %v10822_v37, %v10822_v37 }
0x4470   :  { %v10832_v63 = vsel %vm145_vm3, %v10825_v42, 0.0 }
0x4471   :  { %10833 = vadd.xlane.f32.xlu1 %v10832_v63 }
0x44f6   :  { %v10828_v58 = vpop.xlane.xlu1 %10827 }
0x44f7   :  { %v10835_v2 = vmul.f32 0.03125, %v10828_v58 }
0x44f9   :  { %v10838_v25 = vadd.f32 1e-05, %v10835_v2 }
0x44fa   :  { %v10831_v35 = vpop.xlane.xlu0 %10830 }
0x44fb   :  { %15088 = vrsqrt.f32 %v10838_v25  ;;  %v10836_v32 = vmul.f32 0.03125, %v10831_v35 }
0x44fd   :  { %v10839_v15 = vadd.f32 1e-05, %v10836_v32 }
0x44fe   :  { %v10834_v50 = vpop.xlane.xlu1 %10833 }
0x44ff   :  { %15090 = vrsqrt.f32 %v10839_v15  ;;  %v10837_v11 = vmul.f32 0.03125, %v10834_v50 }
0x4501   :  { %v10840_v44 = vadd.f32 1e-05, %v10837_v11 }
0x4503   :  { %15092 = vrsqrt.f32 %v10840_v44 }
0x4505   :  { %v15089_v62 = vpop.eup %15088 }
0x4506   :  { %v10844_v39 = vmul.f32 %v15089_v62, %v10820_v18  ;;  %v11086_v62 = vrot.slane %v17984_v8, %v15910_v28 }
0x4508   :  { %v10851_v41 = vmul.f32 %v10850_v51, %v10844_v39 }
0x4509   :  { %v15091_v9 = vpop.eup %15090 }
0x450a   :  { %v10858_v4 = vadd.f32 %v10857_v34, %v10851_v41  ;;  %v10845_v53 = vmul.f32 %v15091_v9, %v10821_v48 }
0x450c   :  { %v10852_v52 = vmul.f32 %v10850_v51, %v10845_v53  ;;  %14286 = vmatmul.mubr.msk.f32.vlgmr.msra.gmra.mrb[62].mxu1 %vm138_vm2, %v10858_v4 }
0x450d   :  { %v15093_v57 = vpop.eup %15092  ;;  %14288 = vmatprep.mubr.msk.f32.mxu1 %vm15120_vm0, %v15121_v3 }
0x450e   :  { %v10859_v6 = vadd.f32 %v10857_v34, %v10852_v52  ;;  %v10846_v31 = vmul.f32 %v15093_v57, %v10822_v37 }
0x4510   :  { %v10853_v49 = vmul.f32 %v10850_v51, %v10846_v31  ;;  %14289 = vmatmul.mubr.msk.f32.gmra.mrb[64].mxu1 %vm138_vm2, %v10859_v6 }
0x4511   :  { %14291 = vmatprep.mubr.msk.f32.mxu1 %vm15120_vm0, %v15121_v3 }
0x4512   :  { %v10860_v7 = vadd.f32 %v10857_v34, %v10853_v49 }
0x4514   :  { %14292 = vmatmul.mubr.msk.f32.gmra.mrb[66].mxu1 %vm138_vm2, %v10860_v7 }
0x4515   :  { %14313 = vmatprep.mubr.msk.f32.mxu1 %vm15120_vm0, %v15121_v3 }
0x45df   :  { %v10945_v33 = vpop.f32.mrb[62].mxu1 }
0x45e0   :  { %v10946_v26 = vadd.f32 %v10945_v33, %v10869_v17  ;;  %v14287_v21 = vpop.f32.mrb[63].mxu1 }
0x45e2   :  { %v10962_v38 = vmul.f32 0.044715, %v10946_v26  ;;  %v10959_v22 = vmul.f32 0.5, %v10946_v26 }
0x45e3   :  { %v10950_v5 = vpop.f32.mrb[64].mxu1 }
0x45e4   :  { %v10965_v12 = vmul.f32 %v10962_v38, %v10946_v26  ;;  %v10951_v0 = vadd.f32 %v10950_v5, %v10869_v17  ;;  %v14290_v18 = vpop.f32.mrb[65].mxu1 }
0x45e5   :  { %v35_v18 = vld [vmem:[%s18094_s6 + $0x48] sm:$0xff] }
0x45e6   :  { %v10968_v29 = vmul.f32 %v10965_v12, %v10946_v26  ;;  %v10963_v30 = vmul.f32 0.044715, %v10951_v0  ;;  %v10960_v35 = vmul.f32 0.5, %v10951_v0  ;;  %14312 = vmatpush3.xpose.msk.msra.mxu1 %vm138_vm2, %v35_v18 }
0x45e7   :  { %v10955_v1 = vpop.f32.mrb[66].mxu1 }
0x45e8   :  { %v10971_v48 = vadd.f32 %v10968_v29, %v10946_v26  ;;  %v10966_v45 = vmul.f32 %v10963_v30, %v10951_v0  ;;  %v10956_v43 = vadd.f32 %v10955_v1, %v10869_v17  ;;  %v14293_v20 = vpop.f32.mrb[67].mxu1 }
0x45ea   :  { %v10974_v13 = vmul.f32 0.7978846, %v10971_v48  ;;  %v10969_v37 = vmul.f32 %v10966_v45, %v10951_v0  ;;  %v10964_v40 = vmul.f32 0.044715, %v10956_v43  ;;  %v10961_v11 = vmul.f32 0.5, %v10956_v43 }
0x45ec   :  { %15094 = vtanh.f32 %v10974_v13  ;;  %v10972_v42 = vadd.f32 %v10969_v37, %v10951_v0  ;;  %v10967_v63 = vmul.f32 %v10964_v40, %v10956_v43  ;;  %v11132_v40 = vrot.slane %v35_v18, %v15910_v28 }
0x45ed   :  { %v11145_v28 = vsub.s32 7, %v15252_v56 }
0x45ee   :  { %v10975_v47 = vmul.f32 0.7978846, %v10972_v42  ;;  %v10970_v60 = vmul.f32 %v10967_v63, %v10956_v43 }
0x45f0   :  { %15096 = vtanh.f32 %v10975_v47  ;;  %v10973_v24 = vadd.f32 %v10970_v60, %v10956_v43  ;;  %v11139_v47 = vrot.slane %v35_v18, %v15896_v59 }
0x45f2   :  { %v10976_v46 = vmul.f32 0.7978846, %v10973_v24 }
0x45f4   :  { %15098 = vtanh.f32 %v10976_v46 }
0x45f6   :  { %v15095_v61 = vpop.eup %15094 }
0x45f7   :  { %v10980_v58 = vadd.f32 1.0, %v15095_v61 }
0x45f9   :  { %v10983_v2 = vmul.f32 %v10980_v58, %v10959_v22 }
0x45fa   :  { %v15097_v25 = vpop.eup %15096 }
0x45fb   :  { %v10981_v32 = vadd.f32 1.0, %v15097_v25  ;;  %14303 = vmatmul.mubr.msk.f32.vlgmr.msra.gmra.mrb[68].mxu0 %vm138_vm2, %v10983_v2 }
0x45fc   :  { %14305 = vmatprep.mubr.msk.f32.mxu0 %vm15120_vm0, %v15121_v3 }
0x45fd   :  { %v10984_v15 = vmul.f32 %v10981_v32, %v10960_v35  ;;  %v11146_v32 = vrot.slane %v35_v18, %v11145_v28 }
0x45fe   :  { %v15099_v50 = vpop.eup %15098 }
0x45ff   :  { %v10982_v44 = vadd.f32 1.0, %v15099_v50  ;;  %14306 = vmatmul.mubr.msk.f32.gmra.mrb[70].mxu0 %vm138_vm2, %v10984_v15 }
0x4600   :  { %14308 = vmatprep.mubr.msk.f32.mxu0 %vm15120_vm0, %v15121_v3 }
0x4601   :  { %v10985_v51 = vmul.f32 %v10982_v44, %v10961_v11 }
0x4603   :  { %14309 = vmatmul.mubr.msk.f32.gmra.mrb[72].mxu0 %vm138_vm2, %v10985_v51 }
0x46ce   :  { %v11066_v34 = vpop.f32.mrb[68].mxu0 }
0x46cf   :  { %v11080_v39 = vadd.f32 %v11066_v34, %v17989_v23  ;;  %v14304_v41 = vpop.f32.mrb[69].mxu0 }
0x46d1   :  { %v11087_v9 = vadd.f32 %v11086_v62, %v11080_v39 }
0x46d2   :  { %v11071_v4 = vpop.f32.mrb[70].mxu0 }
0x46d3   :  { %v11081_v53 = vadd.f32 %v11071_v4, %v17995_v14  ;;  %v14307_v52 = vpop.f32.mrb[71].mxu0  ;;  %v11090_v57 = vsel %vm138_vm2, %v11087_v9, 0.0 }
0x46d4   :  { %11091 = vadd.xlane.f32.xlu0 %v11090_v57 }
0x46d5   :  { %v11088_v6 = vadd.f32 %v11086_v62, %v11081_v53 }
0x46d6   :  { %v11076_v31 = vpop.f32.mrb[72].mxu0 }
0x46d7   :  { %v11082_v49 = vadd.f32 %v11076_v31, %v18001_v19  ;;  %v14310_v7 = vpop.f32.mrb[73].mxu0  ;;  %v11093_v54 = vsel %vm138_vm2, %v11088_v6, 0.0 }
0x46d8   :  { %11094 = vadd.xlane.f32.xlu1 %v11093_v54 }
0x46d9   :  { %v11089_v8 = vadd.f32 %v11086_v62, %v11082_v49 }
0x46db   :  { %v11096_v23 = vsel %vm145_vm3, %v11089_v8, 0.0 }
0x46dc   :  { %11097 = vadd.xlane.f32.xlu0 %v11096_v23 }
0x4761   :  { %v11092_v36 = vpop.xlane.xlu0 %11091 }
0x4762   :  { %v11099_v10 = vmul.f32 0.03125, %v11092_v36 }
0x4764   :  { %v11102_v27 = vsub.f32 %v11087_v9, %v11099_v10 }
0x4765   :  { %v11095_v14 = vpop.xlane.xlu1 %11094 }
0x4766   :  { %v11100_v16 = vmul.f32 0.03125, %v11095_v14  ;;  %v11105_v55 = vmul.f32 %v11102_v27, %v11102_v27 }
0x4768   :  { %v11103_v17 = vsub.f32 %v11088_v6, %v11100_v16  ;;  %v11108_v33 = vsel %vm138_vm2, %v11105_v55, 0.0 }
0x4769   :  { %11109 = vadd.xlane.f32.xlu1 %v11108_v33  ;;  %v11098_v26 = vpop.xlane.xlu0 %11097 }
0x476a   :  { %v11101_v19 = vmul.f32 0.03125, %v11098_v26  ;;  %v11106_v21 = vmul.f32 %v11103_v17, %v11103_v17 }
0x476c   :  { %v11104_v38 = vsub.f32 %v11089_v8, %v11101_v19  ;;  %v11111_v5 = vsel %vm138_vm2, %v11106_v21, 0.0 }
0x476d   :  { %11112 = vadd.xlane.f32.xlu0 %v11111_v5 }
0x476e   :  { %v11107_v12 = vmul.f32 %v11104_v38, %v11104_v38 }
0x4770   :  { %v11114_v0 = vsel %vm145_vm3, %v11107_v12, 0.0 }
0x4771   :  { %11115 = vadd.xlane.f32.xlu1 %v11114_v0 }
0x47f6   :  { %v11110_v29 = vpop.xlane.xlu1 %11109 }
0x47f7   :  { %v11117_v30 = vmul.f32 0.03125, %v11110_v29 }
0x47f9   :  { %v11120_v1 = vadd.f32 1e-05, %v11117_v30 }
0x47fa   :  { %v11113_v48 = vpop.xlane.xlu0 %11112 }
0x47fb   :  { %15100 = vrsqrt.f32 %v11120_v1  ;;  %v11118_v45 = vmul.f32 0.03125, %v11113_v48 }
0x47fd   :  { %v11121_v43 = vadd.f32 1e-05, %v11118_v45 }
0x47fe   :  { %v11116_v20 = vpop.xlane.xlu1 %11115 }
0x47ff   :  { %15102 = vrsqrt.f32 %v11121_v43  ;;  %v11119_v13 = vmul.f32 0.03125, %v11116_v20 }
0x4801   :  { %v11122_v37 = vadd.f32 1e-05, %v11119_v13 }
0x4803   :  { %15104 = vrsqrt.f32 %v11122_v37 }
0x4805   :  { %v15101_v42 = vpop.eup %15100 }
0x4806   :  { %v11126_v63 = vmul.f32 %v15101_v42, %v11102_v27 }
0x4808   :  { %v11133_v60 = vmul.f32 %v11132_v40, %v11126_v63 }
0x4809   :  { %v15103_v24 = vpop.eup %15102 }
0x480a   :  { %v11127_v46 = vmul.f32 %v15103_v24, %v11103_v17  ;;  %v11140_v61 = vadd.f32 %v11139_v47, %v11133_v60 }
0x480c   :  { %v11134_v22 = vmul.f32 %v11132_v40, %v11127_v46  ;;  %14314 = vmatmul.mubr.msk.f32.vlgmr.msra.gmra.mrb[68].mxu1 %vm138_vm2, %v11140_v61 }
0x480d   :  { %v15105_v58 = vpop.eup %15104  ;;  %14316 = vmatprep.mubr.msk.f32.mxu1 %vm15120_vm0, %v15121_v3 }
0x480e   :  { %v11128_v2 = vmul.f32 %v15105_v58, %v11104_v38  ;;  %v11141_v25 = vadd.f32 %v11139_v47, %v11134_v22 }
0x4810   :  { %v11135_v35 = vmul.f32 %v11132_v40, %v11128_v2  ;;  %14317 = vmatmul.mubr.msk.f32.gmra.mrb[70].mxu1 %vm138_vm2, %v11141_v25 }
0x4811   :  { %14319 = vmatprep.mubr.msk.f32.mxu1 %vm15120_vm0, %v15121_v3 }
0x4812   :  { %v11142_v59 = vadd.f32 %v11139_v47, %v11135_v35 }
0x4814   :  { %14320 = vmatmul.mubr.msk.f32.gmra.mrb[72].mxu1 %vm138_vm2, %v11142_v59 }
0x48df   :  { %v11225_v15 = vpop.f32.mrb[68].mxu1 }
0x48e0   :  { %v11226_v50 = vadd.f32 %v11225_v15, %v11146_v32  ;;  %v14315_v11 = vpop.f32.mrb[69].mxu1 }
0x48e2   :  { %11240 = vst.msk [vmem:[%s18101_s7] sm:$0xff] %vm11239_vm8, %v11226_v50 }
0x48e3   :  { %v11230_v44 = vpop.f32.mrb[70].mxu1 }
0x48e4   :  { %v11231_v51 = vadd.f32 %v11230_v44, %v11146_v32  ;;  %v14318_v62 = vpop.f32.mrb[71].mxu1 }
0x48e6   :  { %11241 = vst.msk [vmem:[%s18101_s7 + $0x8] sm:$0xff] %vm11239_vm8, %v11231_v51 }
0x48e7   :  { %v11235_v3 = vpop.f32.mrb[72].mxu1 }
0x48e8   :  { %v11236_v34 = vadd.f32 %v11235_v3, %v11146_v32  ;;  %v14321_v56 = vpop.f32.mrb[73].mxu1 }
0x48ea   :  { %11243 = vst.msk [vmem:[%s18101_s7 + $0x10] sm:$0x3] %vm11242_vm9, %v11236_v34 }

</bundles_post_ra>
